<compile_context>
chip_gen: v6e
topology: v6e:2x2x1
jax: 0.10.0
libtpu: 0.0.40
codegen_flags: <defaults>
</compile_context>

<pallas_src>
import jax
import jax.numpy as jnp
import numpy as np
from jax.experimental import pallas as pl
from jax.experimental.pallas import tpu as pltpu

FEATURE_CH = 512
INPUT_CH = 67
MLP_CH = 1024
edge_num = 2
L = edge_num + 1            # Conv1d length / positions per sample
OUT_CH = edge_num + 1       # actor mode
BLOCK_NUM = 3               # conv blocks

C_PAD = 128                 # INPUT_CH (67) zero-padded to one full lane width
OUT_PAD = 128               # OUT_CH (3) zero-padded to one full lane width


# ----------------------------------------------------------------------------
# Fused kernel: conv(k=1) x3 + 3-layer MLP for one batch tile
# ----------------------------------------------------------------------------
def _fused_kernel(x_ref,
                  w0c_ref, b0c_ref, w1c_ref, b1c_ref, w2c_ref, b2c_ref,
                  w0m_ref, b0m_ref, w1m_ref, b1m_ref, w2m_ref, b2m_ref,
                  o_ref):
    """x_ref: (L, TB, C_PAD) bf16; weights bf16, biases f32; o_ref: (TB, OUT_PAD) f32.

    w0m_ref is (L, FEATURE_CH, MLP_CH): MLP layer-0 weight split per position l,
    which folds PyTorch's view(B,-1) feature order (c*L + l) into the weights.
    """
    n_pos = x_ref.shape[0]
    tb = x_ref.shape[1]

    def mm(a, w):
        # bf16 x bf16 MXU matmul with f32 accumulation.
        return jnp.dot(a, w, preferred_element_type=jnp.float32)

    def layer(a, w_ref, b_ref, relu=True):
        y = mm(a, w_ref[...]) + b_ref[...]
        if relu:
            return jnp.maximum(y, 0.0).astype(jnp.bfloat16)
        return y

    # Free relayout (tb % 8 == 0): (L, tb, C) -> (L*tb, C), row index = l*tb + b.
    x = x_ref[...].reshape(n_pos * tb, x_ref.shape[2])

    # conv stage: Conv1d(kernel_size=1)+ReLU == per-row matmul + bias + ReLU.
    h = layer(x, w0c_ref, b0c_ref)
    h = layer(h, w1c_ref, b1c_ref)
    h = layer(h, w2c_ref, b2c_ref)

    # MLP layer 0 as a sum over positions (no transpose / relayout needed):
    #   out[b,:] = sum_l conv_out[b,:,l] @ w0m[l]  (+ bias)
    acc = mm(h[0:tb, :], w0m_ref[0]) + b0m_ref[...]
    for l in range(1, n_pos):
        acc = acc + mm(h[l * tb:(l + 1) * tb, :], w0m_ref[l])
    h2 = jnp.maximum(acc, 0.0).astype(jnp.bfloat16)

    h2 = layer(h2, w1m_ref, b1m_ref)
    out = layer(h2, w2m_ref, b2m_ref, relu=False)     # last layer: no ReLU
    o_ref[...] = out.astype(o_ref.dtype)


# ----------------------------------------------------------------------------
# Parameters (deterministic, PyTorch-default-style uniform init)
# ----------------------------------------------------------------------------
def init_params(seed=0):
    """Returns (params, raw).

    params: padded / position-split / bf16 tensors consumed by the kernel.
    raw:    plain f32 PyTorch-layout weights for the pure-JAX reference.
    """
    key = jax.random.PRNGKey(seed)

    def linear(k, fan_in, fan_out):
        kw, kb = jax.random.split(k)
        bound = 1.0 / float(fan_in) ** 0.5
        w = jax.random.uniform(kw, (fan_in, fan_out), jnp.float32, -bound, bound)
        b = jax.random.uniform(kb, (1, fan_out), jnp.float32, -bound, bound)
        return w, b

    keys = jax.random.split(key, 6)
    w0c, b0c = linear(keys[0], INPUT_CH, FEATURE_CH)
    w1c, b1c = linear(keys[1], FEATURE_CH, FEATURE_CH)
    w2c, b2c = linear(keys[2], FEATURE_CH, FEATURE_CH)
    w0m, b0m = linear(keys[3], L * FEATURE_CH, MLP_CH)
    w1m, b1m = linear(keys[4], MLP_CH, MLP_CH)
    w2m, b2m = linear(keys[5], MLP_CH, OUT_CH)

    raw = {"conv": [(w0c, b0c), (w1c, b1c), (w2c, b2c)],
           "mlp": [(w0m, b0m), (w1m, b1m), (w2m, b2m)]}

    # Lane-align: K-pad conv layer-0 (67 -> 128, zero rows), pad final output
    # width (3 -> 128, zero columns + zero bias lanes).
    w0c_p = jnp.zeros((C_PAD, FEATURE_CH), jnp.float32).at[:INPUT_CH, :].set(w0c)
    w2m_p = jnp.zeros((MLP_CH, OUT_PAD), jnp.float32).at[:, :OUT_CH].set(w2m)
    b2m_p = jnp.zeros((1, OUT_PAD), jnp.float32).at[:, :OUT_CH].set(b2m)

    # Fold PyTorch's x.view(B,-1) feature order (c*L + l) into MLP layer-0:
    #   w0m_pos[l, c, :] == w0m[c*L + l, :]
    w0m_pos = w0m.reshape(FEATURE_CH, L, MLP_CH).transpose(1, 0, 2)

    bf16 = jnp.bfloat16
    params = {
        "conv_w0": w0c_p.astype(bf16),   "conv_b0": b0c,
        "conv_w1": w1c.astype(bf16),     "conv_b1": b1c,
        "conv_w2": w2c.astype(bf16),     "conv_b2": b2c,
        "mlp_w0":  w0m_pos.astype(bf16), "mlp_b0": b0m,
        "mlp_w1":  w1m.astype(bf16),     "mlp_b1": b1m,
        "mlp_w2":  w2m_p.astype(bf16),   "mlp_b2": b2m_p,
    }
    return params, raw


# ----------------------------------------------------------------------------
# Forward pass (mirrors mec_net.forward: returns (logits, state))
# ----------------------------------------------------------------------------
def _round_up(x, m):
    return (x + m - 1) // m * m


@jax.jit
def mec_net_forward(obs, params):
    # state = torch.tensor(obs).float(); .cuda() is just device placement.
    state = obs.astype(jnp.float32)                    # (B, INPUT_CH, L)
    B = state.shape[0]

    # 256-row batch tile: fills the 256x256 MXU on v6e/v7x and amortizes the
    # per-grid-step overhead; still a multiple of 8 sublanes for small B.
    tb = min(256, _round_up(B, 8))
    num_tiles = (B + tb - 1) // tb
    b_pad = num_tiles * tb

    # Channels-last, positions outermost: (L, B_pad, C_PAD), zero padded,
    # cast to bf16 in the same copy (halves the kernel's input DMA).
    # TODO(synk): this transpose/pad copy could be absorbed into the kernel's
    #             input DMA via allow_input_fusion once validated.
    x = jnp.transpose(state, (2, 0, 1))                # (L, B, INPUT_CH)
    x = jnp.pad(x, ((0, 0), (0, b_pad - B), (0, C_PAD - INPUT_CH)))
    x = x.astype(jnp.bfloat16)

    const2 = lambda i: (0, 0)
    const3 = lambda i: (0, 0, 0)

    def w_spec(arr):
        # Constant index_map + single buffering: weights/biases stay VMEM
        # resident across grid steps without a wasted second pipeline buffer.
        return pl.BlockSpec(arr.shape, const3 if arr.ndim == 3 else const2,
                            pipeline_mode=pl.Buffered(1))

    out = pl.pallas_call(
        _fused_kernel,
        grid=(num_tiles,),
        in_specs=[
            pl.BlockSpec((L, tb, C_PAD), lambda i: (0, i, 0)),
            w_spec(params["conv_w0"]), w_spec(params["conv_b0"]),
            w_spec(params["conv_w1"]), w_spec(params["conv_b1"]),
            w_spec(params["conv_w2"]), w_spec(params["conv_b2"]),
            w_spec(params["mlp_w0"]),  w_spec(params["mlp_b0"]),
            w_spec(params["mlp_w1"]),  w_spec(params["mlp_b1"]),
            w_spec(params["mlp_w2"]),  w_spec(params["mlp_b2"]),
        ],
        out_specs=pl.BlockSpec((tb, OUT_PAD), lambda i: (i, 0)),
        out_shape=jax.ShapeDtypeStruct((b_pad, OUT_PAD), jnp.float32),
        compiler_params=pltpu.CompilerParams(
            dimension_semantics=("parallel",),
            vmem_limit_bytes=32 << 20,                 # ~13 MB actual use; safe on v5e/v6e/v7x
        ),
    )(x,
      params["conv_w0"], params["conv_b0"],
      params["conv_w1"], params["conv_b1"],
      params["conv_w2"], params["conv_b2"],
      params["mlp_w0"], params["mlp_b0"],
      params["mlp_w1"], params["mlp_b1"],
      params["mlp_w2"], params["mlp_b2"])

    logits = out[:B, :OUT_CH]
    return logits, state


# ----------------------------------------------------------------------------
# Pure-JAX f32 reference (PyTorch-faithful math, unpadded weights)
# ----------------------------------------------------------------------------
def reference_forward(obs, raw):
    x = obs.astype(jnp.float32)                        # (B, INPUT_CH, L)
    for w, b in raw["conv"]:                           # Conv1d(k=1) + ReLU
        x = jnp.einsum("bil,io->bol", x, w) + b[0][None, :, None]
        x = jnp.maximum(x, 0.0)
    h = x.reshape(x.shape[0], -1)                      # view(B,-1): feature = c*L + l
    (w0, b0), (w1, b1), (w2, b2) = raw["mlp"]
    h = jnp.maximum(h @ w0 + b0, 0.0)
    h = jnp.maximum(h @ w1 + b1, 0.0)
    return h @ w2 + b2


if __name__ == "__main__":
    key = jax.random.PRNGKey(0)
    B = 2
    # obs in PyTorch NCL layout: (batch, INPUT_CH, edge_num+1)
    obs = jax.random.normal(key, (B, INPUT_CH, edge_num + 1), dtype=jnp.float32)

    params, raw = init_params(seed=0)
    logits, state = mec_net_forward(obs, params)
    jax.block_until_ready((logits, state))

    assert logits.shape == (B, OUT_CH), logits.shape
    assert state.shape == obs.shape, state.shape
    assert bool(jnp.all(jnp.isfinite(logits)))

    # Compare against the f32 PyTorch-style reference (kernel runs bf16
    # weights and bf16 inter-layer activations, f32 accumulation).
    ref = reference_forward(obs, raw)
    np.testing.assert_allclose(np.asarray(logits), np.asarray(ref),
                               rtol=0.1, atol=0.1)
    print("KERNEL_OK")
</pallas_src>

<mosaic_0001>
module attributes {stable_mosaic.version = 11 : i64} {
  func.func @_fused_kernel(%arg0: i32, %arg1: memref<3x8x128xbf16, #tpu.memory_space<vmem>>, %arg2: memref<128x512xbf16, #tpu.memory_space<vmem>>, %arg3: memref<1x512xf32, #tpu.memory_space<vmem>>, %arg4: memref<512x512xbf16, #tpu.memory_space<vmem>>, %arg5: memref<1x512xf32, #tpu.memory_space<vmem>>, %arg6: memref<512x512xbf16, #tpu.memory_space<vmem>>, %arg7: memref<1x512xf32, #tpu.memory_space<vmem>>, %arg8: memref<3x512x1024xbf16, #tpu.memory_space<vmem>>, %arg9: memref<1x1024xf32, #tpu.memory_space<vmem>>, %arg10: memref<1024x1024xbf16, #tpu.memory_space<vmem>>, %arg11: memref<1x1024xf32, #tpu.memory_space<vmem>>, %arg12: memref<1024x128xbf16, #tpu.memory_space<vmem>>, %arg13: memref<1x128xf32, #tpu.memory_space<vmem>>, %arg14: memref<8x128xf32, #tpu.memory_space<vmem>>) attributes {dimension_semantics = [#tpu.dimension_semantics<parallel>], iteration_bounds = array<i64: 1>, scalar_prefetch = 0 : i64, scratch_operands = 0 : i64, tpu.core_type = #tpu.core_type<tc>, window_params = [{transform_indices = @transform_0, window_bounds = array<i64: 3, 8, 128>}, {pipeline_mode = #tpu.pipeline_mode<synchronous>, transform_indices = @transform_1, window_bounds = array<i64: 128, 512>}, {pipeline_mode = #tpu.pipeline_mode<synchronous>, transform_indices = @transform_2, window_bounds = array<i64: 1, 512>}, {pipeline_mode = #tpu.pipeline_mode<synchronous>, transform_indices = @transform_3, window_bounds = array<i64: 512, 512>}, {pipeline_mode = #tpu.pipeline_mode<synchronous>, transform_indices = @transform_4, window_bounds = array<i64: 1, 512>}, {pipeline_mode = #tpu.pipeline_mode<synchronous>, transform_indices = @transform_5, window_bounds = array<i64: 512, 512>}, {pipeline_mode = #tpu.pipeline_mode<synchronous>, transform_indices = @transform_6, window_bounds = array<i64: 1, 512>}, {pipeline_mode = #tpu.pipeline_mode<synchronous>, transform_indices = @transform_7, window_bounds = array<i64: 3, 512, 1024>}, {pipeline_mode = #tpu.pipeline_mode<synchronous>, transform_indices = @transform_8, window_bounds = array<i64: 1, 1024>}, {pipeline_mode = #tpu.pipeline_mode<synchronous>, transform_indices = @transform_9, window_bounds = array<i64: 1024, 1024>}, {pipeline_mode = #tpu.pipeline_mode<synchronous>, transform_indices = @transform_10, window_bounds = array<i64: 1, 1024>}, {pipeline_mode = #tpu.pipeline_mode<synchronous>, transform_indices = @transform_11, window_bounds = array<i64: 1024, 128>}, {pipeline_mode = #tpu.pipeline_mode<synchronous>, transform_indices = @transform_12, window_bounds = array<i64: 1, 128>}, {transform_indices = @transform_13, window_bounds = array<i64: 8, 128>}]} {
    %c0 = arith.constant 0 : index
    %c0_0 = arith.constant 0 : index
    %c0_1 = arith.constant 0 : index
    %0 = vector.load %arg1[%c0, %c0_0, %c0_1] : memref<3x8x128xbf16, #tpu.memory_space<vmem>>, vector<3x8x128xbf16>
    %1 = vector.shape_cast %0 : vector<3x8x128xbf16> to vector<24x128xbf16>
    %c0_2 = arith.constant 0 : index
    %c0_3 = arith.constant 0 : index
    %2 = vector.load %arg2[%c0_2, %c0_3] : memref<128x512xbf16, #tpu.memory_space<vmem>>, vector<128x512xbf16>
    %cst = arith.constant dense<0.000000e+00> : vector<24x512xf32>
    %3 = tpu.matmul %1, %2, %cst {dimension_numbers = #tpu.dot_dimension_numbers<[1], [0], [0], [1], [0, 0, 1, 1], [], []>} : vector<24x128xbf16>, vector<128x512xbf16>, vector<24x512xf32> -> vector<24x512xf32>
    %c0_4 = arith.constant 0 : index
    %c0_5 = arith.constant 0 : index
    %4 = vector.load %arg3[%c0_4, %c0_5] : memref<1x512xf32, #tpu.memory_space<vmem>>, vector<1x512xf32>
    %5 = vector.broadcast %4 : vector<1x512xf32> to vector<24x512xf32>
    %6 = arith.addf %3, %5 : vector<24x512xf32>
    %cst_6 = arith.constant 0.000000e+00 : f32
    %7 = vector.broadcast %cst_6 : f32 to vector<24x512xf32>
    %8 = arith.maximumf %6, %7 : vector<24x512xf32>
    %9 = arith.truncf %8 : vector<24x512xf32> to vector<24x512xbf16>
    %c0_7 = arith.constant 0 : index
    %c0_8 = arith.constant 0 : index
    %10 = vector.load %arg4[%c0_7, %c0_8] : memref<512x512xbf16, #tpu.memory_space<vmem>>, vector<512x512xbf16>
    %cst_9 = arith.constant dense<0.000000e+00> : vector<24x512xf32>
    %11 = tpu.matmul %9, %10, %cst_9 {dimension_numbers = #tpu.dot_dimension_numbers<[1], [0], [0], [1], [0, 0, 1, 1], [], []>} : vector<24x512xbf16>, vector<512x512xbf16>, vector<24x512xf32> -> vector<24x512xf32>
    %c0_10 = arith.constant 0 : index
    %c0_11 = arith.constant 0 : index
    %12 = vector.load %arg5[%c0_10, %c0_11] : memref<1x512xf32, #tpu.memory_space<vmem>>, vector<1x512xf32>
    %13 = vector.broadcast %12 : vector<1x512xf32> to vector<24x512xf32>
    %14 = arith.addf %11, %13 : vector<24x512xf32>
    %cst_12 = arith.constant 0.000000e+00 : f32
    %15 = vector.broadcast %cst_12 : f32 to vector<24x512xf32>
    %16 = arith.maximumf %14, %15 : vector<24x512xf32>
    %17 = arith.truncf %16 : vector<24x512xf32> to vector<24x512xbf16>
    %c0_13 = arith.constant 0 : index
    %c0_14 = arith.constant 0 : index
    %18 = vector.load %arg6[%c0_13, %c0_14] : memref<512x512xbf16, #tpu.memory_space<vmem>>, vector<512x512xbf16>
    %cst_15 = arith.constant dense<0.000000e+00> : vector<24x512xf32>
    %19 = tpu.matmul %17, %18, %cst_15 {dimension_numbers = #tpu.dot_dimension_numbers<[1], [0], [0], [1], [0, 0, 1, 1], [], []>} : vector<24x512xbf16>, vector<512x512xbf16>, vector<24x512xf32> -> vector<24x512xf32>
    %c0_16 = arith.constant 0 : index
    %c0_17 = arith.constant 0 : index
    %20 = vector.load %arg7[%c0_16, %c0_17] : memref<1x512xf32, #tpu.memory_space<vmem>>, vector<1x512xf32>
    %21 = vector.broadcast %20 : vector<1x512xf32> to vector<24x512xf32>
    %22 = arith.addf %19, %21 : vector<24x512xf32>
    %cst_18 = arith.constant 0.000000e+00 : f32
    %23 = vector.broadcast %cst_18 : f32 to vector<24x512xf32>
    %24 = arith.maximumf %22, %23 : vector<24x512xf32>
    %25 = arith.truncf %24 : vector<24x512xf32> to vector<24x512xbf16>
    %26 = vector.extract_strided_slice %25 {offsets = [0, 0], sizes = [8, 512], strides = [1, 1]} : vector<24x512xbf16> to vector<8x512xbf16>
    %c0_19 = arith.constant 0 : index
    %c0_20 = arith.constant 0 : index
    %c0_21 = arith.constant 0 : index
    %27 = vector.load %arg8[%c0_19, %c0_20, %c0_21] : memref<3x512x1024xbf16, #tpu.memory_space<vmem>>, vector<1x512x1024xbf16>
    %28 = vector.shape_cast %27 : vector<1x512x1024xbf16> to vector<512x1024xbf16>
    %cst_22 = arith.constant dense<0.000000e+00> : vector<8x1024xf32>
    %29 = tpu.matmul %26, %28, %cst_22 {dimension_numbers = #tpu.dot_dimension_numbers<[1], [0], [0], [1], [0, 0, 1, 1], [], []>} : vector<8x512xbf16>, vector<512x1024xbf16>, vector<8x1024xf32> -> vector<8x1024xf32>
    %c0_23 = arith.constant 0 : index
    %c0_24 = arith.constant 0 : index
    %30 = vector.load %arg9[%c0_23, %c0_24] : memref<1x1024xf32, #tpu.memory_space<vmem>>, vector<1x1024xf32>
    %31 = vector.broadcast %30 : vector<1x1024xf32> to vector<8x1024xf32>
    %32 = arith.addf %29, %31 : vector<8x1024xf32>
    %33 = vector.extract_strided_slice %25 {offsets = [8, 0], sizes = [8, 512], strides = [1, 1]} : vector<24x512xbf16> to vector<8x512xbf16>
    %c1 = arith.constant 1 : index
    %c0_25 = arith.constant 0 : index
    %c0_26 = arith.constant 0 : index
    %34 = vector.load %arg8[%c1, %c0_25, %c0_26] : memref<3x512x1024xbf16, #tpu.memory_space<vmem>>, vector<1x512x1024xbf16>
    %35 = vector.shape_cast %34 : vector<1x512x1024xbf16> to vector<512x1024xbf16>
    %cst_27 = arith.constant dense<0.000000e+00> : vector<8x1024xf32>
    %36 = tpu.matmul %33, %35, %cst_27 {dimension_numbers = #tpu.dot_dimension_numbers<[1], [0], [0], [1], [0, 0, 1, 1], [], []>} : vector<8x512xbf16>, vector<512x1024xbf16>, vector<8x1024xf32> -> vector<8x1024xf32>
    %37 = arith.addf %32, %36 : vector<8x1024xf32>
    %38 = vector.extract_strided_slice %25 {offsets = [16, 0], sizes = [8, 512], strides = [1, 1]} : vector<24x512xbf16> to vector<8x512xbf16>
    %c2 = arith.constant 2 : index
    %c0_28 = arith.constant 0 : index
    %c0_29 = arith.constant 0 : index
    %39 = vector.load %arg8[%c2, %c0_28, %c0_29] : memref<3x512x1024xbf16, #tpu.memory_space<vmem>>, vector<1x512x1024xbf16>
    %40 = vector.shape_cast %39 : vector<1x512x1024xbf16> to vector<512x1024xbf16>
    %cst_30 = arith.constant dense<0.000000e+00> : vector<8x1024xf32>
    %41 = tpu.matmul %38, %40, %cst_30 {dimension_numbers = #tpu.dot_dimension_numbers<[1], [0], [0], [1], [0, 0, 1, 1], [], []>} : vector<8x512xbf16>, vector<512x1024xbf16>, vector<8x1024xf32> -> vector<8x1024xf32>
    %42 = arith.addf %37, %41 : vector<8x1024xf32>
    %cst_31 = arith.constant 0.000000e+00 : f32
    %43 = vector.broadcast %cst_31 : f32 to vector<8x1024xf32>
    %44 = arith.maximumf %42, %43 : vector<8x1024xf32>
    %45 = arith.truncf %44 : vector<8x1024xf32> to vector<8x1024xbf16>
    %c0_32 = arith.constant 0 : index
    %c0_33 = arith.constant 0 : index
    %46 = vector.load %arg10[%c0_32, %c0_33] : memref<1024x1024xbf16, #tpu.memory_space<vmem>>, vector<1024x1024xbf16>
    %cst_34 = arith.constant dense<0.000000e+00> : vector<8x1024xf32>
    %47 = tpu.matmul %45, %46, %cst_34 {dimension_numbers = #tpu.dot_dimension_numbers<[1], [0], [0], [1], [0, 0, 1, 1], [], []>} : vector<8x1024xbf16>, vector<1024x1024xbf16>, vector<8x1024xf32> -> vector<8x1024xf32>
    %c0_35 = arith.constant 0 : index
    %c0_36 = arith.constant 0 : index
    %48 = vector.load %arg11[%c0_35, %c0_36] : memref<1x1024xf32, #tpu.memory_space<vmem>>, vector<1x1024xf32>
    %49 = vector.broadcast %48 : vector<1x1024xf32> to vector<8x1024xf32>
    %50 = arith.addf %47, %49 : vector<8x1024xf32>
    %cst_37 = arith.constant 0.000000e+00 : f32
    %51 = vector.broadcast %cst_37 : f32 to vector<8x1024xf32>
    %52 = arith.maximumf %50, %51 : vector<8x1024xf32>
    %53 = arith.truncf %52 : vector<8x1024xf32> to vector<8x1024xbf16>
    %c0_38 = arith.constant 0 : index
    %c0_39 = arith.constant 0 : index
    %54 = vector.load %arg12[%c0_38, %c0_39] : memref<1024x128xbf16, #tpu.memory_space<vmem>>, vector<1024x128xbf16>
    %cst_40 = arith.constant dense<0.000000e+00> : vector<8x128xf32>
    %55 = tpu.matmul %53, %54, %cst_40 {dimension_numbers = #tpu.dot_dimension_numbers<[1], [0], [0], [1], [0, 0, 1, 1], [], []>} : vector<8x1024xbf16>, vector<1024x128xbf16>, vector<8x128xf32> -> vector<8x128xf32>
    %c0_41 = arith.constant 0 : index
    %c0_42 = arith.constant 0 : index
    %56 = vector.load %arg13[%c0_41, %c0_42] : memref<1x128xf32, #tpu.memory_space<vmem>>, vector<1x128xf32>
    %57 = vector.broadcast %56 : vector<1x128xf32> to vector<8x128xf32>
    %58 = arith.addf %55, %57 : vector<8x128xf32>
    %c0_43 = arith.constant 0 : index
    %c0_44 = arith.constant 0 : index
    %59 = vector.load %arg14[%c0_43, %c0_44] : memref<8x128xf32, #tpu.memory_space<vmem>>, vector<8x128xf32>
    tpu.vector_store %arg14[%c0_43, %c0_44], %58 {strides = array<i32>} : memref<8x128xf32, #tpu.memory_space<vmem>>, vector<8x128xf32>,
    return
  }
  func.func @transform_0(%arg0: i32) -> (i32, i32, i32) {
    %c0_i32 = arith.constant 0 : i32
    %c0_i32_0 = arith.constant 0 : i32
    %c0_i32_1 = arith.constant 0 : i32
    return %c0_i32, %arg0, %c0_i32_0 : i32, i32, i32
  }
  func.func @transform_1(%arg0: i32) -> (i32, i32) {
    %c0_i32 = arith.constant 0 : i32
    %c0_i32_0 = arith.constant 0 : i32
    %c0_i32_1 = arith.constant 0 : i32
    return %c0_i32, %c0_i32_0 : i32, i32
  }
  func.func @transform_2(%arg0: i32) -> (i32, i32) {
    %c0_i32 = arith.constant 0 : i32
    %c0_i32_0 = arith.constant 0 : i32
    %c0_i32_1 = arith.constant 0 : i32
    return %c0_i32, %c0_i32_0 : i32, i32
  }
  func.func @transform_3(%arg0: i32) -> (i32, i32) {
    %c0_i32 = arith.constant 0 : i32
    %c0_i32_0 = arith.constant 0 : i32
    %c0_i32_1 = arith.constant 0 : i32
    return %c0_i32, %c0_i32_0 : i32, i32
  }
  func.func @transform_4(%arg0: i32) -> (i32, i32) {
    %c0_i32 = arith.constant 0 : i32
    %c0_i32_0 = arith.constant 0 : i32
    %c0_i32_1 = arith.constant 0 : i32
    return %c0_i32, %c0_i32_0 : i32, i32
  }
  func.func @transform_5(%arg0: i32) -> (i32, i32) {
    %c0_i32 = arith.constant 0 : i32
    %c0_i32_0 = arith.constant 0 : i32
    %c0_i32_1 = arith.constant 0 : i32
    return %c0_i32, %c0_i32_0 : i32, i32
  }
  func.func @transform_6(%arg0: i32) -> (i32, i32) {
    %c0_i32 = arith.constant 0 : i32
    %c0_i32_0 = arith.constant 0 : i32
    %c0_i32_1 = arith.constant 0 : i32
    return %c0_i32, %c0_i32_0 : i32, i32
  }
  func.func @transform_7(%arg0: i32) -> (i32, i32, i32) {
    %c0_i32 = arith.constant 0 : i32
    %c0_i32_0 = arith.constant 0 : i32
    %c0_i32_1 = arith.constant 0 : i32
    %c0_i32_2 = arith.constant 0 : i32
    return %c0_i32, %c0_i32_0, %c0_i32_1 : i32, i32, i32
  }
  func.func @transform_8(%arg0: i32) -> (i32, i32) {
    %c0_i32 = arith.constant 0 : i32
    %c0_i32_0 = arith.constant 0 : i32
    %c0_i32_1 = arith.constant 0 : i32
    return %c0_i32, %c0_i32_0 : i32, i32
  }
  func.func @transform_9(%arg0: i32) -> (i32, i32) {
    %c0_i32 = arith.constant 0 : i32
    %c0_i32_0 = arith.constant 0 : i32
    %c0_i32_1 = arith.constant 0 : i32
    return %c0_i32, %c0_i32_0 : i32, i32
  }
  func.func @transform_10(%arg0: i32) -> (i32, i32) {
    %c0_i32 = arith.constant 0 : i32
    %c0_i32_0 = arith.constant 0 : i32
    %c0_i32_1 = arith.constant 0 : i32
    return %c0_i32, %c0_i32_0 : i32, i32
  }
  func.func @transform_11(%arg0: i32) -> (i32, i32) {
    %c0_i32 = arith.constant 0 : i32
    %c0_i32_0 = arith.constant 0 : i32
    %c0_i32_1 = arith.constant 0 : i32
    return %c0_i32, %c0_i32_0 : i32, i32
  }
  func.func @transform_12(%arg0: i32) -> (i32, i32) {
    %c0_i32 = arith.constant 0 : i32
    %c0_i32_0 = arith.constant 0 : i32
    %c0_i32_1 = arith.constant 0 : i32
    return %c0_i32, %c0_i32_0 : i32, i32
  }
  func.func @transform_13(%arg0: i32) -> (i32, i32) {
    %c0_i32 = arith.constant 0 : i32
    %c0_i32_0 = arith.constant 0 : i32
    return %arg0, %c0_i32 : i32, i32
  }
}

</mosaic_0001>

<bundles_post_ra>
// kernel: mec_net_forward.1
= control target key start
LH: loop header
LB: loop body
LE: loop exit
PB: predicated region body
PF: predicated region fallthrough
CT: control target
= control target key end

     0   :  { %18 = vsyncpa [#allocation3], 0  ;;  %s15872_s0 = inlined_call_operand.vmem [shape: bf16[3,8,128], index: 0, kind: input, shape index: {}]   ;;  %s15873_s1 = inlined_call_operand.hbm [shape: bf16[128,512], index: 1, kind: input, shape index: {}]   ;;  %s15874_s2 = inlined_call_operand.hbm [shape: f32[1,512], index: 2, kind: input, shape index: {}]   ;;  %s15875_s3 = inlined_call_operand.hbm [shape: bf16[512,512], index: 3, kind: input, shape index: {}]   ;;  %s15876_s4 = inlined_call_operand.hbm [shape: f32[1,512], index: 4, kind: input, shape index: {}]   ;;  %s15877_s5 = inlined_call_operand.hbm [shape: bf16[512,512], index: 5, kind: input, shape index: {}]   ;;  %s15878_s6 = inlined_call_operand.hbm [shape: f32[1,512], index: 6, kind: input, shape index: {}]   ;;  %s15879_s7 = inlined_call_operand.hbm [shape: bf16[3,512,1024], index: 7, kind: input, shape index: {}]   ;;  %s15880_s8 = inlined_call_operand.hbm [shape: f32[1,1024], index: 8, kind: input, shape index: {}]   ;;  %s15881_s9 = inlined_call_operand.hbm [shape: bf16[1024,1024], index: 9, kind: input, shape index: {}]   ;;  %s15882_s10 = inlined_call_operand.hbm [shape: f32[1,1024], index: 10, kind: input, shape index: {}]   ;;  %s15883_s11 = inlined_call_operand.hbm [shape: bf16[1024,128], index: 11, kind: input, shape index: {}]   ;;  %s15884_s12 = inlined_call_operand.hbm [shape: f32[1,128], index: 12, kind: input, shape index: {}]   ;;  %s15885_s13 = inlined_call_operand.vmem [shape: f32[8,128], index: 13, kind: output, shape index: {}]  }
   0x1   :  { %19 = vsyncpa [#allocation5], 0 }
   0x2   :  { %20 = vsyncpa [#allocation8], 0 }
   0x3   :  { %21 = vsyncpa [#allocation11], 0 }
   0x4   :  { %22 = vsyncpa [#allocation14], 0 }
   0x5   :  { %23 = vsyncpa [#allocation17], 0 }
   0x6   :  { %24 = vsyncpa [#allocation20], 0  ;;  %s15226_s25 = smov [#allocation4]   ;;  %s15227_s27 = smov [#allocation7]  }
   0x7   :  { %s45_s26 = sshll.u32 %s15226_s25, 4  ;;  %s67_s28 = sshll.u32 %s15227_s27, 4  ;;  %s46_s26 = int_to_ptr.vmem [resolvable:$true] %s45_s26  ;;  %s68_s28 = int_to_ptr.vmem [resolvable:$true] %s67_s28 }
   0x8   :  { %s14980_s29 = scalar_lea.vmem %s46_s26, 64  ;;  %p14985_p1 = scmp.lt.s32.totalorder %s46_s26, %s46_s26 }
   0x9   :  { %p14981_p0 = scmp.ne.s32.totalorder %s46_s26, %s14980_s29  ;;  %p14986_p2 = scmp.lt.s32.totalorder %s14980_s29, %s14980_s29 }
   0xb   :  { %p14987_p3 = por %p14986_p2, %p14985_p1 }
   0xd   :  { %p14988_p4 = pnand %p14987_p3, %p14981_p0 }
   0xf   :  { %14991 = shalt.err (!%p14988_p4)
}
  0x10   :  { %48 = dma.hbm_to_vmem [thread:$0]  %s15874_s2, 64, %s46_s26, [#allocation5]  }
  0x11   :  { %s15000_s15 = scalar_lea.vmem %s68_s28, 64  ;;  %p15005_p6 = scmp.lt.s32.totalorder %s68_s28, %s68_s28 }
  0x12   :  { %p15001_p5 = scmp.ne.s32.totalorder %s68_s28, %s15000_s15  ;;  %p15006_p7 = scmp.lt.s32.totalorder %s15000_s15, %s15000_s15 }
  0x14   :  { %p15007_p8 = por %p15006_p7, %p15005_p6 }
  0x16   :  { %p15008_p9 = pnand %p15007_p8, %p15001_p5 }
  0x18   :  { %15011 = shalt.err (!%p15008_p9)
}
  0x19   :  { %70 = dma.hbm_to_vmem [thread:$0]  %s15876_s4, 64, %s68_s28, [#allocation8]  }
  0x1a   :  { %s15228_s18 = smov [#allocation10]   ;;  %s15229_s20 = smov [#allocation13]  }
  0x1b   :  { %s89_s19 = sshll.u32 %s15228_s18, 4  ;;  %s111_s21 = sshll.u32 %s15229_s20, 4  ;;  %s90_s19 = int_to_ptr.vmem [resolvable:$true] %s89_s19  ;;  %s112_s21 = int_to_ptr.vmem [resolvable:$true] %s111_s21 }
  0x1c   :  { %s15020_s22 = scalar_lea.vmem %s90_s19, 64  ;;  %p15025_p11 = scmp.lt.s32.totalorder %s90_s19, %s90_s19 }
  0x1d   :  { %p15021_p10 = scmp.ne.s32.totalorder %s90_s19, %s15020_s22  ;;  %p15026_p12 = scmp.lt.s32.totalorder %s15020_s22, %s15020_s22 }
  0x1f   :  { %p15027_p13 = por %p15026_p12, %p15025_p11 }
  0x21   :  { %p15028_p0 = pnand %p15027_p13, %p15021_p10 }
  0x23   :  { %15031 = shalt.err (!%p15028_p0)
}
  0x24   :  { %92 = dma.hbm_to_vmem [thread:$0]  %s15878_s6, 64, %s90_s19, [#allocation11]  }
  0x25   :  { %s15040_s24 = scalar_lea.vmem %s112_s21, 128  ;;  %p15045_p2 = scmp.lt.s32.totalorder %s112_s21, %s112_s21 }
  0x26   :  { %p15041_p1 = scmp.ne.s32.totalorder %s112_s21, %s15040_s24  ;;  %p15046_p3 = scmp.lt.s32.totalorder %s15040_s24, %s15040_s24 }
  0x28   :  { %p15047_p4 = por %p15046_p3, %p15045_p2 }
  0x2a   :  { %p15048_p5 = pnand %p15047_p4, %p15041_p1 }
  0x2c   :  { %15051 = shalt.err (!%p15048_p5)
}
  0x2d   :  { %114 = dma.hbm_to_vmem [thread:$0]  %s15880_s8, 128, %s112_s21, [#allocation14]  }
  0x2e   :  { %s15230_s26 = smov [#allocation16]   ;;  %s15231_s28 = smov [#allocation2]  }
  0x2f   :  { %s133_s27 = sshll.u32 %s15230_s26, 4  ;;  %s32_s29 = sshll.u32 %s15231_s28, 4  ;;  %s134_s27 = int_to_ptr.vmem [resolvable:$true] %s133_s27  ;;  %s33_s29 = int_to_ptr.vmem [resolvable:$true] %s32_s29 }
  0x30   :  { %s15060_s30 = scalar_lea.vmem %s134_s27, 128  ;;  %p15065_p7 = scmp.lt.s32.totalorder %s134_s27, %s134_s27 }
  0x31   :  { %p15061_p6 = scmp.ne.s32.totalorder %s134_s27, %s15060_s30  ;;  %p15066_p8 = scmp.lt.s32.totalorder %s15060_s30, %s15060_s30 }
  0x33   :  { %p15067_p9 = por %p15066_p8, %p15065_p7 }
  0x35   :  { %p15068_p10 = pnand %p15067_p9, %p15061_p6 }
  0x37   :  { %15071 = shalt.err (!%p15068_p10)
}
  0x38   :  { %136 = dma.hbm_to_vmem [thread:$0]  %s15882_s10, 128, %s134_s27, [#allocation17]  }
  0x39   :  { %s15080_s15 = scalar_lea.vmem %s33_s29, 4096  ;;  %p15085_p12 = scmp.lt.s32.totalorder %s33_s29, %s33_s29 }
  0x3a   :  { %p15081_p11 = scmp.ne.s32.totalorder %s33_s29, %s15080_s15  ;;  %p15086_p13 = scmp.lt.s32.totalorder %s15080_s15, %s15080_s15 }
  0x3c   :  { %p15087_p0 = por %p15086_p13, %p15085_p12 }
  0x3e   :  { %p15088_p1 = pnand %p15087_p0, %p15081_p11 }
  0x40   :  { %15091 = shalt.err (!%p15088_p1)
}
  0x41   :  { %s15232_s8 = smov 256   ;;  %s15233_s16 = smov 16  }
  0x42   :  { %38 = dma.hbm_to_vmem [thread:$0]  %s15873_s1, 4096, %s33_s29, [#allocation3], %s15232_s8, %s15232_s8, %s15233_s16  }
  0x43   :  { %s15234_s19 = smov [#allocation6]   ;;  %s15235_s21 = smov [#allocation9]  }
  0x44   :  { %s54_s20 = sshll.u32 %s15234_s19, 4  ;;  %s76_s22 = sshll.u32 %s15235_s21, 4  ;;  %s55_s20 = int_to_ptr.vmem [resolvable:$true] %s54_s20  ;;  %s77_s22 = int_to_ptr.vmem [resolvable:$true] %s76_s22 }
  0x45   :  { %s15100_s10 = scalar_lea.vmem %s55_s20, 16384  ;;  %p15105_p3 = scmp.lt.s32.totalorder %s55_s20, %s55_s20 }
  0x46   :  { %p15101_p2 = scmp.ne.s32.totalorder %s55_s20, %s15100_s10  ;;  %p15106_p4 = scmp.lt.s32.totalorder %s15100_s10, %s15100_s10 }
  0x48   :  { %p15107_p5 = por %p15106_p4, %p15105_p3 }
  0x4a   :  { %p15108_p6 = pnand %p15107_p5, %p15101_p2 }
  0x4c   :  { %15111 = shalt.err (!%p15108_p6)
}
  0x4d   :  { %60 = dma.hbm_to_vmem [thread:$0]  %s15875_s3, 16384, %s55_s20, [#allocation5], %s15232_s8, %s15232_s8, %s15233_s16  }
  0x4e   :  { %s15120_s24 = scalar_lea.vmem %s77_s22, 16384  ;;  %p15125_p8 = scmp.lt.s32.totalorder %s77_s22, %s77_s22 }
  0x4f   :  { %p15121_p7 = scmp.ne.s32.totalorder %s77_s22, %s15120_s24  ;;  %p15126_p9 = scmp.lt.s32.totalorder %s15120_s24, %s15120_s24 }
  0x51   :  { %p15127_p10 = por %p15126_p9, %p15125_p8 }
  0x53   :  { %p15128_p11 = pnand %p15127_p10, %p15121_p7 }
  0x55   :  { %15131 = shalt.err (!%p15128_p11)
}
  0x56   :  { %82 = dma.hbm_to_vmem [thread:$0]  %s15877_s5, 16384, %s77_s22, [#allocation8], %s15232_s8, %s15232_s8, %s15233_s16  }
  0x57   :  { %s15236_s25 = smov [#allocation12]  }
  0x58   :  { %s98_s26 = sshll.u32 %s15236_s25, 4  ;;  %s99_s26 = int_to_ptr.vmem [resolvable:$true] %s98_s26 }
  0x59   :  { %s15140_s27 = scalar_lea.vmem %s99_s26, 98304  ;;  %p15145_p13 = scmp.lt.s32.totalorder %s99_s26, %s99_s26 }
  0x5a   :  { %p15141_p12 = scmp.ne.s32.totalorder %s99_s26, %s15140_s27  ;;  %p15146_p0 = scmp.lt.s32.totalorder %s15140_s27, %s15140_s27 }
  0x5c   :  { %p15147_p1 = por %p15146_p0, %p15145_p13 }
  0x5e   :  { %p15148_p2 = pnand %p15147_p1, %p15141_p12 }
  0x60   :  { %15151 = shalt.err (!%p15148_p2)
}
  0x61   :  { %s15237_s3 = smov 512   ;;  %s15238_s28 = smov 32  }
  0x62   :  { %104 = dma.hbm_to_vmem [thread:$0]  %s15879_s7, 98304, %s99_s26, [#allocation11], %s15237_s3, %s15237_s3, %s15238_s28  }
  0x63   :  { %s15239_s6 = smov [#allocation15]   ;;  %s15240_s5 = smov [#allocation18]  }
  0x64   :  { %s120_s14 = sshll.u32 %s15239_s6, 4  ;;  %s142_s15 = sshll.u32 %s15240_s5, 4  ;;  %s121_s14 = int_to_ptr.vmem [resolvable:$true] %s120_s14  ;;  %s143_s15 = int_to_ptr.vmem [resolvable:$true] %s142_s15 }
  0x65   :  { %s15160_s8 = scalar_lea.vmem %s121_s14, 65536  ;;  %p15165_p4 = scmp.lt.s32.totalorder %s121_s14, %s121_s14 }
  0x66   :  { %p15161_p3 = scmp.ne.s32.totalorder %s121_s14, %s15160_s8  ;;  %p15166_p5 = scmp.lt.s32.totalorder %s15160_s8, %s15160_s8 }
  0x68   :  { %p15167_p6 = por %p15166_p5, %p15165_p4 }
  0x6a   :  { %p15168_p7 = pnand %p15167_p6, %p15161_p3 }
  0x6c   :  { %15171 = shalt.err (!%p15168_p7)
}
  0x6d   :  { %126 = dma.hbm_to_vmem [thread:$0]  %s15881_s9, 65536, %s121_s14, [#allocation14], %s15237_s3, %s15237_s3, %s15238_s28  }
  0x6e   :  { %s15180_s18 = scalar_lea.vmem %s143_s15, 8192  ;;  %p15185_p9 = scmp.lt.s32.totalorder %s143_s15, %s143_s15 }
  0x6f   :  { %p15181_p8 = scmp.ne.s32.totalorder %s143_s15, %s15180_s18  ;;  %p15186_p10 = scmp.lt.s32.totalorder %s15180_s18, %s15180_s18 }
  0x71   :  { %p15187_p11 = por %p15186_p10, %p15185_p9 }
  0x73   :  { %p15188_p12 = pnand %p15187_p11, %p15181_p8 }
  0x75   :  { %15191 = shalt.err (!%p15188_p12)
}
  0x76   :  { %s15241_s7 = smov 64   ;;  %s15242_s19 = smov 4  }
  0x77   :  { %148 = dma.hbm_to_vmem [thread:$0]  %s15883_s11, 8192, %s143_s15, [#allocation17], %s15241_s7, %s15241_s7, %s15242_s19  }
  0x78   :  { %s15243_s22 = smov [#allocation19]  }
  0x79   :  { %s155_s10 = sshll.u32 %s15243_s22, 4  ;;  %s156_s10 = int_to_ptr.vmem [resolvable:$true] %s155_s10 }
  0x7a   :  { %s15200_s2 = scalar_lea.vmem %s156_s10, 16  ;;  %s15204_s9 = scalar_lea.vmem %s156_s10, 32 }
  0x7b   :  { %p15201_p13 = scmp.ne.s32.totalorder %s156_s10, %s15200_s2  ;;  %p15205_p0 = scmp.lt.s32.totalorder %s156_s10, %s156_s10 }
  0x7c   :  { %p15206_p1 = scmp.lt.s32.totalorder %s15204_s9, %s15200_s2 }
  0x7e   :  { %p15207_p2 = por %p15206_p1, %p15205_p0 }
  0x80   :  { %p15208_p3 = pnand %p15207_p2, %p15201_p13 }
  0x82   :  { %15211 = shalt.err (!%p15208_p3)
}
  0x83   :  { %158 = dma.hbm_to_vmem [thread:$0]  %s15884_s12, 16, %s156_s10, [#allocation20]  }
  0x84   :  { %15212 = dma.done.wait [#allocation3], 4096  }
  0x85   :  { %15213 = vsyncadd [#allocation3], 4294963200 }
  0x86   :  { %15214 = dma.done.wait [#allocation5], 16448  }
  0x87   :  { %15215 = vsyncadd [#allocation5], 4294950848 }
  0x88   :  { %15216 = dma.done.wait [#allocation8], 16448  }
  0x89   :  { %15217 = vsyncadd [#allocation8], 4294950848 }
  0x8a   :  { %15218 = dma.done.wait [#allocation11], 98368  }
  0x8b   :  { %15219 = vsyncadd [#allocation11], 4294868928 }
  0x8c   :  { %15220 = dma.done.wait [#allocation14], 65664  }
  0x8d   :  { %15221 = vsyncadd [#allocation14], 4294901632 }
  0x8e   :  { %15222 = dma.done.wait [#allocation17], 8320  }
  0x8f   :  { %15223 = vsyncadd [#allocation17], 4294958976 }
  0x90   :  { %15224 = dma.done.wait [#allocation20], 16  }
  0x91   :  { %15225 = vsyncadd [#allocation20], 4294967280  ;;  %v15244_v0 = vmov 0   ;;  %v14472_v1 = vld [vmem:[#allocation2 + $0xe4] ss:$16 sps:$4 sm:$0xff]  }
  0x92   :  { %455 = vmatprep.mubr.bf16.mxu0 %v15244_v0  ;;  %506 = vmatprep.mubr.bf16.mxu1 %v15244_v0  ;;  %v14474_v2 = vld [vmem:[#allocation2 + $0xec] ss:$16 sps:$4 sm:$0xff]   ;;  %v14476_v3 = vld [vmem:[#allocation2 + $0xe0] ss:$16 sps:$4 sm:$0xff]   ;;  %v14477_v4 = vld [vmem:[#allocation2 + $0xe8] ss:$16 sps:$4 sm:$0xff]  }
  0x93   :  { %423 = vmatprep.subr.bf16.mxu0 %v14472_v1  ;;  %474 = vmatprep.subr.bf16.mxu1 %v14474_v2  ;;  %v14478_v5 = vld [vmem:[#allocation2 + $0xc4] ss:$16 sps:$4 sm:$0xff]   ;;  %v14480_v6 = vld [vmem:[#allocation2 + $0xcc] ss:$16 sps:$4 sm:$0xff]   ;;  %v14482_v7 = vld [vmem:[#allocation2 + $0xc0] ss:$16 sps:$4 sm:$0xff]  }
  0x94   :  { %424 = vmatpush1.bf16.msra.mxu0 %v14476_v3  ;;  %475 = vmatpush1.bf16.msra.mxu1 %v14477_v4  ;;  %v14483_v8 = vld [vmem:[#allocation2 + $0xc8] ss:$16 sps:$4 sm:$0xff]   ;;  %v14484_v9 = vld [vmem:[#allocation2 + $0xa4] ss:$16 sps:$4 sm:$0xff]   ;;  %v14486_v10 = vld [vmem:[#allocation2 + $0xac] ss:$16 sps:$4 sm:$0xff]  }
  0x95   :  { %425 = vmatprep.subr.bf16.mxu0 %v14478_v5  ;;  %476 = vmatprep.subr.bf16.mxu1 %v14480_v6  ;;  %v14488_v11 = vld [vmem:[#allocation2 + $0xa0] ss:$16 sps:$4 sm:$0xff]   ;;  %v14489_v12 = vld [vmem:[#allocation2 + $0xa8] ss:$16 sps:$4 sm:$0xff]   ;;  %v14490_v13 = vld [vmem:[#allocation2 + $0x84] ss:$16 sps:$4 sm:$0xff]  }
  0x96   :  { %v14492_v14 = vld [vmem:[#allocation2 + $0x8c] ss:$16 sps:$4 sm:$0xff]   ;;  %v14494_v15 = vld [vmem:[#allocation2 + $0x80] ss:$16 sps:$4 sm:$0xff]   ;;  %v14495_v16 = vld [vmem:[#allocation2 + $0x88] ss:$16 sps:$4 sm:$0xff]  }
  0x97   :  { %v14496_v17 = vld [vmem:[#allocation2 + $0x64] ss:$16 sps:$4 sm:$0xff]   ;;  %v14498_v18 = vld [vmem:[#allocation2 + $0x6c] ss:$16 sps:$4 sm:$0xff]   ;;  %v14500_v19 = vld [vmem:[#allocation2 + $0x60] ss:$16 sps:$4 sm:$0xff]  }
  0x98   :  { %426 = vmatpush1.bf16.msra.mxu0 %v14482_v7  ;;  %477 = vmatpush1.bf16.msra.mxu1 %v14483_v8  ;;  %v14501_v20 = vld [vmem:[#allocation2 + $0x68] ss:$16 sps:$4 sm:$0xff]   ;;  %v14502_v21 = vld [vmem:[#allocation2 + $0x44] ss:$16 sps:$4 sm:$0xff]   ;;  %v14504_v22 = vld [vmem:[#allocation2 + $0x4c] ss:$16 sps:$4 sm:$0xff]  }
  0x99   :  { %427 = vmatprep.subr.bf16.mxu0 %v14484_v9  ;;  %478 = vmatprep.subr.bf16.mxu1 %v14486_v10  ;;  %v14506_v23 = vld [vmem:[#allocation2 + $0x40] ss:$16 sps:$4 sm:$0xff]   ;;  %v14507_v24 = vld [vmem:[#allocation2 + $0x48] ss:$16 sps:$4 sm:$0xff]   ;;  %v14508_v25 = vld [vmem:[#allocation2 + $0x24] ss:$16 sps:$4 sm:$0xff]  }
  0x9a   :  { %v14510_v26 = vld [vmem:[#allocation2 + $0x2c] ss:$16 sps:$4 sm:$0xff]   ;;  %v14512_v27 = vld [vmem:[#allocation2 + $0x20] ss:$16 sps:$4 sm:$0xff]   ;;  %v14513_v28 = vld [vmem:[#allocation2 + $0x28] ss:$16 sps:$4 sm:$0xff]  }
  0x9b   :  { %v14514_v29 = vld [vmem:[#allocation2 + $0x4] ss:$16 sps:$4 sm:$0xff]   ;;  %v14516_v30 = vld [vmem:[#allocation2 + $0xc] ss:$16 sps:$4 sm:$0xff]   ;;  %v14518_v31 = vld [vmem:[#allocation2] ss:$16 sps:$4 sm:$0xff]  }
  0x9c   :  { %428 = vmatpush1.bf16.msra.mxu0 %v14488_v11  ;;  %479 = vmatpush1.bf16.msra.mxu1 %v14489_v12  ;;  %v14519_v32 = vld [vmem:[#allocation2 + $0x8] ss:$16 sps:$4 sm:$0xff]   ;;  %v14520_v35 = vld [vmem:[%s15872_s0] sm:$0xff]  }
  0x9d   :  { %429 = vmatprep.subr.bf16.mxu0 %v14490_v13  ;;  %480 = vmatprep.subr.bf16.mxu1 %v14492_v14  ;;  %v14524_v33 = vld [vmem:[#allocation6 + $0xe4] ss:$16 sps:$4 sm:$0xff]   ;;  %v14522_v36 = vld [vmem:[#allocation6 + $0xe0] ss:$16 sps:$4 sm:$0xff]  }
  0x9e   :  { %v14527_v34 = vld [vmem:[#allocation6 + $0x2e4] ss:$16 sps:$4 sm:$0xff]   ;;  %v14525_v37 = vld [vmem:[#allocation6 + $0x2e0] ss:$16 sps:$4 sm:$0xff]  }
  0x9f   :  { %v14530_v38 = vld [vmem:[#allocation6 + $0xc4] ss:$16 sps:$4 sm:$0xff]   ;;  %v14528_v40 = vld [vmem:[#allocation6 + $0xc0] ss:$16 sps:$4 sm:$0xff]  }
  0xa0   :  { %430 = vmatpush1.bf16.msra.mxu0 %v14494_v15  ;;  %481 = vmatpush1.bf16.msra.mxu1 %v14495_v16  ;;  %v14533_v39 = vld [vmem:[#allocation6 + $0x2c4] ss:$16 sps:$4 sm:$0xff]   ;;  %v14531_v41 = vld [vmem:[#allocation6 + $0x2c0] ss:$16 sps:$4 sm:$0xff]  }
  0xa1   :  { %431 = vmatprep.subr.bf16.mxu0 %v14496_v17  ;;  %482 = vmatprep.subr.bf16.mxu1 %v14498_v18  ;;  %v14536_v42 = vld [vmem:[#allocation6 + $0xa4] ss:$16 sps:$4 sm:$0xff]   ;;  %v14534_v45 = vld [vmem:[#allocation6 + $0xa0] ss:$16 sps:$4 sm:$0xff]  }
  0xa2   :  { %v14539_v43 = vld [vmem:[#allocation6 + $0x2a4] ss:$16 sps:$4 sm:$0xff]   ;;  %v14537_v46 = vld [vmem:[#allocation6 + $0x2a0] ss:$16 sps:$4 sm:$0xff]  }
  0xa3   :  { %v14521_v44 = vld [vmem:[%s15872_s0 + $0x8] ss:$0 sps:$4 sm:$0xff]   ;;  %v14540_v49 = vld [vmem:[#allocation6 + $0x80] ss:$16 sps:$4 sm:$0xff]  }
  0xa4   :  { %432 = vmatpush1.bf16.msra.mxu0 %v14500_v19  ;;  %483 = vmatpush1.bf16.msra.mxu1 %v14501_v20  ;;  %v14542_v47 = vld [vmem:[#allocation6 + $0x84] ss:$16 sps:$4 sm:$0xff]   ;;  %v14543_v50 = vld [vmem:[#allocation6 + $0x280] ss:$16 sps:$4 sm:$0xff]  }
  0xa5   :  { %433 = vmatprep.subr.bf16.mxu0 %v14502_v21  ;;  %484 = vmatprep.subr.bf16.mxu1 %v14504_v22  ;;  %v14545_v48 = vld [vmem:[#allocation6 + $0x284] ss:$16 sps:$4 sm:$0xff]   ;;  %v14546_v53 = vld [vmem:[#allocation6 + $0x60] ss:$16 sps:$4 sm:$0xff]  }
  0xa6   :  { %v14548_v51 = vld [vmem:[#allocation6 + $0x64] ss:$16 sps:$4 sm:$0xff]   ;;  %v14549_v54 = vld [vmem:[#allocation6 + $0x260] ss:$16 sps:$4 sm:$0xff]  }
  0xa7   :  { %v14551_v52 = vld [vmem:[#allocation6 + $0x264] ss:$16 sps:$4 sm:$0xff]   ;;  %v14552_v57 = vld [vmem:[#allocation6 + $0x40] ss:$16 sps:$4 sm:$0xff]  }
  0xa8   :  { %434 = vmatpush1.bf16.msra.mxu0 %v14506_v23  ;;  %485 = vmatpush1.bf16.msra.mxu1 %v14507_v24  ;;  %v14554_v55 = vld [vmem:[#allocation6 + $0x44] ss:$16 sps:$4 sm:$0xff]   ;;  %v14555_v58 = vld [vmem:[#allocation6 + $0x240] ss:$16 sps:$4 sm:$0xff]  }
  0xa9   :  { %435 = vmatprep.subr.bf16.mxu0 %v14508_v25  ;;  %486 = vmatprep.subr.bf16.mxu1 %v14510_v26  ;;  %v14557_v56 = vld [vmem:[#allocation6 + $0x244] ss:$16 sps:$4 sm:$0xff]   ;;  %v14558_v61 = vld [vmem:[#allocation6 + $0x20] ss:$16 sps:$4 sm:$0xff]  }
  0xaa   :  { %v14560_v59 = vld [vmem:[#allocation6 + $0x24] ss:$16 sps:$4 sm:$0xff]   ;;  %v14561_v62 = vld [vmem:[#allocation6 + $0x220] ss:$16 sps:$4 sm:$0xff]  }
  0xab   :  { %v14563_v60 = vld [vmem:[#allocation6 + $0x224] ss:$16 sps:$4 sm:$0xff]   ;;  %v14564_v1 = vld [vmem:[#allocation6] ss:$16 sps:$4 sm:$0xff]  }
  0xac   :  { %436 = vmatpush1.bf16.msra.mxu0 %v14512_v27  ;;  %487 = vmatpush1.bf16.msra.mxu1 %v14513_v28  ;;  %v14566_v63 = vld [vmem:[#allocation6 + $0x4] ss:$16 sps:$4 sm:$0xff]   ;;  %v14567_v2 = vld [vmem:[#allocation6 + $0x200] ss:$16 sps:$4 sm:$0xff]  }
  0xad   :  { %437 = vmatprep.subr.bf16.mxu0 %v14514_v29  ;;  %488 = vmatprep.subr.bf16.mxu1 %v14516_v30  ;;  %v14572_v3 = vld [vmem:[#allocation6 + $0x1e4] ss:$16 sps:$4 sm:$0xff]   ;;  %v14570_v5 = vld [vmem:[#allocation6 + $0x1e0] ss:$16 sps:$4 sm:$0xff]  }
  0xae   :  { %v14575_v4 = vld [vmem:[#allocation6 + $0x3e4] ss:$16 sps:$4 sm:$0xff]   ;;  %v14573_v6 = vld [vmem:[#allocation6 + $0x3e0] ss:$16 sps:$4 sm:$0xff]  }
  0xaf   :  { %v14578_v7 = vld [vmem:[#allocation6 + $0x1c4] ss:$16 sps:$4 sm:$0xff]   ;;  %v14576_v9 = vld [vmem:[#allocation6 + $0x1c0] ss:$16 sps:$4 sm:$0xff]  }
  0xb0   :  { %438 = vmatpush1.bf16.msra.mxu0 %v14518_v31  ;;  %489 = vmatpush1.bf16.msra.mxu1 %v14519_v32  ;;  %v14581_v8 = vld [vmem:[#allocation6 + $0x3c4] ss:$16 sps:$4 sm:$0xff]   ;;  %v14579_v10 = vld [vmem:[#allocation6 + $0x3c0] ss:$16 sps:$4 sm:$0xff]  }
  0xb1   :  { %1335 = vmatprep.subr.bf16.mxu0 %v14524_v33  ;;  %1386 = vmatprep.subr.bf16.mxu1 %v14527_v34  ;;  %v14584_v11 = vld [vmem:[#allocation6 + $0x1a4] ss:$16 sps:$4 sm:$0xff]   ;;  %v14582_v13 = vld [vmem:[#allocation6 + $0x1a0] ss:$16 sps:$4 sm:$0xff]  }
  0xb2   :  { %v14587_v12 = vld [vmem:[#allocation6 + $0x3a4] ss:$16 sps:$4 sm:$0xff]   ;;  %v14585_v14 = vld [vmem:[#allocation6 + $0x3a0] ss:$16 sps:$4 sm:$0xff]  }
  0xb3   :  { %456 = vmatmul.mubr.bf16.vlgmr.msra.gmra.mxu0 %v14520_v35  ;;  %507 = vmatmul.mubr.bf16.vlgmr.msra.gmra.mxu1 %v14520_v35  ;;  %v14590_v15 = vld [vmem:[#allocation6 + $0x184] ss:$16 sps:$4 sm:$0xff]   ;;  %v14588_v17 = vld [vmem:[#allocation6 + $0x180] ss:$16 sps:$4 sm:$0xff]   ;;  %v14620_v35 = vld [vmem:[#allocation6 + $0xec] ss:$16 sps:$4 sm:$0xff]  }
  0xb4   :  { %465 = vmatprep.mubr.bf16.mxu0 %v15244_v0  ;;  %516 = vmatprep.mubr.bf16.mxu1 %v15244_v0  ;;  %v14569_v0 = vld [vmem:[#allocation6 + $0x204] ss:$16 sps:$4 sm:$0xff]   ;;  %v14591_v18 = vld [vmem:[#allocation6 + $0x380] ss:$16 sps:$4 sm:$0xff]  }
  0xb5   :  { %1336 = vmatpush1.bf16.msra.mxu0 %v14522_v36  ;;  %1387 = vmatpush1.bf16.msra.mxu1 %v14525_v37  ;;  %v14593_v16 = vld [vmem:[#allocation6 + $0x384] ss:$16 sps:$4 sm:$0xff]   ;;  %v14594_v21 = vld [vmem:[#allocation6 + $0x160] ss:$16 sps:$4 sm:$0xff]   ;;  %v14623_v36 = vld [vmem:[#allocation6 + $0x2ec] ss:$16 sps:$4 sm:$0xff]   ;;  %v233_v37 = vlaneseq }
  0xb6   :  { %1337 = vmatprep.subr.bf16.mxu0 %v14530_v38  ;;  %1388 = vmatprep.subr.bf16.mxu1 %v14533_v39  ;;  %v14596_v19 = vld [vmem:[#allocation6 + $0x164] ss:$16 sps:$4 sm:$0xff]   ;;  %v14597_v22 = vld [vmem:[#allocation6 + $0x360] ss:$16 sps:$4 sm:$0xff]  }
  0xb7   :  { %v14599_v20 = vld [vmem:[#allocation6 + $0x364] ss:$16 sps:$4 sm:$0xff]   ;;  %v14600_v25 = vld [vmem:[#allocation6 + $0x140] ss:$16 sps:$4 sm:$0xff]   ;;  %v15361_v38 = vshrl.u32 %v233_v37, 7 }
  0xb8   :  { %v14602_v23 = vld [vmem:[#allocation6 + $0x144] ss:$16 sps:$4 sm:$0xff]   ;;  %v14603_v26 = vld [vmem:[#allocation6 + $0x340] ss:$16 sps:$4 sm:$0xff]   ;;  %v14635_v37 = vld [vmem:[#allocation6 + $0x2ac] ss:$16 sps:$4 sm:$0xff]  }
  0xb9   :  { %1338 = vmatpush1.bf16.msra.mxu0 %v14528_v40  ;;  %1389 = vmatpush1.bf16.msra.mxu1 %v14531_v41  ;;  %v14605_v24 = vld [vmem:[#allocation6 + $0x344] ss:$16 sps:$4 sm:$0xff]   ;;  %v14606_v29 = vld [vmem:[#allocation6 + $0x120] ss:$16 sps:$4 sm:$0xff]   ;;  %v15364_v39 = vsub.s32 1, %v15361_v38  ;;  %v15367_v40 = vsub.s32 3, %v15361_v38 }
  0xba   :  { %1339 = vmatprep.subr.bf16.mxu0 %v14536_v42  ;;  %1390 = vmatprep.subr.bf16.mxu1 %v14539_v43  ;;  %v14608_v27 = vld [vmem:[#allocation6 + $0x124] ss:$16 sps:$4 sm:$0xff]   ;;  %v14609_v30 = vld [vmem:[#allocation6 + $0x320] ss:$16 sps:$4 sm:$0xff]   ;;  %v15370_v41 = vsub.s32 0, %v15361_v38  ;;  %v15373_v42 = vsub.s32 2, %v15361_v38 }
  0xbb   :  { %466 = vmatmul.mubr.bf16.gmra.mxu0 %v14521_v44  ;;  %517 = vmatmul.mubr.bf16.gmra.mxu1 %v14521_v44  ;;  %v14611_v28 = vld [vmem:[#allocation6 + $0x324] ss:$16 sps:$4 sm:$0xff]   ;;  %v14612_v33 = vld [vmem:[#allocation6 + $0x100] ss:$16 sps:$4 sm:$0xff]   ;;  %v231_v43 = vld [vmem:[#allocation4] sm:$0xf] }
  0xbc   :  { %v14614_v31 = vld [vmem:[#allocation6 + $0x104] ss:$16 sps:$4 sm:$0xff]   ;;  %v14615_v34 = vld [vmem:[#allocation6 + $0x300] ss:$16 sps:$4 sm:$0xff]  }
  0xbd   :  { %1340 = vmatpush1.bf16.msra.mxu0 %v14534_v45  ;;  %1391 = vmatpush1.bf16.msra.mxu1 %v14537_v46  ;;  %v14617_v32 = vld [vmem:[#allocation6 + $0x304] ss:$16 sps:$4 sm:$0xff]   ;;  %v240_v46 = vrot.slane %v231_v43, %v15364_v39 }
  0xbe   :  { %1341 = vmatprep.subr.bf16.mxu0 %v14542_v47  ;;  %1392 = vmatprep.subr.bf16.mxu1 %v14545_v48  ;;  %v248_v47 = vrot.slane %v231_v43, %v15367_v40  ;;  %v236_v48 = vrot.slane %v231_v43, %v15370_v41 }
  0xc1   :  { %1342 = vmatpush1.bf16.msra.mxu0 %v14540_v49  ;;  %1393 = vmatpush1.bf16.msra.mxu1 %v14543_v50  ;;  %v244_v49 = vrot.slane %v231_v43, %v15373_v42 }
  0xc2   :  { %1343 = vmatprep.subr.bf16.mxu0 %v14548_v51  ;;  %1394 = vmatprep.subr.bf16.mxu1 %v14551_v52 }
  0xc5   :  { %1344 = vmatpush1.bf16.msra.mxu0 %v14546_v53  ;;  %1395 = vmatpush1.bf16.msra.mxu1 %v14549_v54 }
  0xc6   :  { %1345 = vmatprep.subr.bf16.mxu0 %v14554_v55  ;;  %1396 = vmatprep.subr.bf16.mxu1 %v14557_v56 }
  0xc9   :  { %1346 = vmatpush1.bf16.msra.mxu0 %v14552_v57  ;;  %1397 = vmatpush1.bf16.msra.mxu1 %v14555_v58 }
  0xca   :  { %1347 = vmatprep.subr.bf16.mxu0 %v14560_v59  ;;  %1398 = vmatprep.subr.bf16.mxu1 %v14563_v60 }
  0xcd   :  { %1348 = vmatpush1.bf16.msra.mxu0 %v14558_v61  ;;  %1399 = vmatpush1.bf16.msra.mxu1 %v14561_v62 }
  0xce   :  { %1349 = vmatprep.subr.bf16.mxu0 %v14566_v63  ;;  %1400 = vmatprep.subr.bf16.mxu1 %v14569_v0 }
  0xd1   :  { %1350 = vmatpush1.bf16.msra.mxu0 %v14564_v1  ;;  %1401 = vmatpush1.bf16.msra.mxu1 %v14567_v2 }
  0xd2   :  { %1351 = vmatprep.subr.bf16.mxu0 %v14572_v3  ;;  %1402 = vmatprep.subr.bf16.mxu1 %v14575_v4 }
  0xd5   :  { %1352 = vmatpush2.bf16.msra.mxu0 %v14570_v5  ;;  %1403 = vmatpush2.bf16.msra.mxu1 %v14573_v6 }
  0xd6   :  { %1353 = vmatprep.subr.bf16.mxu0 %v14578_v7  ;;  %1404 = vmatprep.subr.bf16.mxu1 %v14581_v8 }
  0xd9   :  { %1354 = vmatpush2.bf16.msra.mxu0 %v14576_v9  ;;  %1405 = vmatpush2.bf16.msra.mxu1 %v14579_v10 }
  0xda   :  { %1355 = vmatprep.subr.bf16.mxu0 %v14584_v11  ;;  %1406 = vmatprep.subr.bf16.mxu1 %v14587_v12 }
  0xdd   :  { %1356 = vmatpush2.bf16.msra.mxu0 %v14582_v13  ;;  %1407 = vmatpush2.bf16.msra.mxu1 %v14585_v14 }
  0xde   :  { %1357 = vmatprep.subr.bf16.mxu0 %v14590_v15  ;;  %1408 = vmatprep.subr.bf16.mxu1 %v14593_v16  ;;  %v14618_v16 = vld [vmem:[#allocation6 + $0xe8] ss:$16 sps:$4 sm:$0xff]  }
  0xe1   :  { %1358 = vmatpush2.bf16.msra.mxu0 %v14588_v17  ;;  %1409 = vmatpush2.bf16.msra.mxu1 %v14591_v18  ;;  %v14621_v17 = vld [vmem:[#allocation6 + $0x2e8] ss:$16 sps:$4 sm:$0xff]  }
  0xe2   :  { %1359 = vmatprep.subr.bf16.mxu0 %v14596_v19  ;;  %1410 = vmatprep.subr.bf16.mxu1 %v14599_v20 }
  0xe5   :  { %1360 = vmatpush2.bf16.msra.mxu0 %v14594_v21  ;;  %1411 = vmatpush2.bf16.msra.mxu1 %v14597_v22  ;;  %v14626_v22 = vld [vmem:[#allocation6 + $0xcc] ss:$16 sps:$4 sm:$0xff]  }
  0xe6   :  { %1361 = vmatprep.subr.bf16.mxu0 %v14602_v23  ;;  %1412 = vmatprep.subr.bf16.mxu1 %v14605_v24  ;;  %v14629_v23 = vld [vmem:[#allocation6 + $0x2cc] ss:$16 sps:$4 sm:$0xff]  }
  0xe9   :  { %1362 = vmatpush2.bf16.msra.mxu0 %v14600_v25  ;;  %1413 = vmatpush2.bf16.msra.mxu1 %v14603_v26 }
  0xea   :  { %1363 = vmatprep.subr.bf16.mxu0 %v14608_v27  ;;  %1414 = vmatprep.subr.bf16.mxu1 %v14611_v28 }
  0xed   :  { %1364 = vmatpush2.bf16.msra.mxu0 %v14606_v29  ;;  %1415 = vmatpush2.bf16.msra.mxu1 %v14609_v30 }
  0xee   :  { %1365 = vmatprep.subr.bf16.mxu0 %v14614_v31  ;;  %1416 = vmatprep.subr.bf16.mxu1 %v14617_v32 }
  0xf1   :  { %1366 = vmatpush2.bf16.msra.mxu0 %v14612_v33  ;;  %1417 = vmatpush2.bf16.msra.mxu1 %v14615_v34  ;;  %v14624_v34 = vld [vmem:[#allocation6 + $0xc8] ss:$16 sps:$4 sm:$0xff]  }
  0xf2   :  { %1437 = vmatprep.subr.bf16.mxu0 %v14620_v35  ;;  %1488 = vmatprep.subr.bf16.mxu1 %v14623_v36  ;;  %v14627_v35 = vld [vmem:[#allocation6 + $0x2c8] ss:$16 sps:$4 sm:$0xff]   ;;  %v14632_v36 = vld [vmem:[#allocation6 + $0xac] ss:$16 sps:$4 sm:$0xff]  }
 0x173   :  { %v457_v44 = vpop.f32.mrf.mxu0  ;;  %v508_v45 = vpop.f32.mrf.mxu1 }
 0x174   :  { %v458_v58 = vadd.f32 %v457_v44, %v236_v48  ;;  %v509_v59 = vadd.f32 %v508_v45, %v244_v49  ;;  %v14630_v45 = vld [vmem:[#allocation6 + $0xa8] ss:$16 sps:$4 sm:$0xff]  }
 0x175   :  { %v459_v50 = vpop.f32.mrf.mxu0  ;;  %v510_v51 = vpop.f32.mrf.mxu1 }
 0x176   :  { %v460_v54 = vadd.f32 %v459_v50, %v240_v46  ;;  %v511_v55 = vadd.f32 %v510_v51, %v248_v47  ;;  %v525_v8 = vmax.f32 %v458_v58, 0.0  ;;  %v527_v9 = vmax.f32 %v509_v59, 0.0  ;;  %v14639_v50 = vld [vmem:[#allocation6 + $0x288] ss:$16 sps:$4 sm:$0xff]   ;;  %v14644_v51 = vld [vmem:[#allocation6 + $0x6c] ss:$16 sps:$4 sm:$0xff]  }
 0x177   :  { %v461_v52 = vpop.f32.mrf.mxu0  ;;  %v512_v53 = vpop.f32.mrf.mxu1  ;;  %v14651_v58 = vld [vmem:[#allocation6 + $0x248] ss:$16 sps:$4 sm:$0xff]   ;;  %v14656_v59 = vld [vmem:[#allocation6 + $0x2c] ss:$16 sps:$4 sm:$0xff]  }
 0x178   :  { %v462_v56 = vadd.f32 %v461_v52, %v236_v48  ;;  %v513_v57 = vadd.f32 %v512_v53, %v244_v49  ;;  %v526_v4 = vmax.f32 %v460_v54, 0.0  ;;  %v528_v5 = vmax.f32 %v511_v55, 0.0  ;;  %v14647_v52 = vld [vmem:[#allocation6 + $0x26c] ss:$16 sps:$4 sm:$0xff]   ;;  %v14642_v53 = vld [vmem:[#allocation6 + $0x68] ss:$16 sps:$4 sm:$0xff]  }
 0x179   :  { %v463_v60 = vpop.f32.mrf.mxu0  ;;  %v514_v61 = vpop.f32.mrf.mxu1  ;;  %v14645_v54 = vld [vmem:[#allocation6 + $0x268] ss:$16 sps:$4 sm:$0xff]   ;;  %v14650_v55 = vld [vmem:[#allocation6 + $0x4c] ss:$16 sps:$4 sm:$0xff]  }
 0x17a   :  { %v464_v62 = vadd.f32 %v463_v60, %v240_v46  ;;  %v515_v63 = vadd.f32 %v514_v61, %v248_v47  ;;  %v529_v0 = vmax.f32 %v462_v56, 0.0  ;;  %v531_v1 = vmax.f32 %v513_v57, 0.0  ;;  %v14653_v56 = vld [vmem:[#allocation6 + $0x24c] ss:$16 sps:$4 sm:$0xff]   ;;  %v14648_v57 = vld [vmem:[#allocation6 + $0x48] ss:$16 sps:$4 sm:$0xff]  }
 0x17b   :  { %v467_v2 = vpop.f32.mrf.mxu0  ;;  %v518_v3 = vpop.f32.mrf.mxu1  ;;  %v14659_v60 = vld [vmem:[#allocation6 + $0x22c] ss:$16 sps:$4 sm:$0xff]   ;;  %v14654_v61 = vld [vmem:[#allocation6 + $0x28] ss:$16 sps:$4 sm:$0xff]  }
 0x17c   :  { %v530_v6 = vmax.f32 %v464_v62, 0.0  ;;  %v532_v7 = vmax.f32 %v515_v63, 0.0  ;;  %v468_v10 = vadd.f32 %v467_v2, %v236_v48  ;;  %v519_v11 = vadd.f32 %v518_v3, %v244_v49  ;;  %v14641_v48 = vld [vmem:[#allocation6 + $0x28c] ss:$16 sps:$4 sm:$0xff]   ;;  %v14636_v49 = vld [vmem:[#allocation6 + $0x88] ss:$16 sps:$4 sm:$0xff]  }
 0x17d   :  { %v469_v12 = vpop.f32.mrf.mxu0  ;;  %v520_v13 = vpop.f32.mrf.mxu1  ;;  %v15379_v20 = vpack.c.bf16 %v529_v0, %v525_v8  ;;  %v15381_v21 = vpack.c.bf16 %v531_v1, %v527_v9  ;;  %v14657_v62 = vld [vmem:[#allocation6 + $0x228] ss:$16 sps:$4 sm:$0xff]   ;;  %v14662_v63 = vld [vmem:[#allocation6 + $0xc] ss:$16 sps:$4 sm:$0xff]  }
 0x17e   :  { %v538_v14 = vpack.c.bf16 %v530_v6, %v526_v4  ;;  %v540_v15 = vpack.c.bf16 %v532_v7, %v528_v5  ;;  %v470_v18 = vadd.f32 %v469_v12, %v240_v46  ;;  %v521_v19 = vadd.f32 %v520_v13, %v248_v47  ;;  %v14633_v46 = vld [vmem:[#allocation6 + $0x2a8] ss:$16 sps:$4 sm:$0xff]   ;;  %v14638_v47 = vld [vmem:[#allocation6 + $0x8c] ss:$16 sps:$4 sm:$0xff]  }
 0x17f   :  { %v471_v24 = vpop.f32.mrf.mxu0  ;;  %v522_v25 = vpop.f32.mrf.mxu1  ;;  %v533_v28 = vmax.f32 %v468_v10, 0.0  ;;  %v535_v29 = vmax.f32 %v519_v11, 0.0  ;;  %v14665_v0 = vld [vmem:[#allocation6 + $0x20c] ss:$16 sps:$4 sm:$0xff]   ;;  %v14660_v1 = vld [vmem:[#allocation6 + $0x8] ss:$16 sps:$4 sm:$0xff]  }
 0x180   :  { %1367 = vmatprep.mubr.bf16.mxu0 %v538_v14  ;;  %1418 = vmatprep.mubr.bf16.mxu1 %v540_v15  ;;  %v534_v26 = vmax.f32 %v470_v18, 0.0  ;;  %v536_v27 = vmax.f32 %v521_v19, 0.0  ;;  %v14663_v2 = vld [vmem:[#allocation6 + $0x208] ss:$16 sps:$4 sm:$0xff]   ;;  %v14668_v3 = vld [vmem:[#allocation6 + $0x1ec] ss:$16 sps:$4 sm:$0xff]  }
 0x181   :  { %1368 = vmatmul.mubr.bf16.vlgmr.msra.gmra.mxu0 %v15379_v20  ;;  %1419 = vmatmul.mubr.bf16.vlgmr.msra.gmra.mxu1 %v15381_v21  ;;  %v472_v30 = vpop.f32.mrf.mxu0  ;;  %v523_v31 = vpop.f32.mrf.mxu1  ;;  %v15391_v43 = vpack.c.bf16 %v533_v28, %v533_v28  ;;  %v15393_v44 = vpack.c.bf16 %v535_v29, %v535_v29  ;;  %v14671_v4 = vld [vmem:[#allocation6 + $0x3ec] ss:$16 sps:$4 sm:$0xff]   ;;  %v14666_v5 = vld [vmem:[#allocation6 + $0x1e8] ss:$16 sps:$4 sm:$0xff]  }
 0x182   :  { %v15385_v32 = vpack.c.bf16 %v534_v26, %v534_v26  ;;  %v15387_v33 = vpack.c.bf16 %v536_v27, %v536_v27  ;;  %1438 = vmatpush1.bf16.msra.mxu0 %v14618_v16  ;;  %1489 = vmatpush1.bf16.msra.mxu1 %v14621_v17  ;;  %v14669_v6 = vld [vmem:[#allocation6 + $0x3e8] ss:$16 sps:$4 sm:$0xff]   ;;  %v14674_v7 = vld [vmem:[#allocation6 + $0x1cc] ss:$16 sps:$4 sm:$0xff]  }
 0x183   :  { %1439 = vmatprep.subr.bf16.mxu0 %v14626_v22  ;;  %1490 = vmatprep.subr.bf16.mxu1 %v14629_v23  ;;  %v14677_v8 = vld [vmem:[#allocation6 + $0x3cc] ss:$16 sps:$4 sm:$0xff]   ;;  %v14672_v9 = vld [vmem:[#allocation6 + $0x1c8] ss:$16 sps:$4 sm:$0xff]  }
 0x184   :  { %1377 = vmatprep.mubr.bf16.mxu0 %v15385_v32  ;;  %1428 = vmatprep.mubr.bf16.mxu1 %v15387_v33  ;;  %v14675_v10 = vld [vmem:[#allocation6 + $0x3c8] ss:$16 sps:$4 sm:$0xff]   ;;  %v14680_v11 = vld [vmem:[#allocation6 + $0x1ac] ss:$16 sps:$4 sm:$0xff]  }
 0x185   :  { %v14683_v12 = vld [vmem:[#allocation6 + $0x3ac] ss:$16 sps:$4 sm:$0xff]   ;;  %v14678_v13 = vld [vmem:[#allocation6 + $0x1a8] ss:$16 sps:$4 sm:$0xff]  }
 0x186   :  { %1440 = vmatpush1.bf16.msra.mxu0 %v14624_v34  ;;  %1491 = vmatpush1.bf16.msra.mxu1 %v14627_v35  ;;  %v14689_v16 = vld [vmem:[#allocation6 + $0x38c] ss:$16 sps:$4 sm:$0xff]   ;;  %v14684_v17 = vld [vmem:[#allocation6 + $0x188] ss:$16 sps:$4 sm:$0xff]  }
 0x187   :  { %1441 = vmatprep.subr.bf16.mxu0 %v14632_v36  ;;  %1492 = vmatprep.subr.bf16.mxu1 %v14635_v37  ;;  %v14687_v18 = vld [vmem:[#allocation6 + $0x388] ss:$16 sps:$4 sm:$0xff]   ;;  %v14692_v19 = vld [vmem:[#allocation6 + $0x16c] ss:$16 sps:$4 sm:$0xff]  }
 0x188   :  { %v14695_v22 = vld [vmem:[#allocation6 + $0x36c] ss:$16 sps:$4 sm:$0xff]   ;;  %v14690_v23 = vld [vmem:[#allocation6 + $0x168] ss:$16 sps:$4 sm:$0xff]  }
 0x189   :  { %1378 = vmatmul.mubr.bf16.gmra.mxu0 %v15391_v43  ;;  %1429 = vmatmul.mubr.bf16.gmra.mxu1 %v15393_v44  ;;  %v14693_v24 = vld [vmem:[#allocation6 + $0x368] ss:$16 sps:$4 sm:$0xff]   ;;  %v14698_v25 = vld [vmem:[#allocation6 + $0x14c] ss:$16 sps:$4 sm:$0xff]  }
 0x18a   :  { %1442 = vmatpush1.bf16.msra.mxu0 %v14630_v45  ;;  %1493 = vmatpush1.bf16.msra.mxu1 %v14633_v46  ;;  %v14701_v26 = vld [vmem:[#allocation6 + $0x34c] ss:$16 sps:$4 sm:$0xff]   ;;  %v14696_v27 = vld [vmem:[#allocation6 + $0x148] ss:$16 sps:$4 sm:$0xff]  }
 0x18b   :  { %1469 = vmatprep.mubr.bf16.mxu0 %v538_v14  ;;  %1520 = vmatprep.mubr.bf16.mxu1 %v540_v15  ;;  %v14681_v14 = vld [vmem:[#allocation6 + $0x3a8] ss:$16 sps:$4 sm:$0xff]   ;;  %v14686_v15 = vld [vmem:[#allocation6 + $0x18c] ss:$16 sps:$4 sm:$0xff]  }
 0x18c   :  { %1443 = vmatprep.subr.bf16.mxu0 %v14638_v47  ;;  %1494 = vmatprep.subr.bf16.mxu1 %v14641_v48  ;;  %v14699_v28 = vld [vmem:[#allocation6 + $0x348] ss:$16 sps:$4 sm:$0xff]   ;;  %v14704_v29 = vld [vmem:[#allocation6 + $0x12c] ss:$16 sps:$4 sm:$0xff]   ;;  %v14714_v47 = vld [vmem:[#allocation9 + $0xe0] ss:$16 sps:$4 sm:$0xff]  }
 0x18d   :  { %v14707_v30 = vld [vmem:[#allocation6 + $0x32c] ss:$16 sps:$4 sm:$0xff]   ;;  %v14702_v31 = vld [vmem:[#allocation6 + $0x128] ss:$16 sps:$4 sm:$0xff]  }
 0x18e   :  { %1444 = vmatpush1.bf16.msra.mxu0 %v14636_v49  ;;  %1495 = vmatpush1.bf16.msra.mxu1 %v14639_v50  ;;  %v14705_v34 = vld [vmem:[#allocation6 + $0x328] ss:$16 sps:$4 sm:$0xff]   ;;  %v14710_v35 = vld [vmem:[#allocation6 + $0x10c] ss:$16 sps:$4 sm:$0xff]   ;;  %v14717_v49 = vld [vmem:[#allocation9 + $0xc0] ss:$16 sps:$4 sm:$0xff]  }
 0x18f   :  { %1445 = vmatprep.subr.bf16.mxu0 %v14644_v51  ;;  %1496 = vmatprep.subr.bf16.mxu1 %v14647_v52  ;;  %v14713_v36 = vld [vmem:[#allocation6 + $0x30c] ss:$16 sps:$4 sm:$0xff]   ;;  %v14708_v37 = vld [vmem:[#allocation6 + $0x108] ss:$16 sps:$4 sm:$0xff]   ;;  %v14720_v51 = vld [vmem:[#allocation9 + $0xa0] ss:$16 sps:$4 sm:$0xff]  }
 0x190   :  { %v14711_v45 = vld [vmem:[#allocation6 + $0x308] ss:$16 sps:$4 sm:$0xff]  }
 0x191   :  { %v14716_v46 = vld [vmem:[#allocation9 + $0xe4] ss:$16 sps:$4 sm:$0xff]  }
 0x192   :  { %1446 = vmatpush1.bf16.msra.mxu0 %v14642_v53  ;;  %1497 = vmatpush1.bf16.msra.mxu1 %v14645_v54  ;;  %v14719_v48 = vld [vmem:[#allocation9 + $0xc4] ss:$16 sps:$4 sm:$0xff]  }
 0x193   :  { %1447 = vmatprep.subr.bf16.mxu0 %v14650_v55  ;;  %1498 = vmatprep.subr.bf16.mxu1 %v14653_v56  ;;  %v14722_v50 = vld [vmem:[#allocation9 + $0xa4] ss:$16 sps:$4 sm:$0xff]   ;;  %v14768_v55 = vld [vmem:[#allocation9 + $0x2c0] ss:$16 sps:$4 sm:$0xff]  }
 0x194   :  { %v14725_v52 = vld [vmem:[#allocation9 + $0x84] ss:$16 sps:$4 sm:$0xff]  }
 0x195   :  { %v14764_v53 = vld [vmem:[#allocation9 + $0x2e4] ss:$16 sps:$4 sm:$0xff]  }
 0x196   :  { %1448 = vmatpush1.bf16.msra.mxu0 %v14648_v57  ;;  %1499 = vmatpush1.bf16.msra.mxu1 %v14651_v58  ;;  %v14731_v54 = vld [vmem:[#allocation9 + $0x44] ss:$16 sps:$4 sm:$0xff]   ;;  %v14729_v57 = vld [vmem:[#allocation9 + $0x40] ss:$16 sps:$4 sm:$0xff]  }
 0x197   :  { %1449 = vmatprep.subr.bf16.mxu0 %v14656_v59  ;;  %1500 = vmatprep.subr.bf16.mxu1 %v14659_v60  ;;  %v14770_v56 = vld [vmem:[#allocation9 + $0x2c4] ss:$16 sps:$4 sm:$0xff]   ;;  %v14732_v59 = vld [vmem:[#allocation9 + $0x20] ss:$16 sps:$4 sm:$0xff]  }
 0x198   :  { %v14776_v58 = vld [vmem:[#allocation9 + $0x2a4] ss:$16 sps:$4 sm:$0xff]  }
 0x199   :  { %v14737_v60 = vld [vmem:[#allocation9 + $0x4] ss:$16 sps:$4 sm:$0xff]  }
 0x19a   :  { %1450 = vmatpush1.bf16.msra.mxu0 %v14654_v61  ;;  %1501 = vmatpush1.bf16.msra.mxu1 %v14657_v62  ;;  %v14780_v61 = vld [vmem:[#allocation9 + $0x280] ss:$16 sps:$4 sm:$0xff]   ;;  %v14782_v62 = vld [vmem:[#allocation9 + $0x284] ss:$16 sps:$4 sm:$0xff]  }
 0x19b   :  { %1451 = vmatprep.subr.bf16.mxu0 %v14662_v63  ;;  %1502 = vmatprep.subr.bf16.mxu1 %v14665_v0  ;;  %v14735_v63 = vld [vmem:[#allocation9] ss:$16 sps:$4 sm:$0xff]   ;;  %v14740_v0 = vld [vmem:[#allocation9 + $0x1e4] ss:$16 sps:$4 sm:$0xff]  }
 0x19e   :  { %1452 = vmatpush1.bf16.msra.mxu0 %v14660_v1  ;;  %1503 = vmatpush1.bf16.msra.mxu1 %v14663_v2  ;;  %v14786_v1 = vld [vmem:[#allocation9 + $0x260] ss:$16 sps:$4 sm:$0xff]   ;;  %v14788_v2 = vld [vmem:[#allocation9 + $0x264] ss:$16 sps:$4 sm:$0xff]  }
 0x19f   :  { %1453 = vmatprep.subr.bf16.mxu0 %v14668_v3  ;;  %1504 = vmatprep.subr.bf16.mxu1 %v14671_v4  ;;  %v14738_v3 = vld [vmem:[#allocation9 + $0x1e0] ss:$16 sps:$4 sm:$0xff]   ;;  %v14743_v4 = vld [vmem:[#allocation9 + $0x1c4] ss:$16 sps:$4 sm:$0xff]  }
 0x1a2   :  { %1454 = vmatpush2.bf16.msra.mxu0 %v14666_v5  ;;  %1505 = vmatpush2.bf16.msra.mxu1 %v14669_v6  ;;  %v14792_v5 = vld [vmem:[#allocation9 + $0x240] ss:$16 sps:$4 sm:$0xff]   ;;  %v14794_v6 = vld [vmem:[#allocation9 + $0x244] ss:$16 sps:$4 sm:$0xff]  }
 0x1a3   :  { %1455 = vmatprep.subr.bf16.mxu0 %v14674_v7  ;;  %1506 = vmatprep.subr.bf16.mxu1 %v14677_v8  ;;  %v14741_v7 = vld [vmem:[#allocation9 + $0x1c0] ss:$16 sps:$4 sm:$0xff]   ;;  %v14746_v8 = vld [vmem:[#allocation9 + $0x1a4] ss:$16 sps:$4 sm:$0xff]  }
 0x1a6   :  { %1456 = vmatpush2.bf16.msra.mxu0 %v14672_v9  ;;  %1507 = vmatpush2.bf16.msra.mxu1 %v14675_v10  ;;  %v14798_v9 = vld [vmem:[#allocation9 + $0x220] ss:$16 sps:$4 sm:$0xff]   ;;  %v14800_v10 = vld [vmem:[#allocation9 + $0x224] ss:$16 sps:$4 sm:$0xff]  }
 0x1a7   :  { %1457 = vmatprep.subr.bf16.mxu0 %v14680_v11  ;;  %1508 = vmatprep.subr.bf16.mxu1 %v14683_v12  ;;  %v14744_v11 = vld [vmem:[#allocation9 + $0x1a0] ss:$16 sps:$4 sm:$0xff]   ;;  %v14749_v12 = vld [vmem:[#allocation9 + $0x184] ss:$16 sps:$4 sm:$0xff]  }
 0x1aa   :  { %1458 = vmatpush2.bf16.msra.mxu0 %v14678_v13  ;;  %1509 = vmatpush2.bf16.msra.mxu1 %v14681_v14  ;;  %v14804_v13 = vld [vmem:[#allocation9 + $0x200] ss:$16 sps:$4 sm:$0xff]   ;;  %v14806_v14 = vld [vmem:[#allocation9 + $0x204] ss:$16 sps:$4 sm:$0xff]  }
 0x1ab   :  { %1459 = vmatprep.subr.bf16.mxu0 %v14686_v15  ;;  %1510 = vmatprep.subr.bf16.mxu1 %v14689_v16  ;;  %v14747_v15 = vld [vmem:[#allocation9 + $0x180] ss:$16 sps:$4 sm:$0xff]   ;;  %v14752_v16 = vld [vmem:[#allocation9 + $0x164] ss:$16 sps:$4 sm:$0xff]  }
 0x1ae   :  { %1460 = vmatpush2.bf16.msra.mxu0 %v14684_v17  ;;  %1511 = vmatpush2.bf16.msra.mxu1 %v14687_v18  ;;  %v14810_v17 = vld [vmem:[#allocation9 + $0x3e0] ss:$16 sps:$4 sm:$0xff]   ;;  %v14812_v18 = vld [vmem:[#allocation9 + $0x3e4] ss:$16 sps:$4 sm:$0xff]  }
 0x1af   :  { %1461 = vmatprep.subr.bf16.mxu0 %v14692_v19  ;;  %1512 = vmatprep.subr.bf16.mxu1 %v14695_v22  ;;  %v14750_v19 = vld [vmem:[#allocation9 + $0x160] ss:$16 sps:$4 sm:$0xff]   ;;  %v14755_v22 = vld [vmem:[#allocation9 + $0x144] ss:$16 sps:$4 sm:$0xff]  }
 0x1b2   :  { %1462 = vmatpush2.bf16.msra.mxu0 %v14690_v23  ;;  %1513 = vmatpush2.bf16.msra.mxu1 %v14693_v24  ;;  %v14816_v23 = vld [vmem:[#allocation9 + $0x3c0] ss:$16 sps:$4 sm:$0xff]   ;;  %v14818_v24 = vld [vmem:[#allocation9 + $0x3c4] ss:$16 sps:$4 sm:$0xff]  }
 0x1b3   :  { %1463 = vmatprep.subr.bf16.mxu0 %v14698_v25  ;;  %1514 = vmatprep.subr.bf16.mxu1 %v14701_v26  ;;  %v14753_v25 = vld [vmem:[#allocation9 + $0x140] ss:$16 sps:$4 sm:$0xff]   ;;  %v14758_v26 = vld [vmem:[#allocation9 + $0x124] ss:$16 sps:$4 sm:$0xff]  }
 0x1b6   :  { %1464 = vmatpush2.bf16.msra.mxu0 %v14696_v27  ;;  %1515 = vmatpush2.bf16.msra.mxu1 %v14699_v28  ;;  %v14822_v27 = vld [vmem:[#allocation9 + $0x3a0] ss:$16 sps:$4 sm:$0xff]   ;;  %v14824_v28 = vld [vmem:[#allocation9 + $0x3a4] ss:$16 sps:$4 sm:$0xff]  }
 0x1b7   :  { %1465 = vmatprep.subr.bf16.mxu0 %v14704_v29  ;;  %1516 = vmatprep.subr.bf16.mxu1 %v14707_v30  ;;  %v14756_v29 = vld [vmem:[#allocation9 + $0x120] ss:$16 sps:$4 sm:$0xff]   ;;  %v14761_v30 = vld [vmem:[#allocation9 + $0x104] ss:$16 sps:$4 sm:$0xff]  }
 0x1ba   :  { %1466 = vmatpush2.bf16.msra.mxu0 %v14702_v31  ;;  %1517 = vmatpush2.bf16.msra.mxu1 %v14705_v34  ;;  %v14828_v31 = vld [vmem:[#allocation9 + $0x380] ss:$16 sps:$4 sm:$0xff]   ;;  %v14830_v34 = vld [vmem:[#allocation9 + $0x384] ss:$16 sps:$4 sm:$0xff]  }
 0x1bb   :  { %1467 = vmatprep.subr.bf16.mxu0 %v14710_v35  ;;  %1518 = vmatprep.subr.bf16.mxu1 %v14713_v36  ;;  %v14759_v35 = vld [vmem:[#allocation9 + $0x100] ss:$16 sps:$4 sm:$0xff]   ;;  %v14767_v36 = vld [vmem:[#allocation9 + $0xec] ss:$16 sps:$4 sm:$0xff]  }
 0x1be   :  { %1468 = vmatpush2.bf16.msra.mxu0 %v14708_v37  ;;  %1519 = vmatpush2.bf16.msra.mxu1 %v14711_v45  ;;  %v14834_v37 = vld [vmem:[#allocation9 + $0x360] ss:$16 sps:$4 sm:$0xff]   ;;  %v14836_v45 = vld [vmem:[#allocation9 + $0x364] ss:$16 sps:$4 sm:$0xff]  }
 0x1bf   :  { %2349 = vmatprep.subr.bf16.mxu0 %v14716_v46  ;;  %2400 = vmatprep.subr.bf16.mxu1 %v14764_v53  ;;  %v14842_v46 = vld [vmem:[#allocation9 + $0x344] ss:$16 sps:$4 sm:$0xff]  }
 0x1c1   :  { %1470 = vmatmul.mubr.bf16.vlgmr.msra.gmra.mxu0 %v15379_v20  ;;  %1521 = vmatmul.mubr.bf16.vlgmr.msra.gmra.mxu1 %v15381_v21  ;;  %v14723_v20 = vld [vmem:[#allocation9 + $0x80] ss:$16 sps:$4 sm:$0xff]   ;;  %v14728_v21 = vld [vmem:[#allocation9 + $0x64] ss:$16 sps:$4 sm:$0xff]  }
 0x1c2   :  { %1479 = vmatprep.mubr.bf16.mxu0 %v15385_v32  ;;  %1530 = vmatprep.mubr.bf16.mxu1 %v15387_v33  ;;  %v14726_v32 = vld [vmem:[#allocation9 + $0x60] ss:$16 sps:$4 sm:$0xff]  }
 0x1c3   :  { %2350 = vmatpush1.bf16.msra.mxu0 %v14714_v47  ;;  %v14762_v33 = vld [vmem:[#allocation9 + $0x2e0] ss:$16 sps:$4 sm:$0xff]  }
 0x1c4   :  { %2351 = vmatprep.subr.bf16.mxu0 %v14719_v48  ;;  %2401 = vmatpush1.bf16.msra.mxu1 %v14762_v33  ;;  %v14840_v47 = vld [vmem:[#allocation9 + $0x340] ss:$16 sps:$4 sm:$0xff]   ;;  %v14848_v48 = vld [vmem:[#allocation9 + $0x324] ss:$16 sps:$4 sm:$0xff]  }
 0x1c5   :  { %2402 = vmatprep.subr.bf16.mxu1 %v14770_v56 }
 0x1c7   :  { %2352 = vmatpush1.bf16.msra.mxu0 %v14717_v49  ;;  %v14846_v49 = vld [vmem:[#allocation9 + $0x320] ss:$16 sps:$4 sm:$0xff]  }
 0x1c8   :  { %2353 = vmatprep.subr.bf16.mxu0 %v14722_v50  ;;  %2403 = vmatpush1.bf16.msra.mxu1 %v14768_v55  ;;  %v14854_v50 = vld [vmem:[#allocation9 + $0x304] ss:$16 sps:$4 sm:$0xff]  }
 0x1c9   :  { %1480 = vmatmul.mubr.bf16.gmra.mxu0 %v15391_v43  ;;  %1531 = vmatmul.mubr.bf16.gmra.mxu1 %v15393_v44  ;;  %v14734_v43 = vld [vmem:[#allocation9 + $0x24] ss:$16 sps:$4 sm:$0xff]   ;;  %v14774_v44 = vld [vmem:[#allocation9 + $0x2a0] ss:$16 sps:$4 sm:$0xff]  }
 0x1ca   :  { %2404 = vmatprep.subr.bf16.mxu1 %v14776_v58 }
 0x1cb   :  { %2354 = vmatpush1.bf16.msra.mxu0 %v14720_v51  ;;  %v14852_v51 = vld [vmem:[#allocation9 + $0x300] ss:$16 sps:$4 sm:$0xff]  }
 0x1cc   :  { %2355 = vmatprep.subr.bf16.mxu0 %v14725_v52  ;;  %2405 = vmatpush1.bf16.msra.mxu1 %v14774_v44  ;;  %v14860_v52 = vld [vmem:[#allocation9 + $0x2ec] ss:$16 sps:$4 sm:$0xff]  }
 0x1cd   :  { %2406 = vmatprep.subr.bf16.mxu1 %v14782_v62 }
 0x1cf   :  { %2356 = vmatpush1.bf16.msra.mxu0 %v14723_v20  ;;  %v15403_v20 = vld [vmem:[#allocation7] sm:$0xf] }
 0x1d0   :  { %2357 = vmatprep.subr.bf16.mxu0 %v14728_v21  ;;  %2407 = vmatpush1.bf16.msra.mxu1 %v14780_v61  ;;  %v682_v21 = vrot.slane %v15403_v20, %v15364_v39  ;;  %v678_v53 = vrot.slane %v15403_v20, %v15370_v41 }
 0x1d1   :  { %2408 = vmatprep.subr.bf16.mxu1 %v14788_v2 }
 0x1d3   :  { %2358 = vmatpush1.bf16.msra.mxu0 %v14726_v32 }
 0x1d4   :  { %2359 = vmatprep.subr.bf16.mxu0 %v14731_v54  ;;  %2409 = vmatpush1.bf16.msra.mxu1 %v14786_v1 }
 0x1d5   :  { %2410 = vmatprep.subr.bf16.mxu1 %v14794_v6 }
 0x1d7   :  { %2360 = vmatpush1.bf16.msra.mxu0 %v14729_v57 }
 0x1d8   :  { %2361 = vmatprep.subr.bf16.mxu0 %v14734_v43  ;;  %2411 = vmatpush1.bf16.msra.mxu1 %v14792_v5 }
 0x1d9   :  { %2412 = vmatprep.subr.bf16.mxu1 %v14800_v10 }
 0x1db   :  { %2362 = vmatpush1.bf16.msra.mxu0 %v14732_v59 }
 0x1dc   :  { %2363 = vmatprep.subr.bf16.mxu0 %v14737_v60  ;;  %2413 = vmatpush1.bf16.msra.mxu1 %v14798_v9 }
 0x1dd   :  { %2414 = vmatprep.subr.bf16.mxu1 %v14806_v14 }
 0x1df   :  { %2364 = vmatpush1.bf16.msra.mxu0 %v14735_v63 }
 0x1e0   :  { %2365 = vmatprep.subr.bf16.mxu0 %v14740_v0  ;;  %2415 = vmatpush1.bf16.msra.mxu1 %v14804_v13 }
 0x1e1   :  { %2416 = vmatprep.subr.bf16.mxu1 %v14812_v18 }
 0x1e3   :  { %2366 = vmatpush2.bf16.msra.mxu0 %v14738_v3 }
 0x1e4   :  { %2367 = vmatprep.subr.bf16.mxu0 %v14743_v4  ;;  %2417 = vmatpush2.bf16.msra.mxu1 %v14810_v17 }
 0x1e5   :  { %2418 = vmatprep.subr.bf16.mxu1 %v14818_v24 }
 0x1e7   :  { %2368 = vmatpush2.bf16.msra.mxu0 %v14741_v7 }
 0x1e8   :  { %2369 = vmatprep.subr.bf16.mxu0 %v14746_v8  ;;  %2419 = vmatpush2.bf16.msra.mxu1 %v14816_v23 }
 0x1e9   :  { %2420 = vmatprep.subr.bf16.mxu1 %v14824_v28  ;;  %v14779_v28 = vld [vmem:[#allocation9 + $0xac] ss:$16 sps:$4 sm:$0xff]  }
 0x1eb   :  { %2370 = vmatpush2.bf16.msra.mxu0 %v14744_v11 }
 0x1ec   :  { %2371 = vmatprep.subr.bf16.mxu0 %v14749_v12  ;;  %2421 = vmatpush2.bf16.msra.mxu1 %v14822_v27  ;;  %v14771_v27 = vld [vmem:[#allocation9 + $0xc8] ss:$16 sps:$4 sm:$0xff]  }
 0x1ed   :  { %2422 = vmatprep.subr.bf16.mxu1 %v14830_v34  ;;  %v14783_v34 = vld [vmem:[#allocation9 + $0x88] ss:$16 sps:$4 sm:$0xff]  }
 0x1ef   :  { %2372 = vmatpush2.bf16.msra.mxu0 %v14747_v15 }
 0x1f0   :  { %2373 = vmatprep.subr.bf16.mxu0 %v14752_v16  ;;  %2423 = vmatpush2.bf16.msra.mxu1 %v14828_v31  ;;  %v14765_v16 = vld [vmem:[#allocation9 + $0xe8] ss:$16 sps:$4 sm:$0xff]   ;;  %v14785_v31 = vld [vmem:[#allocation9 + $0x8c] ss:$16 sps:$4 sm:$0xff]  }
 0x1f1   :  { %2424 = vmatprep.subr.bf16.mxu1 %v14836_v45  ;;  %v14795_v45 = vld [vmem:[#allocation9 + $0x48] ss:$16 sps:$4 sm:$0xff]  }
 0x1f3   :  { %2374 = vmatpush2.bf16.msra.mxu0 %v14750_v19  ;;  %v14773_v19 = vld [vmem:[#allocation9 + $0xcc] ss:$16 sps:$4 sm:$0xff]  }
 0x1f4   :  { %2375 = vmatprep.subr.bf16.mxu0 %v14755_v22  ;;  %2425 = vmatpush2.bf16.msra.mxu1 %v14834_v37  ;;  %v14797_v37 = vld [vmem:[#allocation9 + $0x4c] ss:$16 sps:$4 sm:$0xff]  }
 0x1f5   :  { %2426 = vmatprep.subr.bf16.mxu1 %v14842_v46  ;;  %v14803_v46 = vld [vmem:[#allocation9 + $0x2c] ss:$16 sps:$4 sm:$0xff]  }
 0x1f7   :  { %2376 = vmatpush2.bf16.msra.mxu0 %v14753_v25 }
 0x1f8   :  { %2377 = vmatprep.subr.bf16.mxu0 %v14758_v26  ;;  %2427 = vmatpush2.bf16.msra.mxu1 %v14840_v47  ;;  %v14801_v47 = vld [vmem:[#allocation9 + $0x28] ss:$16 sps:$4 sm:$0xff]  }
 0x1f9   :  { %2428 = vmatprep.subr.bf16.mxu1 %v14848_v48  ;;  %v14809_v48 = vld [vmem:[#allocation9 + $0xc] ss:$16 sps:$4 sm:$0xff]  }
 0x1fb   :  { %2378 = vmatpush2.bf16.msra.mxu0 %v14756_v29 }
 0x1fc   :  { %2379 = vmatprep.subr.bf16.mxu0 %v14761_v30  ;;  %2429 = vmatpush2.bf16.msra.mxu1 %v14846_v49  ;;  %v14777_v30 = vld [vmem:[#allocation9 + $0xa8] ss:$16 sps:$4 sm:$0xff]  }
 0x1fd   :  { %2430 = vmatprep.subr.bf16.mxu1 %v14854_v50  ;;  %v14807_v49 = vld [vmem:[#allocation9 + $0x8] ss:$16 sps:$4 sm:$0xff]   ;;  %v14815_v50 = vld [vmem:[#allocation9 + $0x1ec] ss:$16 sps:$4 sm:$0xff]  }
 0x1ff   :  { %2380 = vmatpush2.bf16.msra.mxu0 %v14759_v35  ;;  %v14791_v35 = vld [vmem:[#allocation9 + $0x6c] ss:$16 sps:$4 sm:$0xff]  }
 0x200   :  { %2451 = vmatprep.subr.bf16.mxu0 %v14767_v36  ;;  %2431 = vmatpush2.bf16.msra.mxu1 %v14852_v51  ;;  %v14789_v36 = vld [vmem:[#allocation9 + $0x68] ss:$16 sps:$4 sm:$0xff]  }
 0x201   :  { %2502 = vmatprep.subr.bf16.mxu1 %v14860_v52  ;;  %v14813_v51 = vld [vmem:[#allocation9 + $0x1e8] ss:$16 sps:$4 sm:$0xff]   ;;  %v14821_v52 = vld [vmem:[#allocation9 + $0x1cc] ss:$16 sps:$4 sm:$0xff]  }
 0x241   :  { %v1369_v32 = vpop.f32.mrf.mxu0  ;;  %v1420_v33 = vpop.f32.mrf.mxu1 }
 0x242   :  { %v1370_v57 = vadd.f32 %v1369_v32, %v678_v53  ;;  %v14825_v32 = vld [vmem:[#allocation9 + $0x1a8] ss:$16 sps:$4 sm:$0xff]  }
 0x243   :  { %v1371_v54 = vpop.f32.mrf.mxu0  ;;  %v1422_v55 = vpop.f32.mrf.mxu1 }
 0x244   :  { %v1372_v56 = vadd.f32 %v1371_v54, %v682_v21  ;;  %v1421_v0 = vadd.f32 %v1420_v33, %v1370_v57  ;;  %v14833_v33 = vld [vmem:[#allocation9 + $0x18c] ss:$16 sps:$4 sm:$0xff]   ;;  %v14831_v54 = vld [vmem:[#allocation9 + $0x188] ss:$16 sps:$4 sm:$0xff]  }
 0x245   :  { %v1373_v43 = vpop.f32.mrf.mxu0  ;;  %v1424_v44 = vpop.f32.mrf.mxu1  ;;  %v14845_v57 = vld [vmem:[#allocation9 + $0x14c] ss:$16 sps:$4 sm:$0xff]  }
 0x246   :  { %v1374_v58 = vadd.f32 %v1373_v43, %v678_v53  ;;  %v1423_v61 = vadd.f32 %v1422_v55, %v1372_v56  ;;  %v1539_v11 = vmax.f32 %v1421_v0, 0.0  ;;  %v14839_v55 = vld [vmem:[#allocation9 + $0x16c] ss:$16 sps:$4 sm:$0xff]   ;;  %v14837_v56 = vld [vmem:[#allocation9 + $0x168] ss:$16 sps:$4 sm:$0xff]   ;;  %v690_v43 = vrot.slane %v15403_v20, %v15367_v40 }
 0x247   :  { %v1375_v59 = vpop.f32.mrf.mxu0  ;;  %v1426_v60 = vpop.f32.mrf.mxu1 }
 0x248   :  { %v1425_v62 = vadd.f32 %v1424_v44, %v1374_v58  ;;  %v1376_v63 = vadd.f32 %v1375_v59, %v682_v21  ;;  %v1540_v8 = vmax.f32 %v1423_v61, 0.0  ;;  %v686_v44 = vrot.slane %v15403_v20, %v15373_v42 }
 0x249   :  { %v1379_v1 = vpop.f32.mrf.mxu0  ;;  %v1430_v2 = vpop.f32.mrf.mxu1 }
 0x24a   :  { %v1427_v3 = vadd.f32 %v1426_v60, %v1376_v63  ;;  %v1380_v4 = vadd.f32 %v1379_v1, %v678_v53  ;;  %v1543_v5 = vmax.f32 %v1425_v62, 0.0  ;;  %v14827_v53 = vld [vmem:[#allocation9 + $0x1ac] ss:$16 sps:$4 sm:$0xff]   ;;  %v14843_v60 = vld [vmem:[#allocation9 + $0x148] ss:$16 sps:$4 sm:$0xff]  }
 0x24b   :  { %v1381_v6 = vpop.f32.mrf.mxu0  ;;  %v1432_v7 = vpop.f32.mrf.mxu1  ;;  %v14851_v63 = vld [vmem:[#allocation9 + $0x12c] ss:$16 sps:$4 sm:$0xff]  }
 0x24c   :  { %v1544_v9 = vmax.f32 %v1427_v3, 0.0  ;;  %v1382_v10 = vadd.f32 %v1381_v6, %v682_v21  ;;  %v1431_v12 = vadd.f32 %v1430_v2, %v1380_v4  ;;  %v15409_v18 = vpack.c.bf16 %v1543_v5, %v1539_v11  ;;  %v14819_v21 = vld [vmem:[#allocation9 + $0x1c8] ss:$16 sps:$4 sm:$0xff]  }
 0x24d   :  { %v1383_v13 = vpop.f32.mrf.mxu0  ;;  %v1434_v14 = vpop.f32.mrf.mxu1  ;;  %v14849_v5 = vld [vmem:[#allocation9 + $0x128] ss:$16 sps:$4 sm:$0xff]  }
 0x24e   :  { %v1552_v15 = vpack.c.bf16 %v1544_v9, %v1540_v8  ;;  %v1433_v17 = vadd.f32 %v1432_v7, %v1382_v10  ;;  %v1547_v25 = vmax.f32 %v1431_v12, 0.0  ;;  %v14857_v8 = vld [vmem:[#allocation9 + $0x10c] ss:$16 sps:$4 sm:$0xff]  }
 0x24f   :  { %v1384_v22 = vpop.f32.mrf.mxu0  ;;  %v1435_v23 = vpop.f32.mrf.mxu1 }
 0x250   :  { %2381 = vmatprep.mubr.bf16.mxu0 %v1552_v15  ;;  %v1548_v24 = vmax.f32 %v1433_v17, 0.0  ;;  %v15415_v29 = vpack.c.bf16 %v1547_v25, %v1547_v25 }
 0x251   :  { %2382 = vmatmul.mubr.bf16.vlgmr.msra.gmra.mxu0 %v15409_v18 }
 0x252   :  { %v15412_v26 = vpack.c.bf16 %v1548_v24, %v1548_v24  ;;  %2452 = vmatpush1.bf16.msra.mxu0 %v14765_v16 }
 0x253   :  { %2453 = vmatprep.subr.bf16.mxu0 %v14773_v19 }
 0x254   :  { %2391 = vmatprep.mubr.bf16.mxu0 %v15412_v26 }
 0x256   :  { %2454 = vmatpush1.bf16.msra.mxu0 %v14771_v27 }
 0x257   :  { %2455 = vmatprep.subr.bf16.mxu0 %v14779_v28 }
 0x259   :  { %2392 = vmatmul.mubr.bf16.gmra.mxu0 %v15415_v29 }
 0x25a   :  { %2456 = vmatpush1.bf16.msra.mxu0 %v14777_v30  ;;  %2483 = vmatprep.mubr.bf16.mxu0 %v1552_v15  ;;  %v14855_v15 = vld [vmem:[#allocation9 + $0x108] ss:$16 sps:$4 sm:$0xff]  }
 0x25b   :  { %2457 = vmatprep.subr.bf16.mxu0 %v14785_v31 }
 0x25e   :  { %2458 = vmatpush1.bf16.msra.mxu0 %v14783_v34 }
 0x25f   :  { %2459 = vmatprep.subr.bf16.mxu0 %v14791_v35  ;;  %v14858_v35 = vld [vmem:[#allocation9 + $0x2e8] ss:$16 sps:$4 sm:$0xff]  }
 0x262   :  { %2460 = vmatpush1.bf16.msra.mxu0 %v14789_v36 }
 0x263   :  { %2461 = vmatprep.subr.bf16.mxu0 %v14797_v37 }
 0x266   :  { %2462 = vmatpush1.bf16.msra.mxu0 %v14795_v45 }
 0x267   :  { %2463 = vmatprep.subr.bf16.mxu0 %v14803_v46 }
 0x26a   :  { %2464 = vmatpush1.bf16.msra.mxu0 %v14801_v47  ;;  %v14863_v47 = vld [vmem:[#allocation9 + $0x2cc] ss:$16 sps:$4 sm:$0xff]  }
 0x26b   :  { %2465 = vmatprep.subr.bf16.mxu0 %v14809_v48 }
 0x26e   :  { %2466 = vmatpush1.bf16.msra.mxu0 %v14807_v49 }
 0x26f   :  { %2467 = vmatprep.subr.bf16.mxu0 %v14815_v50  ;;  %v14861_v50 = vld [vmem:[#allocation9 + $0x2c8] ss:$16 sps:$4 sm:$0xff]  }
 0x272   :  { %2468 = vmatpush2.bf16.msra.mxu0 %v14813_v51 }
 0x273   :  { %2469 = vmatprep.subr.bf16.mxu0 %v14821_v52  ;;  %v14866_v52 = vld [vmem:[#allocation9 + $0x2ac] ss:$16 sps:$4 sm:$0xff]  }
 0x276   :  { %2470 = vmatpush2.bf16.msra.mxu0 %v14819_v21  ;;  %v14864_v21 = vld [vmem:[#allocation9 + $0x2a8] ss:$16 sps:$4 sm:$0xff]  }
 0x277   :  { %2471 = vmatprep.subr.bf16.mxu0 %v14827_v53 }
 0x27a   :  { %2472 = vmatpush2.bf16.msra.mxu0 %v14825_v32  ;;  %v14869_v32 = vld [vmem:[#allocation9 + $0x28c] ss:$16 sps:$4 sm:$0xff]  }
 0x27b   :  { %2473 = vmatprep.subr.bf16.mxu0 %v14833_v33  ;;  %v2629_v33 = vld [vmem:[#allocation12 + $0x1c0] sm:$0xff] }
 0x27e   :  { %2474 = vmatpush2.bf16.msra.mxu0 %v14831_v54  ;;  %v2633_v54 = vld [vmem:[#allocation12 + $0x1e0] sm:$0xff] }
 0x27f   :  { %2475 = vmatprep.subr.bf16.mxu0 %v14839_v55  ;;  %v13077_v55 = vcombine.high %v2629_v33, %v2633_v54 }
 0x281   :  { %v1471_v58 = vpop.f32.mrf.mxu0  ;;  %v1522_v59 = vpop.f32.mrf.mxu1 }
 0x282   :  { %2476 = vmatpush2.bf16.msra.mxu0 %v14837_v56  ;;  %v1472_v1 = vadd.f32 %v1471_v58, %v686_v44  ;;  %v2625_v56 = vld [vmem:[#allocation12 + $0x1a0] sm:$0xff] }
 0x283   :  { %v1473_v61 = vpop.f32.mrf.mxu0  ;;  %v1524_v62 = vpop.f32.mrf.mxu1  ;;  %2477 = vmatprep.subr.bf16.mxu0 %v14845_v57  ;;  %v14867_v57 = vld [vmem:[#allocation9 + $0x288] ss:$16 sps:$4 sm:$0xff]  }
 0x284   :  { %v1474_v0 = vadd.f32 %v1473_v61, %v690_v43  ;;  %v1523_v11 = vadd.f32 %v1522_v59, %v1472_v1  ;;  %v2617_v58 = vld [vmem:[#allocation12 + $0x160] sm:$0xff]  ;;  %v14872_v59 = vld [vmem:[#allocation9 + $0x26c] ss:$16 sps:$4 sm:$0xff]  }
 0x285   :  { %v1475_v2 = vpop.f32.mrf.mxu0  ;;  %v1526_v3 = vpop.f32.mrf.mxu1 }
 0x286   :  { %v1476_v4 = vadd.f32 %v1475_v2, %v686_v44  ;;  %2478 = vmatpush2.bf16.msra.mxu0 %v14843_v60  ;;  %v1525_v20 = vadd.f32 %v1524_v62, %v1474_v0  ;;  %v1541_v27 = vmax.f32 %v1523_v11, 0.0  ;;  %v14870_v62 = vld [vmem:[#allocation9 + $0x268] ss:$16 sps:$4 sm:$0xff]   ;;  %v14875_v0 = vld [vmem:[#allocation9 + $0x24c] ss:$16 sps:$4 sm:$0xff]  }
 0x287   :  { %v1477_v6 = vpop.f32.mrf.mxu0  ;;  %v1528_v7 = vpop.f32.mrf.mxu1  ;;  %2479 = vmatprep.subr.bf16.mxu0 %v14851_v63  ;;  %v2605_v63 = vld [vmem:[#allocation12 + $0x100] sm:$0xff]  ;;  %v14881_v11 = vld [vmem:[#allocation9 + $0x20c] ss:$16 sps:$4 sm:$0xff]  }
 0x288   :  { %v1527_v9 = vadd.f32 %v1526_v3, %v1476_v4  ;;  %v1478_v10 = vadd.f32 %v1477_v6, %v690_v43  ;;  %v1542_v23 = vmax.f32 %v1525_v20, 0.0  ;;  %v14873_v3 = vld [vmem:[#allocation9 + $0x248] ss:$16 sps:$4 sm:$0xff]   ;;  %v14878_v6 = vld [vmem:[#allocation9 + $0x22c] ss:$16 sps:$4 sm:$0xff]  }
 0x289   :  { %v1481_v12 = vpop.f32.mrf.mxu0  ;;  %v1532_v13 = vpop.f32.mrf.mxu1  ;;  %v2597_v4 = vld [vmem:[#allocation12 + $0xc0] sm:$0xff] }
 0x28a   :  { %v1529_v14 = vadd.f32 %v1528_v7, %v1478_v10  ;;  %2480 = vmatpush2.bf16.msra.mxu0 %v14849_v5  ;;  %v1545_v16 = vmax.f32 %v1527_v9, 0.0  ;;  %v1482_v17 = vadd.f32 %v1481_v12, %v686_v44  ;;  %v2613_v44 = vld [vmem:[#allocation12 + $0x140] sm:$0xff] }
 0x28b   :  { %v1483_v19 = vpop.f32.mrf.mxu0  ;;  %v1534_v22 = vpop.f32.mrf.mxu1  ;;  %2481 = vmatprep.subr.bf16.mxu0 %v14857_v8  ;;  %v13061_v61 = vcombine.high %v2613_v44, %v2617_v58  ;;  %v13060_v1 = vcombine.low %v2613_v44, %v2617_v58  ;;  %v2601_v5 = vld [vmem:[#allocation12 + $0xe0] sm:$0xff]  ;;  %v14899_v44 = vld [vmem:[#allocation9 + $0x34c] ss:$16 sps:$4 sm:$0xff]  }
 0x28c   :  { %v1546_v24 = vmax.f32 %v1529_v14, 0.0  ;;  %v1484_v25 = vadd.f32 %v1483_v19, %v690_v43  ;;  %v15422_v36 = vpack.c.bf16 %v1545_v16, %v1541_v27  ;;  %v1533_v37 = vadd.f32 %v1532_v13, %v1482_v17  ;;  %v14876_v20 = vld [vmem:[#allocation9 + $0x228] ss:$16 sps:$4 sm:$0xff]   ;;  %v14884_v17 = vld [vmem:[#allocation9 + $0x3ec] ss:$16 sps:$4 sm:$0xff]  }
 0x28d   :  { %v1485_v28 = vpop.f32.mrf.mxu0  ;;  %v1536_v30 = vpop.f32.mrf.mxu1  ;;  %v13045_v8 = vcombine.high %v2597_v4, %v2601_v5  ;;  %v2589_v9 = vld [vmem:[#allocation12 + $0x80] sm:$0xff]  ;;  %v13044_v12 = vcombine.low %v2597_v4, %v2601_v5  ;;  %v14887_v27 = vld [vmem:[#allocation9 + $0x3cc] ss:$16 sps:$4 sm:$0xff]  }
 0x28e   :  { %v1554_v31 = vpack.c.bf16 %v1546_v24, %v1542_v23  ;;  %v1535_v34 = vadd.f32 %v1534_v22, %v1484_v25  ;;  %2482 = vmatpush2.bf16.msra.mxu0 %v14855_v15  ;;  %v1549_v51 = vmax.f32 %v1533_v37, 0.0  ;;  %v2593_v10 = vld [vmem:[#allocation12 + $0xa0] sm:$0xff]  ;;  %v14890_v37 = vld [vmem:[#allocation9 + $0x3ac] ss:$16 sps:$4 sm:$0xff]  }
 0x28f   :  { %v1486_v45 = vpop.f32.mrf.mxu0  ;;  %v1537_v46 = vpop.f32.mrf.mxu1  ;;  %4151 = vmatprep.subr.bf16.mxu0 %v13077_v55  ;;  %v13037_v13 = vcombine.high %v2589_v9, %v2593_v10  ;;  %v14879_v14 = vld [vmem:[#allocation9 + $0x208] ss:$16 sps:$4 sm:$0xff]   ;;  %v13036_v19 = vcombine.low %v2589_v9, %v2593_v10 }
 0x290   :  { %v1550_v48 = vmax.f32 %v1535_v34, 0.0  ;;  %2432 = vmatprep.mubr.bf16.mxu1 %v1554_v31  ;;  %v15430_v53 = vpack.c.bf16 %v1549_v51, %v1549_v51  ;;  %v2581_v15 = vld [vmem:[#allocation12 + $0x40] sm:$0xff]  ;;  %v14893_v51 = vld [vmem:[#allocation9 + $0x38c] ss:$16 sps:$4 sm:$0xff]  }
 0x291   :  { %2433 = vmatmul.mubr.bf16.vlgmr.msra.gmra.mxu1 %v15422_v36  ;;  %2484 = vmatmul.mubr.bf16.vlgmr.msra.gmra.mxu0 %v15409_v18  ;;  %v2621_v18 = vld [vmem:[#allocation12 + $0x180] sm:$0xff] }
 0x292   :  { %v15426_v49 = vpack.c.bf16 %v1550_v48, %v1550_v48  ;;  %2503 = vmatpush1.bf16.msra.mxu1 %v14858_v35  ;;  %2493 = vmatprep.mubr.bf16.mxu0 %v15412_v26  ;;  %v13076_v26 = vcombine.low %v2629_v33, %v2633_v54  ;;  %v13069_v43 = vcombine.high %v2621_v18, %v2625_v56  ;;  %v2585_v16 = vld [vmem:[#allocation12 + $0x60] sm:$0xff] }
 0x293   :  { %2504 = vmatprep.subr.bf16.mxu1 %v14863_v47  ;;  %v13068_v60 = vcombine.low %v2621_v18, %v2625_v56  ;;  %v13029_v22 = vcombine.high %v2581_v15, %v2585_v16  ;;  %v14882_v23 = vld [vmem:[#allocation9 + $0x3e8] ss:$16 sps:$4 sm:$0xff]   ;;  %v13028_v28 = vcombine.low %v2581_v15, %v2585_v16  ;;  %v14896_v18 = vld [vmem:[#allocation9 + $0x36c] ss:$16 sps:$4 sm:$0xff]  }
 0x294   :  { %2442 = vmatprep.mubr.bf16.mxu1 %v15426_v49  ;;  %4152 = vmatpush1.bf16.msra.mxu0 %v13076_v26  ;;  %v2573_v24 = vld [vmem:[#allocation12] sm:$0xff] }
 0x295   :  { %4153 = vmatprep.subr.bf16.mxu0 %v13069_v43  ;;  %v2577_v25 = vld [vmem:[#allocation12 + $0x20] sm:$0xff] }
 0x296   :  { %2505 = vmatpush1.bf16.msra.mxu1 %v14861_v50  ;;  %v13021_v30 = vcombine.high %v2573_v24, %v2577_v25  ;;  %v2693_v34 = vld [vmem:[#allocation12 + $0x3c0] sm:$0xff]  ;;  %v13020_v45 = vcombine.low %v2573_v24, %v2577_v25 }
 0x297   :  { %2506 = vmatprep.subr.bf16.mxu1 %v14866_v52  ;;  %v2697_v35 = vld [vmem:[#allocation12 + $0x3e0] sm:$0xff] }
 0x298   :  { %4154 = vmatpush1.bf16.msra.mxu0 %v13068_v60  ;;  %v13141_v46 = vcombine.high %v2693_v34, %v2697_v35  ;;  %v14888_v47 = vld [vmem:[#allocation9 + $0x3a8] ss:$16 sps:$4 sm:$0xff]   ;;  %v13140_v52 = vcombine.low %v2693_v34, %v2697_v35 }
 0x299   :  { %2443 = vmatmul.mubr.bf16.gmra.mxu1 %v15430_v53  ;;  %2494 = vmatmul.mubr.bf16.gmra.mxu0 %v15415_v29  ;;  %v2609_v29 = vld [vmem:[#allocation12 + $0x120] sm:$0xff] }
 0x29a   :  { %2507 = vmatpush1.bf16.msra.mxu1 %v14864_v21  ;;  %2534 = vmatprep.mubr.bf16.mxu1 %v1554_v31  ;;  %v13053_v2 = vcombine.high %v2605_v63, %v2609_v29  ;;  %v13052_v7 = vcombine.low %v2605_v63, %v2609_v29  ;;  %v14885_v31 = vld [vmem:[#allocation9 + $0x3c8] ss:$16 sps:$4 sm:$0xff]   ;;  %v14902_v63 = vld [vmem:[#allocation9 + $0x32c] ss:$16 sps:$4 sm:$0xff]  }
 0x29b   :  { %2508 = vmatprep.subr.bf16.mxu1 %v14869_v32  ;;  %4155 = vmatprep.subr.bf16.mxu0 %v13061_v61  ;;  %v2685_v48 = vld [vmem:[#allocation12 + $0x380] sm:$0xff] }
 0x29c   :  { %4156 = vmatpush1.bf16.msra.mxu0 %v13060_v1  ;;  %v2689_v50 = vld [vmem:[#allocation12 + $0x3a0] sm:$0xff] }
 0x29d   :  { %4157 = vmatprep.subr.bf16.mxu0 %v13053_v2  ;;  %v13133_v21 = vcombine.high %v2685_v48, %v2689_v50  ;;  %v14891_v32 = vld [vmem:[#allocation9 + $0x388] ss:$16 sps:$4 sm:$0xff]   ;;  %v13132_v26 = vcombine.low %v2685_v48, %v2689_v50  ;;  %v14905_v2 = vld [vmem:[#allocation9 + $0x30c] ss:$16 sps:$4 sm:$0xff]  }
 0x29e   :  { %2509 = vmatpush1.bf16.msra.mxu1 %v14867_v57  ;;  %v2677_v33 = vld [vmem:[#allocation12 + $0x340] sm:$0xff] }
 0x29f   :  { %2510 = vmatprep.subr.bf16.mxu1 %v14872_v59  ;;  %v2681_v54 = vld [vmem:[#allocation12 + $0x360] sm:$0xff] }
 0x2a0   :  { %4158 = vmatpush1.bf16.msra.mxu0 %v13052_v7  ;;  %v13125_v55 = vcombine.high %v2677_v33, %v2681_v54  ;;  %v14894_v56 = vld [vmem:[#allocation9 + $0x368] ss:$16 sps:$4 sm:$0xff]   ;;  %v13124_v58 = vcombine.low %v2677_v33, %v2681_v54 }
 0x2a1   :  { %4159 = vmatprep.subr.bf16.mxu0 %v13045_v8  ;;  %v2669_v57 = vld [vmem:[#allocation12 + $0x300] sm:$0xff] }
 0x2a2   :  { %2511 = vmatpush1.bf16.msra.mxu1 %v14870_v62  ;;  %v2673_v43 = vld [vmem:[#allocation12 + $0x320] sm:$0xff] }
 0x2a3   :  { %2512 = vmatprep.subr.bf16.mxu1 %v14875_v0  ;;  %v13117_v59 = vcombine.high %v2669_v57, %v2673_v43  ;;  %v14897_v60 = vld [vmem:[#allocation9 + $0x348] ss:$16 sps:$4 sm:$0xff]   ;;  %v13116_v29 = vcombine.low %v2669_v57, %v2673_v43 }
 0x2a4   :  { %4160 = vmatpush1.bf16.msra.mxu0 %v13044_v12  ;;  %v2661_v61 = vld [vmem:[#allocation12 + $0x2c0] sm:$0xff] }
 0x2a5   :  { %4161 = vmatprep.subr.bf16.mxu0 %v13037_v13  ;;  %v2665_v62 = vld [vmem:[#allocation12 + $0x2e0] sm:$0xff] }
 0x2a6   :  { %2513 = vmatpush1.bf16.msra.mxu1 %v14873_v3  ;;  %v13109_v0 = vcombine.high %v2661_v61, %v2665_v62  ;;  %v14900_v1 = vld [vmem:[#allocation9 + $0x328] ss:$16 sps:$4 sm:$0xff]   ;;  %v13108_v3 = vcombine.low %v2661_v61, %v2665_v62 }
 0x2a7   :  { %2514 = vmatprep.subr.bf16.mxu1 %v14878_v6  ;;  %v14903_v4 = vld [vmem:[#allocation9 + $0x308] ss:$16 sps:$4 sm:$0xff]  }
 0x2a8   :  { %4162 = vmatpush1.bf16.msra.mxu0 %v13036_v19  ;;  %v2653_v5 = vld [vmem:[#allocation12 + $0x280] sm:$0xff]  ;;  %v15439_v19 = vld [vmem:[#allocation12 + $0x1e8] sm:$0xff] }
 0x2a9   :  { %4163 = vmatprep.subr.bf16.mxu0 %v13029_v22  ;;  %v2657_v6 = vld [vmem:[#allocation12 + $0x2a0] sm:$0xff] }
 0x2aa   :  { %2515 = vmatpush1.bf16.msra.mxu1 %v14876_v20  ;;  %v13101_v7 = vcombine.high %v2653_v5, %v2657_v6  ;;  %v13100_v8 = vcombine.low %v2653_v5, %v2657_v6  ;;  %v2645_v20 = vld [vmem:[#allocation12 + $0x240] sm:$0xff] }
 0x2ab   :  { %2516 = vmatprep.subr.bf16.mxu1 %v14881_v11  ;;  %v2649_v9 = vld [vmem:[#allocation12 + $0x260] sm:$0xff] }
 0x2ac   :  { %4164 = vmatpush1.bf16.msra.mxu0 %v13028_v28  ;;  %v13093_v10 = vcombine.high %v2645_v20, %v2649_v9  ;;  %v13092_v11 = vcombine.low %v2645_v20, %v2649_v9  ;;  %v2637_v12 = vld [vmem:[#allocation12 + $0x200] sm:$0xff] }
 0x2ad   :  { %4165 = vmatprep.subr.bf16.mxu0 %v13021_v30  ;;  %v2641_v13 = vld [vmem:[#allocation12 + $0x220] sm:$0xff] }
 0x2ae   :  { %2517 = vmatpush1.bf16.msra.mxu1 %v14879_v14  ;;  %v13085_v14 = vcombine.high %v2637_v12, %v2641_v13  ;;  %v13084_v15 = vcombine.low %v2637_v12, %v2641_v13  ;;  %v2761_v16 = vld [vmem:[#allocation12 + $0x5e0] sm:$0xff] }
 0x2af   :  { %2518 = vmatprep.subr.bf16.mxu1 %v14884_v17  ;;  %v15437_v17 = vld [vmem:[#allocation12 + $0x1c8] sm:$0xff]  ;;  %v2753_v25 = vld [vmem:[#allocation12 + $0x5a0] sm:$0xff] }
 0x2b0   :  { %4166 = vmatpush1.bf16.msra.mxu0 %v13020_v45  ;;  %v13078_v24 = vcombine.low %v15437_v17, %v15439_v19  ;;  %v2741_v30 = vld [vmem:[#allocation12 + $0x540] sm:$0xff] }
 0x2b1   :  { %4167 = vmatprep.subr.bf16.mxu0 %v13141_v46  ;;  %v2737_v45 = vld [vmem:[#allocation12 + $0x520] sm:$0xff] }
 0x2b2   :  { %2519 = vmatpush2.bf16.msra.mxu1 %v14882_v23  ;;  %v13079_v23 = vcombine.high %v15437_v17, %v15439_v19  ;;  %v2725_v48 = vld [vmem:[#allocation12 + $0x4c0] sm:$0xff]  ;;  %v2594_v17 = vld [vmem:[#allocation12 + $0xa8] sm:$0xff] }
 0x2b3   :  { %2520 = vmatprep.subr.bf16.mxu1 %v14887_v27  ;;  %v2729_v50 = vld [vmem:[#allocation12 + $0x4e0] sm:$0xff] }
 0x2b4   :  { %4168 = vmatpush2.bf16.msra.mxu0 %v13140_v52  ;;  %v13173_v52 = vcombine.high %v2725_v48, %v2729_v50  ;;  %v2701_v57 = vld [vmem:[#allocation12 + $0x400] sm:$0xff] }
 0x2b5   :  { %4169 = vmatprep.subr.bf16.mxu0 %v13133_v21  ;;  %v2717_v21 = vld [vmem:[#allocation12 + $0x480] sm:$0xff] }
 0x2b6   :  { %2521 = vmatpush2.bf16.msra.mxu1 %v14885_v31  ;;  %v2745_v31 = vld [vmem:[#allocation12 + $0x560] sm:$0xff] }
 0x2b7   :  { %2522 = vmatprep.subr.bf16.mxu1 %v14890_v37  ;;  %v13188_v34 = vcombine.low %v2741_v30, %v2745_v31  ;;  %v13189_v35 = vcombine.high %v2741_v30, %v2745_v31  ;;  %v2733_v37 = vld [vmem:[#allocation12 + $0x500] sm:$0xff] }
 0x2b8   :  { %4170 = vmatpush2.bf16.msra.mxu0 %v13132_v26  ;;  %v13180_v46 = vcombine.low %v2733_v37, %v2737_v45  ;;  %v2713_v26 = vld [vmem:[#allocation12 + $0x460] sm:$0xff] }
 0x2b9   :  { %4171 = vmatprep.subr.bf16.mxu0 %v13125_v55  ;;  %v2705_v43 = vld [vmem:[#allocation12 + $0x420] sm:$0xff] }
 0x2ba   :  { %2523 = vmatpush2.bf16.msra.mxu1 %v14888_v47  ;;  %v13181_v47 = vcombine.high %v2733_v37, %v2737_v45  ;;  %v2797_v6 = vld [vmem:[#allocation12 + $0x700] sm:$0xff] }
 0x2bb   :  { %2524 = vmatprep.subr.bf16.mxu1 %v14893_v51  ;;  %v13172_v51 = vcombine.low %v2725_v48, %v2729_v50  ;;  %v2789_v9 = vld [vmem:[#allocation12 + $0x6c0] sm:$0xff] }
 0x2bc   :  { %4172 = vmatpush2.bf16.msra.mxu0 %v13124_v58  ;;  %v13149_v58 = vcombine.high %v2701_v57, %v2705_v43  ;;  %v2781_v13 = vld [vmem:[#allocation12 + $0x680] sm:$0xff] }
 0x2bd   :  { %4173 = vmatprep.subr.bf16.mxu0 %v13117_v59  ;;  %v2821_v59 = vld [vmem:[#allocation12 + $0x7c0] sm:$0xff] }
 0x2be   :  { %2525 = vmatpush2.bf16.msra.mxu1 %v14891_v32  ;;  %v2721_v32 = vld [vmem:[#allocation12 + $0x4a0] sm:$0xff] }
 0x2bf   :  { %2526 = vmatprep.subr.bf16.mxu1 %v14896_v18  ;;  %v13164_v33 = vcombine.low %v2717_v21, %v2721_v32  ;;  %v13165_v54 = vcombine.high %v2717_v21, %v2721_v32  ;;  %v2709_v18 = vld [vmem:[#allocation12 + $0x440] sm:$0xff] }
 0x2c0   :  { %4174 = vmatpush2.bf16.msra.mxu0 %v13116_v29  ;;  %v13156_v55 = vcombine.low %v2709_v18, %v2713_v26  ;;  %v2817_v29 = vld [vmem:[#allocation12 + $0x7a0] sm:$0xff] }
 0x2c1   :  { %4175 = vmatprep.subr.bf16.mxu0 %v13109_v0  ;;  %v2765_v31 = vld [vmem:[#allocation12 + $0x600] sm:$0xff] }
 0x2c2   :  { %2527 = vmatpush2.bf16.msra.mxu1 %v14894_v56  ;;  %v13157_v56 = vcombine.high %v2709_v18, %v2713_v26 }
 0x2c3   :  { %2528 = vmatprep.subr.bf16.mxu1 %v14899_v44  ;;  %v13148_v44 = vcombine.low %v2701_v57, %v2705_v43 }
 0x2c4   :  { %4176 = vmatpush2.bf16.msra.mxu0 %v13108_v3  ;;  %v2809_v3 = vld [vmem:[#allocation12 + $0x760] sm:$0xff] }
 0x2c5   :  { %4177 = vmatprep.subr.bf16.mxu0 %v13101_v7  ;;  %v2801_v7 = vld [vmem:[#allocation12 + $0x720] sm:$0xff] }
 0x2c6   :  { %2529 = vmatpush2.bf16.msra.mxu1 %v14897_v60  ;;  %v2825_v60 = vld [vmem:[#allocation12 + $0x7e0] sm:$0xff]  ;;  %v13245_v20 = vcombine.high %v2797_v6, %v2801_v7 }
 0x2c7   :  { %2530 = vmatprep.subr.bf16.mxu1 %v14902_v63  ;;  %v13268_v61 = vcombine.low %v2821_v59, %v2825_v60  ;;  %v13269_v62 = vcombine.high %v2821_v59, %v2825_v60  ;;  %v2813_v63 = vld [vmem:[#allocation12 + $0x780] sm:$0xff] }
 0x2c8   :  { %4178 = vmatpush2.bf16.msra.mxu0 %v13100_v8  ;;  %v13260_v0 = vcombine.low %v2813_v63, %v2817_v29  ;;  %v13244_v8 = vcombine.low %v2797_v6, %v2801_v7 }
 0x2c9   :  { %4179 = vmatprep.subr.bf16.mxu0 %v13093_v10  ;;  %v2793_v10 = vld [vmem:[#allocation12 + $0x6e0] sm:$0xff] }
 0x2ca   :  { %2531 = vmatpush2.bf16.msra.mxu1 %v14900_v1  ;;  %v13261_v1 = vcombine.high %v2813_v63, %v2817_v29  ;;  %v13237_v12 = vcombine.high %v2789_v9, %v2793_v10 }
 0x2cb   :  { %2532 = vmatprep.subr.bf16.mxu1 %v14905_v2  ;;  %v2805_v2 = vld [vmem:[#allocation12 + $0x740] sm:$0xff] }
 0x2cc   :  { %4180 = vmatpush2.bf16.msra.mxu0 %v13092_v11  ;;  %v13253_v5 = vcombine.high %v2805_v2, %v2809_v3  ;;  %v13236_v11 = vcombine.low %v2789_v9, %v2793_v10 }
 0x2cd   :  { %4181 = vmatprep.subr.bf16.mxu0 %v13085_v14  ;;  %v2785_v14 = vld [vmem:[#allocation12 + $0x6a0] sm:$0xff] }
 0x2ce   :  { %2533 = vmatpush2.bf16.msra.mxu1 %v14903_v4  ;;  %v13252_v4 = vcombine.low %v2805_v2, %v2809_v3 }
 0x2d0   :  { %4182 = vmatpush2.bf16.msra.mxu0 %v13084_v15  ;;  %v13229_v15 = vcombine.high %v2781_v13, %v2785_v14 }
 0x2d1   :  { %2535 = vmatmul.mubr.bf16.vlgmr.msra.gmra.mxu1 %v15422_v36  ;;  %v2757_v36 = vld [vmem:[#allocation12 + $0x5c0] sm:$0xff]  ;;  %4233 = vmatprep.subr.bf16.mxu0 %v13079_v23 }
 0x2d2   :  { %2544 = vmatprep.mubr.bf16.mxu1 %v15426_v49  ;;  %v13205_v49 = vcombine.high %v2757_v36, %v2761_v16  ;;  %v13204_v22 = vcombine.low %v2757_v36, %v2761_v16  ;;  %v13228_v16 = vcombine.low %v2781_v13, %v2785_v14  ;;  %v2777_v23 = vld [vmem:[#allocation12 + $0x660] sm:$0xff]  ;;  %v2622_v13 = vld [vmem:[#allocation12 + $0x188] sm:$0xff] }
 0x2d3   :  { %v2626_v14 = vld [vmem:[#allocation12 + $0x1a8] sm:$0xff] }
 0x2d4   :  { %4192 = vmatprep.subr.bf16.mxu1 %v13205_v49 }
 0x2d5   :  { %4193 = vmatpush1.bf16.msra.mxu1 %v13204_v22  ;;  %v2773_v22 = vld [vmem:[#allocation12 + $0x640] sm:$0xff] }
 0x2d9   :  { %2545 = vmatmul.mubr.bf16.gmra.mxu1 %v15430_v53  ;;  %v2749_v53 = vld [vmem:[#allocation12 + $0x580] sm:$0xff] }
 0x2da   :  { %v13196_v27 = vcombine.low %v2749_v53, %v2753_v25  ;;  %v13197_v28 = vcombine.high %v2749_v53, %v2753_v25  ;;  %v13221_v53 = vcombine.high %v2773_v22, %v2777_v23  ;;  %v1687_v25 = vld [vmem:[#allocation10] sm:$0xf] }
 0x2db   :  { %v15464_v3 = vrot.slane %v1687_v25, %v15373_v42  ;;  %v15467_v7 = vrot.slane %v1687_v25, %v15367_v40 }
 0x2dc   :  { %4194 = vmatprep.subr.bf16.mxu1 %v13197_v28  ;;  %v13220_v28 = vcombine.low %v2773_v22, %v2777_v23 }
 0x2dd   :  { %4195 = vmatpush1.bf16.msra.mxu1 %v13196_v27 }
 0x2de   :  { %4196 = vmatprep.subr.bf16.mxu1 %v13189_v35  ;;  %v1692_v35 = vrot.slane %v1687_v25, %v15370_v41 }
 0x2e1   :  { %4197 = vmatpush1.bf16.msra.mxu1 %v13188_v34  ;;  %v2769_v34 = vld [vmem:[#allocation12 + $0x620] sm:$0xff] }
 0x2e2   :  { %4198 = vmatprep.subr.bf16.mxu1 %v13181_v47  ;;  %v13213_v37 = vcombine.high %v2765_v31, %v2769_v34  ;;  %v1696_v47 = vrot.slane %v1687_v25, %v15364_v39  ;;  %v13071_v25 = vcombine.high %v2622_v13, %v2626_v14 }
 0x2e5   :  { %4199 = vmatpush1.bf16.msra.mxu1 %v13180_v46  ;;  %v13212_v46 = vcombine.low %v2765_v31, %v2769_v34  ;;  %v13070_v34 = vcombine.low %v2622_v13, %v2626_v14  ;;  %v2670_v14 = vld [vmem:[#allocation12 + $0x308] sm:$0xff] }
 0x2e6   :  { %4200 = vmatprep.subr.bf16.mxu1 %v13173_v52  ;;  %v15449_v52 = vld [vmem:[#allocation12 + $0x5e8] sm:$0xff] }
 0x2e9   :  { %4201 = vmatpush1.bf16.msra.mxu1 %v13172_v51  ;;  %v15447_v51 = vld [vmem:[#allocation12 + $0x5c8] sm:$0xff] }
 0x2ea   :  { %4202 = vmatprep.subr.bf16.mxu1 %v13165_v54  ;;  %v13207_v32 = vcombine.high %v15447_v51, %v15449_v52  ;;  %v13206_v54 = vcombine.low %v15447_v51, %v15449_v52 }
 0x2ed   :  { %4203 = vmatpush1.bf16.msra.mxu1 %v13164_v33 }
 0x2ee   :  { %4204 = vmatprep.subr.bf16.mxu1 %v13157_v56 }
 0x2f1   :  { %4205 = vmatpush1.bf16.msra.mxu1 %v13156_v55 }
 0x2f2   :  { %4206 = vmatprep.subr.bf16.mxu1 %v13149_v58 }
 0x2f5   :  { %4207 = vmatpush1.bf16.msra.mxu1 %v13148_v44 }
 0x2f6   :  { %4208 = vmatprep.subr.bf16.mxu1 %v13269_v62 }
 0x2f9   :  { %4209 = vmatpush2.bf16.msra.mxu1 %v13268_v61 }
 0x2fa   :  { %4210 = vmatprep.subr.bf16.mxu1 %v13261_v1 }
 0x2fd   :  { %4211 = vmatpush2.bf16.msra.mxu1 %v13260_v0 }
 0x2fe   :  { %4212 = vmatprep.subr.bf16.mxu1 %v13253_v5 }
 0x301   :  { %4213 = vmatpush2.bf16.msra.mxu1 %v13252_v4 }
 0x302   :  { %4214 = vmatprep.subr.bf16.mxu1 %v13245_v20 }
 0x305   :  { %4215 = vmatpush2.bf16.msra.mxu1 %v13244_v8 }
 0x306   :  { %4216 = vmatprep.subr.bf16.mxu1 %v13237_v12 }
 0x309   :  { %4217 = vmatpush2.bf16.msra.mxu1 %v13236_v11 }
 0x30a   :  { %4218 = vmatprep.subr.bf16.mxu1 %v13229_v15 }
 0x30d   :  { %4219 = vmatpush2.bf16.msra.mxu1 %v13228_v16 }
 0x30e   :  { %4220 = vmatprep.subr.bf16.mxu1 %v13221_v53 }
 0x311   :  { %v2383_v36 = vpop.f32.mrf.mxu0  ;;  %4221 = vmatpush2.bf16.msra.mxu1 %v13220_v28  ;;  %v2618_v28 = vld [vmem:[#allocation12 + $0x168] sm:$0xff] }
 0x312   :  { %4222 = vmatprep.subr.bf16.mxu1 %v13213_v37  ;;  %v2384_v56 = vadd.f32 %v2383_v36, %v1692_v35  ;;  %v2606_v37 = vld [vmem:[#allocation12 + $0x108] sm:$0xff] }
 0x313   :  { %v2385_v49 = vpop.f32.mrf.mxu0 }
 0x314   :  { %v2386_v57 = vadd.f32 %v2385_v49, %v1696_v47 }
 0x315   :  { %v2387_v27 = vpop.f32.mrf.mxu0  ;;  %4223 = vmatpush2.bf16.msra.mxu1 %v13212_v46 }
 0x316   :  { %4274 = vmatprep.subr.bf16.mxu1 %v13207_v32  ;;  %v2388_v58 = vadd.f32 %v2387_v27, %v1692_v35  ;;  %v2614_v27 = vld [vmem:[#allocation12 + $0x148] sm:$0xff] }
 0x317   :  { %v2389_v30 = vpop.f32.mrf.mxu0  ;;  %v13062_v46 = vcombine.low %v2614_v27, %v2618_v28 }
 0x318   :  { %v2390_v63 = vadd.f32 %v2389_v30, %v1696_v47 }
 0x319   :  { %v2393_v45 = vpop.f32.mrf.mxu0 }
 0x31a   :  { %v2394_v48 = vadd.f32 %v2393_v45, %v1692_v35  ;;  %v13063_v35 = vcombine.high %v2614_v27, %v2618_v28  ;;  %v2610_v45 = vld [vmem:[#allocation12 + $0x128] sm:$0xff] }
 0x31b   :  { %v2395_v50 = vpop.f32.mrf.mxu0 }
 0x31c   :  { %v2396_v21 = vadd.f32 %v2395_v50, %v1696_v47  ;;  %v13055_v47 = vcombine.high %v2606_v37, %v2610_v45  ;;  %v2602_v50 = vld [vmem:[#allocation12 + $0xe8] sm:$0xff] }
 0x31d   :  { %v2397_v33 = vpop.f32.mrf.mxu0 }
 0x31e   :  { %v2590_v33 = vld [vmem:[#allocation12 + $0x88] sm:$0xff] }
 0x31f   :  { %v2398_v18 = vpop.f32.mrf.mxu0 }
 0x320   :  { %v2582_v18 = vld [vmem:[#allocation12 + $0x48] sm:$0xff] }
 0x351   :  { %v2434_v26 = vpop.f32.mrf.mxu1  ;;  %v15455_v55 = vpop.f32.mrf.mxu0 }
 0x352   :  { %v2435_v59 = vadd.f32 %v2434_v26, %v2384_v56  ;;  %v2586_v26 = vld [vmem:[#allocation12 + $0x68] sm:$0xff]  ;;  %v13038_v56 = vcombine.low %v2590_v33, %v2594_v17 }
 0x353   :  { %v2436_v43 = vpop.f32.mrf.mxu1  ;;  %v15457_v44 = vpop.f32.mrf.mxu0 }
 0x354   :  { %v2437_v60 = vadd.f32 %v2436_v43, %v2386_v57  ;;  %v2553_v2 = vmax.f32 %v2435_v59, 0.0  ;;  %v13031_v57 = vcombine.high %v2582_v18, %v2586_v26  ;;  %v2574_v43 = vld [vmem:[#allocation12 + $0x8] sm:$0xff]  ;;  %v13030_v59 = vcombine.low %v2582_v18, %v2586_v26 }
 0x355   :  { %v2438_v61 = vpop.f32.mrf.mxu1  ;;  %v15459_v62 = vpop.f32.mrf.mxu0 }
 0x356   :  { %v2439_v29 = vadd.f32 %v2438_v61, %v2388_v58  ;;  %v2554_v6 = vmax.f32 %v2437_v60, 0.0  ;;  %v2578_v58 = vld [vmem:[#allocation12 + $0x28] sm:$0xff] }
 0x357   :  { %v2440_v0 = vpop.f32.mrf.mxu1  ;;  %v15461_v1 = vpop.f32.mrf.mxu0  ;;  %v13023_v60 = vcombine.high %v2574_v43, %v2578_v58  ;;  %v2694_v61 = vld [vmem:[#allocation12 + $0x3c8] sm:$0xff] }
 0x358   :  { %v2557_v4 = vmax.f32 %v2439_v29, 0.0  ;;  %v2441_v5 = vadd.f32 %v2440_v0, %v2390_v63  ;;  %v2698_v63 = vld [vmem:[#allocation12 + $0x3e8] sm:$0xff]  ;;  %v13022_v29 = vcombine.low %v2574_v43, %v2578_v58  ;;  %v2631_v58 = vld [vmem:[#allocation12 + $0x1d0] sm:$0xff] }
 0x359   :  { %v2444_v8 = vpop.f32.mrf.mxu1  ;;  %v2495_v20 = vpop.f32.mrf.mxu0  ;;  %v13143_v0 = vcombine.high %v2694_v61, %v2698_v63 }
 0x35a   :  { %v15469_v9 = vpack.c.bf16 %v2557_v4, %v2553_v2  ;;  %v2558_v10 = vmax.f32 %v2441_v5, 0.0  ;;  %v15471_v11 = vadd.f32 %v2444_v8, %v2394_v48  ;;  %v15474_v12 = vadd.f32 %v2495_v20, %v15464_v3  ;;  %v2598_v48 = vld [vmem:[#allocation12 + $0xc8] sm:$0xff] }
 0x35b   :  { %v2446_v15 = vpop.f32.mrf.mxu1  ;;  %v2497_v36 = vpop.f32.mrf.mxu0  ;;  %v13047_v32 = vcombine.high %v2598_v48, %v2602_v50  ;;  %v13046_v19 = vcombine.low %v2598_v48, %v2602_v50  ;;  %v2686_v2 = vld [vmem:[#allocation12 + $0x388] sm:$0xff]  ;;  %v13142_v5 = vcombine.low %v2694_v61, %v2698_v63  ;;  %v2486_v50 = vadd.f32 %v15455_v55, %v15464_v3 }
 0x35c   :  { %v15476_v16 = vpack.c.bf16 %v2558_v10, %v2554_v6  ;;  %v15478_v49 = vadd.f32 %v2446_v15, %v2396_v21  ;;  %v15481_v22 = vadd.f32 %v2497_v36, %v15467_v7  ;;  %v13054_v21 = vcombine.low %v2606_v37, %v2610_v45  ;;  %v2690_v4 = vld [vmem:[#allocation12 + $0x3a8] sm:$0xff] }
 0x35d   :  { %v2448_v23 = vpop.f32.mrf.mxu1  ;;  %v2499_v53 = vpop.f32.mrf.mxu0  ;;  %v13135_v6 = vcombine.high %v2686_v2, %v2690_v4  ;;  %v2678_v8 = vld [vmem:[#allocation12 + $0x348] sm:$0xff]  ;;  %v13134_v10 = vcombine.low %v2686_v2, %v2690_v4 }
 0x35e   :  { %4183 = vmatprep.mubr.bf16.mxu0 %v15476_v16  ;;  %v2682_v20 = vld [vmem:[#allocation12 + $0x368] sm:$0xff] }
 0x35f   :  { %v2449_v30 = vpop.f32.mrf.mxu1  ;;  %v2500_v31 = vpop.f32.mrf.mxu0  ;;  %4184 = vmatmul.mubr.bf16.vlgmr.msra.gmra.mxu0 %v15469_v9  ;;  %v13127_v13 = vcombine.high %v2678_v8, %v2682_v20  ;;  %v2674_v15 = vld [vmem:[#allocation12 + $0x328] sm:$0xff]  ;;  %v13126_v36 = vcombine.low %v2678_v8, %v2682_v20  ;;  %v2623_v8 = vld [vmem:[#allocation12 + $0x190] sm:$0xff] }
 0x360   :  { %4234 = vmatpush1.bf16.msra.mxu0 %v13078_v24  ;;  %4265 = vmatprep.mubr.bf16.mxu0 %v15476_v16  ;;  %v13039_v24 = vcombine.high %v2590_v33, %v2594_v17  ;;  %v13119_v23 = vcombine.high %v2670_v14, %v2674_v15  ;;  %v2662_v53 = vld [vmem:[#allocation12 + $0x2c8] sm:$0xff]  ;;  %v13118_v27 = vcombine.low %v2670_v14, %v2674_v15  ;;  %v2627_v20 = vld [vmem:[#allocation12 + $0x1b0] sm:$0xff] }
 0x361   :  { %4235 = vmatprep.subr.bf16.mxu0 %v13071_v25  ;;  %v2666_v25 = vld [vmem:[#allocation12 + $0x2e8] sm:$0xff]  ;;  %v2488_v17 = vadd.f32 %v15457_v44, %v15467_v7 }
 0x362   :  { %v13111_v28 = vcombine.high %v2662_v53, %v2666_v25  ;;  %v2654_v30 = vld [vmem:[#allocation12 + $0x288] sm:$0xff] }
 0x363   :  { %v2658_v31 = vld [vmem:[#allocation12 + $0x2a8] sm:$0xff] }
 0x364   :  { %4236 = vmatpush1.bf16.msra.mxu0 %v13070_v34  ;;  %v13110_v34 = vcombine.low %v2662_v53, %v2666_v25  ;;  %v2646_v37 = vld [vmem:[#allocation12 + $0x248] sm:$0xff] }
 0x365   :  { %4237 = vmatprep.subr.bf16.mxu0 %v13063_v35  ;;  %v13103_v35 = vcombine.high %v2654_v30, %v2658_v31  ;;  %v2650_v45 = vld [vmem:[#allocation12 + $0x268] sm:$0xff] }
 0x366   :  { %v13095_v48 = vcombine.high %v2646_v37, %v2650_v45  ;;  %v13094_v18 = vcombine.low %v2646_v37, %v2650_v45  ;;  %v2746_v53 = vld [vmem:[#allocation12 + $0x568] sm:$0xff]  ;;  %v2607_v45 = vld [vmem:[#allocation12 + $0x110] sm:$0xff] }
 0x367   :  { %v2738_v37 = vld [vmem:[#allocation12 + $0x528] sm:$0xff] }
 0x368   :  { %4238 = vmatpush1.bf16.msra.mxu0 %v13062_v46  ;;  %v13102_v46 = vcombine.low %v2654_v30, %v2658_v31  ;;  %v13072_v30 = vcombine.low %v2623_v8, %v2627_v20 }
 0x369   :  { %4239 = vmatprep.subr.bf16.mxu0 %v13055_v47 }
 0x36c   :  { %4240 = vmatpush1.bf16.msra.mxu0 %v13054_v21  ;;  %v2638_v21 = vld [vmem:[#allocation12 + $0x208] sm:$0xff] }
 0x36d   :  { %4241 = vmatprep.subr.bf16.mxu0 %v13047_v32  ;;  %v2642_v32 = vld [vmem:[#allocation12 + $0x228] sm:$0xff] }
 0x370   :  { %4242 = vmatpush1.bf16.msra.mxu0 %v13046_v19  ;;  %v2490_v19 = vadd.f32 %v15459_v62, %v15464_v3 }
 0x371   :  { %4243 = vmatprep.subr.bf16.mxu0 %v13039_v24 }
 0x374   :  { %4244 = vmatpush1.bf16.msra.mxu0 %v13038_v56  ;;  %v13087_v56 = vcombine.high %v2638_v21, %v2642_v32 }
 0x375   :  { %4245 = vmatprep.subr.bf16.mxu0 %v13031_v57  ;;  %v2492_v57 = vadd.f32 %v15461_v1, %v15467_v7  ;;  %v2750_v1 = vld [vmem:[#allocation12 + $0x588] sm:$0xff] }
 0x378   :  { %4246 = vmatpush1.bf16.msra.mxu0 %v13030_v59  ;;  %v2635_v59 = vld [vmem:[#allocation12 + $0x1f0] sm:$0xff] }
 0x379   :  { %4247 = vmatprep.subr.bf16.mxu0 %v13023_v60  ;;  %v13081_v3 = vcombine.high %v2631_v58, %v2635_v59  ;;  %v13080_v15 = vcombine.low %v2631_v58, %v2635_v59 }
 0x37c   :  { %4248 = vmatpush1.bf16.msra.mxu0 %v13022_v29  ;;  %v13086_v29 = vcombine.low %v2638_v21, %v2642_v32  ;;  %v2599_v21 = vld [vmem:[#allocation12 + $0xd0] sm:$0xff] }
 0x37d   :  { %4249 = vmatprep.subr.bf16.mxu0 %v13143_v0  ;;  %v2603_v32 = vld [vmem:[#allocation12 + $0xf0] sm:$0xff] }
 0x380   :  { %4250 = vmatpush2.bf16.msra.mxu0 %v13142_v5 }
 0x381   :  { %4251 = vmatprep.subr.bf16.mxu0 %v13135_v6  ;;  %v2754_v6 = vld [vmem:[#allocation12 + $0x5a8] sm:$0xff] }
 0x384   :  { %4252 = vmatpush2.bf16.msra.mxu0 %v13134_v10 }
 0x385   :  { %4253 = vmatprep.subr.bf16.mxu0 %v13127_v13 }
 0x388   :  { %4254 = vmatpush2.bf16.msra.mxu0 %v13126_v36  ;;  %v13199_v36 = vcombine.high %v2750_v1, %v2754_v6 }
 0x389   :  { %4255 = vmatprep.subr.bf16.mxu0 %v13119_v23  ;;  %v13073_v23 = vcombine.high %v2623_v8, %v2627_v20 }
 0x38c   :  { %4256 = vmatpush2.bf16.msra.mxu0 %v13118_v27  ;;  %v2615_v27 = vld [vmem:[#allocation12 + $0x150] sm:$0xff] }
 0x38d   :  { %4257 = vmatprep.subr.bf16.mxu0 %v13111_v28  ;;  %v2619_v28 = vld [vmem:[#allocation12 + $0x170] sm:$0xff] }
 0x38e   :  { %v13064_v51 = vcombine.low %v2615_v27, %v2619_v28 }
 0x390   :  { %4258 = vmatpush2.bf16.msra.mxu0 %v13110_v34  ;;  %v13065_v34 = vcombine.high %v2615_v27, %v2619_v28 }
 0x391   :  { %v2536_v47 = vpop.f32.mrf.mxu1  ;;  %4259 = vmatprep.subr.bf16.mxu0 %v13103_v35  ;;  %v2734_v35 = vld [vmem:[#allocation12 + $0x508] sm:$0xff] }
 0x392   :  { %v2537_v24 = vadd.f32 %v2536_v47, %v2486_v50  ;;  %v13183_v52 = vcombine.high %v2734_v35, %v2738_v37  ;;  %v2730_v50 = vld [vmem:[#allocation12 + $0x4e8] sm:$0xff] }
 0x393   :  { %v2538_v33 = vpop.f32.mrf.mxu1 }
 0x394   :  { %4260 = vmatpush2.bf16.msra.mxu0 %v13102_v46  ;;  %v2539_v43 = vadd.f32 %v2538_v33, %v2488_v17  ;;  %v2555_v61 = vmax.f32 %v2537_v24, 0.0  ;;  %v2611_v46 = vld [vmem:[#allocation12 + $0x130] sm:$0xff]  ;;  %v13182_v33 = vcombine.low %v2734_v35, %v2738_v37  ;;  %v13049_v24 = vcombine.high %v2599_v21, %v2603_v32 }
 0x395   :  { %v2540_v26 = vpop.f32.mrf.mxu1  ;;  %4261 = vmatprep.subr.bf16.mxu0 %v13095_v48  ;;  %v2726_v48 = vld [vmem:[#allocation12 + $0x4c8] sm:$0xff]  ;;  %v13056_v17 = vcombine.low %v2607_v45, %v2611_v46  ;;  %v2691_v35 = vld [vmem:[#allocation12 + $0x3b0] sm:$0xff] }
 0x396   :  { %v2541_v55 = vadd.f32 %v2540_v26, %v2490_v19  ;;  %v2556_v0 = vmax.f32 %v2539_v43, 0.0  ;;  %v13175_v19 = vcombine.high %v2726_v48, %v2730_v50  ;;  %v2722_v26 = vld [vmem:[#allocation12 + $0x4a8] sm:$0xff]  ;;  %v13174_v43 = vcombine.low %v2726_v48, %v2730_v50  ;;  %v2683_v48 = vld [vmem:[#allocation12 + $0x370] sm:$0xff] }
 0x397   :  { %v2542_v60 = vpop.f32.mrf.mxu1 }
 0x398   :  { %v2559_v63 = vmax.f32 %v2541_v55, 0.0  ;;  %v2543_v44 = vadd.f32 %v2542_v60, %v2492_v57  ;;  %4262 = vmatpush2.bf16.msra.mxu0 %v13094_v18  ;;  %v2718_v18 = vld [vmem:[#allocation12 + $0x488] sm:$0xff]  ;;  %v2595_v57 = vld [vmem:[#allocation12 + $0xb0] sm:$0xff]  ;;  %v13048_v55 = vcombine.low %v2599_v21, %v2603_v32 }
 0x399   :  { %v2546_v62 = vpop.f32.mrf.mxu1  ;;  %4263 = vmatprep.subr.bf16.mxu0 %v13087_v56  ;;  %v2591_v56 = vld [vmem:[#allocation12 + $0x90] sm:$0xff]  ;;  %v13167_v58 = vcombine.high %v2718_v18, %v2722_v26  ;;  %v2710_v60 = vld [vmem:[#allocation12 + $0x448] sm:$0xff] }
 0x39a   :  { %v15497_v2 = vpack.c.bf16 %v2559_v63, %v2555_v61  ;;  %v2560_v4 = vmax.f32 %v2543_v44, 0.0  ;;  %v15500_v5 = vadd.f32 %v2546_v62, %v15474_v12  ;;  %v2742_v12 = vld [vmem:[#allocation12 + $0x548] sm:$0xff]  ;;  %v13041_v59 = vcombine.high %v2591_v56, %v2595_v57  ;;  %v2583_v63 = vld [vmem:[#allocation12 + $0x50] sm:$0xff] }
 0x39b   :  { %v2548_v7 = vpop.f32.mrf.mxu1  ;;  %v13191_v31 = vcombine.high %v2742_v12, %v2746_v53  ;;  %v13190_v47 = vcombine.low %v2742_v12, %v2746_v53  ;;  %v2714_v61 = vld [vmem:[#allocation12 + $0x468] sm:$0xff]  ;;  %v2587_v44 = vld [vmem:[#allocation12 + $0x70] sm:$0xff]  ;;  %v13040_v62 = vcombine.low %v2591_v56, %v2595_v57 }
 0x39c   :  { %v15502_v10 = vpack.c.bf16 %v2560_v4, %v2556_v0  ;;  %v15505_v13 = vadd.f32 %v2548_v7, %v15481_v22  ;;  %4264 = vmatpush2.bf16.msra.mxu0 %v13086_v29  ;;  %v13198_v22 = vcombine.low %v2750_v1, %v2754_v6  ;;  %v13166_v29 = vcombine.low %v2718_v18, %v2722_v26  ;;  %v2702_v4 = vld [vmem:[#allocation12 + $0x408] sm:$0xff]  ;;  %v2575_v7 = vld [vmem:[#allocation12 + $0x10] sm:$0xff] }
 0x39d   :  { %v2550_v14 = vpop.f32.mrf.mxu1  ;;  %4315 = vmatprep.subr.bf16.mxu0 %v13081_v3  ;;  %v13159_v3 = vcombine.high %v2710_v60, %v2714_v61  ;;  %v13033_v0 = vcombine.high %v2583_v63, %v2587_v44  ;;  %v2706_v1 = vld [vmem:[#allocation12 + $0x428] sm:$0xff]  ;;  %v2579_v6 = vld [vmem:[#allocation12 + $0x30] sm:$0xff]  ;;  %v13158_v8 = vcombine.low %v2710_v60, %v2714_v61  ;;  %v13032_v20 = vcombine.low %v2583_v63, %v2587_v44 }
 0x39e   :  { %4224 = vmatprep.mubr.bf16.mxu1 %v15502_v10  ;;  %v13151_v14 = vcombine.high %v2702_v4, %v2706_v1  ;;  %v2695_v12 = vld [vmem:[#allocation12 + $0x3d0] sm:$0xff]  ;;  %v13024_v27 = vcombine.low %v2575_v7, %v2579_v6 }
 0x39f   :  { %v2551_v25 = vpop.f32.mrf.mxu1  ;;  %4225 = vmatmul.mubr.bf16.vlgmr.msra.gmra.mxu1 %v15497_v2  ;;  %4266 = vmatmul.mubr.bf16.vlgmr.msra.gmra.mxu0 %v15469_v9  ;;  %v2699_v53 = vld [vmem:[#allocation12 + $0x3f0] sm:$0xff] }
 0x3a0   :  { %4275 = vmatpush1.bf16.msra.mxu1 %v13206_v54  ;;  %4306 = vmatprep.mubr.bf16.mxu1 %v15502_v10  ;;  %v13057_v54 = vcombine.high %v2607_v45, %v2611_v46  ;;  %v13150_v25 = vcombine.low %v2702_v4, %v2706_v1  ;;  %v13144_v45 = vcombine.low %v2695_v12, %v2699_v53  ;;  %v2675_v18 = vld [vmem:[#allocation12 + $0x330] sm:$0xff] }
 0x3a1   :  { %4316 = vmatpush1.bf16.msra.mxu0 %v13080_v15  ;;  %4347 = vmatprep.mubr.bf16.mxu0 %v15476_v16  ;;  %v13025_v15 = vcombine.high %v2575_v7, %v2579_v6  ;;  %v2667_v60 = vld [vmem:[#allocation12 + $0x2f0] sm:$0xff] }
 0x3a2   :  { %4276 = vmatprep.subr.bf16.mxu1 %v13199_v36  ;;  %4317 = vmatprep.subr.bf16.mxu0 %v13073_v23  ;;  %v2822_v36 = vld [vmem:[#allocation12 + $0x7c8] sm:$0xff]  ;;  %v2659_v4 = vld [vmem:[#allocation12 + $0x2b0] sm:$0xff] }
 0x3a3   :  { %v2826_v23 = vld [vmem:[#allocation12 + $0x7e8] sm:$0xff] }
 0x3a4   :  { %4277 = vmatpush1.bf16.msra.mxu1 %v13198_v22  ;;  %v13271_v28 = vcombine.high %v2822_v36, %v2826_v23  ;;  %v13145_v22 = vcombine.high %v2695_v12, %v2699_v53  ;;  %v13270_v37 = vcombine.low %v2822_v36, %v2826_v23  ;;  %v2651_v36 = vld [vmem:[#allocation12 + $0x270] sm:$0xff] }
 0x3a5   :  { %4318 = vmatpush1.bf16.msra.mxu0 %v13072_v30  ;;  %4278 = vmatprep.subr.bf16.mxu1 %v13191_v31  ;;  %v2814_v30 = vld [vmem:[#allocation12 + $0x788] sm:$0xff] }
 0x3a6   :  { %4319 = vmatprep.subr.bf16.mxu0 %v13065_v34  ;;  %v2818_v31 = vld [vmem:[#allocation12 + $0x7a8] sm:$0xff]  ;;  %v2687_v34 = vld [vmem:[#allocation12 + $0x390] sm:$0xff] }
 0x3a7   :  { %v13263_v46 = vcombine.high %v2814_v30, %v2818_v31  ;;  %v13262_v50 = vcombine.low %v2814_v30, %v2818_v31  ;;  %v13136_v21 = vcombine.low %v2687_v34, %v2691_v35  ;;  %v2643_v30 = vld [vmem:[#allocation12 + $0x230] sm:$0xff] }
 0x3a8   :  { %4279 = vmatpush1.bf16.msra.mxu1 %v13190_v47  ;;  %v13137_v47 = vcombine.high %v2687_v34, %v2691_v35 }
 0x3a9   :  { %4320 = vmatpush1.bf16.msra.mxu0 %v13064_v51  ;;  %4280 = vmatprep.subr.bf16.mxu1 %v13183_v52  ;;  %v2806_v51 = vld [vmem:[#allocation12 + $0x748] sm:$0xff] }
 0x3aa   :  { %4321 = vmatprep.subr.bf16.mxu0 %v13057_v54  ;;  %v2810_v52 = vld [vmem:[#allocation12 + $0x768] sm:$0xff]  ;;  %v2679_v54 = vld [vmem:[#allocation12 + $0x350] sm:$0xff] }
 0x3ab   :  { %v13255_v32 = vcombine.high %v2806_v51, %v2810_v52  ;;  %v13254_v26 = vcombine.low %v2806_v51, %v2810_v52  ;;  %v13128_v56 = vcombine.low %v2679_v54, %v2683_v48  ;;  %v2636_v51 = vld [vmem:[#allocation12 + $0x1f8] sm:$0xff] }
 0x3ac   :  { %4281 = vmatpush1.bf16.msra.mxu1 %v13182_v33  ;;  %v13129_v33 = vcombine.high %v2679_v54, %v2683_v48 }
 0x3ad   :  { %4322 = vmatpush1.bf16.msra.mxu0 %v13056_v17  ;;  %4282 = vmatprep.subr.bf16.mxu1 %v13175_v19  ;;  %v2798_v17 = vld [vmem:[#allocation12 + $0x708] sm:$0xff] }
 0x3ae   :  { %4323 = vmatprep.subr.bf16.mxu0 %v13049_v24  ;;  %v2802_v19 = vld [vmem:[#allocation12 + $0x728] sm:$0xff]  ;;  %v2671_v24 = vld [vmem:[#allocation12 + $0x310] sm:$0xff] }
 0x3af   :  { %v13247_v57 = vcombine.high %v2798_v17, %v2802_v19  ;;  %v13246_v61 = vcombine.low %v2798_v17, %v2802_v19  ;;  %v13120_v63 = vcombine.low %v2671_v24, %v2675_v18  ;;  %v2624_v17 = vld [vmem:[#allocation12 + $0x198] sm:$0xff] }
 0x3b0   :  { %4283 = vmatpush1.bf16.msra.mxu1 %v13174_v43  ;;  %v13121_v43 = vcombine.high %v2671_v24, %v2675_v18  ;;  %v2628_v19 = vld [vmem:[#allocation12 + $0x1b8] sm:$0xff] }
 0x3b1   :  { %4324 = vmatpush1.bf16.msra.mxu0 %v13048_v55  ;;  %4284 = vmatprep.subr.bf16.mxu1 %v13167_v58  ;;  %v2790_v55 = vld [vmem:[#allocation12 + $0x6c8] sm:$0xff] }
 0x3b2   :  { %4325 = vmatprep.subr.bf16.mxu0 %v13041_v59  ;;  %v2794_v58 = vld [vmem:[#allocation12 + $0x6e8] sm:$0xff]  ;;  %v2663_v59 = vld [vmem:[#allocation12 + $0x2d0] sm:$0xff] }
 0x3b3   :  { %v13239_v44 = vcombine.high %v2790_v55, %v2794_v58  ;;  %v13238_v1 = vcombine.low %v2790_v55, %v2794_v58  ;;  %v13112_v7 = vcombine.low %v2663_v59, %v2667_v60  ;;  %v2620_v55 = vld [vmem:[#allocation12 + $0x178] sm:$0xff] }
 0x3b4   :  { %4285 = vmatpush1.bf16.msra.mxu1 %v13166_v29  ;;  %v13113_v29 = vcombine.high %v2663_v59, %v2667_v60  ;;  %v13074_v59 = vcombine.low %v2624_v17, %v2628_v19 }
 0x3b5   :  { %4326 = vmatpush1.bf16.msra.mxu0 %v13040_v62  ;;  %4286 = vmatprep.subr.bf16.mxu1 %v13159_v3  ;;  %v2782_v62 = vld [vmem:[#allocation12 + $0x688] sm:$0xff] }
 0x3b6   :  { %4327 = vmatprep.subr.bf16.mxu0 %v13033_v0  ;;  %v2786_v3 = vld [vmem:[#allocation12 + $0x6a8] sm:$0xff]  ;;  %v2655_v0 = vld [vmem:[#allocation12 + $0x290] sm:$0xff] }
 0x3b7   :  { %v13231_v6 = vcombine.high %v2782_v62, %v2786_v3  ;;  %v13230_v23 = vcombine.low %v2782_v62, %v2786_v3  ;;  %v13104_v12 = vcombine.low %v2655_v0, %v2659_v4  ;;  %v2612_v62 = vld [vmem:[#allocation12 + $0x138] sm:$0xff] }
 0x3b8   :  { %4287 = vmatpush1.bf16.msra.mxu1 %v13158_v8  ;;  %v13105_v8 = vcombine.high %v2655_v0, %v2659_v4 }
 0x3b9   :  { %4328 = vmatpush1.bf16.msra.mxu0 %v13032_v20  ;;  %4288 = vmatprep.subr.bf16.mxu1 %v13151_v14  ;;  %v2774_v20 = vld [vmem:[#allocation12 + $0x648] sm:$0xff] }
 0x3ba   :  { %4329 = vmatprep.subr.bf16.mxu0 %v13025_v15  ;;  %v2778_v14 = vld [vmem:[#allocation12 + $0x668] sm:$0xff]  ;;  %v2647_v15 = vld [vmem:[#allocation12 + $0x250] sm:$0xff] }
 0x3bb   :  { %v13223_v53 = vcombine.high %v2774_v20, %v2778_v14  ;;  %v13222_v31 = vcombine.low %v2774_v20, %v2778_v14  ;;  %v13096_v34 = vcombine.low %v2647_v15, %v2651_v36  ;;  %v2604_v20 = vld [vmem:[#allocation12 + $0xf8] sm:$0xff] }
 0x3bc   :  { %4289 = vmatpush1.bf16.msra.mxu1 %v13150_v25  ;;  %v13097_v25 = vcombine.high %v2647_v15, %v2651_v36 }
 0x3bd   :  { %4330 = vmatpush1.bf16.msra.mxu0 %v13024_v27  ;;  %4290 = vmatprep.subr.bf16.mxu1 %v13271_v28  ;;  %v2766_v27 = vld [vmem:[#allocation12 + $0x608] sm:$0xff] }
 0x3be   :  { %4331 = vmatprep.subr.bf16.mxu0 %v13145_v22  ;;  %v2770_v28 = vld [vmem:[#allocation12 + $0x628] sm:$0xff]  ;;  %v2639_v22 = vld [vmem:[#allocation12 + $0x210] sm:$0xff] }
 0x3bf   :  { %v13215_v35 = vcombine.high %v2766_v27, %v2770_v28  ;;  %v13214_v52 = vcombine.low %v2766_v27, %v2770_v28  ;;  %v13088_v54 = vcombine.low %v2639_v22, %v2643_v30  ;;  %v2596_v27 = vld [vmem:[#allocation12 + $0xb8] sm:$0xff] }
 0x3c0   :  { %4291 = vmatpush2.bf16.msra.mxu1 %v13270_v37  ;;  %v13089_v37 = vcombine.high %v2639_v22, %v2643_v30 }
 0x3c1   :  { %4332 = vmatpush2.bf16.msra.mxu0 %v13144_v45  ;;  %4292 = vmatprep.subr.bf16.mxu1 %v13263_v46  ;;  %v2759_v45 = vld [vmem:[#allocation12 + $0x5d0] sm:$0xff] }
 0x3c2   :  { %4333 = vmatprep.subr.bf16.mxu0 %v13137_v47  ;;  %v2763_v46 = vld [vmem:[#allocation12 + $0x5f0] sm:$0xff]  ;;  %v2632_v47 = vld [vmem:[#allocation12 + $0x1d8] sm:$0xff] }
 0x3c3   :  { %v13209_v48 = vcombine.high %v2759_v45, %v2763_v46  ;;  %v13082_v24 = vcombine.low %v2632_v47, %v2636_v51 }
 0x3c4   :  { %4293 = vmatpush2.bf16.msra.mxu1 %v13262_v50  ;;  %v13083_v50 = vcombine.high %v2632_v47, %v2636_v51 }
 0x3c5   :  { %4334 = vmatpush2.bf16.msra.mxu0 %v13136_v21  ;;  %4294 = vmatprep.subr.bf16.mxu1 %v13255_v32  ;;  %v2751_v21 = vld [vmem:[#allocation12 + $0x590] sm:$0xff] }
 0x3c6   :  { %4335 = vmatprep.subr.bf16.mxu0 %v13129_v33  ;;  %v2755_v32 = vld [vmem:[#allocation12 + $0x5b0] sm:$0xff]  ;;  %v13208_v33 = vcombine.low %v2759_v45, %v2763_v46  ;;  %v2588_v45 = vld [vmem:[#allocation12 + $0x78] sm:$0xff] }
 0x3c7   :  { %v13201_v18 = vcombine.high %v2751_v21, %v2755_v32  ;;  %v13200_v58 = vcombine.low %v2751_v21, %v2755_v32  ;;  %v2580_v21 = vld [vmem:[#allocation12 + $0x38] sm:$0xff] }
 0x3c8   :  { %4295 = vmatpush2.bf16.msra.mxu1 %v13254_v26  ;;  %v2743_v26 = vld [vmem:[#allocation12 + $0x550] sm:$0xff] }
 0x3c9   :  { %4336 = vmatpush2.bf16.msra.mxu0 %v13128_v56  ;;  %4296 = vmatprep.subr.bf16.mxu1 %v13247_v57  ;;  %v2747_v56 = vld [vmem:[#allocation12 + $0x570] sm:$0xff]  ;;  %v13075_v57 = vcombine.high %v2624_v17, %v2628_v19 }
 0x3ca   :  { %4337 = vmatprep.subr.bf16.mxu0 %v13121_v43  ;;  %v2616_v43 = vld [vmem:[#allocation12 + $0x158] sm:$0xff]  ;;  %v13193_v60 = vcombine.high %v2743_v26, %v2747_v56  ;;  %v13192_v3 = vcombine.low %v2743_v26, %v2747_v56 }
 0x3cb   :  { %v13066_v0 = vcombine.low %v2616_v43, %v2620_v55  ;;  %v2696_v26 = vld [vmem:[#allocation12 + $0x3d8] sm:$0xff] }
 0x3cc   :  { %4297 = vmatpush2.bf16.msra.mxu1 %v13246_v61  ;;  %v13067_v61 = vcombine.high %v2616_v43, %v2620_v55  ;;  %v2700_v56 = vld [vmem:[#allocation12 + $0x3f8] sm:$0xff] }
 0x3cd   :  { %4338 = vmatpush2.bf16.msra.mxu0 %v13120_v63  ;;  %4298 = vmatprep.subr.bf16.mxu1 %v13239_v44  ;;  %v2735_v63 = vld [vmem:[#allocation12 + $0x510] sm:$0xff] }
 0x3ce   :  { %4339 = vmatprep.subr.bf16.mxu0 %v13113_v29  ;;  %v2739_v44 = vld [vmem:[#allocation12 + $0x530] sm:$0xff]  ;;  %v2608_v29 = vld [vmem:[#allocation12 + $0x118] sm:$0xff] }
 0x3cf   :  { %v13185_v4 = vcombine.high %v2735_v63, %v2739_v44  ;;  %v13184_v14 = vcombine.low %v2735_v63, %v2739_v44  ;;  %v13058_v15 = vcombine.low %v2608_v29, %v2612_v62  ;;  %v2692_v63 = vld [vmem:[#allocation12 + $0x3b8] sm:$0xff] }
 0x3d0   :  { %4299 = vmatpush2.bf16.msra.mxu1 %v13238_v1  ;;  %v13059_v1 = vcombine.high %v2608_v29, %v2612_v62  ;;  %v13146_v29 = vcombine.low %v2696_v26, %v2700_v56 }
 0x3d1   :  { %4340 = vmatpush2.bf16.msra.mxu0 %v13112_v7  ;;  %4300 = vmatprep.subr.bf16.mxu1 %v13231_v6  ;;  %v2727_v7 = vld [vmem:[#allocation12 + $0x4d0] sm:$0xff] }
 0x3d2   :  { %4341 = vmatprep.subr.bf16.mxu0 %v13105_v8  ;;  %v2731_v6 = vld [vmem:[#allocation12 + $0x4f0] sm:$0xff]  ;;  %v2600_v8 = vld [vmem:[#allocation12 + $0xd8] sm:$0xff] }
 0x3d3   :  { %v13177_v36 = vcombine.high %v2727_v7, %v2731_v6  ;;  %v13176_v28 = vcombine.low %v2727_v7, %v2731_v6  ;;  %v13050_v22 = vcombine.low %v2600_v8, %v2604_v20  ;;  %v2684_v7 = vld [vmem:[#allocation12 + $0x378] sm:$0xff] }
 0x3d4   :  { %4301 = vmatpush2.bf16.msra.mxu1 %v13230_v23  ;;  %v13051_v23 = vcombine.high %v2600_v8, %v2604_v20 }
 0x3d5   :  { %4342 = vmatpush2.bf16.msra.mxu0 %v13104_v12  ;;  %4302 = vmatprep.subr.bf16.mxu1 %v13223_v53  ;;  %v2719_v12 = vld [vmem:[#allocation12 + $0x490] sm:$0xff] }
 0x3d6   :  { %4343 = vmatprep.subr.bf16.mxu0 %v13097_v25  ;;  %v2723_v53 = vld [vmem:[#allocation12 + $0x4b0] sm:$0xff]  ;;  %v2592_v25 = vld [vmem:[#allocation12 + $0x98] sm:$0xff] }
 0x3d7   :  { %v13169_v30 = vcombine.high %v2719_v12, %v2723_v53  ;;  %v13168_v46 = vcombine.low %v2719_v12, %v2723_v53  ;;  %v13042_v47 = vcombine.low %v2592_v25, %v2596_v27  ;;  %v2676_v12 = vld [vmem:[#allocation12 + $0x338] sm:$0xff] }
 0x3d8   :  { %4303 = vmatpush2.bf16.msra.mxu1 %v13222_v31  ;;  %v13043_v31 = vcombine.high %v2592_v25, %v2596_v27 }
 0x3d9   :  { %4344 = vmatpush2.bf16.msra.mxu0 %v13096_v34  ;;  %4304 = vmatprep.subr.bf16.mxu1 %v13215_v35  ;;  %v2711_v34 = vld [vmem:[#allocation12 + $0x450] sm:$0xff] }
 0x3da   :  { %4345 = vmatprep.subr.bf16.mxu0 %v13089_v37  ;;  %v2715_v35 = vld [vmem:[#allocation12 + $0x470] sm:$0xff]  ;;  %v2584_v37 = vld [vmem:[#allocation12 + $0x58] sm:$0xff] }
 0x3db   :  { %v13161_v51 = vcombine.high %v2711_v34, %v2715_v35  ;;  %v13160_v32 = vcombine.low %v2711_v34, %v2715_v35  ;;  %v2668_v34 = vld [vmem:[#allocation12 + $0x2f8] sm:$0xff] }
 0x3dc   :  { %4305 = vmatpush2.bf16.msra.mxu1 %v13214_v52  ;;  %v13035_v52 = vcombine.high %v2584_v37, %v2588_v45 }
 0x3dd   :  { %4346 = vmatpush2.bf16.msra.mxu0 %v13088_v54  ;;  %4356 = vmatprep.subr.bf16.mxu1 %v13209_v48  ;;  %v2703_v54 = vld [vmem:[#allocation12 + $0x410] sm:$0xff] }
 0x3de   :  { %4397 = vmatprep.subr.bf16.mxu0 %v13083_v50  ;;  %v2707_v48 = vld [vmem:[#allocation12 + $0x430] sm:$0xff]  ;;  %v2576_v50 = vld [vmem:[#allocation12 + $0x18] sm:$0xff] }
 0x3df   :  { %4307 = vmatmul.mubr.bf16.vlgmr.msra.gmra.mxu1 %v15497_v2  ;;  %v13153_v17 = vcombine.high %v2703_v54, %v2707_v48  ;;  %v13027_v19 = vcombine.high %v2576_v50, %v2580_v21  ;;  %v13026_v43 = vcombine.low %v2576_v50, %v2580_v21 }
 0x3e0   :  { %4348 = vmatmul.mubr.bf16.vlgmr.msra.gmra.mxu0 %v15469_v9  ;;  %4357 = vmatpush1.bf16.msra.mxu1 %v13208_v33  ;;  %v13034_v33 = vcombine.low %v2584_v37, %v2588_v45 }
 0x3e1   :  { %4388 = vmatprep.mubr.bf16.mxu1 %v15502_v10  ;;  %4398 = vmatpush1.bf16.msra.mxu0 %v13082_v24  ;;  %v2823_v24 = vld [vmem:[#allocation12 + $0x7d0] sm:$0xff] }
 0x3e2   :  { %4429 = vmatprep.mubr.bf16.mxu0 %v15476_v16  ;;  %4358 = vmatprep.subr.bf16.mxu1 %v13201_v18  ;;  %v2827_v18 = vld [vmem:[#allocation12 + $0x7f0] sm:$0xff] }
 0x3e3   :  { %4399 = vmatprep.subr.bf16.mxu0 %v13075_v57  ;;  %v13152_v57 = vcombine.low %v2703_v54, %v2707_v48  ;;  %v13273_v55 = vcombine.high %v2823_v24, %v2827_v18  ;;  %v13272_v44 = vcombine.low %v2823_v24, %v2827_v18  ;;  %v2660_v54 = vld [vmem:[#allocation12 + $0x2b8] sm:$0xff] }
 0x3e4   :  { %4359 = vmatpush1.bf16.msra.mxu1 %v13200_v58  ;;  %v13147_v58 = vcombine.high %v2696_v26, %v2700_v56  ;;  %v2652_v24 = vld [vmem:[#allocation12 + $0x278] sm:$0xff] }
 0x3e5   :  { %4400 = vmatpush1.bf16.msra.mxu0 %v13074_v59  ;;  %4360 = vmatprep.subr.bf16.mxu1 %v13193_v60  ;;  %v2815_v59 = vld [vmem:[#allocation12 + $0x790] sm:$0xff] }
 0x3e6   :  { %4401 = vmatprep.subr.bf16.mxu0 %v13067_v61  ;;  %v2819_v60 = vld [vmem:[#allocation12 + $0x7b0] sm:$0xff]  ;;  %v2688_v61 = vld [vmem:[#allocation12 + $0x398] sm:$0xff] }
 0x3e7   :  { %v13265_v62 = vcombine.high %v2815_v59, %v2819_v60  ;;  %v13264_v6 = vcombine.low %v2815_v59, %v2819_v60  ;;  %v13138_v8 = vcombine.low %v2688_v61, %v2692_v63  ;;  %v2644_v59 = vld [vmem:[#allocation12 + $0x238] sm:$0xff] }
 0x3e8   :  { %4361 = vmatpush1.bf16.msra.mxu1 %v13192_v3  ;;  %v13139_v3 = vcombine.high %v2688_v61, %v2692_v63 }
 0x3e9   :  { %4402 = vmatpush1.bf16.msra.mxu0 %v13066_v0  ;;  %4362 = vmatprep.subr.bf16.mxu1 %v13185_v4  ;;  %v2807_v0 = vld [vmem:[#allocation12 + $0x750] sm:$0xff] }
 0x3ea   :  { %4403 = vmatprep.subr.bf16.mxu0 %v13059_v1  ;;  %v2811_v4 = vld [vmem:[#allocation12 + $0x770] sm:$0xff]  ;;  %v2680_v1 = vld [vmem:[#allocation12 + $0x358] sm:$0xff] }
 0x3eb   :  { %v13257_v20 = vcombine.high %v2807_v0, %v2811_v4  ;;  %v13256_v53 = vcombine.low %v2807_v0, %v2811_v4  ;;  %v13130_v25 = vcombine.low %v2680_v1, %v2684_v7  ;;  %v4540_v0 = vld [vmem:[#allocation12 + $0x9e0] sm:$0xff] }
 0x3ec   :  { %4363 = vmatpush1.bf16.msra.mxu1 %v13184_v14  ;;  %v13131_v14 = vcombine.high %v2680_v1, %v2684_v7 }
 0x3ed   :  { %4404 = vmatpush1.bf16.msra.mxu0 %v13058_v15  ;;  %4364 = vmatprep.subr.bf16.mxu1 %v13177_v36  ;;  %v2799_v15 = vld [vmem:[#allocation12 + $0x710] sm:$0xff] }
 0x3ee   :  { %4405 = vmatprep.subr.bf16.mxu0 %v13051_v23  ;;  %v2803_v36 = vld [vmem:[#allocation12 + $0x730] sm:$0xff]  ;;  %v2672_v23 = vld [vmem:[#allocation12 + $0x318] sm:$0xff] }
 0x3ef   :  { %v13249_v27 = vcombine.high %v2799_v15, %v2803_v36  ;;  %v13248_v35 = vcombine.low %v2799_v15, %v2803_v36  ;;  %v13122_v37 = vcombine.low %v2672_v23, %v2676_v12  ;;  %v4528_v15 = vld [vmem:[#allocation12 + $0x980] sm:$0xff] }
 0x3f0   :  { %4365 = vmatpush1.bf16.msra.mxu1 %v13176_v28  ;;  %v13123_v28 = vcombine.high %v2672_v23, %v2676_v12  ;;  %v4532_v36 = vld [vmem:[#allocation12 + $0x9a0] sm:$0xff] }
 0x3f1   :  { %4406 = vmatpush1.bf16.msra.mxu0 %v13050_v22  ;;  %4366 = vmatprep.subr.bf16.mxu1 %v13169_v30  ;;  %v2791_v22 = vld [vmem:[#allocation12 + $0x6d0] sm:$0xff] }
 0x3f2   :  { %4407 = vmatprep.subr.bf16.mxu0 %v13043_v31  ;;  %v2795_v30 = vld [vmem:[#allocation12 + $0x6f0] sm:$0xff]  ;;  %v2664_v31 = vld [vmem:[#allocation12 + $0x2d8] sm:$0xff] }
 0x3f3   :  { %v13241_v45 = vcombine.high %v2791_v22, %v2795_v30  ;;  %v13240_v48 = vcombine.low %v2791_v22, %v2795_v30  ;;  %v13114_v50 = vcombine.low %v2664_v31, %v2668_v34  ;;  %v4520_v22 = vld [vmem:[#allocation12 + $0x940] sm:$0xff] }
 0x3f4   :  { %4367 = vmatpush1.bf16.msra.mxu1 %v13168_v46  ;;  %v13115_v46 = vcombine.high %v2664_v31, %v2668_v34  ;;  %v4524_v30 = vld [vmem:[#allocation12 + $0x960] sm:$0xff]  ;;  %v15524_v31 = vrot.slane %v15476_v16, 4 }
 0x3f5   :  { %4408 = vmatpush1.bf16.msra.mxu0 %v13042_v47  ;;  %4368 = vmatprep.subr.bf16.mxu1 %v13161_v51  ;;  %v2783_v47 = vld [vmem:[#allocation12 + $0x690] sm:$0xff] }
 0x3f6   :  { %4409 = vmatprep.subr.bf16.mxu0 %v13035_v52  ;;  %v2787_v51 = vld [vmem:[#allocation12 + $0x6b0] sm:$0xff]  ;;  %v2656_v52 = vld [vmem:[#allocation12 + $0x298] sm:$0xff] }
 0x3f7   :  { %v13233_v21 = vcombine.high %v2783_v47, %v2787_v51  ;;  %v13232_v18 = vcombine.low %v2783_v47, %v2787_v51  ;;  %v13106_v26 = vcombine.low %v2656_v52, %v2660_v54  ;;  %v2736_v47 = vld [vmem:[#allocation12 + $0x518] sm:$0xff] }
 0x3f8   :  { %4369 = vmatpush1.bf16.msra.mxu1 %v13160_v32  ;;  %v13107_v32 = vcombine.high %v2656_v52, %v2660_v54  ;;  %v2740_v51 = vld [vmem:[#allocation12 + $0x538] sm:$0xff]  ;;  %v4512_v54 = vld [vmem:[#allocation12 + $0x900] sm:$0xff] }
 0x3f9   :  { %4410 = vmatpush1.bf16.msra.mxu0 %v13034_v33  ;;  %4370 = vmatprep.subr.bf16.mxu1 %v13153_v17  ;;  %v2775_v33 = vld [vmem:[#allocation12 + $0x650] sm:$0xff] }
 0x3fa   :  { %4411 = vmatprep.subr.bf16.mxu0 %v13027_v19  ;;  %v2779_v17 = vld [vmem:[#allocation12 + $0x670] sm:$0xff]  ;;  %v2648_v19 = vld [vmem:[#allocation12 + $0x258] sm:$0xff] }
 0x3fb   :  { %v13225_v56 = vcombine.high %v2775_v33, %v2779_v17  ;;  %v13224_v60 = vcombine.low %v2775_v33, %v2779_v17  ;;  %v13098_v61 = vcombine.low %v2648_v19, %v2652_v24  ;;  %v2728_v17 = vld [vmem:[#allocation12 + $0x4d8] sm:$0xff] }
 0x3fc   :  { %4371 = vmatpush1.bf16.msra.mxu1 %v13152_v57  ;;  %v13099_v57 = vcombine.high %v2648_v19, %v2652_v24  ;;  %v2732_v19 = vld [vmem:[#allocation12 + $0x4f8] sm:$0xff]  ;;  %v4504_v24 = vld [vmem:[#allocation12 + $0x8c0] sm:$0xff] }
 0x3fd   :  { %4412 = vmatpush1.bf16.msra.mxu0 %v13026_v43  ;;  %4372 = vmatprep.subr.bf16.mxu1 %v13273_v55  ;;  %v2767_v43 = vld [vmem:[#allocation12 + $0x610] sm:$0xff] }
 0x3fe   :  { %4413 = vmatprep.subr.bf16.mxu0 %v13147_v58  ;;  %v2771_v55 = vld [vmem:[#allocation12 + $0x630] sm:$0xff]  ;;  %v2640_v58 = vld [vmem:[#allocation12 + $0x218] sm:$0xff] }
 0x3ff   :  { %v13217_v63 = vcombine.high %v2767_v43, %v2771_v55  ;;  %v13216_v4 = vcombine.low %v2767_v43, %v2771_v55  ;;  %v13090_v1 = vcombine.low %v2640_v58, %v2644_v59  ;;  %v2720_v55 = vld [vmem:[#allocation12 + $0x498] sm:$0xff] }
 0x400   :  { %4373 = vmatpush2.bf16.msra.mxu1 %v13272_v44  ;;  %v13091_v44 = vcombine.high %v2640_v58, %v2644_v59  ;;  %v2724_v58 = vld [vmem:[#allocation12 + $0x4b8] sm:$0xff]  ;;  %v4496_v59 = vld [vmem:[#allocation12 + $0x880] sm:$0xff] }
 0x401   :  { %4414 = vmatpush2.bf16.msra.mxu0 %v13146_v29  ;;  %4374 = vmatprep.subr.bf16.mxu1 %v13265_v62  ;;  %v2760_v29 = vld [vmem:[#allocation12 + $0x5d8] sm:$0xff] }
 0x402   :  { %4415 = vmatprep.subr.bf16.mxu0 %v13139_v3  ;;  %v2764_v62 = vld [vmem:[#allocation12 + $0x5f8] sm:$0xff]  ;;  %v4536_v3 = vld [vmem:[#allocation12 + $0x9c0] sm:$0xff] }
 0x403   :  { %v13211_v7 = vcombine.high %v2760_v29, %v2764_v62  ;;  %v13332_v23 = vcombine.low %v4536_v3, %v4540_v0 }
 0x404   :  { %4375 = vmatpush2.bf16.msra.mxu1 %v13264_v6  ;;  %v13333_v6 = vcombine.high %v4536_v3, %v4540_v0  ;;  %v2716_v3 = vld [vmem:[#allocation12 + $0x478] sm:$0xff]  ;;  %v4488_v0 = vld [vmem:[#allocation12 + $0x840] sm:$0xff] }
 0x405   :  { %4416 = vmatpush2.bf16.msra.mxu0 %v13138_v8  ;;  %4376 = vmatprep.subr.bf16.mxu1 %v13257_v20  ;;  %v2752_v8 = vld [vmem:[#allocation12 + $0x598] sm:$0xff] }
 0x406   :  { %4417 = vmatprep.subr.bf16.mxu0 %v13131_v14  ;;  %v2756_v20 = vld [vmem:[#allocation12 + $0x5b8] sm:$0xff]  ;;  %v13210_v14 = vcombine.low %v2760_v29, %v2764_v62 }
 0x407   :  { %v13203_v12 = vcombine.high %v2752_v8, %v2756_v20  ;;  %v13202_v34 = vcombine.low %v2752_v8, %v2756_v20  ;;  %v2712_v62 = vld [vmem:[#allocation12 + $0x458] sm:$0xff] }
 0x408   :  { %4377 = vmatpush2.bf16.msra.mxu1 %v13256_v53  ;;  %v2744_v53 = vld [vmem:[#allocation12 + $0x558] sm:$0xff] }
 0x409   :  { %4418 = vmatpush2.bf16.msra.mxu0 %v13130_v25  ;;  %4378 = vmatprep.subr.bf16.mxu1 %v13249_v27  ;;  %v2748_v25 = vld [vmem:[#allocation12 + $0x578] sm:$0xff] }
 0x40a   :  { %4419 = vmatprep.subr.bf16.mxu0 %v13123_v28  ;;  %v13325_v28 = vcombine.high %v4528_v15, %v4532_v36  ;;  %v13194_v16 = vcombine.low %v2744_v53, %v2748_v25  ;;  %v2704_v20 = vld [vmem:[#allocation12 + $0x418] sm:$0xff] }
 0x40c   :  { %4379 = vmatpush2.bf16.msra.mxu1 %v13248_v35 }
 0x40d   :  { %4420 = vmatpush2.bf16.msra.mxu0 %v13122_v37  ;;  %4380 = vmatprep.subr.bf16.mxu1 %v13241_v45  ;;  %v13324_v37 = vcombine.low %v4528_v15, %v4532_v36  ;;  %v13195_v45 = vcombine.high %v2744_v53, %v2748_v25  ;;  %v4480_v15 = vld [vmem:[#allocation12 + $0x800] sm:$0xff] }
 0x40e   :  { %4421 = vmatprep.subr.bf16.mxu0 %v13115_v46  ;;  %v13317_v46 = vcombine.high %v4520_v22, %v4524_v30  ;;  %v4484_v36 = vld [vmem:[#allocation12 + $0x820] sm:$0xff] }
 0x40f   :  { %v13277_v25 = vcombine.high %v4480_v15, %v4484_v36 }
 0x410   :  { %4381 = vmatpush2.bf16.msra.mxu1 %v13240_v48  ;;  %v4516_v48 = vld [vmem:[#allocation12 + $0x920] sm:$0xff] }
 0x411   :  { %4422 = vmatpush2.bf16.msra.mxu0 %v13114_v50  ;;  %4382 = vmatprep.subr.bf16.mxu1 %v13233_v21  ;;  %v13316_v21 = vcombine.low %v4520_v22, %v4524_v30  ;;  %v13309_v33 = vcombine.high %v4512_v54, %v4516_v48  ;;  %v2828_v22 = vld [vmem:[#allocation12 + $0x7f8] sm:$0xff]  ;;  %v4600_v30 = vld [vmem:[#allocation12 + $0xbc0] sm:$0xff] }
 0x412   :  { %4423 = vmatprep.subr.bf16.mxu0 %v13107_v32  ;;  %v13187_v32 = vcombine.high %v2736_v47, %v2740_v51 }
 0x414   :  { %4383 = vmatpush2.bf16.msra.mxu1 %v13232_v18  ;;  %v4508_v18 = vld [vmem:[#allocation12 + $0x8e0] sm:$0xff] }
 0x415   :  { %4424 = vmatpush2.bf16.msra.mxu0 %v13106_v26  ;;  %4384 = vmatprep.subr.bf16.mxu1 %v13225_v56  ;;  %v13186_v26 = vcombine.low %v2736_v47, %v2740_v51  ;;  %v13308_v56 = vcombine.low %v4512_v54, %v4516_v48  ;;  %v13301_v43 = vcombine.high %v4504_v24, %v4508_v18  ;;  %v2816_v51 = vld [vmem:[#allocation12 + $0x798] sm:$0xff]  ;;  %v4592_v54 = vld [vmem:[#allocation12 + $0xb80] sm:$0xff] }
 0x416   :  { %4425 = vmatprep.subr.bf16.mxu0 %v13099_v57  ;;  %v13179_v57 = vcombine.high %v2728_v17, %v2732_v19  ;;  %v4596_v48 = vld [vmem:[#allocation12 + $0xba0] sm:$0xff] }
 0x418   :  { %4385 = vmatpush2.bf16.msra.mxu1 %v13224_v60  ;;  %v4500_v60 = vld [vmem:[#allocation12 + $0x8a0] sm:$0xff] }
 0x419   :  { %4426 = vmatpush2.bf16.msra.mxu0 %v13098_v61  ;;  %4386 = vmatprep.subr.bf16.mxu1 %v13217_v63  ;;  %v13178_v61 = vcombine.low %v2728_v17, %v2732_v19  ;;  %v13300_v63 = vcombine.low %v4504_v24, %v4508_v18  ;;  %v13293_v29 = vcombine.high %v4496_v59, %v4500_v60  ;;  %v2812_v17 = vld [vmem:[#allocation12 + $0x778] sm:$0xff]  ;;  %v4584_v19 = vld [vmem:[#allocation12 + $0xb40] sm:$0xff] }
 0x41a   :  { %4427 = vmatprep.subr.bf16.mxu0 %v13091_v44  ;;  %v13171_v44 = vcombine.high %v2720_v55, %v2724_v58  ;;  %v4588_v24 = vld [vmem:[#allocation12 + $0xb60] sm:$0xff] }
 0x41c   :  { %4387 = vmatpush2.bf16.msra.mxu1 %v13216_v4  ;;  %v4492_v4 = vld [vmem:[#allocation12 + $0x860] sm:$0xff] }
 0x41d   :  { %4428 = vmatpush2.bf16.msra.mxu0 %v13090_v1  ;;  %4438 = vmatprep.subr.bf16.mxu1 %v13211_v7  ;;  %v13170_v1 = vcombine.low %v2720_v55, %v2724_v58  ;;  %v13292_v7 = vcombine.low %v4496_v59, %v4500_v60  ;;  %v13285_v8 = vcombine.high %v4488_v0, %v4492_v4  ;;  %v2804_v55 = vld [vmem:[#allocation12 + $0x738] sm:$0xff]  ;;  %v4576_v58 = vld [vmem:[#allocation12 + $0xb00] sm:$0xff] }
 0x41e   :  { %6028 = vmatprep.subr.bf16.mxu0 %v13333_v6  ;;  %v13163_v6 = vcombine.high %v2712_v62, %v2716_v3  ;;  %v4580_v59 = vld [vmem:[#allocation12 + $0xb20] sm:$0xff] }
 0x41f   :  { %4389 = vmatmul.mubr.bf16.vlgmr.msra.gmra.mxu1 %v15497_v2  ;;  %v15520_v27 = vpop.f32.mrf.mxu0 }
 0x420   :  { %4430 = vmatmul.mubr.bf16.vlgmr.msra.gmra.mxu0 %v15469_v9  ;;  %4439 = vmatpush1.bf16.msra.mxu1 %v13210_v14  ;;  %v2708_v14 = vld [vmem:[#allocation12 + $0x438] sm:$0xff] }
 0x421   :  { %4470 = vmatprep.mubr.bf16.mxu1 %v15502_v10  ;;  %6029 = vmatpush1.bf16.msra.mxu0 %v13332_v23  ;;  %v15527_v35 = vpop.f32.mrf.mxu0  ;;  %v13162_v23 = vcombine.low %v2712_v62, %v2716_v3  ;;  %v13155_v53 = vcombine.high %v2704_v20, %v2708_v14  ;;  %v2796_v62 = vld [vmem:[#allocation12 + $0x6f8] sm:$0xff]  ;;  %v4568_v3 = vld [vmem:[#allocation12 + $0xac0] sm:$0xff] }
 0x422   :  { %6060 = vmatprep.mubr.bf16.mxu0 %v15524_v31  ;;  %4440 = vmatprep.subr.bf16.mxu1 %v13203_v12  ;;  %v13284_v12 = vcombine.low %v4488_v0, %v4492_v4  ;;  %v4572_v0 = vld [vmem:[#allocation12 + $0xae0] sm:$0xff] }
 0x423   :  { %6030 = vmatprep.subr.bf16.mxu0 %v13325_v28  ;;  %v4189_v52 = vpop.f32.mrf.mxu0  ;;  %v2824_v28 = vld [vmem:[#allocation12 + $0x7d8] sm:$0xff] }
 0x424   :  { %4441 = vmatpush1.bf16.msra.mxu1 %v13202_v34  ;;  %v4604_v34 = vld [vmem:[#allocation12 + $0xbe0] sm:$0xff]  ;;  %v2820_v52 = vld [vmem:[#allocation12 + $0x7b8] sm:$0xff] }
 0x425   :  { %6031 = vmatpush1.bf16.msra.mxu0 %v13324_v37  ;;  %v4190_v50 = vpop.f32.mrf.mxu0  ;;  %4442 = vmatprep.subr.bf16.mxu1 %v13195_v45  ;;  %v13154_v37 = vcombine.low %v2704_v20, %v2708_v14  ;;  %v13276_v45 = vcombine.low %v4480_v15, %v4484_v36  ;;  %v13397_v47 = vcombine.high %v4600_v30, %v4604_v34  ;;  %v2788_v20 = vld [vmem:[#allocation12 + $0x6b8] sm:$0xff]  ;;  %v4560_v14 = vld [vmem:[#allocation12 + $0xa80] sm:$0xff] }
 0x426   :  { %6032 = vmatprep.subr.bf16.mxu0 %v13317_v46  ;;  %v13275_v46 = vcombine.high %v2824_v28, %v2828_v22  ;;  %v13396_v50 = vcombine.low %v4600_v30, %v4604_v34  ;;  %v13266_v18 = vcombine.low %v2816_v51, %v2820_v52  ;;  %v4564_v15 = vld [vmem:[#allocation12 + $0xaa0] sm:$0xff] }
 0x427   :  { %v4556_v30 = vld [vmem:[#allocation12 + $0xa60] sm:$0xff] }
 0x428   :  { %4443 = vmatpush1.bf16.msra.mxu1 %v13194_v16  ;;  %v13274_v16 = vcombine.low %v2824_v28, %v2828_v22  ;;  %v2780_v28 = vld [vmem:[#allocation12 + $0x678] sm:$0xff]  ;;  %v4552_v22 = vld [vmem:[#allocation12 + $0xa40] sm:$0xff] }
 0x429   :  { %6033 = vmatpush1.bf16.msra.mxu0 %v13316_v21  ;;  %4444 = vmatprep.subr.bf16.mxu1 %v13187_v32  ;;  %v13267_v21 = vcombine.high %v2816_v51, %v2820_v52  ;;  %v13389_v32 = vcombine.high %v4592_v54, %v4596_v48  ;;  %v2772_v51 = vld [vmem:[#allocation12 + $0x638] sm:$0xff]  ;;  %v4544_v52 = vld [vmem:[#allocation12 + $0xa00] sm:$0xff] }
 0x42a   :  { %6034 = vmatprep.subr.bf16.mxu0 %v13309_v33  ;;  %v2808_v33 = vld [vmem:[#allocation12 + $0x758] sm:$0xff] }
 0x42b   :  { %v13258_v60 = vcombine.low %v2808_v33, %v2812_v17 }
 0x42c   :  { %4445 = vmatpush1.bf16.msra.mxu1 %v13186_v26  ;;  %v13388_v26 = vcombine.low %v4592_v54, %v4596_v48  ;;  %v4548_v54 = vld [vmem:[#allocation12 + $0xa20] sm:$0xff] }
 0x42d   :  { %6035 = vmatpush1.bf16.msra.mxu0 %v13308_v56  ;;  %4446 = vmatprep.subr.bf16.mxu1 %v13179_v57  ;;  %v13259_v56 = vcombine.high %v2808_v33, %v2812_v17  ;;  %v13381_v57 = vcombine.high %v4584_v19, %v4588_v24  ;;  %v4668_v33 = vld [vmem:[#allocation12 + $0xde0] sm:$0xff] }
 0x42e   :  { %6036 = vmatprep.subr.bf16.mxu0 %v13301_v43  ;;  %v2800_v43 = vld [vmem:[#allocation12 + $0x718] sm:$0xff]  ;;  %v15530_v17 = vld [vmem:[#allocation13] sm:$0xff] }
 0x42f   :  { %v13250_v4 = vcombine.low %v2800_v43, %v2804_v55 }
 0x430   :  { %4447 = vmatpush1.bf16.msra.mxu1 %v13178_v61  ;;  %v13380_v61 = vcombine.low %v4584_v19, %v4588_v24  ;;  %v4537_v19 = vld [vmem:[#allocation12 + $0x9c8] sm:$0xff] }
 0x431   :  { %6037 = vmatpush1.bf16.msra.mxu0 %v13300_v63  ;;  %4448 = vmatprep.subr.bf16.mxu1 %v13171_v44  ;;  %v13251_v63 = vcombine.high %v2800_v43, %v2804_v55  ;;  %v13373_v44 = vcombine.high %v4576_v58, %v4580_v59  ;;  %v4541_v24 = vld [vmem:[#allocation12 + $0x9e8] sm:$0xff]  ;;  %v4656_v55 = vld [vmem:[#allocation12 + $0xd80] sm:$0xff] }
 0x432   :  { %6038 = vmatprep.subr.bf16.mxu0 %v13293_v29  ;;  %v2792_v29 = vld [vmem:[#allocation12 + $0x6d8] sm:$0xff]  ;;  %v13335_v43 = vcombine.high %v4537_v19, %v4541_v24 }
 0x433   :  { %v13242_v36 = vcombine.low %v2792_v29, %v2796_v62 }
 0x434   :  { %4449 = vmatpush1.bf16.msra.mxu1 %v13170_v1  ;;  %v13372_v1 = vcombine.low %v4576_v58, %v4580_v59  ;;  %v4660_v58 = vld [vmem:[#allocation12 + $0xda0] sm:$0xff]  ;;  %v2838_v59 = vrot.slane %v15530_v17, %v15364_v39 }
 0x435   :  { %6039 = vmatpush1.bf16.msra.mxu0 %v13292_v7  ;;  %4450 = vmatprep.subr.bf16.mxu1 %v13163_v6  ;;  %v13243_v7 = vcombine.high %v2792_v29, %v2796_v62  ;;  %v13365_v6 = vcombine.high %v4568_v3, %v4572_v0  ;;  %v15538_v62 = vrot.slane %v15469_v9, 4  ;;  %v13452_v9 = vcombine.low %v4656_v55, %v4660_v58 }
 0x436   :  { %6040 = vmatprep.subr.bf16.mxu0 %v13285_v8  ;;  %v2784_v8 = vld [vmem:[#allocation12 + $0x698] sm:$0xff] }
 0x437   :  { %v13234_v34 = vcombine.low %v2784_v8, %v2788_v20 }
 0x438   :  { %4451 = vmatpush1.bf16.msra.mxu1 %v13162_v23  ;;  %v13364_v23 = vcombine.low %v4568_v3, %v4572_v0  ;;  %v13453_v3 = vcombine.high %v4656_v55, %v4660_v58  ;;  %v4648_v0 = vld [vmem:[#allocation12 + $0xd40] sm:$0xff] }
 0x439   :  { %6041 = vmatpush1.bf16.msra.mxu0 %v13284_v12  ;;  %4452 = vmatprep.subr.bf16.mxu1 %v13155_v53  ;;  %v13235_v12 = vcombine.high %v2784_v8, %v2788_v20  ;;  %v13357_v53 = vcombine.high %v4560_v14, %v4564_v15  ;;  %v4521_v20 = vld [vmem:[#allocation12 + $0x948] sm:$0xff] }
 0x43a   :  { %6042 = vmatprep.subr.bf16.mxu0 %v13277_v25  ;;  %v2776_v25 = vld [vmem:[#allocation12 + $0x658] sm:$0xff] }
 0x43b   :  { %v13226_v48 = vcombine.low %v2776_v25, %v2780_v28 }
 0x43c   :  { %4453 = vmatpush1.bf16.msra.mxu1 %v13154_v37  ;;  %v13356_v37 = vcombine.low %v4560_v14, %v4564_v15  ;;  %v4525_v14 = vld [vmem:[#allocation12 + $0x968] sm:$0xff] }
 0x43d   :  { %6043 = vmatpush1.bf16.msra.mxu0 %v13276_v45  ;;  %4454 = vmatprep.subr.bf16.mxu1 %v13275_v46  ;;  %v13227_v45 = vcombine.high %v2776_v25, %v2780_v28  ;;  %v13349_v46 = vcombine.high %v4552_v22, %v4556_v30  ;;  %v4640_v25 = vld [vmem:[#allocation12 + $0xd00] sm:$0xff] }
 0x43e   :  { %6044 = vmatprep.subr.bf16.mxu0 %v13397_v47  ;;  %v2768_v47 = vld [vmem:[#allocation12 + $0x618] sm:$0xff]  ;;  %v4644_v28 = vld [vmem:[#allocation12 + $0xd20] sm:$0xff] }
 0x440   :  { %4455 = vmatpush2.bf16.msra.mxu1 %v13274_v16  ;;  %v13348_v16 = vcombine.low %v4552_v22, %v4556_v30 }
 0x441   :  { %6045 = vmatpush2.bf16.msra.mxu0 %v13396_v50  ;;  %4456 = vmatprep.subr.bf16.mxu1 %v13267_v21  ;;  %v13219_v50 = vcombine.high %v2768_v47, %v2772_v51  ;;  %v13341_v21 = vcombine.high %v4544_v52, %v4548_v54 }
 0x442   :  { %6046 = vmatprep.subr.bf16.mxu0 %v13389_v32  ;;  %v4664_v32 = vld [vmem:[#allocation12 + $0xdc0] sm:$0xff] }
 0x444   :  { %4457 = vmatpush2.bf16.msra.mxu1 %v13266_v18  ;;  %v13218_v18 = vcombine.low %v2768_v47, %v2772_v51  ;;  %v13318_v51 = vcombine.low %v4521_v20, %v4525_v14 }
 0x445   :  { %6047 = vmatpush2.bf16.msra.mxu0 %v13388_v26  ;;  %4458 = vmatprep.subr.bf16.mxu1 %v13259_v56  ;;  %v13340_v26 = vcombine.low %v4544_v52, %v4548_v54  ;;  %v13461_v56 = vcombine.high %v4664_v32, %v4668_v33  ;;  %v13437_v52 = vcombine.high %v4640_v25, %v4644_v28 }
 0x446   :  { %6048 = vmatprep.subr.bf16.mxu0 %v13381_v57  ;;  %v2834_v57 = vrot.slane %v15530_v17, %v15370_v41 }
 0x448   :  { %4459 = vmatpush2.bf16.msra.mxu1 %v13258_v60  ;;  %v13460_v60 = vcombine.low %v4664_v32, %v4668_v33  ;;  %v4186_v29 = vadd.f32 %v15520_v27, %v2834_v57  ;;  %v4188_v27 = vadd.f32 %v15527_v35, %v2838_v59  ;;  %v13319_v35 = vcombine.high %v4521_v20, %v4525_v14  ;;  %v4501_v57 = vld [vmem:[#allocation12 + $0x8a8] sm:$0xff] }
 0x449   :  { %6049 = vmatpush2.bf16.msra.mxu0 %v13380_v61  ;;  %4460 = vmatprep.subr.bf16.mxu1 %v13251_v63  ;;  %v4529_v61 = vld [vmem:[#allocation12 + $0x988] sm:$0xff]  ;;  %v13436_v32 = vcombine.low %v4640_v25, %v4644_v28 }
 0x44a   :  { %6050 = vmatprep.subr.bf16.mxu0 %v13373_v44  ;;  %v4533_v63 = vld [vmem:[#allocation12 + $0x9a8] sm:$0xff]  ;;  %v13334_v44 = vcombine.low %v4537_v19, %v4541_v24 }
 0x44b   :  { %v13327_v8 = vcombine.high %v4529_v61, %v4533_v63  ;;  %v4481_v20 = vld [vmem:[#allocation12 + $0x808] sm:$0xff] }
 0x44c   :  { %4461 = vmatpush2.bf16.msra.mxu1 %v13250_v4  ;;  %v4652_v4 = vld [vmem:[#allocation12 + $0xd60] sm:$0xff]  ;;  %v4485_v14 = vld [vmem:[#allocation12 + $0x828] sm:$0xff] }
 0x44d   :  { %6051 = vmatpush2.bf16.msra.mxu0 %v13372_v1  ;;  %4462 = vmatprep.subr.bf16.mxu1 %v13243_v7  ;;  %v4601_v25 = vld [vmem:[#allocation12 + $0xbc8] sm:$0xff] }
 0x44e   :  { %6052 = vmatprep.subr.bf16.mxu0 %v13365_v6  ;;  %v15544_v6 = vrot.slane %v15502_v10, 4  ;;  %v13445_v10 = vcombine.high %v4648_v0, %v4652_v4  ;;  %v4605_v28 = vld [vmem:[#allocation12 + $0xbe8] sm:$0xff] }
 0x450   :  { %4463 = vmatpush2.bf16.msra.mxu1 %v13242_v36 }
 0x451   :  { %6053 = vmatpush2.bf16.msra.mxu0 %v13364_v23  ;;  %4464 = vmatprep.subr.bf16.mxu1 %v13235_v12  ;;  %v13326_v12 = vcombine.low %v4529_v61, %v4533_v63  ;;  %v4620_v61 = vld [vmem:[#allocation12 + $0xc60] sm:$0xff]  ;;  %v4489_v63 = vld [vmem:[#allocation12 + $0x848] sm:$0xff] }
 0x452   :  { %6054 = vmatprep.subr.bf16.mxu0 %v13357_v53 }
 0x454   :  { %4465 = vmatpush2.bf16.msra.mxu1 %v13234_v34  ;;  %v4513_v34 = vld [vmem:[#allocation12 + $0x908] sm:$0xff] }
 0x455   :  { %6055 = vmatpush2.bf16.msra.mxu0 %v13356_v37  ;;  %4466 = vmatprep.subr.bf16.mxu1 %v13227_v45  ;;  %v4517_v37 = vld [vmem:[#allocation12 + $0x928] sm:$0xff]  ;;  %v13444_v45 = vcombine.low %v4648_v0, %v4652_v4 }
 0x456   :  { %6056 = vmatprep.subr.bf16.mxu0 %v13349_v46  ;;  %v13311_v54 = vcombine.high %v4513_v34, %v4517_v37  ;;  %v13310_v33 = vcombine.low %v4513_v34, %v4517_v37  ;;  %v13399_v37 = vcombine.high %v4601_v25, %v4605_v28 }
 0x458   :  { %4467 = vmatpush2.bf16.msra.mxu1 %v13226_v48  ;;  %v4632_v48 = vld [vmem:[#allocation12 + $0xcc0] sm:$0xff] }
 0x459   :  { %6057 = vmatpush2.bf16.msra.mxu0 %v13348_v16  ;;  %4468 = vmatprep.subr.bf16.mxu1 %v13219_v50  ;;  %v4636_v16 = vld [vmem:[#allocation12 + $0xce0] sm:$0xff]  ;;  %v4505_v50 = vld [vmem:[#allocation12 + $0x8c8] sm:$0xff] }
 0x45a   :  { %6058 = vmatprep.subr.bf16.mxu0 %v13341_v21  ;;  %v4509_v21 = vld [vmem:[#allocation12 + $0x8e8] sm:$0xff]  ;;  %v13429_v19 = vcombine.high %v4632_v48, %v4636_v16 }
 0x45b   :  { %v13303_v24 = vcombine.high %v4505_v50, %v4509_v21  ;;  %v13302_v55 = vcombine.low %v4505_v50, %v4509_v21  ;;  %v4712_v50 = vld [vmem:[#allocation12 + $0xf40] sm:$0xff] }
 0x45c   :  { %4469 = vmatpush2.bf16.msra.mxu1 %v13218_v18  ;;  %v4624_v18 = vld [vmem:[#allocation12 + $0xc80] sm:$0xff] }
 0x45d   :  { %6059 = vmatpush2.bf16.msra.mxu0 %v13340_v26  ;;  %6069 = vmatprep.subr.bf16.mxu1 %v13461_v56  ;;  %v4628_v26 = vld [vmem:[#allocation12 + $0xca0] sm:$0xff]  ;;  %v4497_v56 = vld [vmem:[#allocation12 + $0x888] sm:$0xff] }
 0x45e   :  { %6110 = vmatprep.subr.bf16.mxu0 %v13335_v43  ;;  %v13428_v43 = vcombine.low %v4632_v48, %v4636_v16  ;;  %v13421_v58 = vcombine.high %v4624_v18, %v4628_v26  ;;  %v13295_v59 = vcombine.high %v4497_v56, %v4501_v57  ;;  %v4716_v21 = vld [vmem:[#allocation12 + $0xf60] sm:$0xff] }
 0x45f   :  { %4471 = vmatmul.mubr.bf16.vlgmr.msra.gmra.mxu1 %v15497_v2  ;;  %v4226_v1 = vpop.f32.mrf.mxu1  ;;  %v15541_v7 = vpop.f32.mrf.mxu0 }
 0x460   :  { %v15547_v15 = vadd.f32 %v4226_v1, %v4186_v29  ;;  %6061 = vmatmul.mubr.bf16.vlgmr.msra.gmra.mxu0 %v15538_v62  ;;  %6070 = vmatpush1.bf16.msra.mxu1 %v13460_v60  ;;  %v4616_v60 = vld [vmem:[#allocation12 + $0xc40] sm:$0xff]  ;;  %v13420_v29 = vcombine.low %v4624_v18, %v4628_v26  ;;  %v13509_v18 = vcombine.high %v4712_v50, %v4716_v21 }
 0x461   :  { %6101 = vmatprep.mubr.bf16.mxu1 %v15544_v6  ;;  %6111 = vmatpush1.bf16.msra.mxu0 %v13334_v44  ;;  %v4228_v36 = vpop.f32.mrf.mxu1  ;;  %v15551_v23 = vpop.f32.mrf.mxu0  ;;  %v4493_v44 = vld [vmem:[#allocation12 + $0x868] sm:$0xff]  ;;  %v13413_v0 = vcombine.high %v4616_v60, %v4620_v61  ;;  %v4608_v1 = vld [vmem:[#allocation12 + $0xc00] sm:$0xff] }
 0x462   :  { %6142 = vmatprep.mubr.bf16.mxu0 %v15524_v31  ;;  %v15554_v53 = vadd.f32 %v4228_v36, %v4188_v27  ;;  %6071 = vmatprep.subr.bf16.mxu1 %v13453_v3  ;;  %v13294_v3 = vcombine.low %v4497_v56, %v4501_v57  ;;  %v13287_v4 = vcombine.high %v4489_v63, %v4493_v44  ;;  %v4704_v56 = vld [vmem:[#allocation12 + $0xf00] sm:$0xff] }
 0x463   :  { %v4230_v22 = vpop.f32.mrf.mxu1  ;;  %v4271_v30 = vpop.f32.mrf.mxu0  ;;  %6112 = vmatprep.subr.bf16.mxu0 %v13327_v8  ;;  %v4612_v8 = vld [vmem:[#allocation12 + $0xc20] sm:$0xff]  ;;  %v13412_v27 = vcombine.low %v4616_v60, %v4620_v61 }
 0x464   :  { %6072 = vmatpush1.bf16.msra.mxu1 %v13452_v9  ;;  %v13286_v9 = vcombine.low %v4489_v63, %v4493_v44  ;;  %v13405_v36 = vcombine.high %v4608_v1, %v4612_v8  ;;  %v13404_v22 = vcombine.low %v4608_v1, %v4612_v8  ;;  %v13278_v30 = vcombine.low %v4481_v20, %v4485_v14  ;;  %v4708_v57 = vld [vmem:[#allocation12 + $0xf20] sm:$0xff] }
 0x465   :  { %6113 = vmatpush1.bf16.msra.mxu0 %v13326_v12  ;;  %v4231_v46 = vpop.f32.mrf.mxu1  ;;  %v4272_v47 = vpop.f32.mrf.mxu0  ;;  %6073 = vmatprep.subr.bf16.mxu1 %v13445_v10  ;;  %v13279_v12 = vcombine.high %v4481_v20, %v4485_v14  ;;  %v4728_v10 = vld [vmem:[#allocation12 + $0xfc0] sm:$0xff]  ;;  %v13501_v60 = vcombine.high %v4704_v56, %v4708_v57 }
 0x466   :  { %6114 = vmatprep.subr.bf16.mxu0 %v13319_v35  ;;  %v4732_v35 = vld [vmem:[#allocation12 + $0xfe0] sm:$0xff]  ;;  %v4593_v47 = vld [vmem:[#allocation12 + $0xb88] sm:$0xff] }
 0x467   :  { %v13525_v34 = vcombine.high %v4728_v10, %v4732_v35  ;;  %v4724_v46 = vld [vmem:[#allocation12 + $0xfa0] sm:$0xff] }
 0x468   :  { %6074 = vmatpush1.bf16.msra.mxu1 %v13444_v45  ;;  %v4720_v45 = vld [vmem:[#allocation12 + $0xf80] sm:$0xff] }
 0x469   :  { %6115 = vmatpush1.bf16.msra.mxu0 %v13318_v51  ;;  %6075 = vmatprep.subr.bf16.mxu1 %v13437_v52  ;;  %v4597_v51 = vld [vmem:[#allocation12 + $0xba8] sm:$0xff]  ;;  %v13524_v52 = vcombine.low %v4728_v10, %v4732_v35  ;;  %v13517_v48 = vcombine.high %v4720_v45, %v4724_v46  ;;  %v4696_v63 = vld [vmem:[#allocation12 + $0xec0] sm:$0xff] }
 0x46a   :  { %6116 = vmatprep.subr.bf16.mxu0 %v13311_v54  ;;  %v13398_v54 = vcombine.low %v4601_v25, %v4605_v28  ;;  %v13391_v16 = vcombine.high %v4593_v47, %v4597_v51  ;;  %v4700_v44 = vld [vmem:[#allocation12 + $0xee0] sm:$0xff] }
 0x46b   :  { %v13493_v1 = vcombine.high %v4696_v63, %v4700_v44  ;;  %v4688_v20 = vld [vmem:[#allocation12 + $0xe80] sm:$0xff] }
 0x46c   :  { %6076 = vmatpush1.bf16.msra.mxu1 %v13436_v32  ;;  %v4585_v32 = vld [vmem:[#allocation12 + $0xb48] sm:$0xff]  ;;  %v4692_v14 = vld [vmem:[#allocation12 + $0xea0] sm:$0xff] }
 0x46d   :  { %6117 = vmatpush1.bf16.msra.mxu0 %v13310_v33  ;;  %6077 = vmatprep.subr.bf16.mxu1 %v13429_v19  ;;  %v4589_v33 = vld [vmem:[#allocation12 + $0xb68] sm:$0xff]  ;;  %v13516_v19 = vcombine.low %v4720_v45, %v4724_v46  ;;  %v13485_v10 = vcombine.high %v4688_v20, %v4692_v14  ;;  %v4680_v25 = vld [vmem:[#allocation12 + $0xe40] sm:$0xff] }
 0x46e   :  { %6118 = vmatprep.subr.bf16.mxu0 %v13303_v24  ;;  %v13390_v24 = vcombine.low %v4593_v47, %v4597_v51  ;;  %v13383_v26 = vcombine.high %v4585_v32, %v4589_v33  ;;  %v4684_v28 = vld [vmem:[#allocation12 + $0xe60] sm:$0xff] }
 0x46f   :  { %v13477_v45 = vcombine.high %v4680_v25, %v4684_v28  ;;  %v4672_v47 = vld [vmem:[#allocation12 + $0xe00] sm:$0xff] }
 0x470   :  { %6078 = vmatpush1.bf16.msra.mxu1 %v13428_v43  ;;  %v4577_v43 = vld [vmem:[#allocation12 + $0xb08] sm:$0xff]  ;;  %v4676_v51 = vld [vmem:[#allocation12 + $0xe20] sm:$0xff] }
 0x471   :  { %6119 = vmatpush1.bf16.msra.mxu0 %v13302_v55  ;;  %6079 = vmatprep.subr.bf16.mxu1 %v13421_v58  ;;  %v4581_v55 = vld [vmem:[#allocation12 + $0xb28] sm:$0xff]  ;;  %v13508_v58 = vcombine.low %v4712_v50, %v4716_v21  ;;  %v13469_v50 = vcombine.high %v4672_v47, %v4676_v51 }
 0x472   :  { %6120 = vmatprep.subr.bf16.mxu0 %v13295_v59  ;;  %v13382_v59 = vcombine.low %v4585_v32, %v4589_v33  ;;  %v13375_v61 = vcombine.high %v4577_v43, %v4581_v55  ;;  %v4665_v32 = vld [vmem:[#allocation12 + $0xdc8] sm:$0xff] }
 0x473   :  { %v4669_v33 = vld [vmem:[#allocation12 + $0xde8] sm:$0xff] }
 0x474   :  { %6080 = vmatpush1.bf16.msra.mxu1 %v13420_v29  ;;  %v4569_v29 = vld [vmem:[#allocation12 + $0xac8] sm:$0xff] }
 0x475   :  { %6121 = vmatpush1.bf16.msra.mxu0 %v13294_v3  ;;  %6081 = vmatprep.subr.bf16.mxu1 %v13413_v0  ;;  %v4573_v3 = vld [vmem:[#allocation12 + $0xae8] sm:$0xff]  ;;  %v13500_v0 = vcombine.low %v4704_v56, %v4708_v57  ;;  %v13463_v56 = vcombine.high %v4665_v32, %v4669_v33  ;;  %v2842_v57 = vrot.slane %v15530_v17, %v15373_v42 }
 0x476   :  { %6122 = vmatprep.subr.bf16.mxu0 %v13287_v4  ;;  %v13374_v4 = vcombine.low %v4577_v43, %v4581_v55  ;;  %v13367_v8 = vcombine.high %v4569_v29, %v4573_v3  ;;  %v4657_v55 = vld [vmem:[#allocation12 + $0xd88] sm:$0xff] }
 0x478   :  { %6082 = vmatpush1.bf16.msra.mxu1 %v13412_v27  ;;  %v4561_v27 = vld [vmem:[#allocation12 + $0xa88] sm:$0xff] }
 0x479   :  { %6123 = vmatpush1.bf16.msra.mxu0 %v13286_v9  ;;  %6083 = vmatprep.subr.bf16.mxu1 %v13405_v36  ;;  %v4565_v9 = vld [vmem:[#allocation12 + $0xaa8] sm:$0xff]  ;;  %v13492_v36 = vcombine.low %v4696_v63, %v4700_v44  ;;  %v4534_v63 = vld [vmem:[#allocation12 + $0x9b0] sm:$0xff]  ;;  %v15561_v44 = vrot.slane %v15497_v2, 4 }
 0x47a   :  { %6124 = vmatprep.subr.bf16.mxu0 %v13279_v12  ;;  %v13366_v12 = vcombine.low %v4569_v29, %v4573_v3  ;;  %v13359_v35 = vcombine.high %v4561_v27, %v4565_v9  ;;  %v4268_v3 = vadd.f32 %v15541_v7, %v2842_v57  ;;  %v4629_v57 = vld [vmem:[#allocation12 + $0xca8] sm:$0xff] }
 0x47c   :  { %6084 = vmatpush1.bf16.msra.mxu1 %v13404_v22  ;;  %v4553_v22 = vld [vmem:[#allocation12 + $0xa48] sm:$0xff] }
 0x47d   :  { %6125 = vmatpush1.bf16.msra.mxu0 %v13278_v30  ;;  %6085 = vmatprep.subr.bf16.mxu1 %v13525_v34  ;;  %v4557_v30 = vld [vmem:[#allocation12 + $0xa68] sm:$0xff]  ;;  %v13484_v34 = vcombine.low %v4688_v20, %v4692_v14  ;;  %v4522_v14 = vld [vmem:[#allocation12 + $0x950] sm:$0xff] }
 0x47e   :  { %6126 = vmatprep.subr.bf16.mxu0 %v13399_v37  ;;  %v13358_v37 = vcombine.low %v4561_v27, %v4565_v9  ;;  %v13351_v46 = vcombine.high %v4553_v22, %v4557_v30  ;;  %v4526_v27 = vld [vmem:[#allocation12 + $0x970] sm:$0xff] }
 0x480   :  { %6086 = vmatpush2.bf16.msra.mxu1 %v13524_v52  ;;  %v4545_v52 = vld [vmem:[#allocation12 + $0xa08] sm:$0xff] }
 0x481   :  { %6127 = vmatpush2.bf16.msra.mxu0 %v13398_v54  ;;  %6087 = vmatprep.subr.bf16.mxu1 %v13517_v48  ;;  %v4549_v54 = vld [vmem:[#allocation12 + $0xa28] sm:$0xff]  ;;  %v13476_v48 = vcombine.low %v4680_v25, %v4684_v28 }
 0x482   :  { %6128 = vmatprep.subr.bf16.mxu0 %v13391_v16  ;;  %v13350_v16 = vcombine.low %v4553_v22, %v4557_v30  ;;  %v13343_v21 = vcombine.high %v4545_v52, %v4549_v54  ;;  %v4641_v22 = vld [vmem:[#allocation12 + $0xd08] sm:$0xff] }
 0x483   :  { %v4645_v30 = vld [vmem:[#allocation12 + $0xd28] sm:$0xff] }
 0x484   :  { %6088 = vmatpush2.bf16.msra.mxu1 %v13516_v19  ;;  %v4538_v19 = vld [vmem:[#allocation12 + $0x9d0] sm:$0xff] }
 0x485   :  { %6129 = vmatpush2.bf16.msra.mxu0 %v13390_v24  ;;  %6089 = vmatprep.subr.bf16.mxu1 %v13509_v18  ;;  %v4542_v24 = vld [vmem:[#allocation12 + $0x9f0] sm:$0xff]  ;;  %v13468_v18 = vcombine.low %v4672_v47, %v4676_v51 }
 0x486   :  { %6130 = vmatprep.subr.bf16.mxu0 %v13383_v26  ;;  %v13342_v26 = vcombine.low %v4545_v52, %v4549_v54  ;;  %v13337_v43 = vcombine.high %v4538_v19, %v4542_v24  ;;  %v13336_v29 = vcombine.low %v4538_v19, %v4542_v24  ;;  %v13320_v52 = vcombine.low %v4522_v14, %v4526_v27 }
 0x487   :  { %v13439_v54 = vcombine.high %v4641_v22, %v4645_v30  ;;  %v13438_v19 = vcombine.low %v4641_v22, %v4645_v30  ;;  %v4729_v22 = vld [vmem:[#allocation12 + $0xfc8] sm:$0xff] }
 0x488   :  { %6090 = vmatpush2.bf16.msra.mxu1 %v13508_v58  ;;  %v4661_v58 = vld [vmem:[#allocation12 + $0xda8] sm:$0xff] }
 0x489   :  { %6131 = vmatpush2.bf16.msra.mxu0 %v13382_v59  ;;  %6091 = vmatprep.subr.bf16.mxu1 %v13501_v60  ;;  %v2846_v59 = vrot.slane %v15530_v17, %v15367_v40  ;;  %v13462_v60 = vcombine.low %v4665_v32, %v4669_v33  ;;  %v13454_v7 = vcombine.low %v4657_v55, %v4661_v58  ;;  %v4506_v32 = vld [vmem:[#allocation12 + $0x8d0] sm:$0xff]  ;;  %v4733_v30 = vld [vmem:[#allocation12 + $0xfe8] sm:$0xff] }
 0x48a   :  { %6132 = vmatprep.subr.bf16.mxu0 %v13375_v61  ;;  %v4530_v61 = vld [vmem:[#allocation12 + $0x990] sm:$0xff] }
 0x48b   :  { %v13329_v20 = vcombine.high %v4530_v61, %v4534_v63  ;;  %v4270_v9 = vadd.f32 %v15551_v23, %v2846_v59  ;;  %v13321_v23 = vcombine.high %v4522_v14, %v4526_v27  ;;  %v4510_v33 = vld [vmem:[#allocation12 + $0x8f0] sm:$0xff]  ;;  %v4609_v14 = vld [vmem:[#allocation12 + $0xc08] sm:$0xff] }
 0x48c   :  { %6092 = vmatpush2.bf16.msra.mxu1 %v13500_v0  ;;  %v13455_v0 = vcombine.high %v4657_v55, %v4661_v58  ;;  %v4502_v55 = vld [vmem:[#allocation12 + $0x8b0] sm:$0xff]  ;;  %v13304_v59 = vcombine.low %v4506_v32, %v4510_v33  ;;  %v4613_v27 = vld [vmem:[#allocation12 + $0xc28] sm:$0xff] }
 0x48d   :  { %6133 = vmatpush2.bf16.msra.mxu0 %v13374_v4  ;;  %6093 = vmatprep.subr.bf16.mxu1 %v13493_v1  ;;  %v4649_v4 = vld [vmem:[#allocation12 + $0xd48] sm:$0xff] }
 0x48e   :  { %6134 = vmatprep.subr.bf16.mxu0 %v13367_v8  ;;  %v4653_v1 = vld [vmem:[#allocation12 + $0xd68] sm:$0xff] }
 0x48f   :  { %v13446_v47 = vcombine.low %v4649_v4, %v4653_v1 }
 0x490   :  { %6094 = vmatpush2.bf16.msra.mxu1 %v13492_v36 }
 0x491   :  { %6135 = vmatpush2.bf16.msra.mxu0 %v13366_v12  ;;  %6095 = vmatprep.subr.bf16.mxu1 %v13485_v10  ;;  %v13328_v10 = vcombine.low %v4530_v61, %v4534_v63  ;;  %v4617_v63 = vld [vmem:[#allocation12 + $0xc48] sm:$0xff] }
 0x492   :  { %6136 = vmatprep.subr.bf16.mxu0 %v13359_v35  ;;  %v13447_v35 = vcombine.high %v4649_v4, %v4653_v1 }
 0x494   :  { %6096 = vmatpush2.bf16.msra.mxu1 %v13484_v34 }
 0x495   :  { %6137 = vmatpush2.bf16.msra.mxu0 %v13358_v37  ;;  %6097 = vmatprep.subr.bf16.mxu1 %v13477_v45  ;;  %v4514_v37 = vld [vmem:[#allocation12 + $0x910] sm:$0xff] }
 0x496   :  { %6138 = vmatprep.subr.bf16.mxu0 %v13351_v46  ;;  %v4518_v45 = vld [vmem:[#allocation12 + $0x930] sm:$0xff] }
 0x497   :  { %v13312_v24 = vcombine.low %v4514_v37, %v4518_v45 }
 0x498   :  { %6098 = vmatpush2.bf16.msra.mxu1 %v13476_v48 }
 0x499   :  { %6139 = vmatpush2.bf16.msra.mxu0 %v13350_v16  ;;  %6099 = vmatprep.subr.bf16.mxu1 %v13469_v50  ;;  %v13313_v16 = vcombine.high %v4514_v37, %v4518_v45  ;;  %v4633_v50 = vld [vmem:[#allocation12 + $0xcc8] sm:$0xff]  ;;  %v4606_v37 = vld [vmem:[#allocation12 + $0xbf0] sm:$0xff]  ;;  %v13406_v45 = vcombine.low %v4609_v14, %v4613_v27 }
 0x49a   :  { %6140 = vmatprep.subr.bf16.mxu0 %v13343_v21  ;;  %v4637_v21 = vld [vmem:[#allocation12 + $0xce8] sm:$0xff] }
 0x49b   :  { %v13430_v58 = vcombine.low %v4633_v50, %v4637_v21 }
 0x49c   :  { %6100 = vmatpush2.bf16.msra.mxu1 %v13468_v18  ;;  %v13431_v18 = vcombine.high %v4633_v50, %v4637_v21  ;;  %v13526_v50 = vcombine.low %v4729_v22, %v4733_v30 }
 0x49d   :  { %6141 = vmatpush2.bf16.msra.mxu0 %v13342_v26  ;;  %6151 = vmatprep.subr.bf16.mxu1 %v13463_v56  ;;  %v13305_v26 = vcombine.high %v4506_v32, %v4510_v33  ;;  %v4625_v56 = vld [vmem:[#allocation12 + $0xc88] sm:$0xff] }
 0x49e   :  { %6192 = vmatprep.subr.bf16.mxu0 %v13337_v43  ;;  %v4498_v43 = vld [vmem:[#allocation12 + $0x890] sm:$0xff]  ;;  %v13422_v4 = vcombine.low %v4625_v56, %v4629_v57 }
 0x49f   :  { %v4308_v8 = vpop.f32.mrf.mxu1  ;;  %6102 = vmatmul.mubr.bf16.vlgmr.msra.gmra.mxu1 %v15561_v44  ;;  %v13297_v61 = vcombine.high %v4498_v43, %v4502_v55  ;;  %v13296_v1 = vcombine.low %v4498_v43, %v4502_v55 }
 0x4a0   :  { %v15566_v36 = vadd.f32 %v4308_v8, %v4268_v3  ;;  %v15568_v2 = vpop.f32.mrf.mxu0  ;;  %6143 = vmatmul.mubr.bf16.vlgmr.msra.gmra.mxu0 %v15538_v62  ;;  %6152 = vmatpush1.bf16.msra.mxu1 %v13462_v60  ;;  %v13423_v60 = vcombine.high %v4625_v56, %v4629_v57  ;;  %v4490_v3 = vld [vmem:[#allocation12 + $0x850] sm:$0xff] }
 0x4a1   :  { %6183 = vmatprep.mubr.bf16.mxu1 %v15544_v6  ;;  %v4310_v12 = vpop.f32.mrf.mxu1  ;;  %6193 = vmatpush1.bf16.msra.mxu0 %v13336_v29  ;;  %v4621_v29 = vld [vmem:[#allocation12 + $0xc68] sm:$0xff] }
 0x4a2   :  { %v15572_v25 = vadd.f32 %v4310_v12, %v4270_v9  ;;  %6224 = vmatprep.mubr.bf16.mxu0 %v15524_v31  ;;  %v15575_v28 = vpop.f32.mrf.mxu0  ;;  %6153 = vmatprep.subr.bf16.mxu1 %v13455_v0  ;;  %v4494_v0 = vld [vmem:[#allocation12 + $0x870] sm:$0xff]  ;;  %v13415_v8 = vcombine.high %v4617_v63, %v4621_v29  ;;  %v13414_v12 = vcombine.low %v4617_v63, %v4621_v29 }
 0x4a3   :  { %v4312_v34 = vpop.f32.mrf.mxu1  ;;  %6194 = vmatprep.subr.bf16.mxu0 %v13329_v20  ;;  %v13289_v20 = vcombine.high %v4490_v3, %v4494_v0  ;;  %v4482_v9 = vld [vmem:[#allocation12 + $0x810] sm:$0xff] }
 0x4a4   :  { %v4353_v46 = vpop.f32.mrf.mxu0  ;;  %6154 = vmatpush1.bf16.msra.mxu1 %v13454_v7  ;;  %v4486_v7 = vld [vmem:[#allocation12 + $0x830] sm:$0xff] }
 0x4a5   :  { %v4313_v51 = vpop.f32.mrf.mxu1  ;;  %6195 = vmatpush1.bf16.msra.mxu0 %v13328_v10  ;;  %6155 = vmatprep.subr.bf16.mxu1 %v13447_v35  ;;  %v13288_v10 = vcombine.low %v4490_v3, %v4494_v0  ;;  %v13407_v35 = vcombine.high %v4609_v14, %v4613_v27  ;;  %v4602_v34 = vld [vmem:[#allocation12 + $0xbd0] sm:$0xff]  ;;  %v13280_v46 = vcombine.low %v4482_v9, %v4486_v7 }
 0x4a6   :  { %v4354_v48 = vpop.f32.mrf.mxu0  ;;  %6196 = vmatprep.subr.bf16.mxu0 %v13321_v23  ;;  %v13281_v23 = vcombine.high %v4482_v9, %v4486_v7  ;;  %v13401_v51 = vcombine.high %v4602_v34, %v4606_v37  ;;  %v13400_v21 = vcombine.low %v4602_v34, %v4606_v37 }
 0x4a7   :  { %v4594_v48 = vld [vmem:[#allocation12 + $0xb90] sm:$0xff] }
 0x4a8   :  { %6156 = vmatpush1.bf16.msra.mxu1 %v13446_v47  ;;  %v13527_v47 = vcombine.high %v4729_v22, %v4733_v30 }
 0x4a9   :  { %6197 = vmatpush1.bf16.msra.mxu0 %v13320_v52  ;;  %6157 = vmatprep.subr.bf16.mxu1 %v13439_v54  ;;  %v4721_v52 = vld [vmem:[#allocation12 + $0xf88] sm:$0xff] }
 0x4aa   :  { %6198 = vmatprep.subr.bf16.mxu0 %v13313_v16  ;;  %v4725_v54 = vld [vmem:[#allocation12 + $0xfa8] sm:$0xff]  ;;  %v4598_v16 = vld [vmem:[#allocation12 + $0xbb0] sm:$0xff] }
 0x4ab   :  { %v13519_v32 = vcombine.high %v4721_v52, %v4725_v54  ;;  %v13393_v33 = vcombine.high %v4594_v48, %v4598_v16  ;;  %v13518_v56 = vcombine.low %v4721_v52, %v4725_v54  ;;  %v13392_v57 = vcombine.low %v4594_v48, %v4598_v16 }
 0x4ac   :  { %6158 = vmatpush1.bf16.msra.mxu1 %v13438_v19  ;;  %v4713_v19 = vld [vmem:[#allocation12 + $0xf48] sm:$0xff] }
 0x4ad   :  { %6199 = vmatpush1.bf16.msra.mxu0 %v13312_v24  ;;  %6159 = vmatprep.subr.bf16.mxu1 %v13431_v18  ;;  %v4717_v24 = vld [vmem:[#allocation12 + $0xf68] sm:$0xff]  ;;  %v4586_v18 = vld [vmem:[#allocation12 + $0xb50] sm:$0xff] }
 0x4ae   :  { %6200 = vmatprep.subr.bf16.mxu0 %v13305_v26  ;;  %v4590_v26 = vld [vmem:[#allocation12 + $0xb70] sm:$0xff]  ;;  %v13511_v43 = vcombine.high %v4713_v19, %v4717_v24  ;;  %v13510_v63 = vcombine.low %v4713_v19, %v4717_v24 }
 0x4af   :  { %v13385_v55 = vcombine.high %v4586_v18, %v4590_v26  ;;  %v13384_v29 = vcombine.low %v4586_v18, %v4590_v26  ;;  %v2849_v26 = vsub.s32 4, %v15361_v38 }
 0x4b0   :  { %6160 = vmatpush1.bf16.msra.mxu1 %v13430_v58  ;;  %v4705_v58 = vld [vmem:[#allocation12 + $0xf08] sm:$0xff] }
 0x4b1   :  { %6201 = vmatpush1.bf16.msra.mxu0 %v13304_v59  ;;  %6161 = vmatprep.subr.bf16.mxu1 %v13423_v60  ;;  %v4709_v59 = vld [vmem:[#allocation12 + $0xf28] sm:$0xff]  ;;  %v4578_v60 = vld [vmem:[#allocation12 + $0xb10] sm:$0xff] }
 0x4b2   :  { %6202 = vmatprep.subr.bf16.mxu0 %v13297_v61  ;;  %v4582_v61 = vld [vmem:[#allocation12 + $0xb30] sm:$0xff]  ;;  %v13503_v3 = vcombine.high %v4705_v58, %v4709_v59  ;;  %v13502_v14 = vcombine.low %v4705_v58, %v4709_v59  ;;  %v4543_v58 = vld [vmem:[#allocation12 + $0x9f8] sm:$0xff]  ;;  %v2853_v59 = vsub.s32 5, %v15361_v38 }
 0x4b3   :  { %v13377_v0 = vcombine.high %v4578_v60, %v4582_v61  ;;  %v13376_v27 = vcombine.low %v4578_v60, %v4582_v61 }
 0x4b4   :  { %6162 = vmatpush1.bf16.msra.mxu1 %v13422_v4  ;;  %v4697_v4 = vld [vmem:[#allocation12 + $0xec8] sm:$0xff] }
 0x4b5   :  { %6203 = vmatpush1.bf16.msra.mxu0 %v13296_v1  ;;  %6163 = vmatprep.subr.bf16.mxu1 %v13415_v8  ;;  %v4701_v1 = vld [vmem:[#allocation12 + $0xee8] sm:$0xff]  ;;  %v4570_v8 = vld [vmem:[#allocation12 + $0xad0] sm:$0xff] }
 0x4b6   :  { %6204 = vmatprep.subr.bf16.mxu0 %v13289_v20  ;;  %v4574_v20 = vld [vmem:[#allocation12 + $0xaf0] sm:$0xff]  ;;  %v13495_v9 = vcombine.high %v4697_v4, %v4701_v1  ;;  %v13494_v22 = vcombine.low %v4697_v4, %v4701_v1  ;;  %v2854_v1 = vrot.slane %v15530_v17, %v2853_v59 }
 0x4b7   :  { %v13369_v7 = vcombine.high %v4570_v8, %v4574_v20  ;;  %v13368_v30 = vcombine.low %v4570_v8, %v4574_v20  ;;  %v4662_v4 = vld [vmem:[#allocation12 + $0xdb0] sm:$0xff]  ;;  %v4531_v20 = vld [vmem:[#allocation12 + $0x998] sm:$0xff] }
 0x4b8   :  { %6164 = vmatpush1.bf16.msra.mxu1 %v13414_v12  ;;  %v4689_v12 = vld [vmem:[#allocation12 + $0xe88] sm:$0xff] }
 0x4b9   :  { %6205 = vmatpush1.bf16.msra.mxu0 %v13288_v10  ;;  %6165 = vmatprep.subr.bf16.mxu1 %v13407_v35  ;;  %v4693_v10 = vld [vmem:[#allocation12 + $0xea8] sm:$0xff]  ;;  %v4562_v35 = vld [vmem:[#allocation12 + $0xa90] sm:$0xff] }
 0x4ba   :  { %6206 = vmatprep.subr.bf16.mxu0 %v13281_v23  ;;  %v4566_v23 = vld [vmem:[#allocation12 + $0xab0] sm:$0xff]  ;;  %v13487_v34 = vcombine.high %v4689_v12, %v4693_v10  ;;  %v13486_v52 = vcombine.low %v4689_v12, %v4693_v10 }
 0x4bb   :  { %v13361_v37 = vcombine.high %v4562_v35, %v4566_v23  ;;  %v13360_v54 = vcombine.low %v4562_v35, %v4566_v23  ;;  %v4650_v12 = vld [vmem:[#allocation12 + $0xd50] sm:$0xff] }
 0x4bc   :  { %6166 = vmatpush1.bf16.msra.mxu1 %v13406_v45  ;;  %v4681_v45 = vld [vmem:[#allocation12 + $0xe48] sm:$0xff]  ;;  %v4654_v10 = vld [vmem:[#allocation12 + $0xd70] sm:$0xff] }
 0x4bd   :  { %6207 = vmatpush1.bf16.msra.mxu0 %v13280_v46  ;;  %6167 = vmatprep.subr.bf16.mxu1 %v13527_v47  ;;  %v4685_v46 = vld [vmem:[#allocation12 + $0xe68] sm:$0xff]  ;;  %v4554_v47 = vld [vmem:[#allocation12 + $0xa50] sm:$0xff] }
 0x4be   :  { %6208 = vmatprep.subr.bf16.mxu0 %v13401_v51  ;;  %v4558_v51 = vld [vmem:[#allocation12 + $0xa70] sm:$0xff]  ;;  %v13479_v48 = vcombine.high %v4681_v45, %v4685_v46  ;;  %v13478_v19 = vcombine.low %v4681_v45, %v4685_v46 }
 0x4bf   :  { %v13353_v16 = vcombine.high %v4554_v47, %v4558_v51  ;;  %v13352_v24 = vcombine.low %v4554_v47, %v4558_v51  ;;  %v13449_v47 = vcombine.high %v4650_v12, %v4654_v10 }
 0x4c0   :  { %6168 = vmatpush2.bf16.msra.mxu1 %v13526_v50  ;;  %v4673_v50 = vld [vmem:[#allocation12 + $0xe08] sm:$0xff] }
 0x4c1   :  { %6209 = vmatpush2.bf16.msra.mxu0 %v13400_v21  ;;  %6169 = vmatprep.subr.bf16.mxu1 %v13519_v32  ;;  %v4677_v21 = vld [vmem:[#allocation12 + $0xe28] sm:$0xff]  ;;  %v4546_v32 = vld [vmem:[#allocation12 + $0xa10] sm:$0xff] }
 0x4c2   :  { %6210 = vmatprep.subr.bf16.mxu0 %v13393_v33  ;;  %v4550_v33 = vld [vmem:[#allocation12 + $0xa30] sm:$0xff]  ;;  %v13471_v18 = vcombine.high %v4673_v50, %v4677_v21  ;;  %v13470_v60 = vcombine.low %v4673_v50, %v4677_v21  ;;  %v4515_v50 = vld [vmem:[#allocation12 + $0x918] sm:$0xff] }
 0x4c3   :  { %v13344_v61 = vcombine.low %v4546_v32, %v4550_v33  ;;  %v4519_v21 = vld [vmem:[#allocation12 + $0x938] sm:$0xff] }
 0x4c4   :  { %6170 = vmatpush2.bf16.msra.mxu1 %v13518_v56  ;;  %v13345_v56 = vcombine.high %v4546_v32, %v4550_v33  ;;  %v13448_v33 = vcombine.low %v4650_v12, %v4654_v10  ;;  %v4491_v12 = vld [vmem:[#allocation12 + $0x858] sm:$0xff] }
 0x4c5   :  { %6211 = vmatpush2.bf16.msra.mxu0 %v13392_v57  ;;  %6171 = vmatprep.subr.bf16.mxu1 %v13511_v43  ;;  %v4666_v57 = vld [vmem:[#allocation12 + $0xdd0] sm:$0xff]  ;;  %v4495_v10 = vld [vmem:[#allocation12 + $0x878] sm:$0xff] }
 0x4c6   :  { %6212 = vmatprep.subr.bf16.mxu0 %v13385_v55  ;;  %v4670_v43 = vld [vmem:[#allocation12 + $0xdf0] sm:$0xff]  ;;  %v4539_v55 = vld [vmem:[#allocation12 + $0x9d8] sm:$0xff] }
 0x4c7   :  { %v13464_v8 = vcombine.low %v4666_v57, %v4670_v43 }
 0x4c8   :  { %6172 = vmatpush2.bf16.msra.mxu1 %v13510_v63  ;;  %v13465_v63 = vcombine.high %v4666_v57, %v4670_v43  ;;  %v4634_v57 = vld [vmem:[#allocation12 + $0xcd0] sm:$0xff] }
 0x4c9   :  { %6213 = vmatpush2.bf16.msra.mxu0 %v13384_v29  ;;  %6173 = vmatprep.subr.bf16.mxu1 %v13503_v3  ;;  %v2850_v29 = vrot.slane %v15530_v17, %v2849_v26  ;;  %v13339_v3 = vcombine.high %v4539_v55, %v4543_v58  ;;  %v4352_v17 = vadd.f32 %v15575_v28, %v2854_v1  ;;  %v4638_v43 = vld [vmem:[#allocation12 + $0xcf0] sm:$0xff]  ;;  %v4503_v1 = vld [vmem:[#allocation12 + $0x8b8] sm:$0xff] }
 0x4ca   :  { %6214 = vmatprep.subr.bf16.mxu0 %v13377_v0  ;;  %v4658_v0 = vld [vmem:[#allocation12 + $0xd90] sm:$0xff] }
 0x4cc   :  { %6174 = vmatpush2.bf16.msra.mxu1 %v13502_v14  ;;  %v4535_v14 = vld [vmem:[#allocation12 + $0x9b8] sm:$0xff] }
 0x4cd   :  { %6215 = vmatpush2.bf16.msra.mxu0 %v13376_v27  ;;  %6175 = vmatprep.subr.bf16.mxu1 %v13495_v9  ;;  %v13338_v27 = vcombine.low %v4539_v55, %v4543_v58  ;;  %v4350_v9 = vadd.f32 %v15568_v2, %v2850_v29  ;;  %v13331_v23 = vcombine.high %v4531_v20, %v4535_v14  ;;  %v4507_v55 = vld [vmem:[#allocation12 + $0x8d8] sm:$0xff] }
 0x4ce   :  { %6216 = vmatprep.subr.bf16.mxu0 %v13369_v7  ;;  %v13457_v7 = vcombine.high %v4658_v0, %v4662_v4  ;;  %v13456_v2 = vcombine.low %v4658_v0, %v4662_v4  ;;  %v13330_v46 = vcombine.low %v4531_v20, %v4535_v14  ;;  %v4511_v58 = vld [vmem:[#allocation12 + $0x8f8] sm:$0xff]  ;;  %v4630_v0 = vld [vmem:[#allocation12 + $0xcb0] sm:$0xff] }
 0x4cf   :  { %v13307_v29 = vcombine.high %v4507_v55, %v4511_v58  ;;  %v4499_v4 = vld [vmem:[#allocation12 + $0x898] sm:$0xff]  ;;  %v13306_v20 = vcombine.low %v4507_v55, %v4511_v58 }
 0x4d0   :  { %6176 = vmatpush2.bf16.msra.mxu1 %v13494_v22  ;;  %v4523_v22 = vld [vmem:[#allocation12 + $0x958] sm:$0xff] }
 0x4d1   :  { %6217 = vmatpush2.bf16.msra.mxu0 %v13368_v30  ;;  %6177 = vmatprep.subr.bf16.mxu1 %v13487_v34  ;;  %v4527_v30 = vld [vmem:[#allocation12 + $0x978] sm:$0xff] }
 0x4d2   :  { %6218 = vmatprep.subr.bf16.mxu0 %v13361_v37  ;;  %v13323_v28 = vcombine.high %v4523_v22, %v4527_v30 }
 0x4d4   :  { %6178 = vmatpush2.bf16.msra.mxu1 %v13486_v52 }
 0x4d5   :  { %6219 = vmatpush2.bf16.msra.mxu0 %v13360_v54  ;;  %6179 = vmatprep.subr.bf16.mxu1 %v13479_v48  ;;  %v4642_v54 = vld [vmem:[#allocation12 + $0xd10] sm:$0xff] }
 0x4d6   :  { %6220 = vmatprep.subr.bf16.mxu0 %v13353_v16  ;;  %v4646_v48 = vld [vmem:[#allocation12 + $0xd30] sm:$0xff] }
 0x4d8   :  { %6180 = vmatpush2.bf16.msra.mxu1 %v13478_v19 }
 0x4d9   :  { %6221 = vmatpush2.bf16.msra.mxu0 %v13352_v24  ;;  %6181 = vmatprep.subr.bf16.mxu1 %v13471_v18  ;;  %v13322_v24 = vcombine.low %v4523_v22, %v4527_v30  ;;  %v13441_v18 = vcombine.high %v4642_v54, %v4646_v48  ;;  %v13291_v30 = vcombine.high %v4491_v12, %v4495_v10 }
 0x4da   :  { %6222 = vmatprep.subr.bf16.mxu0 %v13345_v56 }
 0x4dc   :  { %6182 = vmatpush2.bf16.msra.mxu1 %v13470_v60  ;;  %v13440_v60 = vcombine.low %v4642_v54, %v4646_v48 }
 0x4dd   :  { %6223 = vmatpush2.bf16.msra.mxu0 %v13344_v61  ;;  %6233 = vmatprep.subr.bf16.mxu1 %v13465_v63  ;;  %v13314_v61 = vcombine.low %v4515_v50, %v4519_v21  ;;  %v13433_v63 = vcombine.high %v4634_v57, %v4638_v43 }
 0x4de   :  { %6274 = vmatprep.subr.bf16.mxu0 %v13339_v3  ;;  %v4626_v3 = vld [vmem:[#allocation12 + $0xc90] sm:$0xff] }
 0x4df   :  { %v4390_v35 = vpop.f32.mrf.mxu1  ;;  %6184 = vmatmul.mubr.bf16.vlgmr.msra.gmra.mxu1 %v15561_v44  ;;  %v13425_v14 = vcombine.high %v4626_v3, %v4630_v0 }
 0x4e0   :  { %v15588_v34 = vadd.f32 %v4390_v35, %v4350_v9  ;;  %v15590_v37 = vpop.f32.mrf.mxu0  ;;  %6225 = vmatmul.mubr.bf16.vlgmr.msra.gmra.mxu0 %v15538_v62  ;;  %6234 = vmatpush1.bf16.msra.mxu1 %v13464_v8  ;;  %v13432_v8 = vcombine.low %v4634_v57, %v4638_v43  ;;  %v4618_v9 = vld [vmem:[#allocation12 + $0xc50] sm:$0xff]  ;;  %v13424_v35 = vcombine.low %v4626_v3, %v4630_v0  ;;  %v4595_v57 = vld [vmem:[#allocation12 + $0xb98] sm:$0xff] }
 0x4e1   :  { %6265 = vmatprep.mubr.bf16.mxu1 %v15544_v6  ;;  %v4392_v45 = vpop.f32.mrf.mxu1  ;;  %6275 = vmatpush1.bf16.msra.mxu0 %v13338_v27  ;;  %v13299_v27 = vcombine.high %v4499_v4, %v4503_v1  ;;  %v4599_v43 = vld [vmem:[#allocation12 + $0xbb8] sm:$0xff] }
 0x4e2   :  { %v15594_v51 = vadd.f32 %v4392_v45, %v4352_v17  ;;  %6306 = vmatprep.mubr.bf16.mxu0 %v15524_v31  ;;  %v15597_v52 = vpop.f32.mrf.mxu0  ;;  %6235 = vmatprep.subr.bf16.mxu1 %v13457_v7  ;;  %v13315_v31 = vcombine.high %v4515_v50, %v4519_v21  ;;  %v4622_v7 = vld [vmem:[#allocation12 + $0xc70] sm:$0xff]  ;;  %v4483_v45 = vld [vmem:[#allocation12 + $0x818] sm:$0xff] }
 0x4e3   :  { %v4394_v16 = vpop.f32.mrf.mxu1  ;;  %6276 = vmatprep.subr.bf16.mxu0 %v13331_v23  ;;  %v13298_v23 = vcombine.low %v4499_v4, %v4503_v1  ;;  %v13417_v22 = vcombine.high %v4618_v9, %v4622_v7  ;;  %v4610_v17 = vld [vmem:[#allocation12 + $0xc10] sm:$0xff]  ;;  %v4603_v21 = vld [vmem:[#allocation12 + $0xbd8] sm:$0xff]  ;;  %v13394_v1 = vcombine.low %v4595_v57, %v4599_v43 }
 0x4e4   :  { %v4435_v32 = vpop.f32.mrf.mxu0  ;;  %6236 = vmatpush1.bf16.msra.mxu1 %v13456_v2  ;;  %v4614_v2 = vld [vmem:[#allocation12 + $0xc30] sm:$0xff]  ;;  %v4587_v3 = vld [vmem:[#allocation12 + $0xb58] sm:$0xff] }
 0x4e5   :  { %v4395_v19 = vpop.f32.mrf.mxu1  ;;  %6277 = vmatpush1.bf16.msra.mxu0 %v13330_v46  ;;  %6237 = vmatprep.subr.bf16.mxu1 %v13449_v47  ;;  %v4487_v46 = vld [vmem:[#allocation12 + $0x838] sm:$0xff]  ;;  %v13416_v47 = vcombine.low %v4618_v9, %v4622_v7  ;;  %v13409_v54 = vcombine.high %v4610_v17, %v4614_v2  ;;  %v4730_v16 = vld [vmem:[#allocation12 + $0xfd0] sm:$0xff] }
 0x4e6   :  { %v4436_v56 = vpop.f32.mrf.mxu0  ;;  %6278 = vmatprep.subr.bf16.mxu0 %v13323_v28  ;;  %v13290_v28 = vcombine.low %v4491_v12, %v4495_v10  ;;  %v13283_v48 = vcombine.high %v4483_v45, %v4487_v46  ;;  %v4734_v50 = vld [vmem:[#allocation12 + $0xff0] sm:$0xff]  ;;  %v4607_v32 = vld [vmem:[#allocation12 + $0xbf8] sm:$0xff]  ;;  %v13282_v19 = vcombine.low %v4483_v45, %v4487_v46 }
 0x4e7   :  { %v4722_v56 = vld [vmem:[#allocation12 + $0xf90] sm:$0xff]  ;;  %v13528_v55 = vcombine.low %v4730_v16, %v4734_v50  ;;  %v13402_v58 = vcombine.low %v4603_v21, %v4607_v32  ;;  %v4591_v0 = vld [vmem:[#allocation12 + $0xb78] sm:$0xff] }
 0x4e8   :  { %6238 = vmatpush1.bf16.msra.mxu1 %v13448_v33  ;;  %v13408_v33 = vcombine.low %v4610_v17, %v4614_v2  ;;  %v4579_v9 = vld [vmem:[#allocation12 + $0xb18] sm:$0xff]  ;;  %v13386_v10 = vcombine.low %v4587_v3, %v4591_v0 }
 0x4e9   :  { %6279 = vmatpush1.bf16.msra.mxu0 %v13322_v24  ;;  %6239 = vmatprep.subr.bf16.mxu1 %v13441_v18  ;;  %v13529_v24 = vcombine.high %v4730_v16, %v4734_v50  ;;  %v13403_v18 = vcombine.high %v4603_v21, %v4607_v32  ;;  %v4583_v7 = vld [vmem:[#allocation12 + $0xb38] sm:$0xff] }
 0x4ea   :  { %6280 = vmatprep.subr.bf16.mxu0 %v13315_v31  ;;  %v4726_v31 = vld [vmem:[#allocation12 + $0xfb0] sm:$0xff]  ;;  %v4571_v17 = vld [vmem:[#allocation12 + $0xad8] sm:$0xff]  ;;  %v13378_v46 = vcombine.low %v4579_v9, %v4583_v7 }
 0x4eb   :  { %v13520_v4 = vcombine.low %v4722_v56, %v4726_v31  ;;  %v4575_v2 = vld [vmem:[#allocation12 + $0xaf8] sm:$0xff] }
 0x4ec   :  { %6240 = vmatpush1.bf16.msra.mxu1 %v13440_v60  ;;  %v13521_v60 = vcombine.high %v4722_v56, %v4726_v31  ;;  %v4563_v16 = vld [vmem:[#allocation12 + $0xa98] sm:$0xff]  ;;  %v13370_v32 = vcombine.low %v4571_v17, %v4575_v2 }
 0x4ed   :  { %6281 = vmatpush1.bf16.msra.mxu0 %v13314_v61  ;;  %6241 = vmatprep.subr.bf16.mxu1 %v13433_v63  ;;  %v13395_v61 = vcombine.high %v4595_v57, %v4599_v43  ;;  %v4714_v63 = vld [vmem:[#allocation12 + $0xf50] sm:$0xff]  ;;  %v4567_v50 = vld [vmem:[#allocation12 + $0xab8] sm:$0xff] }
 0x4ee   :  { %6282 = vmatprep.subr.bf16.mxu0 %v13307_v29  ;;  %v4718_v29 = vld [vmem:[#allocation12 + $0xf70] sm:$0xff]  ;;  %v4555_v56 = vld [vmem:[#allocation12 + $0xa58] sm:$0xff]  ;;  %v13362_v43 = vcombine.low %v4563_v16, %v4567_v50 }
 0x4ef   :  { %v13512_v12 = vcombine.low %v4714_v63, %v4718_v29  ;;  %v4559_v31 = vld [vmem:[#allocation12 + $0xa78] sm:$0xff] }
 0x4f0   :  { %6242 = vmatpush1.bf16.msra.mxu1 %v13432_v8  ;;  %v13513_v8 = vcombine.high %v4714_v63, %v4718_v29  ;;  %v4547_v63 = vld [vmem:[#allocation12 + $0xa18] sm:$0xff] }
 0x4f1   :  { %6283 = vmatpush1.bf16.msra.mxu0 %v13306_v20  ;;  %6243 = vmatprep.subr.bf16.mxu1 %v13425_v14  ;;  %v13387_v20 = vcombine.high %v4587_v3, %v4591_v0  ;;  %v4706_v14 = vld [vmem:[#allocation12 + $0xf10] sm:$0xff]  ;;  %v4551_v29 = vld [vmem:[#allocation12 + $0xa38] sm:$0xff]  ;;  %v13354_v0 = vcombine.low %v4555_v56, %v4559_v31 }
 0x4f2   :  { %6284 = vmatprep.subr.bf16.mxu0 %v13299_v27  ;;  %v4710_v27 = vld [vmem:[#allocation12 + $0xf30] sm:$0xff] }
 0x4f3   :  { %v13504_v45 = vcombine.low %v4706_v14, %v4710_v27 }
 0x4f4   :  { %6244 = vmatpush1.bf16.msra.mxu1 %v13424_v35  ;;  %v13505_v35 = vcombine.high %v4706_v14, %v4710_v27  ;;  %v4671_v14 = vld [vmem:[#allocation12 + $0xdf8] sm:$0xff]  ;;  %v6421_v27 = vld [vmem:[#allocation12 + $0x11c0] sm:$0xff] }
 0x4f5   :  { %6285 = vmatpush1.bf16.msra.mxu0 %v13298_v23  ;;  %6245 = vmatprep.subr.bf16.mxu1 %v13417_v22  ;;  %v13379_v23 = vcombine.high %v4579_v9, %v4583_v7  ;;  %v4698_v22 = vld [vmem:[#allocation12 + $0xed0] sm:$0xff]  ;;  %v6425_v9 = vld [vmem:[#allocation12 + $0x11e0] sm:$0xff]  ;;  %v2861_v7 = vsub.s32 7, %v15361_v38 }
 0x4f6   :  { %6286 = vmatprep.subr.bf16.mxu0 %v13291_v30  ;;  %v4702_v30 = vld [vmem:[#allocation12 + $0xef0] sm:$0xff] }
 0x4f7   :  { %v13496_v21 = vcombine.low %v4698_v22, %v4702_v30 }
 0x4f8   :  { %6246 = vmatpush1.bf16.msra.mxu1 %v13416_v47  ;;  %v13497_v47 = vcombine.high %v4698_v22, %v4702_v30  ;;  %v13589_v30 = vcombine.high %v6421_v27, %v6425_v9 }
 0x4f9   :  { %6287 = vmatpush1.bf16.msra.mxu0 %v13290_v28  ;;  %6247 = vmatprep.subr.bf16.mxu1 %v13409_v54  ;;  %v13371_v28 = vcombine.high %v4571_v17, %v4575_v2  ;;  %v4690_v54 = vld [vmem:[#allocation12 + $0xe90] sm:$0xff]  ;;  %v2562_v17 = vmax.f32 %v15478_v49, 0.0  ;;  %v4659_v2 = vld [vmem:[#allocation12 + $0xd98] sm:$0xff] }
 0x4fa   :  { %6288 = vmatprep.subr.bf16.mxu0 %v13283_v48  ;;  %v4694_v48 = vld [vmem:[#allocation12 + $0xeb0] sm:$0xff] }
 0x4fb   :  { %v13488_v57 = vcombine.low %v4690_v54, %v4694_v48 }
 0x4fc   :  { %6248 = vmatpush1.bf16.msra.mxu1 %v13408_v33  ;;  %v13489_v33 = vcombine.high %v4690_v54, %v4694_v48  ;;  %v6417_v54 = vld [vmem:[#allocation12 + $0x11a0] sm:$0xff]  ;;  %v13588_v48 = vcombine.low %v6421_v27, %v6425_v9 }
 0x4fd   :  { %6289 = vmatpush1.bf16.msra.mxu0 %v13282_v19  ;;  %6249 = vmatprep.subr.bf16.mxu1 %v13529_v24  ;;  %v13363_v19 = vcombine.high %v4563_v16, %v4567_v50  ;;  %v4682_v24 = vld [vmem:[#allocation12 + $0xe50] sm:$0xff] }
 0x4fe   :  { %6290 = vmatprep.subr.bf16.mxu0 %v13403_v18  ;;  %v4686_v18 = vld [vmem:[#allocation12 + $0xe70] sm:$0xff] }
 0x4ff   :  { %v13480_v3 = vcombine.low %v4682_v24, %v4686_v18 }
 0x500   :  { %6250 = vmatpush2.bf16.msra.mxu1 %v13528_v55  ;;  %v13481_v55 = vcombine.high %v4682_v24, %v4686_v18  ;;  %v6405_v24 = vld [vmem:[#allocation12 + $0x1140] sm:$0xff] }
 0x501   :  { %6291 = vmatpush2.bf16.msra.mxu0 %v13402_v58  ;;  %6251 = vmatprep.subr.bf16.mxu1 %v13521_v60  ;;  %v13355_v58 = vcombine.high %v4555_v56, %v4559_v31  ;;  %v4674_v60 = vld [vmem:[#allocation12 + $0xe10] sm:$0xff]  ;;  %v6409_v18 = vld [vmem:[#allocation12 + $0x1160] sm:$0xff] }
 0x502   :  { %6292 = vmatprep.subr.bf16.mxu0 %v13395_v61  ;;  %v4678_v61 = vld [vmem:[#allocation12 + $0xe30] sm:$0xff] }
 0x504   :  { %6252 = vmatpush2.bf16.msra.mxu1 %v13520_v4  ;;  %v13473_v4 = vcombine.high %v4674_v60, %v4678_v61 }
 0x505   :  { %6293 = vmatpush2.bf16.msra.mxu0 %v13394_v1  ;;  %6253 = vmatprep.subr.bf16.mxu1 %v13513_v8  ;;  %v2857_v1 = vsub.s32 6, %v15361_v38  ;;  %v13347_v8 = vcombine.high %v4547_v63, %v4551_v29 }
 0x506   :  { %6294 = vmatprep.subr.bf16.mxu0 %v13387_v20  ;;  %v4667_v20 = vld [vmem:[#allocation12 + $0xdd8] sm:$0xff] }
 0x508   :  { %6254 = vmatpush2.bf16.msra.mxu1 %v13512_v12  ;;  %v13472_v12 = vcombine.low %v4674_v60, %v4678_v61 }
 0x509   :  { %6295 = vmatpush2.bf16.msra.mxu0 %v13386_v10  ;;  %6255 = vmatprep.subr.bf16.mxu1 %v13505_v35  ;;  %v13346_v10 = vcombine.low %v4547_v63, %v4551_v29  ;;  %v13467_v35 = vcombine.high %v4667_v20, %v4671_v14  ;;  %v4643_v63 = vld [vmem:[#allocation12 + $0xd18] sm:$0xff] }
 0x50a   :  { %6296 = vmatprep.subr.bf16.mxu0 %v13379_v23  ;;  %v14970_v23 = vld [vmem:[#allocation13] sm:$0xff]  ;;  %v4647_v29 = vld [vmem:[#allocation12 + $0xd38] sm:$0xff] }
 0x50b   :  { %v2858_v22 = vrot.slane %v14970_v23, %v2857_v1 }
 0x50c   :  { %6256 = vmatpush2.bf16.msra.mxu1 %v13504_v45  ;;  %v4663_v45 = vld [vmem:[#allocation12 + $0xdb8] sm:$0xff] }
 0x50d   :  { %6297 = vmatpush2.bf16.msra.mxu0 %v13378_v46  ;;  %6257 = vmatprep.subr.bf16.mxu1 %v13497_v47  ;;  %v2862_v46 = vrot.slane %v14970_v23, %v2861_v7  ;;  %v13466_v47 = vcombine.low %v4667_v20, %v4671_v14  ;;  %v4432_v16 = vadd.f32 %v15590_v37, %v2858_v22  ;;  %v6393_v23 = vld [vmem:[#allocation12 + $0x10e0] sm:$0xff] }
 0x50e   :  { %6298 = vmatprep.subr.bf16.mxu0 %v13371_v28  ;;  %v6413_v28 = vld [vmem:[#allocation12 + $0x1180] sm:$0xff]  ;;  %v13459_v50 = vcombine.high %v4659_v2, %v4663_v45  ;;  %v13458_v37 = vcombine.low %v4659_v2, %v4663_v45  ;;  %v13572_v20 = vcombine.low %v6405_v24, %v6409_v18  ;;  %v13443_v14 = vcombine.high %v4643_v63, %v4647_v29  ;;  %v4627_v45 = vld [vmem:[#allocation12 + $0xc98] sm:$0xff] }
 0x50f   :  { %v4434_v56 = vadd.f32 %v15597_v52, %v2862_v46  ;;  %v13573_v52 = vcombine.high %v6405_v24, %v6409_v18  ;;  %v13442_v22 = vcombine.low %v4643_v63, %v4647_v29  ;;  %v4631_v46 = vld [vmem:[#allocation12 + $0xcb8] sm:$0xff] }
 0x510   :  { %6258 = vmatpush2.bf16.msra.mxu1 %v13496_v21  ;;  %v4651_v21 = vld [vmem:[#allocation12 + $0xd58] sm:$0xff]  ;;  %v13426_v24 = vcombine.low %v4627_v45, %v4631_v46 }
 0x511   :  { %6299 = vmatpush2.bf16.msra.mxu0 %v13370_v32  ;;  %6259 = vmatprep.subr.bf16.mxu1 %v13489_v33  ;;  %v4655_v32 = vld [vmem:[#allocation12 + $0xd78] sm:$0xff]  ;;  %v15607_v33 = vpack.c.bf16 %v2562_v17, %v2562_v17 }
 0x512   :  { %6300 = vmatprep.subr.bf16.mxu0 %v13363_v19  ;;  %v13581_v19 = vcombine.high %v6413_v28, %v6417_v54 }
 0x514   :  { %6260 = vmatpush2.bf16.msra.mxu1 %v13488_v57 }
 0x515   :  { %6301 = vmatpush2.bf16.msra.mxu0 %v13362_v43  ;;  %6261 = vmatprep.subr.bf16.mxu1 %v13481_v55  ;;  %v13580_v55 = vcombine.low %v6413_v28, %v6417_v54  ;;  %v6385_v28 = vld [vmem:[#allocation12 + $0x10a0] sm:$0xff] }
 0x516   :  { %6302 = vmatprep.subr.bf16.mxu0 %v13355_v58  ;;  %v13451_v58 = vcombine.high %v4651_v21, %v4655_v32 }
 0x518   :  { %6262 = vmatpush2.bf16.msra.mxu1 %v13480_v3 }
 0x519   :  { %6303 = vmatpush2.bf16.msra.mxu0 %v13354_v0  ;;  %6263 = vmatprep.subr.bf16.mxu1 %v13473_v4  ;;  %v6401_v0 = vld [vmem:[#allocation12 + $0x1120] sm:$0xff] }
 0x51a   :  { %6304 = vmatprep.subr.bf16.mxu0 %v13347_v8 }
 0x51c   :  { %6264 = vmatpush2.bf16.msra.mxu1 %v13472_v12  ;;  %v4635_v12 = vld [vmem:[#allocation12 + $0xcd8] sm:$0xff] }
 0x51d   :  { %6305 = vmatpush2.bf16.msra.mxu0 %v13346_v10  ;;  %6315 = vmatprep.subr.bf16.mxu1 %v13467_v35  ;;  %v4639_v10 = vld [vmem:[#allocation12 + $0xcf8] sm:$0xff]  ;;  %v6389_v35 = vld [vmem:[#allocation12 + $0x10c0] sm:$0xff] }
 0x51e   :  { %7901 = vmatprep.subr.bf16.mxu0 %v13589_v30  ;;  %v13435_v17 = vcombine.high %v4635_v12, %v4639_v10  ;;  %v13557_v2 = vcombine.high %v6389_v35, %v6393_v23  ;;  %v13434_v54 = vcombine.low %v4635_v12, %v4639_v10  ;;  %v4723_v12 = vld [vmem:[#allocation12 + $0xf98] sm:$0xff] }
 0x51f   :  { %v4472_v49 = vpop.f32.mrf.mxu1  ;;  %6266 = vmatmul.mubr.bf16.vlgmr.msra.gmra.mxu1 %v15561_v44  ;;  %v4727_v10 = vld [vmem:[#allocation12 + $0xfb8] sm:$0xff] }
 0x520   :  { %v15611_v31 = vadd.f32 %v4472_v49, %v4432_v16  ;;  %v15613_v57 = vpop.f32.mrf.mxu0  ;;  %6307 = vmatmul.mubr.bf16.vlgmr.msra.gmra.mxu0 %v15538_v62  ;;  %6316 = vmatpush1.bf16.msra.mxu1 %v13466_v47  ;;  %v6397_v62 = vld [vmem:[#allocation12 + $0x1100] sm:$0xff]  ;;  %v13427_v16 = vcombine.high %v4627_v45, %v4631_v46  ;;  %v4715_v45 = vld [vmem:[#allocation12 + $0xf58] sm:$0xff] }
 0x521   :  { %6347 = vmatprep.mubr.bf16.mxu1 %v15544_v6  ;;  %v4474_v43 = vpop.f32.mrf.mxu1  ;;  %7902 = vmatpush1.bf16.msra.mxu0 %v13588_v48  ;;  %v13450_v6 = vcombine.low %v4651_v21, %v4655_v32  ;;  %v13565_v9 = vcombine.high %v6397_v62, %v6401_v0  ;;  %v13564_v30 = vcombine.low %v6397_v62, %v6401_v0  ;;  %v6381_v47 = vld [vmem:[#allocation12 + $0x1080] sm:$0xff]  ;;  %v4619_v21 = vld [vmem:[#allocation12 + $0xc58] sm:$0xff] }
 0x522   :  { %v15617_v60 = vadd.f32 %v4474_v43, %v4434_v56  ;;  %7933 = vmatprep.mubr.bf16.mxu0 %v15607_v33  ;;  %v15620_v61 = vpop.f32.mrf.mxu0  ;;  %6317 = vmatprep.subr.bf16.mxu1 %v13459_v50  ;;  %v13556_v48 = vcombine.low %v6389_v35, %v6393_v23  ;;  %v13549_v50 = vcombine.high %v6381_v47, %v6385_v28  ;;  %v4623_v32 = vld [vmem:[#allocation12 + $0xc78] sm:$0xff]  ;;  %v6373_v49 = vld [vmem:[#allocation12 + $0x1040] sm:$0xff] }
 0x523   :  { %v4476_v3 = vpop.f32.mrf.mxu1  ;;  %7903 = vmatprep.subr.bf16.mxu0 %v13581_v19  ;;  %v6377_v19 = vld [vmem:[#allocation12 + $0x1060] sm:$0xff]  ;;  %v13548_v18 = vcombine.low %v6381_v47, %v6385_v28  ;;  %v13419_v56 = vcombine.high %v4619_v21, %v4623_v32  ;;  %v4611_v43 = vld [vmem:[#allocation12 + $0xc18] sm:$0xff]  ;;  %v13418_v63 = vcombine.low %v4619_v21, %v4623_v32 }
 0x524   :  { %v6066_v4 = vpop.f32.mrf.mxu0  ;;  %6318 = vmatpush1.bf16.msra.mxu1 %v13458_v37  ;;  %v13541_v37 = vcombine.high %v6373_v49, %v6377_v19  ;;  %v13540_v29 = vcombine.low %v6373_v49, %v6377_v19  ;;  %v4731_v0 = vld [vmem:[#allocation12 + $0xfd8] sm:$0xff]  ;;  %v6477_v35 = vld [vmem:[#allocation12 + $0x1380] sm:$0xff] }
 0x525   :  { %v4477_v8 = vpop.f32.mrf.mxu1  ;;  %7904 = vmatpush1.bf16.msra.mxu0 %v13580_v55  ;;  %6319 = vmatprep.subr.bf16.mxu1 %v13451_v58  ;;  %v4615_v55 = vld [vmem:[#allocation12 + $0xc38] sm:$0xff]  ;;  %v6365_v58 = vld [vmem:[#allocation12 + $0x1000] sm:$0xff] }
 0x526   :  { %v6067_v27 = vpop.f32.mrf.mxu0  ;;  %7905 = vmatprep.subr.bf16.mxu0 %v13573_v52  ;;  %v6369_v52 = vld [vmem:[#allocation12 + $0x1020] sm:$0xff]  ;;  %v13411_v3 = vcombine.high %v4611_v43, %v4615_v55  ;;  %v4735_v4 = vld [vmem:[#allocation12 + $0xff8] sm:$0xff] }
 0x527   :  { %v13533_v62 = vcombine.high %v6365_v58, %v6369_v52  ;;  %v6489_v8 = vld [vmem:[#allocation12 + $0x13e0] sm:$0xff]  ;;  %v13531_v27 = vcombine.high %v4731_v0, %v4735_v4  ;;  %v4719_v46 = vld [vmem:[#allocation12 + $0xf78] sm:$0xff] }
 0x528   :  { %6320 = vmatpush1.bf16.msra.mxu1 %v13450_v6  ;;  %v6485_v6 = vld [vmem:[#allocation12 + $0x13c0] sm:$0xff]  ;;  %v4707_v21 = vld [vmem:[#allocation12 + $0xf18] sm:$0xff] }
 0x529   :  { %7906 = vmatpush1.bf16.msra.mxu0 %v13572_v20  ;;  %6321 = vmatprep.subr.bf16.mxu1 %v13443_v14  ;;  %v13410_v20 = vcombine.low %v4611_v43, %v4615_v55  ;;  %v13532_v14 = vcombine.low %v6365_v58, %v6369_v52  ;;  %v6481_v23 = vld [vmem:[#allocation12 + $0x13a0] sm:$0xff]  ;;  %v4711_v32 = vld [vmem:[#allocation12 + $0xf38] sm:$0xff] }
 0x52a   :  { %7907 = vmatprep.subr.bf16.mxu0 %v13565_v9  ;;  %v13653_v9 = vcombine.high %v6485_v6, %v6489_v8  ;;  %v6469_v47 = vld [vmem:[#allocation12 + $0x1340] sm:$0xff]  ;;  %v4699_v43 = vld [vmem:[#allocation12 + $0xed8] sm:$0xff] }
 0x52b   :  { %v6473_v28 = vld [vmem:[#allocation12 + $0x1360] sm:$0xff]  ;;  %v4703_v55 = vld [vmem:[#allocation12 + $0xef8] sm:$0xff] }
 0x52c   :  { %6322 = vmatpush1.bf16.msra.mxu1 %v13442_v22  ;;  %v13530_v22 = vcombine.low %v4731_v0, %v4735_v4  ;;  %v6461_v49 = vld [vmem:[#allocation12 + $0x1300] sm:$0xff]  ;;  %v4691_v0 = vld [vmem:[#allocation12 + $0xe98] sm:$0xff] }
 0x52d   :  { %7908 = vmatpush1.bf16.msra.mxu0 %v13564_v30  ;;  %6323 = vmatprep.subr.bf16.mxu1 %v13435_v17  ;;  %v13652_v30 = vcombine.low %v6485_v6, %v6489_v8  ;;  %v13523_v17 = vcombine.high %v4723_v12, %v4727_v10  ;;  %v6465_v19 = vld [vmem:[#allocation12 + $0x1320] sm:$0xff]  ;;  %v4695_v4 = vld [vmem:[#allocation12 + $0xeb8] sm:$0xff] }
 0x52e   :  { %7909 = vmatprep.subr.bf16.mxu0 %v13557_v2  ;;  %v13645_v2 = vcombine.high %v6477_v35, %v6481_v23  ;;  %v6453_v58 = vld [vmem:[#allocation12 + $0x12c0] sm:$0xff] }
 0x52f   :  { %v6457_v52 = vld [vmem:[#allocation12 + $0x12e0] sm:$0xff] }
 0x530   :  { %6324 = vmatpush1.bf16.msra.mxu1 %v13434_v54  ;;  %v13522_v54 = vcombine.low %v4723_v12, %v4727_v10  ;;  %v6445_v6 = vld [vmem:[#allocation12 + $0x1280] sm:$0xff]  ;;  %v4683_v12 = vld [vmem:[#allocation12 + $0xe58] sm:$0xff] }
 0x531   :  { %7910 = vmatpush1.bf16.msra.mxu0 %v13556_v48  ;;  %6325 = vmatprep.subr.bf16.mxu1 %v13427_v16  ;;  %v13644_v48 = vcombine.low %v6477_v35, %v6481_v23  ;;  %v13515_v16 = vcombine.high %v4715_v45, %v4719_v46  ;;  %v6449_v8 = vld [vmem:[#allocation12 + $0x12a0] sm:$0xff]  ;;  %v4687_v10 = vld [vmem:[#allocation12 + $0xe78] sm:$0xff] }
 0x532   :  { %7911 = vmatprep.subr.bf16.mxu0 %v13549_v50  ;;  %v13637_v50 = vcombine.high %v6469_v47, %v6473_v28  ;;  %v6437_v35 = vld [vmem:[#allocation12 + $0x1240] sm:$0xff] }
 0x533   :  { %v6441_v23 = vld [vmem:[#allocation12 + $0x1260] sm:$0xff] }
 0x534   :  { %6326 = vmatpush1.bf16.msra.mxu1 %v13426_v24  ;;  %v13514_v24 = vcombine.low %v4715_v45, %v4719_v46  ;;  %v4675_v45 = vld [vmem:[#allocation12 + $0xe18] sm:$0xff] }
 0x535   :  { %7912 = vmatpush1.bf16.msra.mxu0 %v13548_v18  ;;  %6327 = vmatprep.subr.bf16.mxu1 %v13419_v56  ;;  %v13636_v18 = vcombine.low %v6469_v47, %v6473_v28  ;;  %v13507_v56 = vcombine.high %v4707_v21, %v4711_v32  ;;  %v4679_v46 = vld [vmem:[#allocation12 + $0xe38] sm:$0xff]  ;;  %v6429_v47 = vld [vmem:[#allocation12 + $0x1200] sm:$0xff] }
 0x536   :  { %7913 = vmatprep.subr.bf16.mxu0 %v13541_v37  ;;  %v13629_v37 = vcombine.high %v6461_v49, %v6465_v19  ;;  %v6433_v28 = vld [vmem:[#allocation12 + $0x1220] sm:$0xff] }
 0x538   :  { %6328 = vmatpush1.bf16.msra.mxu1 %v13418_v63  ;;  %v13506_v63 = vcombine.low %v4707_v21, %v4711_v32  ;;  %v6549_v21 = vld [vmem:[#allocation12 + $0x15c0] sm:$0xff] }
 0x539   :  { %7914 = vmatpush1.bf16.msra.mxu0 %v13540_v29  ;;  %6329 = vmatprep.subr.bf16.mxu1 %v13411_v3  ;;  %v13628_v29 = vcombine.low %v6461_v49, %v6465_v19  ;;  %v13499_v3 = vcombine.high %v4699_v43, %v4703_v55  ;;  %v6553_v32 = vld [vmem:[#allocation12 + $0x15e0] sm:$0xff]  ;;  %v6422_v49 = vld [vmem:[#allocation12 + $0x11c8] sm:$0xff] }
 0x53a   :  { %7915 = vmatprep.subr.bf16.mxu0 %v13533_v62  ;;  %v13621_v62 = vcombine.high %v6453_v58, %v6457_v52  ;;  %v6426_v19 = vld [vmem:[#allocation12 + $0x11e8] sm:$0xff] }
 0x53c   :  { %6330 = vmatpush1.bf16.msra.mxu1 %v13410_v20  ;;  %v13498_v20 = vcombine.low %v4699_v43, %v4703_v55  ;;  %v13591_v43 = vcombine.high %v6422_v49, %v6426_v19  ;;  %v2564_v55 = vmax.f32 %v15505_v13, 0.0 }
 0x53d   :  { %7916 = vmatpush1.bf16.msra.mxu0 %v13532_v14  ;;  %6331 = vmatprep.subr.bf16.mxu1 %v13531_v27  ;;  %v13620_v14 = vcombine.low %v6453_v58, %v6457_v52  ;;  %v13491_v27 = vcombine.high %v4691_v0, %v4695_v4  ;;  %v6541_v58 = vld [vmem:[#allocation12 + $0x1580] sm:$0xff] }
 0x53e   :  { %7917 = vmatprep.subr.bf16.mxu0 %v13653_v9  ;;  %v13613_v9 = vcombine.high %v6445_v6, %v6449_v8  ;;  %v6545_v52 = vld [vmem:[#allocation12 + $0x15a0] sm:$0xff] }
 0x540   :  { %6332 = vmatpush2.bf16.msra.mxu1 %v13530_v22  ;;  %v13490_v22 = vcombine.low %v4691_v0, %v4695_v4  ;;  %v13709_v4 = vcombine.high %v6541_v58, %v6545_v52 }
 0x541   :  { %7918 = vmatpush2.bf16.msra.mxu0 %v13652_v30  ;;  %6333 = vmatprep.subr.bf16.mxu1 %v13523_v17  ;;  %v13612_v30 = vcombine.low %v6445_v6, %v6449_v8  ;;  %v13483_v17 = vcombine.high %v4683_v12, %v4687_v10  ;;  %v6533_v6 = vld [vmem:[#allocation12 + $0x1540] sm:$0xff] }
 0x542   :  { %7919 = vmatprep.subr.bf16.mxu0 %v13645_v2  ;;  %v13605_v2 = vcombine.high %v6437_v35, %v6441_v23  ;;  %v6537_v8 = vld [vmem:[#allocation12 + $0x1560] sm:$0xff] }
 0x544   :  { %6334 = vmatpush2.bf16.msra.mxu1 %v13522_v54  ;;  %v13482_v54 = vcombine.low %v4683_v12, %v4687_v10  ;;  %v13708_v10 = vcombine.low %v6541_v58, %v6545_v52  ;;  %v6513_v58 = vld [vmem:[#allocation12 + $0x14a0] sm:$0xff]  ;;  %v6382_v52 = vld [vmem:[#allocation12 + $0x1088] sm:$0xff] }
 0x545   :  { %7920 = vmatpush2.bf16.msra.mxu0 %v13644_v48  ;;  %6335 = vmatprep.subr.bf16.mxu1 %v13515_v16  ;;  %v13604_v48 = vcombine.low %v6437_v35, %v6441_v23  ;;  %v13475_v16 = vcombine.high %v4675_v45, %v4679_v46 }
 0x546   :  { %7921 = vmatprep.subr.bf16.mxu0 %v13637_v50  ;;  %v13597_v50 = vcombine.high %v6429_v47, %v6433_v28 }
 0x548   :  { %6336 = vmatpush2.bf16.msra.mxu1 %v13514_v24  ;;  %v13474_v24 = vcombine.low %v4675_v45, %v4679_v46  ;;  %v6529_v45 = vld [vmem:[#allocation12 + $0x1520] sm:$0xff] }
 0x549   :  { %7922 = vmatpush2.bf16.msra.mxu0 %v13636_v18  ;;  %6337 = vmatprep.subr.bf16.mxu1 %v13507_v56  ;;  %v13596_v18 = vcombine.low %v6429_v47, %v6433_v28  ;;  %v13717_v56 = vcombine.high %v6549_v21, %v6553_v32  ;;  %v6398_v47 = vld [vmem:[#allocation12 + $0x1108] sm:$0xff] }
 0x54a   :  { %7923 = vmatprep.subr.bf16.mxu0 %v13629_v37  ;;  %v2561_v37 = vmax.f32 %v15471_v11, 0.0  ;;  %v15626_v11 = vpack.c.bf16 %v2564_v55, %v2564_v55  ;;  %v6402_v28 = vld [vmem:[#allocation12 + $0x1128] sm:$0xff]  ;;  %v6509_v55 = vld [vmem:[#allocation12 + $0x1480] sm:$0xff] }
 0x54c   :  { %6338 = vmatpush2.bf16.msra.mxu1 %v13506_v63  ;;  %v13716_v63 = vcombine.low %v6549_v21, %v6553_v32  ;;  %v15624_v0 = vpack.c.bf16 %v2561_v37, %v2561_v37  ;;  %v13567_v32 = vcombine.high %v6398_v47, %v6402_v28 }
 0x54d   :  { %7924 = vmatpush2.bf16.msra.mxu0 %v13628_v29  ;;  %6339 = vmatprep.subr.bf16.mxu1 %v13499_v3  ;;  %v6414_v29 = vld [vmem:[#allocation12 + $0x1188] sm:$0xff] }
 0x54e   :  { %7925 = vmatprep.subr.bf16.mxu0 %v13621_v62  ;;  %v6418_v3 = vld [vmem:[#allocation12 + $0x11a8] sm:$0xff]  ;;  %v13590_v62 = vcombine.low %v6422_v49, %v6426_v19  ;;  %v6517_v49 = vld [vmem:[#allocation12 + $0x14c0] sm:$0xff] }
 0x54f   :  { %v13583_v13 = vcombine.high %v6414_v29, %v6418_v3  ;;  %v13582_v23 = vcombine.low %v6414_v29, %v6418_v3  ;;  %v6521_v19 = vld [vmem:[#allocation12 + $0x14e0] sm:$0xff] }
 0x550   :  { %6340 = vmatpush2.bf16.msra.mxu1 %v13498_v20  ;;  %v13685_v37 = vcombine.high %v6517_v49, %v6521_v19  ;;  %v13684_v29 = vcombine.low %v6517_v49, %v6521_v19  ;;  %v6609_v49 = vld [vmem:[#allocation12 + $0x17a0] sm:$0xff]  ;;  %v6478_v19 = vld [vmem:[#allocation12 + $0x1388] sm:$0xff] }
 0x551   :  { %7926 = vmatpush2.bf16.msra.mxu0 %v13620_v14  ;;  %6341 = vmatprep.subr.bf16.mxu1 %v13491_v27  ;;  %v6406_v14 = vld [vmem:[#allocation12 + $0x1148] sm:$0xff] }
 0x552   :  { %7927 = vmatprep.subr.bf16.mxu0 %v13613_v9  ;;  %v6410_v27 = vld [vmem:[#allocation12 + $0x1168] sm:$0xff] }
 0x554   :  { %6342 = vmatpush2.bf16.msra.mxu1 %v13490_v22  ;;  %v13701_v22 = vcombine.high %v6533_v6, %v6537_v8 }
 0x555   :  { %7928 = vmatpush2.bf16.msra.mxu0 %v13612_v30  ;;  %6343 = vmatprep.subr.bf16.mxu1 %v13483_v17  ;;  %v13575_v17 = vcombine.high %v6406_v14, %v6410_v27 }
 0x556   :  { %7929 = vmatprep.subr.bf16.mxu0 %v13605_v2  ;;  %v6525_v2 = vld [vmem:[#allocation12 + $0x1500] sm:$0xff] }
 0x558   :  { %6344 = vmatpush2.bf16.msra.mxu1 %v13482_v54 }
 0x559   :  { %7930 = vmatpush2.bf16.msra.mxu0 %v13604_v48  ;;  %6345 = vmatprep.subr.bf16.mxu1 %v13475_v16 }
 0x55a   :  { %7931 = vmatprep.subr.bf16.mxu0 %v13597_v50  ;;  %v13693_v50 = vcombine.high %v6525_v2, %v6529_v45 }
 0x55c   :  { %6346 = vmatpush2.bf16.msra.mxu1 %v13474_v24  ;;  %v6390_v24 = vld [vmem:[#allocation12 + $0x10c8] sm:$0xff] }
 0x55d   :  { %7932 = vmatpush2.bf16.msra.mxu0 %v13596_v18  ;;  %7942 = vmatprep.subr.bf16.mxu1 %v13717_v56  ;;  %v6394_v18 = vld [vmem:[#allocation12 + $0x10e8] sm:$0xff]  ;;  %v13692_v56 = vcombine.low %v6525_v2, %v6529_v45 }
 0x55e   :  { %7983 = vmatprep.subr.bf16.mxu0 %v13591_v43  ;;  %v13559_v43 = vcombine.high %v6390_v24, %v6394_v18  ;;  %v13558_v3 = vcombine.low %v6390_v24, %v6394_v18  ;;  %v6482_v24 = vld [vmem:[#allocation12 + $0x13a8] sm:$0xff] }
 0x55f   :  { %v6103_v20 = vpop.f32.mrf.mxu1  ;;  %6348 = vmatmul.mubr.bf16.vlgmr.msra.gmra.mxu1 %v15561_v44 }
 0x560   :  { %v6104_v9 = vadd.f32 %v6103_v20, %v15613_v57  ;;  %v15630_v12 = vpop.f32.mrf.mxu0  ;;  %7934 = vmatmul.mubr.bf16.vlgmr.msra.gmra.mxu0 %v15624_v0  ;;  %7943 = vmatpush1.bf16.msra.mxu1 %v13716_v63  ;;  %v6386_v63 = vld [vmem:[#allocation12 + $0x10a8] sm:$0xff] }
 0x561   :  { %7974 = vmatprep.mubr.bf16.mxu1 %v15626_v11  ;;  %v6105_v35 = vpop.f32.mrf.mxu1  ;;  %7984 = vmatpush1.bf16.msra.mxu0 %v13590_v62  ;;  %v13677_v62 = vcombine.high %v6509_v55, %v6513_v58  ;;  %v6374_v20 = vld [vmem:[#allocation12 + $0x1048] sm:$0xff] }
 0x562   :  { %v15635_v30 = vadd.f32 %v6104_v9, %v15547_v15  ;;  %v6106_v44 = vadd.f32 %v6105_v35, %v15620_v61  ;;  %8015 = vmatprep.mubr.bf16.mxu0 %v15607_v33  ;;  %v15639_v57 = vpop.f32.mrf.mxu0  ;;  %7944 = vmatprep.subr.bf16.mxu1 %v13709_v4  ;;  %v13700_v15 = vcombine.low %v6533_v6, %v6537_v8  ;;  %v6501_v6 = vld [vmem:[#allocation12 + $0x1440] sm:$0xff] }
 0x563   :  { %v6107_v46 = vpop.f32.mrf.mxu1  ;;  %7985 = vmatprep.subr.bf16.mxu0 %v13583_v13  ;;  %v13574_v61 = vcombine.low %v6406_v14, %v6410_v27  ;;  %v13551_v4 = vcombine.high %v6382_v52, %v6386_v63  ;;  %v6505_v8 = vld [vmem:[#allocation12 + $0x1460] sm:$0xff]  ;;  %v6378_v13 = vld [vmem:[#allocation12 + $0x1068] sm:$0xff]  ;;  %v13676_v14 = vcombine.low %v6509_v55, %v6513_v58  ;;  %v13550_v27 = vcombine.low %v6382_v52, %v6386_v63 }
 0x564   :  { %v15642_v54 = vadd.f32 %v6106_v44, %v15554_v53  ;;  %v6148_v48 = vpop.f32.mrf.mxu0  ;;  %7945 = vmatpush1.bf16.msra.mxu1 %v13708_v10  ;;  %v13566_v53 = vcombine.low %v6398_v47, %v6402_v28  ;;  %v13669_v9 = vcombine.high %v6501_v6, %v6505_v8  ;;  %v13543_v10 = vcombine.high %v6374_v20, %v6378_v13  ;;  %v6493_v35 = vld [vmem:[#allocation12 + $0x1400] sm:$0xff]  ;;  %v6370_v44 = vld [vmem:[#allocation12 + $0x1028] sm:$0xff] }
 0x565   :  { %v6108_v16 = vpop.f32.mrf.mxu1  ;;  %7986 = vmatpush1.bf16.msra.mxu0 %v13582_v23  ;;  %7946 = vmatprep.subr.bf16.mxu1 %v13701_v22  ;;  %v6497_v23 = vld [vmem:[#allocation12 + $0x1420] sm:$0xff]  ;;  %v6366_v22 = vld [vmem:[#allocation12 + $0x1008] sm:$0xff]  ;;  %v13542_v2 = vcombine.low %v6374_v20, %v6378_v13 }
 0x566   :  { %v6149_v21 = vpop.f32.mrf.mxu0  ;;  %7987 = vmatprep.subr.bf16.mxu0 %v13575_v17  ;;  %v13668_v17 = vcombine.low %v6501_v6, %v6505_v8  ;;  %v13661_v45 = vcombine.high %v6493_v35, %v6497_v23  ;;  %v13535_v46 = vcombine.high %v6366_v22, %v6370_v44  ;;  %v6613_v47 = vld [vmem:[#allocation12 + $0x17c0] sm:$0xff]  ;;  %v6486_v48 = vld [vmem:[#allocation12 + $0x13c8] sm:$0xff]  ;;  %v13660_v16 = vcombine.low %v6493_v35, %v6497_v23 }
 0x567   :  { %v6617_v28 = vld [vmem:[#allocation12 + $0x17e0] sm:$0xff]  ;;  %v6470_v58 = vld [vmem:[#allocation12 + $0x1348] sm:$0xff] }
 0x568   :  { %7947 = vmatpush1.bf16.msra.mxu1 %v13700_v15  ;;  %v6490_v15 = vld [vmem:[#allocation12 + $0x13e8] sm:$0xff]  ;;  %v13780_v18 = vcombine.low %v6613_v47, %v6617_v28  ;;  %v6601_v55 = vld [vmem:[#allocation12 + $0x1760] sm:$0xff] }
 0x569   :  { %7988 = vmatpush1.bf16.msra.mxu0 %v13574_v61  ;;  %7948 = vmatprep.subr.bf16.mxu1 %v13693_v50  ;;  %v13534_v61 = vcombine.low %v6366_v22, %v6370_v44  ;;  %v13781_v50 = vcombine.high %v6613_v47, %v6617_v28  ;;  %v13655_v21 = vcombine.high %v6486_v48, %v6490_v15  ;;  %v6474_v52 = vld [vmem:[#allocation12 + $0x1368] sm:$0xff]  ;;  %v6593_v6 = vld [vmem:[#allocation12 + $0x1720] sm:$0xff] }
 0x56a   :  { %7989 = vmatprep.subr.bf16.mxu0 %v13567_v32  ;;  %v6605_v32 = vld [vmem:[#allocation12 + $0x1780] sm:$0xff]  ;;  %v6462_v8 = vld [vmem:[#allocation12 + $0x1308] sm:$0xff] }
 0x56b   :  { %v13772_v63 = vcombine.low %v6605_v32, %v6609_v49  ;;  %v6466_v20 = vld [vmem:[#allocation12 + $0x1328] sm:$0xff]  ;;  %v6585_v35 = vld [vmem:[#allocation12 + $0x16e0] sm:$0xff] }
 0x56c   :  { %7949 = vmatpush1.bf16.msra.mxu1 %v13692_v56  ;;  %v13654_v56 = vcombine.low %v6486_v48, %v6490_v15  ;;  %v6454_v23 = vld [vmem:[#allocation12 + $0x12c8] sm:$0xff]  ;;  %v6577_v47 = vld [vmem:[#allocation12 + $0x16a0] sm:$0xff] }
 0x56d   :  { %7990 = vmatpush1.bf16.msra.mxu0 %v13566_v53  ;;  %7950 = vmatprep.subr.bf16.mxu1 %v13685_v37  ;;  %v13773_v53 = vcombine.high %v6605_v32, %v6609_v49  ;;  %v13647_v37 = vcombine.high %v6478_v19, %v6482_v24  ;;  %v6458_v22 = vld [vmem:[#allocation12 + $0x12e8] sm:$0xff]  ;;  %v6569_v32 = vld [vmem:[#allocation12 + $0x1660] sm:$0xff] }
 0x56e   :  { %7991 = vmatprep.subr.bf16.mxu0 %v13559_v43  ;;  %v6597_v43 = vld [vmem:[#allocation12 + $0x1740] sm:$0xff]  ;;  %v6446_v28 = vld [vmem:[#allocation12 + $0x1288] sm:$0xff] }
 0x56f   :  { %v13764_v13 = vcombine.low %v6597_v43, %v6601_v55  ;;  %v6450_v48 = vld [vmem:[#allocation12 + $0x12a8] sm:$0xff] }
 0x570   :  { %7951 = vmatpush1.bf16.msra.mxu1 %v13684_v29  ;;  %v13646_v29 = vcombine.low %v6478_v19, %v6482_v24  ;;  %v6438_v49 = vld [vmem:[#allocation12 + $0x1248] sm:$0xff] }
 0x571   :  { %7992 = vmatpush1.bf16.msra.mxu0 %v13558_v3  ;;  %7952 = vmatprep.subr.bf16.mxu1 %v13677_v62  ;;  %v13765_v3 = vcombine.high %v6597_v43, %v6601_v55  ;;  %v13639_v62 = vcombine.high %v6470_v58, %v6474_v52  ;;  %v6442_v19 = vld [vmem:[#allocation12 + $0x1268] sm:$0xff]  ;;  %v6561_v43 = vld [vmem:[#allocation12 + $0x1620] sm:$0xff] }
 0x572   :  { %7993 = vmatprep.subr.bf16.mxu0 %v13551_v4  ;;  %v6589_v4 = vld [vmem:[#allocation12 + $0x1700] sm:$0xff]  ;;  %v6430_v55 = vld [vmem:[#allocation12 + $0x1208] sm:$0xff] }
 0x573   :  { %v13756_v44 = vcombine.low %v6589_v4, %v6593_v6 }
 0x574   :  { %7953 = vmatpush1.bf16.msra.mxu1 %v13676_v14  ;;  %v13638_v14 = vcombine.low %v6470_v58, %v6474_v52  ;;  %v6434_v58 = vld [vmem:[#allocation12 + $0x1228] sm:$0xff] }
 0x575   :  { %7994 = vmatpush1.bf16.msra.mxu0 %v13550_v27  ;;  %7954 = vmatprep.subr.bf16.mxu1 %v13669_v9  ;;  %v13757_v27 = vcombine.high %v6589_v4, %v6593_v6  ;;  %v13631_v9 = vcombine.high %v6462_v8, %v6466_v20  ;;  %v6554_v4 = vld [vmem:[#allocation12 + $0x15e8] sm:$0xff]  ;;  %v6423_v6 = vld [vmem:[#allocation12 + $0x11d0] sm:$0xff] }
 0x576   :  { %7995 = vmatprep.subr.bf16.mxu0 %v13543_v10  ;;  %v6581_v10 = vld [vmem:[#allocation12 + $0x16c0] sm:$0xff] }
 0x577   :  { %v13748_v15 = vcombine.low %v6581_v10, %v6585_v35 }
 0x578   :  { %7955 = vmatpush1.bf16.msra.mxu1 %v13668_v17  ;;  %v13630_v17 = vcombine.low %v6462_v8, %v6466_v20  ;;  %v6427_v8 = vld [vmem:[#allocation12 + $0x11f0] sm:$0xff] }
 0x579   :  { %7996 = vmatpush1.bf16.msra.mxu0 %v13542_v2  ;;  %7956 = vmatprep.subr.bf16.mxu1 %v13661_v45  ;;  %v13749_v2 = vcombine.high %v6581_v10, %v6585_v35  ;;  %v13623_v45 = vcombine.high %v6454_v23, %v6458_v22  ;;  %v6542_v10 = vld [vmem:[#allocation12 + $0x1588] sm:$0xff] }
 0x57a   :  { %7997 = vmatprep.subr.bf16.mxu0 %v13535_v46  ;;  %v6573_v46 = vld [vmem:[#allocation12 + $0x1680] sm:$0xff]  ;;  %v6546_v35 = vld [vmem:[#allocation12 + $0x15a8] sm:$0xff] }
 0x57b   :  { %v13740_v24 = vcombine.low %v6573_v46, %v6577_v47 }
 0x57c   :  { %7957 = vmatpush1.bf16.msra.mxu1 %v13660_v16  ;;  %v13622_v16 = vcombine.low %v6454_v23, %v6458_v22  ;;  %v6415_v22 = vld [vmem:[#allocation12 + $0x1190] sm:$0xff] }
 0x57d   :  { %7998 = vmatpush1.bf16.msra.mxu0 %v13534_v61  ;;  %7958 = vmatprep.subr.bf16.mxu1 %v13781_v50  ;;  %v13741_v61 = vcombine.high %v6573_v46, %v6577_v47  ;;  %v13615_v50 = vcombine.high %v6446_v28, %v6450_v48  ;;  %v6538_v46 = vld [vmem:[#allocation12 + $0x1568] sm:$0xff] }
 0x57e   :  { %7999 = vmatprep.subr.bf16.mxu0 %v13655_v21  ;;  %v6565_v21 = vld [vmem:[#allocation12 + $0x1640] sm:$0xff] }
 0x57f   :  { %v13732_v52 = vcombine.low %v6565_v21, %v6569_v32 }
 0x580   :  { %7959 = vmatpush2.bf16.msra.mxu1 %v13780_v18  ;;  %v13614_v18 = vcombine.low %v6446_v28, %v6450_v48  ;;  %v6407_v48 = vld [vmem:[#allocation12 + $0x1150] sm:$0xff] }
 0x581   :  { %8000 = vmatpush2.bf16.msra.mxu0 %v13654_v56  ;;  %7960 = vmatprep.subr.bf16.mxu1 %v13773_v53  ;;  %v13733_v56 = vcombine.high %v6565_v21, %v6569_v32  ;;  %v13607_v53 = vcombine.high %v6438_v49, %v6442_v19 }
 0x582   :  { %8001 = vmatprep.subr.bf16.mxu0 %v13647_v37  ;;  %v6557_v37 = vld [vmem:[#allocation12 + $0x1600] sm:$0xff] }
 0x583   :  { %v13724_v20 = vcombine.low %v6557_v37, %v6561_v43 }
 0x584   :  { %7961 = vmatpush2.bf16.msra.mxu1 %v13772_v63  ;;  %v13606_v63 = vcombine.low %v6438_v49, %v6442_v19 }
 0x585   :  { %8002 = vmatpush2.bf16.msra.mxu0 %v13646_v29  ;;  %7962 = vmatprep.subr.bf16.mxu1 %v13765_v3  ;;  %v13725_v29 = vcombine.high %v6557_v37, %v6561_v43  ;;  %v13599_v3 = vcombine.high %v6430_v55, %v6434_v58  ;;  %v6399_v43 = vld [vmem:[#allocation12 + $0x1110] sm:$0xff] }
 0x586   :  { %8003 = vmatprep.subr.bf16.mxu0 %v13639_v62  ;;  %v6550_v62 = vld [vmem:[#allocation12 + $0x15c8] sm:$0xff] }
 0x587   :  { %v13718_v23 = vcombine.low %v6550_v62, %v6554_v4 }
 0x588   :  { %7963 = vmatpush2.bf16.msra.mxu1 %v13764_v13  ;;  %v2563_v13 = vmax.f32 %v15500_v5, 0.0  ;;  %v6534_v5 = vld [vmem:[#allocation12 + $0x1548] sm:$0xff] }
 0x589   :  { %8004 = vmatpush2.bf16.msra.mxu0 %v13638_v14  ;;  %7964 = vmatprep.subr.bf16.mxu1 %v13757_v27  ;;  %v13598_v14 = vcombine.low %v6430_v55, %v6434_v58  ;;  %v13719_v27 = vcombine.high %v6550_v62, %v6554_v4  ;;  %v13703_v49 = vcombine.high %v6534_v5, %v6538_v46  ;;  %v6403_v55 = vld [vmem:[#allocation12 + $0x1130] sm:$0xff]  ;;  %v6518_v4 = vld [vmem:[#allocation12 + $0x14c8] sm:$0xff] }
 0x58a   :  { %8005 = vmatprep.subr.bf16.mxu0 %v13631_v9  ;;  %v13593_v9 = vcombine.high %v6423_v6, %v6427_v8  ;;  %v13569_v62 = vcombine.high %v6399_v43, %v6403_v55 }
 0x58c   :  { %7965 = vmatpush2.bf16.msra.mxu1 %v13756_v44  ;;  %v6419_v44 = vld [vmem:[#allocation12 + $0x11b0] sm:$0xff] }
 0x58d   :  { %8006 = vmatpush2.bf16.msra.mxu0 %v13630_v17  ;;  %7966 = vmatprep.subr.bf16.mxu1 %v13749_v2  ;;  %v15645_v17 = vpack.c.bf16 %v2563_v13, %v2563_v13  ;;  %v13592_v2 = vcombine.low %v6423_v6, %v6427_v8  ;;  %v13585_v28 = vcombine.high %v6415_v22, %v6419_v44  ;;  %v6522_v6 = vld [vmem:[#allocation12 + $0x14e8] sm:$0xff]  ;;  %v6391_v8 = vld [vmem:[#allocation12 + $0x10d0] sm:$0xff] }
 0x58e   :  { %8007 = vmatprep.subr.bf16.mxu0 %v13623_v45  ;;  %v13711_v45 = vcombine.high %v6542_v10, %v6546_v35  ;;  %v13584_v32 = vcombine.low %v6415_v22, %v6419_v44  ;;  %v13686_v22 = vcombine.low %v6518_v4, %v6522_v6 }
 0x590   :  { %7967 = vmatpush2.bf16.msra.mxu1 %v13748_v15  ;;  %v6411_v15 = vld [vmem:[#allocation12 + $0x1170] sm:$0xff] }
 0x591   :  { %8008 = vmatpush2.bf16.msra.mxu0 %v13622_v16  ;;  %7968 = vmatprep.subr.bf16.mxu1 %v13741_v61 }
 0x592   :  { %8009 = vmatprep.subr.bf16.mxu0 %v13615_v50  ;;  %v13710_v50 = vcombine.low %v6542_v10, %v6546_v35  ;;  %v6514_v10 = vld [vmem:[#allocation12 + $0x14a8] sm:$0xff]  ;;  %v6383_v35 = vld [vmem:[#allocation12 + $0x1090] sm:$0xff] }
 0x594   :  { %7969 = vmatpush2.bf16.msra.mxu1 %v13740_v24 }
 0x595   :  { %8010 = vmatpush2.bf16.msra.mxu0 %v13614_v18  ;;  %7970 = vmatprep.subr.bf16.mxu1 %v13733_v56  ;;  %v13577_v18 = vcombine.high %v6407_v48, %v6411_v15  ;;  %v6526_v56 = vld [vmem:[#allocation12 + $0x1508] sm:$0xff] }
 0x596   :  { %8011 = vmatprep.subr.bf16.mxu0 %v13607_v53  ;;  %v6530_v53 = vld [vmem:[#allocation12 + $0x1528] sm:$0xff] }
 0x597   :  { %v13694_v13 = vcombine.low %v6526_v56, %v6530_v53 }
 0x598   :  { %7971 = vmatpush2.bf16.msra.mxu1 %v13732_v52 }
 0x599   :  { %8012 = vmatpush2.bf16.msra.mxu0 %v13606_v63  ;;  %7972 = vmatprep.subr.bf16.mxu1 %v13725_v29  ;;  %v13695_v29 = vcombine.high %v6526_v56, %v6530_v53 }
 0x59a   :  { %8013 = vmatprep.subr.bf16.mxu0 %v13599_v3 }
 0x59c   :  { %7973 = vmatpush2.bf16.msra.mxu1 %v13724_v20  ;;  %v6395_v20 = vld [vmem:[#allocation12 + $0x10f0] sm:$0xff] }
 0x59d   :  { %8014 = vmatpush2.bf16.msra.mxu0 %v13598_v14  ;;  %8024 = vmatprep.subr.bf16.mxu1 %v13719_v27  ;;  %v13687_v14 = vcombine.high %v6518_v4, %v6522_v6  ;;  %v13561_v27 = vcombine.high %v6391_v8, %v6395_v20  ;;  %v13560_v44 = vcombine.low %v6391_v8, %v6395_v20  ;;  %v6610_v4 = vld [vmem:[#allocation12 + $0x17a8] sm:$0xff]  ;;  %v6479_v6 = vld [vmem:[#allocation12 + $0x1390] sm:$0xff] }
 0x59e   :  { %8065 = vmatprep.subr.bf16.mxu0 %v13593_v9  ;;  %v6510_v9 = vld [vmem:[#allocation12 + $0x1488] sm:$0xff]  ;;  %v6483_v8 = vld [vmem:[#allocation12 + $0x13b0] sm:$0xff] }
 0x59f   :  { %v6185_v47 = vpop.f32.mrf.mxu1  ;;  %7975 = vmatmul.mubr.bf16.vlgmr.msra.gmra.mxu1 %v15645_v17 }
 0x5a0   :  { %v6186_v16 = vadd.f32 %v6185_v47, %v15630_v12  ;;  %v15649_v61 = vpop.f32.mrf.mxu0  ;;  %8016 = vmatmul.mubr.bf16.vlgmr.msra.gmra.mxu0 %v15624_v0  ;;  %8025 = vmatpush1.bf16.msra.mxu1 %v13718_v23  ;;  %v6387_v23 = vld [vmem:[#allocation12 + $0x10b0] sm:$0xff] }
 0x5a1   :  { %8056 = vmatprep.mubr.bf16.mxu1 %v15626_v11  ;;  %v6187_v21 = vpop.f32.mrf.mxu1  ;;  %8066 = vmatpush1.bf16.msra.mxu0 %v13592_v2  ;;  %v13679_v2 = vcombine.high %v6510_v9, %v6514_v10  ;;  %v6375_v47 = vld [vmem:[#allocation12 + $0x1050] sm:$0xff] }
 0x5a2   :  { %v15654_v19 = vadd.f32 %v6186_v16, %v15566_v36  ;;  %v6188_v24 = vadd.f32 %v6187_v21, %v15639_v57  ;;  %8097 = vmatprep.mubr.bf16.mxu0 %v15607_v33  ;;  %v15658_v12 = vpop.f32.mrf.mxu0  ;;  %8026 = vmatprep.subr.bf16.mxu1 %v13711_v45  ;;  %v13702_v36 = vcombine.low %v6534_v5, %v6538_v46  ;;  %v6502_v5 = vld [vmem:[#allocation12 + $0x1448] sm:$0xff] }
 0x5a3   :  { %v6189_v37 = vpop.f32.mrf.mxu1  ;;  %8067 = vmatprep.subr.bf16.mxu0 %v13585_v28  ;;  %v13576_v57 = vcombine.low %v6407_v48, %v6411_v15  ;;  %v13553_v45 = vcombine.high %v6383_v35, %v6387_v23  ;;  %v6506_v46 = vld [vmem:[#allocation12 + $0x1468] sm:$0xff]  ;;  %v6379_v28 = vld [vmem:[#allocation12 + $0x1070] sm:$0xff]  ;;  %v13678_v48 = vcombine.low %v6510_v9, %v6514_v10  ;;  %v13552_v15 = vcombine.low %v6383_v35, %v6387_v23 }
 0x5a4   :  { %v15661_v58 = vadd.f32 %v6188_v24, %v15572_v25  ;;  %v6230_v52 = vpop.f32.mrf.mxu0  ;;  %8027 = vmatpush1.bf16.msra.mxu1 %v13710_v50  ;;  %v13568_v25 = vcombine.low %v6399_v43, %v6403_v55  ;;  %v13671_v16 = vcombine.high %v6502_v5, %v6506_v46  ;;  %v13545_v50 = vcombine.high %v6375_v47, %v6379_v28  ;;  %v6494_v21 = vld [vmem:[#allocation12 + $0x1408] sm:$0xff]  ;;  %v6371_v24 = vld [vmem:[#allocation12 + $0x1030] sm:$0xff] }
 0x5a5   :  { %v6190_v63 = vpop.f32.mrf.mxu1  ;;  %8068 = vmatpush1.bf16.msra.mxu0 %v13584_v32  ;;  %8028 = vmatprep.subr.bf16.mxu1 %v13703_v49  ;;  %v6498_v32 = vld [vmem:[#allocation12 + $0x1428] sm:$0xff]  ;;  %v6367_v49 = vld [vmem:[#allocation12 + $0x1010] sm:$0xff]  ;;  %v13544_v56 = vcombine.low %v6375_v47, %v6379_v28 }
 0x5a6   :  { %v6231_v3 = vpop.f32.mrf.mxu0  ;;  %8069 = vmatprep.subr.bf16.mxu0 %v13577_v18  ;;  %v13670_v18 = vcombine.low %v6502_v5, %v6506_v46  ;;  %v13663_v53 = vcombine.high %v6494_v21, %v6498_v32  ;;  %v13537_v37 = vcombine.high %v6367_v49, %v6371_v24  ;;  %v6614_v43 = vld [vmem:[#allocation12 + $0x17c8] sm:$0xff]  ;;  %v6487_v52 = vld [vmem:[#allocation12 + $0x13d0] sm:$0xff]  ;;  %v13662_v63 = vcombine.low %v6494_v21, %v6498_v32 }
 0x5a7   :  { %v6618_v55 = vld [vmem:[#allocation12 + $0x17e8] sm:$0xff]  ;;  %v6471_v10 = vld [vmem:[#allocation12 + $0x1350] sm:$0xff] }
 0x5a8   :  { %8029 = vmatpush1.bf16.msra.mxu1 %v13702_v36  ;;  %v6491_v36 = vld [vmem:[#allocation12 + $0x13f0] sm:$0xff]  ;;  %v13782_v20 = vcombine.low %v6614_v43, %v6618_v55  ;;  %v6602_v9 = vld [vmem:[#allocation12 + $0x1768] sm:$0xff] }
 0x5a9   :  { %8070 = vmatpush1.bf16.msra.mxu0 %v13576_v57  ;;  %8030 = vmatprep.subr.bf16.mxu1 %v13695_v29  ;;  %v13536_v57 = vcombine.low %v6367_v49, %v6371_v24  ;;  %v13783_v29 = vcombine.high %v6614_v43, %v6618_v55  ;;  %v13657_v3 = vcombine.high %v6487_v52, %v6491_v36  ;;  %v6475_v35 = vld [vmem:[#allocation12 + $0x1370] sm:$0xff]  ;;  %v6594_v5 = vld [vmem:[#allocation12 + $0x1728] sm:$0xff] }
 0x5aa   :  { %8071 = vmatprep.subr.bf16.mxu0 %v13569_v62  ;;  %v6606_v62 = vld [vmem:[#allocation12 + $0x1788] sm:$0xff]  ;;  %v6463_v46 = vld [vmem:[#allocation12 + $0x1310] sm:$0xff] }
 0x5ab   :  { %v13774_v23 = vcombine.low %v6606_v62, %v6610_v4  ;;  %v6467_v47 = vld [vmem:[#allocation12 + $0x1330] sm:$0xff]  ;;  %v6586_v21 = vld [vmem:[#allocation12 + $0x16e8] sm:$0xff] }
 0x5ac   :  { %8031 = vmatpush1.bf16.msra.mxu1 %v13694_v13  ;;  %v13656_v13 = vcombine.low %v6487_v52, %v6491_v36  ;;  %v6455_v32 = vld [vmem:[#allocation12 + $0x12d0] sm:$0xff]  ;;  %v6578_v43 = vld [vmem:[#allocation12 + $0x16a8] sm:$0xff] }
 0x5ad   :  { %8072 = vmatpush1.bf16.msra.mxu0 %v13568_v25  ;;  %8032 = vmatprep.subr.bf16.mxu1 %v13687_v14  ;;  %v13775_v25 = vcombine.high %v6606_v62, %v6610_v4  ;;  %v13649_v14 = vcombine.high %v6479_v6, %v6483_v8  ;;  %v6459_v49 = vld [vmem:[#allocation12 + $0x12f0] sm:$0xff]  ;;  %v6570_v62 = vld [vmem:[#allocation12 + $0x1668] sm:$0xff] }
 0x5ae   :  { %8073 = vmatprep.subr.bf16.mxu0 %v13561_v27  ;;  %v6598_v27 = vld [vmem:[#allocation12 + $0x1748] sm:$0xff]  ;;  %v6447_v55 = vld [vmem:[#allocation12 + $0x1290] sm:$0xff] }
 0x5af   :  { %v13766_v28 = vcombine.low %v6598_v27, %v6602_v9  ;;  %v6451_v52 = vld [vmem:[#allocation12 + $0x12b0] sm:$0xff] }
 0x5b0   :  { %8033 = vmatpush1.bf16.msra.mxu1 %v13686_v22  ;;  %v13648_v22 = vcombine.low %v6479_v6, %v6483_v8  ;;  %v6439_v4 = vld [vmem:[#allocation12 + $0x1250] sm:$0xff] }
 0x5b1   :  { %8074 = vmatpush1.bf16.msra.mxu0 %v13560_v44  ;;  %8034 = vmatprep.subr.bf16.mxu1 %v13679_v2  ;;  %v13767_v44 = vcombine.high %v6598_v27, %v6602_v9  ;;  %v13641_v2 = vcombine.high %v6471_v10, %v6475_v35  ;;  %v6443_v6 = vld [vmem:[#allocation12 + $0x1270] sm:$0xff]  ;;  %v6562_v27 = vld [vmem:[#allocation12 + $0x1628] sm:$0xff] }
 0x5b2   :  { %8075 = vmatprep.subr.bf16.mxu0 %v13553_v45  ;;  %v6590_v45 = vld [vmem:[#allocation12 + $0x1708] sm:$0xff]  ;;  %v6431_v9 = vld [vmem:[#allocation12 + $0x1210] sm:$0xff] }
 0x5b3   :  { %v13758_v24 = vcombine.low %v6590_v45, %v6594_v5 }
 0x5b4   :  { %8035 = vmatpush1.bf16.msra.mxu1 %v13678_v48  ;;  %v13640_v48 = vcombine.low %v6471_v10, %v6475_v35  ;;  %v6435_v10 = vld [vmem:[#allocation12 + $0x1230] sm:$0xff] }
 0x5b5   :  { %8076 = vmatpush1.bf16.msra.mxu0 %v13552_v15  ;;  %8036 = vmatprep.subr.bf16.mxu1 %v13671_v16  ;;  %v13759_v15 = vcombine.high %v6590_v45, %v6594_v5  ;;  %v13633_v16 = vcombine.high %v6463_v46, %v6467_v47  ;;  %v6555_v45 = vld [vmem:[#allocation12 + $0x15f0] sm:$0xff]  ;;  %v6424_v5 = vld [vmem:[#allocation12 + $0x11d8] sm:$0xff] }
 0x5b6   :  { %8077 = vmatprep.subr.bf16.mxu0 %v13545_v50  ;;  %v6582_v50 = vld [vmem:[#allocation12 + $0x16c8] sm:$0xff] }
 0x5b7   :  { %v13750_v36 = vcombine.low %v6582_v50, %v6586_v21 }
 0x5b8   :  { %8037 = vmatpush1.bf16.msra.mxu1 %v13670_v18  ;;  %v13632_v18 = vcombine.low %v6463_v46, %v6467_v47  ;;  %v6428_v46 = vld [vmem:[#allocation12 + $0x11f8] sm:$0xff] }
 0x5b9   :  { %8078 = vmatpush1.bf16.msra.mxu0 %v13544_v56  ;;  %8038 = vmatprep.subr.bf16.mxu1 %v13663_v53  ;;  %v13751_v56 = vcombine.high %v6582_v50, %v6586_v21  ;;  %v13625_v53 = vcombine.high %v6455_v32, %v6459_v49  ;;  %v6547_v50 = vld [vmem:[#allocation12 + $0x15b0] sm:$0xff] }
 0x5ba   :  { %8079 = vmatprep.subr.bf16.mxu0 %v13537_v37  ;;  %v6574_v37 = vld [vmem:[#allocation12 + $0x1688] sm:$0xff] }
 0x5bb   :  { %v13742_v8 = vcombine.low %v6574_v37, %v6578_v43 }
 0x5bc   :  { %8039 = vmatpush1.bf16.msra.mxu1 %v13662_v63  ;;  %v13624_v63 = vcombine.low %v6455_v32, %v6459_v49  ;;  %v6416_v32 = vld [vmem:[#allocation12 + $0x1198] sm:$0xff] }
 0x5bd   :  { %8080 = vmatpush1.bf16.msra.mxu0 %v13536_v57  ;;  %8040 = vmatprep.subr.bf16.mxu1 %v13783_v29  ;;  %v13743_v57 = vcombine.high %v6574_v37, %v6578_v43  ;;  %v13617_v29 = vcombine.high %v6447_v55, %v6451_v52  ;;  %v6420_v49 = vld [vmem:[#allocation12 + $0x11b8] sm:$0xff] }
 0x5be   :  { %8081 = vmatprep.subr.bf16.mxu0 %v13657_v3  ;;  %v6566_v3 = vld [vmem:[#allocation12 + $0x1648] sm:$0xff]  ;;  %v13587_v43 = vcombine.high %v6416_v32, %v6420_v49 }
 0x5bf   :  { %v13734_v35 = vcombine.low %v6566_v3, %v6570_v62 }
 0x5c0   :  { %8041 = vmatpush2.bf16.msra.mxu1 %v13782_v20  ;;  %v13616_v20 = vcombine.low %v6447_v55, %v6451_v52  ;;  %v6408_v55 = vld [vmem:[#allocation12 + $0x1158] sm:$0xff] }
 0x5c1   :  { %8082 = vmatpush2.bf16.msra.mxu0 %v13656_v13  ;;  %8042 = vmatprep.subr.bf16.mxu1 %v13775_v25  ;;  %v13735_v13 = vcombine.high %v6566_v3, %v6570_v62  ;;  %v13609_v25 = vcombine.high %v6439_v4, %v6443_v6  ;;  %v6412_v52 = vld [vmem:[#allocation12 + $0x1178] sm:$0xff]  ;;  %v13586_v3 = vcombine.low %v6416_v32, %v6420_v49 }
 0x5c2   :  { %8083 = vmatprep.subr.bf16.mxu0 %v13649_v14  ;;  %v6558_v14 = vld [vmem:[#allocation12 + $0x1608] sm:$0xff] }
 0x5c3   :  { %v13726_v47 = vcombine.low %v6558_v14, %v6562_v27 }
 0x5c4   :  { %8043 = vmatpush2.bf16.msra.mxu1 %v13774_v23  ;;  %v13608_v23 = vcombine.low %v6439_v4, %v6443_v6 }
 0x5c5   :  { %8084 = vmatpush2.bf16.msra.mxu0 %v13648_v22  ;;  %8044 = vmatprep.subr.bf16.mxu1 %v13767_v44  ;;  %v13727_v22 = vcombine.high %v6558_v14, %v6562_v27  ;;  %v13601_v44 = vcombine.high %v6431_v9, %v6435_v10  ;;  %v6400_v14 = vld [vmem:[#allocation12 + $0x1118] sm:$0xff] }
 0x5c6   :  { %8085 = vmatprep.subr.bf16.mxu0 %v13641_v2  ;;  %v6551_v2 = vld [vmem:[#allocation12 + $0x15d0] sm:$0xff]  ;;  %v6404_v27 = vld [vmem:[#allocation12 + $0x1138] sm:$0xff] }
 0x5c7   :  { %v13720_v21 = vcombine.low %v6551_v2, %v6555_v45 }
 0x5c8   :  { %8045 = vmatpush2.bf16.msra.mxu1 %v13766_v28  ;;  %v13600_v28 = vcombine.low %v6431_v9, %v6435_v10 }
 0x5c9   :  { %8086 = vmatpush2.bf16.msra.mxu0 %v13640_v48  ;;  %8046 = vmatprep.subr.bf16.mxu1 %v13759_v15  ;;  %v13721_v48 = vcombine.high %v6551_v2, %v6555_v45  ;;  %v13595_v15 = vcombine.high %v6424_v5, %v6428_v46  ;;  %v6523_v2 = vld [vmem:[#allocation12 + $0x14f0] sm:$0xff]  ;;  %v6392_v45 = vld [vmem:[#allocation12 + $0x10d8] sm:$0xff] }
 0x5ca   :  { %8087 = vmatprep.subr.bf16.mxu0 %v13633_v16  ;;  %v6543_v16 = vld [vmem:[#allocation12 + $0x1590] sm:$0xff] }
 0x5cc   :  { %8047 = vmatpush2.bf16.msra.mxu1 %v13758_v24  ;;  %v13594_v24 = vcombine.low %v6424_v5, %v6428_v46  ;;  %v6396_v5 = vld [vmem:[#allocation12 + $0x10f8] sm:$0xff] }
 0x5cd   :  { %8088 = vmatpush2.bf16.msra.mxu0 %v13632_v18  ;;  %8048 = vmatprep.subr.bf16.mxu1 %v13751_v56  ;;  %v13713_v18 = vcombine.high %v6543_v16, %v6547_v50  ;;  %v6535_v56 = vld [vmem:[#allocation12 + $0x1550] sm:$0xff]  ;;  %v13562_v32 = vcombine.low %v6392_v45, %v6396_v5 }
 0x5ce   :  { %8089 = vmatprep.subr.bf16.mxu0 %v13625_v53  ;;  %v6539_v53 = vld [vmem:[#allocation12 + $0x1570] sm:$0xff] }
 0x5cf   :  { %v13705_v62 = vcombine.high %v6535_v56, %v6539_v53 }
 0x5d0   :  { %8049 = vmatpush2.bf16.msra.mxu1 %v13750_v36 }
 0x5d1   :  { %8090 = vmatpush2.bf16.msra.mxu0 %v13624_v63  ;;  %8050 = vmatprep.subr.bf16.mxu1 %v13743_v57  ;;  %v13712_v57 = vcombine.low %v6543_v16, %v6547_v50  ;;  %v6384_v16 = vld [vmem:[#allocation12 + $0x1098] sm:$0xff] }
 0x5d2   :  { %8091 = vmatprep.subr.bf16.mxu0 %v13617_v29  ;;  %v6388_v50 = vld [vmem:[#allocation12 + $0x10b8] sm:$0xff] }
 0x5d4   :  { %8051 = vmatpush2.bf16.msra.mxu1 %v13742_v8  ;;  %v13579_v8 = vcombine.high %v6408_v55, %v6412_v52 }
 0x5d5   :  { %8092 = vmatpush2.bf16.msra.mxu0 %v13616_v20  ;;  %8052 = vmatprep.subr.bf16.mxu1 %v13735_v13  ;;  %v6527_v20 = vld [vmem:[#allocation12 + $0x1510] sm:$0xff] }
 0x5d6   :  { %8093 = vmatprep.subr.bf16.mxu0 %v13609_v25  ;;  %v6531_v13 = vld [vmem:[#allocation12 + $0x1530] sm:$0xff] }
 0x5d7   :  { %v13696_v46 = vcombine.low %v6527_v20, %v6531_v13 }
 0x5d8   :  { %8053 = vmatpush2.bf16.msra.mxu1 %v13734_v35 }
 0x5d9   :  { %8094 = vmatpush2.bf16.msra.mxu0 %v13608_v23  ;;  %8054 = vmatprep.subr.bf16.mxu1 %v13727_v22  ;;  %v13571_v22 = vcombine.high %v6400_v14, %v6404_v27 }
 0x5da   :  { %8095 = vmatprep.subr.bf16.mxu0 %v13601_v44  ;;  %v6519_v44 = vld [vmem:[#allocation12 + $0x14d0] sm:$0xff] }
 0x5dc   :  { %8055 = vmatpush2.bf16.msra.mxu1 %v13726_v47  ;;  %v13689_v47 = vcombine.high %v6519_v44, %v6523_v2 }
 0x5dd   :  { %8096 = vmatpush2.bf16.msra.mxu0 %v13600_v28  ;;  %8106 = vmatprep.subr.bf16.mxu1 %v13721_v48  ;;  %v13563_v28 = vcombine.high %v6392_v45, %v6396_v5  ;;  %v6511_v48 = vld [vmem:[#allocation12 + $0x1490] sm:$0xff] }
 0x5de   :  { %8147 = vmatprep.subr.bf16.mxu0 %v13595_v15  ;;  %v6515_v15 = vld [vmem:[#allocation12 + $0x14b0] sm:$0xff] }
 0x5df   :  { %v6267_v37 = vpop.f32.mrf.mxu1  ;;  %8057 = vmatmul.mubr.bf16.vlgmr.msra.gmra.mxu1 %v15645_v17  ;;  %v13681_v49 = vcombine.high %v6511_v48, %v6515_v15 }
 0x5e0   :  { %v6268_v36 = vadd.f32 %v6267_v37, %v15649_v61  ;;  %v15665_v63 = vpop.f32.mrf.mxu0  ;;  %8098 = vmatmul.mubr.bf16.vlgmr.msra.gmra.mxu0 %v15624_v0  ;;  %8107 = vmatpush1.bf16.msra.mxu1 %v13720_v21  ;;  %v13688_v21 = vcombine.low %v6519_v44, %v6523_v2  ;;  %v6380_v37 = vld [vmem:[#allocation12 + $0x1078] sm:$0xff] }
 0x5e1   :  { %8138 = vmatprep.mubr.bf16.mxu1 %v15626_v11  ;;  %v6269_v29 = vpop.f32.mrf.mxu1  ;;  %8148 = vmatpush1.bf16.msra.mxu0 %v13594_v24  ;;  %v13555_v24 = vcombine.high %v6384_v16, %v6388_v50  ;;  %v6480_v44 = vld [vmem:[#allocation12 + $0x1398] sm:$0xff] }
 0x5e2   :  { %v15670_v4 = vadd.f32 %v6268_v36, %v15588_v34  ;;  %v6270_v6 = vadd.f32 %v6269_v29, %v15658_v12  ;;  %8179 = vmatprep.mubr.bf16.mxu0 %v15607_v33  ;;  %v15674_v61 = vpop.f32.mrf.mxu0  ;;  %8108 = vmatprep.subr.bf16.mxu1 %v13713_v18  ;;  %v13704_v34 = vcombine.low %v6535_v56, %v6539_v53  ;;  %v6503_v18 = vld [vmem:[#allocation12 + $0x1450] sm:$0xff]  ;;  %v6376_v53 = vld [vmem:[#allocation12 + $0x1058] sm:$0xff] }
 0x5e3   :  { %v6271_v25 = vpop.f32.mrf.mxu1  ;;  %8149 = vmatprep.subr.bf16.mxu0 %v13587_v43  ;;  %v13578_v33 = vcombine.low %v6408_v55, %v6412_v52  ;;  %v13697_v12 = vcombine.high %v6527_v20, %v6531_v13  ;;  %v6507_v56 = vld [vmem:[#allocation12 + $0x1470] sm:$0xff]  ;;  %v13680_v43 = vcombine.low %v6511_v48, %v6515_v15  ;;  %v13554_v55 = vcombine.low %v6384_v16, %v6388_v50  ;;  %v6484_v2 = vld [vmem:[#allocation12 + $0x13b8] sm:$0xff] }
 0x5e4   :  { %v15677_v9 = vadd.f32 %v6270_v6, %v15594_v51  ;;  %v6312_v10 = vpop.f32.mrf.mxu0  ;;  %8109 = vmatpush1.bf16.msra.mxu1 %v13712_v57  ;;  %v13570_v51 = vcombine.low %v6400_v14, %v6404_v27  ;;  %v13673_v52 = vcombine.high %v6503_v18, %v6507_v56  ;;  %v13547_v36 = vcombine.high %v6376_v53, %v6380_v37  ;;  %v6495_v57 = vld [vmem:[#allocation12 + $0x1410] sm:$0xff]  ;;  %v6488_v27 = vld [vmem:[#allocation12 + $0x13d8] sm:$0xff] }
 0x5e5   :  { %v6272_v35 = vpop.f32.mrf.mxu1  ;;  %8150 = vmatpush1.bf16.msra.mxu0 %v13586_v3  ;;  %8110 = vmatprep.subr.bf16.mxu1 %v13705_v62  ;;  %v6499_v29 = vld [vmem:[#allocation12 + $0x1430] sm:$0xff]  ;;  %v6368_v3 = vld [vmem:[#allocation12 + $0x1018] sm:$0xff]  ;;  %v13672_v6 = vcombine.low %v6503_v18, %v6507_v56  ;;  %v13650_v50 = vcombine.low %v6480_v44, %v6484_v2 }
 0x5e6   :  { %v6313_v23 = vpop.f32.mrf.mxu0  ;;  %8151 = vmatprep.subr.bf16.mxu0 %v13579_v8  ;;  %v6372_v62 = vld [vmem:[#allocation12 + $0x1038] sm:$0xff]  ;;  %v13546_v8 = vcombine.low %v6376_v53, %v6380_v37  ;;  %v13665_v20 = vcombine.high %v6495_v57, %v6499_v29  ;;  %v6615_v25 = vld [vmem:[#allocation12 + $0x17d0] sm:$0xff] }
 0x5e7   :  { %v13539_v13 = vcombine.high %v6368_v3, %v6372_v62  ;;  %v6619_v14 = vld [vmem:[#allocation12 + $0x17f0] sm:$0xff]  ;;  %v6492_v10 = vld [vmem:[#allocation12 + $0x13f8] sm:$0xff]  ;;  %v13538_v35 = vcombine.low %v6368_v3, %v6372_v62 }
 0x5e8   :  { %8111 = vmatpush1.bf16.msra.mxu1 %v13704_v34  ;;  %v13664_v34 = vcombine.low %v6495_v57, %v6499_v29  ;;  %v6607_v23 = vld [vmem:[#allocation12 + $0x1790] sm:$0xff]  ;;  %v13784_v45 = vcombine.low %v6615_v25, %v6619_v14  ;;  %v13658_v5 = vcombine.low %v6488_v27, %v6492_v10  ;;  %v6472_v48 = vld [vmem:[#allocation12 + $0x1358] sm:$0xff] }
 0x5e9   :  { %8152 = vmatpush1.bf16.msra.mxu0 %v13578_v33  ;;  %8112 = vmatprep.subr.bf16.mxu1 %v13697_v12  ;;  %v13785_v33 = vcombine.high %v6615_v25, %v6619_v14  ;;  %v13659_v12 = vcombine.high %v6488_v27, %v6492_v10  ;;  %v6476_v15 = vld [vmem:[#allocation12 + $0x1378] sm:$0xff] }
 0x5ea   :  { %8153 = vmatprep.subr.bf16.mxu0 %v13571_v22  ;;  %v6611_v22 = vld [vmem:[#allocation12 + $0x17b0] sm:$0xff]  ;;  %v6464_v18 = vld [vmem:[#allocation12 + $0x1318] sm:$0xff]  ;;  %v13642_v37 = vcombine.low %v6472_v48, %v6476_v15 }
 0x5eb   :  { %v13776_v16 = vcombine.low %v6607_v23, %v6611_v22  ;;  %v6468_v56 = vld [vmem:[#allocation12 + $0x1338] sm:$0xff] }
 0x5ec   :  { %8113 = vmatpush1.bf16.msra.mxu1 %v13696_v46  ;;  %v13777_v46 = vcombine.high %v6607_v23, %v6611_v22  ;;  %v6456_v57 = vld [vmem:[#allocation12 + $0x12d8] sm:$0xff]  ;;  %v13634_v62 = vcombine.low %v6464_v18, %v6468_v56 }
 0x5ed   :  { %8154 = vmatpush1.bf16.msra.mxu0 %v13570_v51  ;;  %8114 = vmatprep.subr.bf16.mxu1 %v13689_v47  ;;  %v13651_v51 = vcombine.high %v6480_v44, %v6484_v2  ;;  %v6599_v47 = vld [vmem:[#allocation12 + $0x1750] sm:$0xff]  ;;  %v6460_v29 = vld [vmem:[#allocation12 + $0x12f8] sm:$0xff] }
 0x5ee   :  { %8155 = vmatprep.subr.bf16.mxu0 %v13563_v28  ;;  %v6603_v28 = vld [vmem:[#allocation12 + $0x1770] sm:$0xff]  ;;  %v6448_v25 = vld [vmem:[#allocation12 + $0x1298] sm:$0xff]  ;;  %v13626_v10 = vcombine.low %v6456_v57, %v6460_v29 }
 0x5ef   :  { %v13768_v53 = vcombine.low %v6599_v47, %v6603_v28  ;;  %v6452_v14 = vld [vmem:[#allocation12 + $0x12b8] sm:$0xff] }
 0x5f0   :  { %8115 = vmatpush1.bf16.msra.mxu1 %v13688_v21  ;;  %v13769_v21 = vcombine.high %v6599_v47, %v6603_v28  ;;  %v6440_v23 = vld [vmem:[#allocation12 + $0x1258] sm:$0xff]  ;;  %v13618_v2 = vcombine.low %v6448_v25, %v6452_v14 }
 0x5f1   :  { %8156 = vmatpush1.bf16.msra.mxu0 %v13562_v32  ;;  %8116 = vmatprep.subr.bf16.mxu1 %v13681_v49  ;;  %v13643_v32 = vcombine.high %v6472_v48, %v6476_v15  ;;  %v6591_v49 = vld [vmem:[#allocation12 + $0x1710] sm:$0xff]  ;;  %v6444_v22 = vld [vmem:[#allocation12 + $0x1278] sm:$0xff] }
 0x5f2   :  { %8157 = vmatprep.subr.bf16.mxu0 %v13555_v24  ;;  %v6595_v24 = vld [vmem:[#allocation12 + $0x1730] sm:$0xff]  ;;  %v6432_v47 = vld [vmem:[#allocation12 + $0x1218] sm:$0xff]  ;;  %v13610_v15 = vcombine.low %v6440_v23, %v6444_v22 }
 0x5f3   :  { %v13760_v3 = vcombine.low %v6591_v49, %v6595_v24  ;;  %v6436_v28 = vld [vmem:[#allocation12 + $0x1238] sm:$0xff] }
 0x5f4   :  { %8117 = vmatpush1.bf16.msra.mxu1 %v13680_v43  ;;  %v13761_v43 = vcombine.high %v6591_v49, %v6595_v24  ;;  %v8309_v49 = vld [vmem:[#allocation15 + $0x1c0] sm:$0xff] }
 0x5f5   :  { %8158 = vmatpush1.bf16.msra.mxu0 %v13554_v55  ;;  %8118 = vmatprep.subr.bf16.mxu1 %v13673_v52  ;;  %v13635_v55 = vcombine.high %v6464_v18, %v6468_v56  ;;  %v6583_v52 = vld [vmem:[#allocation12 + $0x16d0] sm:$0xff]  ;;  %v8313_v24 = vld [vmem:[#allocation15 + $0x1e0] sm:$0xff]  ;;  %v13602_v56 = vcombine.low %v6432_v47, %v6436_v28 }
 0x5f6   :  { %8159 = vmatprep.subr.bf16.mxu0 %v13547_v36  ;;  %v6587_v36 = vld [vmem:[#allocation12 + $0x16f0] sm:$0xff] }
 0x5f7   :  { %v13752_v27 = vcombine.low %v6583_v52, %v6587_v36 }
 0x5f8   :  { %8119 = vmatpush1.bf16.msra.mxu1 %v13672_v6  ;;  %v13753_v6 = vcombine.high %v6583_v52, %v6587_v36  ;;  %v8301_v36 = vld [vmem:[#allocation15 + $0x180] sm:$0xff] }
 0x5f9   :  { %8160 = vmatpush1.bf16.msra.mxu0 %v13546_v8  ;;  %8120 = vmatprep.subr.bf16.mxu1 %v13665_v20  ;;  %v13627_v8 = vcombine.high %v6456_v57, %v6460_v29  ;;  %v6575_v20 = vld [vmem:[#allocation12 + $0x1690] sm:$0xff]  ;;  %v8305_v57 = vld [vmem:[#allocation15 + $0x1a0] sm:$0xff] }
 0x5fa   :  { %8161 = vmatprep.subr.bf16.mxu0 %v13539_v13  ;;  %v6579_v13 = vld [vmem:[#allocation12 + $0x16b0] sm:$0xff] }
 0x5fb   :  { %v13744_v44 = vcombine.low %v6575_v20, %v6579_v13 }
 0x5fc   :  { %8121 = vmatpush1.bf16.msra.mxu1 %v13664_v34  ;;  %v13745_v34 = vcombine.high %v6575_v20, %v6579_v13  ;;  %v13837_v20 = vcombine.high %v8301_v36, %v8305_v57 }
 0x5fd   :  { %8162 = vmatpush1.bf16.msra.mxu0 %v13538_v35  ;;  %8122 = vmatprep.subr.bf16.mxu1 %v13785_v33  ;;  %v13619_v35 = vcombine.high %v6448_v25, %v6452_v14  ;;  %v6567_v33 = vld [vmem:[#allocation12 + $0x1650] sm:$0xff] }
 0x5fe   :  { %8163 = vmatprep.subr.bf16.mxu0 %v13659_v12  ;;  %v6571_v12 = vld [vmem:[#allocation12 + $0x1670] sm:$0xff] }
 0x5ff   :  { %v13736_v48 = vcombine.low %v6567_v33, %v6571_v12 }
 0x600   :  { %8123 = vmatpush2.bf16.msra.mxu1 %v13784_v45  ;;  %v13737_v45 = vcombine.high %v6567_v33, %v6571_v12 }
 0x601   :  { %8164 = vmatpush2.bf16.msra.mxu0 %v13658_v5  ;;  %8124 = vmatprep.subr.bf16.mxu1 %v13777_v46  ;;  %v13611_v5 = vcombine.high %v6440_v23, %v6444_v22  ;;  %v6559_v46 = vld [vmem:[#allocation12 + $0x1610] sm:$0xff]  ;;  %v6532_v22 = vld [vmem:[#allocation12 + $0x1538] sm:$0xff] }
 0x602   :  { %8165 = vmatprep.subr.bf16.mxu0 %v13651_v51  ;;  %v6563_v51 = vld [vmem:[#allocation12 + $0x1630] sm:$0xff] }
 0x603   :  { %v13728_v18 = vcombine.low %v6559_v46, %v6563_v51 }
 0x604   :  { %8125 = vmatpush2.bf16.msra.mxu1 %v13776_v16  ;;  %v13729_v16 = vcombine.high %v6559_v46, %v6563_v51  ;;  %v8285_v46 = vld [vmem:[#allocation15 + $0x100] sm:$0xff] }
 0x605   :  { %8166 = vmatpush2.bf16.msra.mxu0 %v13650_v50  ;;  %8126 = vmatprep.subr.bf16.mxu1 %v13769_v21  ;;  %v13603_v50 = vcombine.high %v6432_v47, %v6436_v28  ;;  %v6552_v21 = vld [vmem:[#allocation12 + $0x15d8] sm:$0xff] }
 0x606   :  { %8167 = vmatprep.subr.bf16.mxu0 %v13643_v32  ;;  %v6556_v32 = vld [vmem:[#allocation12 + $0x15f8] sm:$0xff] }
 0x607   :  { %v13722_v52 = vcombine.low %v6552_v21, %v6556_v32  ;;  %v6520_v28 = vld [vmem:[#allocation12 + $0x14d8] sm:$0xff] }
 0x608   :  { %8127 = vmatpush2.bf16.msra.mxu1 %v13768_v53  ;;  %v13723_v53 = vcombine.high %v6552_v21, %v6556_v32  ;;  %v8277_v21 = vld [vmem:[#allocation15 + $0xc0] sm:$0xff] }
 0x609   :  { %8168 = vmatpush2.bf16.msra.mxu0 %v13642_v37  ;;  %8128 = vmatprep.subr.bf16.mxu1 %v13761_v43  ;;  %v6544_v37 = vld [vmem:[#allocation12 + $0x1598] sm:$0xff] }
 0x60a   :  { %8169 = vmatprep.subr.bf16.mxu0 %v13635_v55  ;;  %v6548_v43 = vld [vmem:[#allocation12 + $0x15b8] sm:$0xff]  ;;  %v13845_v55 = vcombine.high %v8309_v49, %v8313_v24 }
 0x60b   :  { %v13715_v29 = vcombine.high %v6544_v37, %v6548_v43  ;;  %v13714_v14 = vcombine.low %v6544_v37, %v6548_v43  ;;  %v8269_v37 = vld [vmem:[#allocation15 + $0x80] sm:$0xff] }
 0x60c   :  { %8129 = vmatpush2.bf16.msra.mxu1 %v13760_v3  ;;  %v6536_v3 = vld [vmem:[#allocation12 + $0x1558] sm:$0xff]  ;;  %v8273_v43 = vld [vmem:[#allocation15 + $0xa0] sm:$0xff] }
 0x60d   :  { %8170 = vmatpush2.bf16.msra.mxu0 %v13634_v62  ;;  %8130 = vmatprep.subr.bf16.mxu1 %v13753_v6  ;;  %v6540_v62 = vld [vmem:[#allocation12 + $0x1578] sm:$0xff]  ;;  %v13844_v6 = vcombine.low %v8309_v49, %v8313_v24 }
 0x60e   :  { %8171 = vmatprep.subr.bf16.mxu0 %v13627_v8  ;;  %v6512_v49 = vld [vmem:[#allocation12 + $0x1498] sm:$0xff] }
 0x60f   :  { %v6516_v24 = vld [vmem:[#allocation12 + $0x14b8] sm:$0xff] }
 0x610   :  { %8131 = vmatpush2.bf16.msra.mxu1 %v13752_v27  ;;  %v8293_v27 = vld [vmem:[#allocation15 + $0x140] sm:$0xff] }
 0x611   :  { %8172 = vmatpush2.bf16.msra.mxu0 %v13626_v10  ;;  %8132 = vmatprep.subr.bf16.mxu1 %v13745_v34  ;;  %v8297_v10 = vld [vmem:[#allocation15 + $0x160] sm:$0xff] }
 0x612   :  { %8173 = vmatprep.subr.bf16.mxu0 %v13619_v35  ;;  %v13707_v35 = vcombine.high %v6536_v3, %v6540_v62 }
 0x614   :  { %8133 = vmatpush2.bf16.msra.mxu1 %v13744_v44 }
 0x615   :  { %8174 = vmatpush2.bf16.msra.mxu0 %v13618_v2  ;;  %8134 = vmatprep.subr.bf16.mxu1 %v13737_v45  ;;  %v13829_v2 = vcombine.high %v8293_v27, %v8297_v10 }
 0x616   :  { %8175 = vmatprep.subr.bf16.mxu0 %v13611_v5  ;;  %v13706_v5 = vcombine.low %v6536_v3, %v6540_v62  ;;  %v13682_v3 = vcombine.low %v6512_v49, %v6516_v24  ;;  %v8261_v62 = vld [vmem:[#allocation15 + $0x40] sm:$0xff] }
 0x618   :  { %8135 = vmatpush2.bf16.msra.mxu1 %v13736_v48  ;;  %v6524_v48 = vld [vmem:[#allocation12 + $0x14f8] sm:$0xff] }
 0x619   :  { %8176 = vmatpush2.bf16.msra.mxu0 %v13610_v15  ;;  %8136 = vmatprep.subr.bf16.mxu1 %v13729_v16  ;;  %v13828_v15 = vcombine.low %v8293_v27, %v8297_v10  ;;  %v13691_v32 = vcombine.high %v6520_v28, %v6524_v48 }
 0x61a   :  { %8177 = vmatprep.subr.bf16.mxu0 %v13603_v50 }
 0x61c   :  { %8137 = vmatpush2.bf16.msra.mxu1 %v13728_v18 }
 0x61d   :  { %8178 = vmatpush2.bf16.msra.mxu0 %v13602_v56  ;;  %8188 = vmatprep.subr.bf16.mxu1 %v13723_v53  ;;  %v13690_v53 = vcombine.low %v6520_v28, %v6524_v48  ;;  %v8365_v48 = vld [vmem:[#allocation15 + $0x380] sm:$0xff] }
 0x61e   :  { %11367 = vmatprep.subr.bf16.mxu0 %v13845_v55  ;;  %v13683_v55 = vcombine.high %v6512_v49, %v6516_v24  ;;  %v8357_v24 = vld [vmem:[#allocation15 + $0x340] sm:$0xff] }
 0x61f   :  { %v6349_v8 = vpop.f32.mrf.mxu1  ;;  %8139 = vmatmul.mubr.bf16.vlgmr.msra.gmra.mxu1 %v15645_v17 }
 0x620   :  { %v6350_v13 = vadd.f32 %v6349_v8, %v15665_v63  ;;  %v15681_v25 = vpop.f32.mrf.mxu0  ;;  %8180 = vmatmul.mubr.bf16.vlgmr.msra.gmra.mxu0 %v15624_v0  ;;  %8189 = vmatpush1.bf16.msra.mxu1 %v13722_v52  ;;  %v6528_v63 = vld [vmem:[#allocation12 + $0x1518] sm:$0xff]  ;;  %v13836_v0 = vcombine.low %v8301_v36, %v8305_v57 }
 0x621   :  { %8220 = vmatprep.mubr.bf16.mxu1 %v15626_v11  ;;  %v6351_v34 = vpop.f32.mrf.mxu1  ;;  %8190 = vmatprep.subr.bf16.mxu1 %v13715_v29  ;;  %v13698_v50 = vcombine.low %v6528_v63, %v6532_v22  ;;  %v6504_v52 = vld [vmem:[#allocation12 + $0x1458] sm:$0xff]  ;;  %v13805_v29 = vcombine.high %v8269_v37, %v8273_v43 }
 0x622   :  { %v15686_v33 = vadd.f32 %v6350_v13, %v15611_v31  ;;  %v6352_v12 = vadd.f32 %v6351_v34, %v15674_v61  ;;  %v15689_v23 = vpop.f32.mrf.mxu0  ;;  %11368 = vmatpush1.bf16.msra.mxu0 %v13844_v6  ;;  %v8289_v31 = vld [vmem:[#allocation15 + $0x120] sm:$0xff]  ;;  %v13699_v61 = vcombine.high %v6528_v63, %v6532_v22  ;;  %v6508_v36 = vld [vmem:[#allocation12 + $0x1478] sm:$0xff] }
 0x623   :  { %v6353_v44 = vpop.f32.mrf.mxu1  ;;  %11369 = vmatprep.subr.bf16.mxu0 %v13837_v20  ;;  %v13821_v16 = vcombine.high %v8285_v46, %v8289_v31  ;;  %v13820_v18 = vcombine.low %v8285_v46, %v8289_v31  ;;  %v8265_v6 = vld [vmem:[#allocation15 + $0x60] sm:$0xff]  ;;  %v13675_v8 = vcombine.high %v6504_v52, %v6508_v36  ;;  %v6496_v20 = vld [vmem:[#allocation12 + $0x1418] sm:$0xff]  ;;  %v13674_v10 = vcombine.low %v6504_v52, %v6508_v36 }
 0x624   :  { %v15692_v45 = vadd.f32 %v6352_v12, %v15617_v60  ;;  %v7939_v11 = vpop.f32.mrf.mxu0  ;;  %8191 = vmatpush1.bf16.msra.mxu1 %v13714_v14  ;;  %v8281_v60 = vld [vmem:[#allocation15 + $0xe0] sm:$0xff]  ;;  %v6500_v13 = vld [vmem:[#allocation12 + $0x1438] sm:$0xff]  ;;  %v13804_v14 = vcombine.low %v8269_v37, %v8273_v43  ;;  %v13797_v27 = vcombine.high %v8261_v62, %v8265_v6 }
 0x625   :  { %v6354_v51 = vpop.f32.mrf.mxu1  ;;  %8192 = vmatprep.subr.bf16.mxu1 %v13707_v35  ;;  %v13813_v56 = vcombine.high %v8277_v21, %v8281_v60  ;;  %v13812_v57 = vcombine.low %v8277_v21, %v8281_v60  ;;  %v8253_v34 = vld [vmem:[#allocation15] sm:$0xff]  ;;  %v13667_v12 = vcombine.high %v6496_v20, %v6500_v13  ;;  %v6616_v63 = vld [vmem:[#allocation12 + $0x17d8] sm:$0xff] }
 0x626   :  { %v7940_v47 = vpop.f32.mrf.mxu0  ;;  %11370 = vmatpush1.bf16.msra.mxu0 %v13836_v0  ;;  %v8257_v35 = vld [vmem:[#allocation15 + $0x20] sm:$0xff]  ;;  %v6620_v22 = vld [vmem:[#allocation12 + $0x17f8] sm:$0xff]  ;;  %v13796_v0 = vcombine.low %v8261_v62, %v8265_v6 }
 0x627   :  { %11371 = vmatprep.subr.bf16.mxu0 %v13829_v2  ;;  %v13789_v44 = vcombine.high %v8253_v34, %v8257_v35  ;;  %v13666_v2 = vcombine.low %v6496_v20, %v6500_v13  ;;  %v8373_v11 = vld [vmem:[#allocation15 + $0x3c0] sm:$0xff]  ;;  %v13787_v46 = vcombine.high %v6616_v63, %v6620_v22  ;;  %v6608_v31 = vld [vmem:[#allocation12 + $0x1798] sm:$0xff]  ;;  %v13786_v28 = vcombine.low %v6616_v63, %v6620_v22 }
 0x628   :  { %8193 = vmatpush1.bf16.msra.mxu1 %v13706_v5  ;;  %v8377_v5 = vld [vmem:[#allocation15 + $0x3e0] sm:$0xff]  ;;  %v6612_v51 = vld [vmem:[#allocation12 + $0x17b8] sm:$0xff] }
 0x629   :  { %8194 = vmatprep.subr.bf16.mxu1 %v13699_v61  ;;  %v13788_v61 = vcombine.low %v8253_v34, %v8257_v35  ;;  %v13909_v47 = vcombine.high %v8373_v11, %v8377_v5  ;;  %v6604_v21 = vld [vmem:[#allocation12 + $0x1778] sm:$0xff]  ;;  %v13908_v60 = vcombine.low %v8373_v11, %v8377_v5  ;;  %v13778_v49 = vcombine.low %v6608_v31, %v6612_v51  ;;  %v8349_v36 = vld [vmem:[#allocation15 + $0x300] sm:$0xff] }
 0x62a   :  { %11372 = vmatpush1.bf16.msra.mxu0 %v13828_v15  ;;  %v8369_v15 = vld [vmem:[#allocation15 + $0x3a0] sm:$0xff]  ;;  %v6596_v37 = vld [vmem:[#allocation12 + $0x1738] sm:$0xff] }
 0x62b   :  { %11373 = vmatprep.subr.bf16.mxu0 %v13821_v16  ;;  %v13779_v16 = vcombine.high %v6608_v31, %v6612_v51  ;;  %v13900_v43 = vcombine.low %v8365_v48, %v8369_v15  ;;  %v6588_v62 = vld [vmem:[#allocation12 + $0x16f8] sm:$0xff]  ;;  %v8341_v13 = vld [vmem:[#allocation15 + $0x2c0] sm:$0xff] }
 0x62c   :  { %8195 = vmatpush1.bf16.msra.mxu1 %v13698_v50  ;;  %v6600_v50 = vld [vmem:[#allocation12 + $0x1758] sm:$0xff]  ;;  %v8333_v22 = vld [vmem:[#allocation15 + $0x280] sm:$0xff] }
 0x62d   :  { %8196 = vmatprep.subr.bf16.mxu1 %v13691_v32  ;;  %v13901_v32 = vcombine.high %v8365_v48, %v8369_v15  ;;  %v13770_v52 = vcombine.low %v6600_v50, %v6604_v21  ;;  %v6580_v34 = vld [vmem:[#allocation12 + $0x16b8] sm:$0xff]  ;;  %v8325_v51 = vld [vmem:[#allocation15 + $0x240] sm:$0xff] }
 0x62e   :  { %11374 = vmatpush1.bf16.msra.mxu0 %v13820_v18  ;;  %v8361_v18 = vld [vmem:[#allocation15 + $0x360] sm:$0xff]  ;;  %v6572_v11 = vld [vmem:[#allocation12 + $0x1678] sm:$0xff] }
 0x62f   :  { %11375 = vmatprep.subr.bf16.mxu0 %v13813_v56  ;;  %v13771_v56 = vcombine.high %v6600_v50, %v6604_v21  ;;  %v13892_v6 = vcombine.low %v8357_v24, %v8361_v18  ;;  %v6564_v48 = vld [vmem:[#allocation12 + $0x1638] sm:$0xff]  ;;  %v8317_v21 = vld [vmem:[#allocation15 + $0x200] sm:$0xff] }
 0x630   :  { %8197 = vmatpush1.bf16.msra.mxu1 %v13690_v53  ;;  %v6592_v53 = vld [vmem:[#allocation12 + $0x1718] sm:$0xff] }
 0x631   :  { %8198 = vmatprep.subr.bf16.mxu1 %v13683_v55  ;;  %v13893_v55 = vcombine.high %v8357_v24, %v8361_v18  ;;  %v13762_v20 = vcombine.low %v6592_v53, %v6596_v37  ;;  %v8437_v24 = vld [vmem:[#allocation15 + $0x5c0] sm:$0xff] }
 0x632   :  { %11376 = vmatpush1.bf16.msra.mxu0 %v13812_v57  ;;  %v8353_v57 = vld [vmem:[#allocation15 + $0x320] sm:$0xff] }
 0x633   :  { %11377 = vmatprep.subr.bf16.mxu0 %v13805_v29  ;;  %v13763_v29 = vcombine.high %v6592_v53, %v6596_v37  ;;  %v13884_v35 = vcombine.low %v8349_v36, %v8353_v57  ;;  %v8441_v18 = vld [vmem:[#allocation15 + $0x5e0] sm:$0xff] }
 0x634   :  { %8199 = vmatpush1.bf16.msra.mxu1 %v13682_v3  ;;  %v6584_v3 = vld [vmem:[#allocation12 + $0x16d8] sm:$0xff]  ;;  %v15694_v37 = vld [vmem:[#allocation15 + $0x9c0] sm:$0xff] }
 0x635   :  { %8200 = vmatprep.subr.bf16.mxu1 %v13675_v8  ;;  %v13885_v8 = vcombine.high %v8349_v36, %v8353_v57  ;;  %v13754_v63 = vcombine.low %v6584_v3, %v6588_v62  ;;  %v8429_v36 = vld [vmem:[#allocation15 + $0x580] sm:$0xff] }
 0x636   :  { %11378 = vmatpush1.bf16.msra.mxu0 %v13804_v14  ;;  %v8345_v14 = vld [vmem:[#allocation15 + $0x2e0] sm:$0xff] }
 0x637   :  { %11379 = vmatprep.subr.bf16.mxu0 %v13797_v27  ;;  %v13755_v27 = vcombine.high %v6584_v3, %v6588_v62  ;;  %v13876_v5 = vcombine.low %v8341_v13, %v8345_v14  ;;  %v8433_v57 = vld [vmem:[#allocation15 + $0x5a0] sm:$0xff]  ;;  %v13972_v3 = vcombine.low %v8437_v24, %v8441_v18 }
 0x638   :  { %8201 = vmatpush1.bf16.msra.mxu1 %v13674_v10  ;;  %v6576_v10 = vld [vmem:[#allocation12 + $0x1698] sm:$0xff]  ;;  %v13965_v62 = vcombine.high %v8429_v36, %v8433_v57 }
 0x639   :  { %8202 = vmatprep.subr.bf16.mxu1 %v13667_v12  ;;  %v13877_v12 = vcombine.high %v8341_v13, %v8345_v14  ;;  %v13746_v31 = vcombine.low %v6576_v10, %v6580_v34 }
 0x63a   :  { %11380 = vmatpush1.bf16.msra.mxu0 %v13796_v0  ;;  %v8337_v0 = vld [vmem:[#allocation15 + $0x2a0] sm:$0xff] }
 0x63b   :  { %11381 = vmatprep.subr.bf16.mxu0 %v13789_v44  ;;  %v13747_v44 = vcombine.high %v6576_v10, %v6580_v34  ;;  %v13868_v15 = vcombine.low %v8333_v22, %v8337_v0 }
 0x63c   :  { %8203 = vmatpush1.bf16.msra.mxu1 %v13666_v2  ;;  %v6568_v2 = vld [vmem:[#allocation12 + $0x1658] sm:$0xff] }
 0x63d   :  { %8204 = vmatprep.subr.bf16.mxu1 %v13787_v46  ;;  %v13869_v46 = vcombine.high %v8333_v22, %v8337_v0  ;;  %v13738_v50 = vcombine.low %v6568_v2, %v6572_v11  ;;  %v8413_v22 = vld [vmem:[#allocation15 + $0x500] sm:$0xff] }
 0x63e   :  { %11382 = vmatpush1.bf16.msra.mxu0 %v13788_v61  ;;  %v8329_v61 = vld [vmem:[#allocation15 + $0x260] sm:$0xff] }
 0x63f   :  { %11383 = vmatprep.subr.bf16.mxu0 %v13909_v47  ;;  %v13739_v47 = vcombine.high %v6568_v2, %v6572_v11  ;;  %v8417_v0 = vld [vmem:[#allocation15 + $0x520] sm:$0xff] }
 0x640   :  { %8205 = vmatpush2.bf16.msra.mxu1 %v13786_v28  ;;  %v6560_v28 = vld [vmem:[#allocation12 + $0x1618] sm:$0xff] }
 0x641   :  { %8206 = vmatprep.subr.bf16.mxu1 %v13779_v16  ;;  %v13861_v16 = vcombine.high %v8325_v51, %v8329_v61  ;;  %v13730_v53 = vcombine.low %v6560_v28, %v6564_v48 }
 0x642   :  { %11384 = vmatpush2.bf16.msra.mxu0 %v13908_v60  ;;  %v8321_v60 = vld [vmem:[#allocation15 + $0x220] sm:$0xff] }
 0x643   :  { %11385 = vmatprep.subr.bf16.mxu0 %v13901_v32  ;;  %v13731_v32 = vcombine.high %v6560_v28, %v6564_v48  ;;  %v13948_v48 = vcombine.low %v8413_v22, %v8417_v0 }
 0x644   :  { %8207 = vmatpush2.bf16.msra.mxu1 %v13778_v49  ;;  %v13860_v49 = vcombine.low %v8325_v51, %v8329_v61 }
 0x645   :  { %8208 = vmatprep.subr.bf16.mxu1 %v13771_v56  ;;  %v13853_v56 = vcombine.high %v8317_v21, %v8321_v60 }
 0x646   :  { %11386 = vmatpush2.bf16.msra.mxu0 %v13900_v43  ;;  %v15696_v43 = vld [vmem:[#allocation15 + $0x9e0] sm:$0xff] }
 0x647   :  { %11387 = vmatprep.subr.bf16.mxu0 %v13893_v55  ;;  %v13973_v55 = vcombine.high %v8437_v24, %v8441_v18  ;;  %v8549_v24 = vld [vmem:[#allocation15 + $0x940] sm:$0xff] }
 0x648   :  { %8209 = vmatpush2.bf16.msra.mxu1 %v13770_v52  ;;  %v13852_v52 = vcombine.low %v8317_v21, %v8321_v60  ;;  %v8397_v21 = vld [vmem:[#allocation15 + $0x480] sm:$0xff] }
 0x649   :  { %8210 = vmatprep.subr.bf16.mxu1 %v13763_v29  ;;  %v14101_v29 = vcombine.high %v15694_v37, %v15696_v43  ;;  %v8553_v18 = vld [vmem:[#allocation15 + $0x960] sm:$0xff] }
 0x64a   :  { %11388 = vmatpush2.bf16.msra.mxu0 %v13892_v6  ;;  %v8421_v6 = vld [vmem:[#allocation15 + $0x540] sm:$0xff] }
 0x64b   :  { %11389 = vmatprep.subr.bf16.mxu0 %v13885_v8  ;;  %v8425_v8 = vld [vmem:[#allocation15 + $0x560] sm:$0xff] }
 0x64c   :  { %8211 = vmatpush2.bf16.msra.mxu1 %v13762_v20  ;;  %v13957_v34 = vcombine.high %v8421_v6, %v8425_v8 }
 0x64d   :  { %8212 = vmatprep.subr.bf16.mxu1 %v13755_v27  ;;  %v13964_v27 = vcombine.low %v8429_v36, %v8433_v57  ;;  %v8393_v36 = vld [vmem:[#allocation15 + $0x460] sm:$0xff] }
 0x64e   :  { %11390 = vmatpush2.bf16.msra.mxu0 %v13884_v35  ;;  %v8541_v57 = vld [vmem:[#allocation15 + $0x900] sm:$0xff] }
 0x64f   :  { %11391 = vmatprep.subr.bf16.mxu0 %v13877_v12 }
 0x650   :  { %8213 = vmatpush2.bf16.msra.mxu1 %v13754_v63 }
 0x651   :  { %8214 = vmatprep.subr.bf16.mxu1 %v13747_v44 }
 0x652   :  { %11392 = vmatpush2.bf16.msra.mxu0 %v13876_v5 }
 0x653   :  { %11393 = vmatprep.subr.bf16.mxu0 %v13869_v46  ;;  %v13949_v46 = vcombine.high %v8413_v22, %v8417_v0  ;;  %v8501_v22 = vld [vmem:[#allocation15 + $0x7c0] sm:$0xff] }
 0x654   :  { %8215 = vmatpush2.bf16.msra.mxu1 %v13746_v31  ;;  %v8405_v31 = vld [vmem:[#allocation15 + $0x4c0] sm:$0xff] }
 0x655   :  { %8216 = vmatprep.subr.bf16.mxu1 %v13739_v47  ;;  %v8557_v47 = vld [vmem:[#allocation15 + $0x980] sm:$0xff] }
 0x656   :  { %11394 = vmatpush2.bf16.msra.mxu0 %v13868_v15  ;;  %v15713_v15 = vld [vmem:[#allocation15 + $0x1c8] sm:$0xff] }
 0x657   :  { %11395 = vmatprep.subr.bf16.mxu0 %v13861_v16 }
 0x658   :  { %8217 = vmatpush2.bf16.msra.mxu1 %v13738_v50 }
 0x659   :  { %8218 = vmatprep.subr.bf16.mxu1 %v13731_v32  ;;  %v15717_v32 = vld [vmem:[#allocation15 + $0x1e8] sm:$0xff] }
 0x65a   :  { %11396 = vmatpush2.bf16.msra.mxu0 %v13860_v49  ;;  %v8401_v49 = vld [vmem:[#allocation15 + $0x4a0] sm:$0xff] }
 0x65b   :  { %11397 = vmatprep.subr.bf16.mxu0 %v13853_v56  ;;  %v13846_v56 = vcombine.low %v15713_v15, %v15717_v32 }
 0x65c   :  { %8219 = vmatpush2.bf16.msra.mxu1 %v13730_v53 }
 0x65d   :  { %11408 = vmatprep.subr.bf16.mxu1 %v13973_v55  ;;  %v8389_v55 = vld [vmem:[#allocation15 + $0x440] sm:$0xff] }
 0x65e   :  { %11398 = vmatpush2.bf16.msra.mxu0 %v13852_v52  ;;  %v14085_v52 = vcombine.high %v8549_v24, %v8553_v18 }
 0x65f   :  { %v7976_v20 = vpop.f32.mrf.mxu1  ;;  %8221 = vmatmul.mubr.bf16.vlgmr.msra.gmra.mxu1 %v15645_v17  ;;  %11449 = vmatprep.subr.bf16.mxu0 %v14101_v29  ;;  %v8545_v29 = vld [vmem:[#allocation15 + $0x920] sm:$0xff] }
 0x660   :  { %v7977_v13 = vadd.f32 %v7976_v20, %v15681_v25  ;;  %v15702_v14 = vpop.f32.mrf.mxu0  ;;  %11409 = vmatpush1.bf16.msra.mxu1 %v13972_v3  ;;  %v13956_v25 = vcombine.low %v8421_v6, %v8425_v8  ;;  %v13932_v3 = vcombine.low %v8397_v21, %v8401_v49  ;;  %v13925_v6 = vcombine.high %v8389_v55, %v8393_v36  ;;  %v8381_v8 = vld [vmem:[#allocation15 + $0x400] sm:$0xff] }
 0x661   :  { %v7978_v10 = vpop.f32.mrf.mxu1  ;;  %11410 = vmatprep.subr.bf16.mxu1 %v13965_v62  ;;  %v14084_v62 = vcombine.low %v8549_v24, %v8553_v18  ;;  %v14077_v20 = vcombine.high %v8541_v57, %v8545_v29 }
 0x662   :  { %v8229_v35 = vadd.f32 %v7977_v13, %v15635_v30  ;;  %v7979_v12 = vadd.f32 %v7978_v10, %v15689_v23  ;;  %v15706_v63 = vpop.f32.mrf.mxu0  ;;  %v8409_v30 = vld [vmem:[#allocation15 + $0x4e0] sm:$0xff] }
 0x663   :  { %v7980_v44 = vpop.f32.mrf.mxu1  ;;  %v8561_v23 = vld [vmem:[#allocation15 + $0x9a0] sm:$0xff]  ;;  %v13941_v50 = vcombine.high %v8405_v31, %v8409_v30  ;;  %v13940_v53 = vcombine.low %v8405_v31, %v8409_v30 }
 0x664   :  { %v8230_v17 = vadd.f32 %v7979_v12, %v15642_v54  ;;  %v8021_v2 = vpop.f32.mrf.mxu0  ;;  %11411 = vmatpush1.bf16.msra.mxu1 %v13964_v27  ;;  %v8237_v11 = vmax.f32 %v8229_v35, 0.0  ;;  %v14100_v54 = vcombine.low %v15694_v37, %v15696_v43  ;;  %v14093_v60 = vcombine.high %v8557_v47, %v8561_v23  ;;  %v8385_v13 = vld [vmem:[#allocation15 + $0x420] sm:$0xff] }
 0x665   :  { %v7981_v5 = vpop.f32.mrf.mxu1  ;;  %11412 = vmatprep.subr.bf16.mxu1 %v13957_v34  ;;  %v14092_v37 = vcombine.low %v8557_v47, %v8561_v23  ;;  %v13933_v43 = vcombine.high %v8397_v21, %v8401_v49  ;;  %v8533_v27 = vld [vmem:[#allocation15 + $0x8c0] sm:$0xff]  ;;  %v13924_v34 = vcombine.low %v8389_v55, %v8393_v36  ;;  %v14076_v35 = vcombine.low %v8541_v57, %v8545_v29 }
 0x666   :  { %v8238_v51 = vmax.f32 %v8230_v17, 0.0  ;;  %v8022_v61 = vpop.f32.mrf.mxu0  ;;  %v15715_v16 = vpack.c.bf16 %v8237_v11, %v8237_v11  ;;  %v8537_v10 = vld [vmem:[#allocation15 + $0x8e0] sm:$0xff]  ;;  %v13917_v12 = vcombine.high %v8381_v8, %v8385_v13 }
 0x667   :  { %v14069_v0 = vcombine.high %v8533_v27, %v8537_v10  ;;  %v8505_v44 = vld [vmem:[#allocation15 + $0x7e0] sm:$0xff]  ;;  %v14068_v11 = vcombine.low %v8533_v27, %v8537_v10 }
 0x668   :  { %v15709_v28 = vpack.c.bf16 %v8238_v51, %v8238_v51  ;;  %11413 = vmatpush1.bf16.msra.mxu1 %v13956_v25  ;;  %v8525_v17 = vld [vmem:[#allocation15 + $0x880] sm:$0xff]  ;;  %v13916_v25 = vcombine.low %v8381_v8, %v8385_v13  ;;  %v14037_v5 = vcombine.high %v8501_v22, %v8505_v44  ;;  %v14036_v47 = vcombine.low %v8501_v22, %v8505_v44 }
 0x669   :  { %11414 = vmatprep.subr.bf16.mxu1 %v13949_v46  ;;  %v8529_v2 = vld [vmem:[#allocation15 + $0x8a0] sm:$0xff] }
 0x66a   :  { %11399 = vmatprep.mubr.bf16.mxu0 %v15709_v28  ;;  %v8493_v46 = vld [vmem:[#allocation15 + $0x780] sm:$0xff]  ;;  %v14061_v31 = vcombine.high %v8525_v17, %v8529_v2  ;;  %v14060_v23 = vcombine.low %v8525_v17, %v8529_v2 }
 0x66b   :  { %11400 = vmatmul.mubr.bf16.vlgmr.msra.gmra.mxu0 %v15715_v16  ;;  %v8497_v51 = vld [vmem:[#allocation15 + $0x7a0] sm:$0xff] }
 0x66c   :  { %11415 = vmatpush1.bf16.msra.mxu1 %v13948_v48  ;;  %11450 = vmatpush1.bf16.msra.mxu0 %v14100_v54  ;;  %v8517_v61 = vld [vmem:[#allocation15 + $0x840] sm:$0xff]  ;;  %v14029_v48 = vcombine.high %v8493_v46, %v8497_v51  ;;  %v14028_v24 = vcombine.low %v8493_v46, %v8497_v51 }
 0x66d   :  { %11416 = vmatprep.subr.bf16.mxu1 %v13941_v50  ;;  %11451 = vmatprep.subr.bf16.mxu0 %v14093_v60  ;;  %v8521_v30 = vld [vmem:[#allocation15 + $0x860] sm:$0xff] }
 0x66e   :  { %v8485_v54 = vld [vmem:[#allocation15 + $0x740] sm:$0xff]  ;;  %v14053_v50 = vcombine.high %v8517_v61, %v8521_v30  ;;  %v14052_v18 = vcombine.low %v8517_v61, %v8521_v30 }
 0x66f   :  { %v8489_v21 = vld [vmem:[#allocation15 + $0x760] sm:$0xff] }
 0x670   :  { %11417 = vmatpush1.bf16.msra.mxu1 %v13940_v53  ;;  %11452 = vmatpush1.bf16.msra.mxu0 %v14092_v37  ;;  %v8509_v60 = vld [vmem:[#allocation15 + $0x800] sm:$0xff]  ;;  %v14021_v53 = vcombine.high %v8485_v54, %v8489_v21  ;;  %v14020_v57 = vcombine.low %v8485_v54, %v8489_v21 }
 0x671   :  { %11418 = vmatprep.subr.bf16.mxu1 %v13933_v43  ;;  %11453 = vmatprep.subr.bf16.mxu0 %v14085_v52  ;;  %v8513_v49 = vld [vmem:[#allocation15 + $0x820] sm:$0xff] }
 0x672   :  { %v8477_v37 = vld [vmem:[#allocation15 + $0x700] sm:$0xff]  ;;  %v14045_v43 = vcombine.high %v8509_v60, %v8513_v49  ;;  %v14044_v29 = vcombine.low %v8509_v60, %v8513_v49 }
 0x673   :  { %v8481_v55 = vld [vmem:[#allocation15 + $0x720] sm:$0xff] }
 0x674   :  { %11419 = vmatpush1.bf16.msra.mxu1 %v13932_v3  ;;  %11454 = vmatpush1.bf16.msra.mxu0 %v14084_v62  ;;  %v8629_v52 = vld [vmem:[#allocation15 + $0xbc0] sm:$0xff]  ;;  %v14013_v3 = vcombine.high %v8477_v37, %v8481_v55  ;;  %v14012_v27 = vcombine.low %v8477_v37, %v8481_v55 }
 0x675   :  { %11420 = vmatprep.subr.bf16.mxu1 %v13925_v6  ;;  %11455 = vmatprep.subr.bf16.mxu0 %v14077_v20  ;;  %v8633_v36 = vld [vmem:[#allocation15 + $0xbe0] sm:$0xff] }
 0x676   :  { %v8469_v62 = vld [vmem:[#allocation15 + $0x6c0] sm:$0xff]  ;;  %v14165_v6 = vcombine.high %v8629_v52, %v8633_v36  ;;  %v14164_v10 = vcombine.low %v8629_v52, %v8633_v36 }
 0x677   :  { %v8473_v8 = vld [vmem:[#allocation15 + $0x6e0] sm:$0xff] }
 0x678   :  { %11421 = vmatpush1.bf16.msra.mxu1 %v13924_v34  ;;  %11456 = vmatpush1.bf16.msra.mxu0 %v14076_v35  ;;  %v8621_v20 = vld [vmem:[#allocation15 + $0xb80] sm:$0xff]  ;;  %v14005_v34 = vcombine.high %v8469_v62, %v8473_v8  ;;  %v14004_v17 = vcombine.low %v8469_v62, %v8473_v8 }
 0x679   :  { %11422 = vmatprep.subr.bf16.mxu1 %v13917_v12  ;;  %11457 = vmatprep.subr.bf16.mxu0 %v14069_v0  ;;  %v8625_v13 = vld [vmem:[#allocation15 + $0xba0] sm:$0xff] }
 0x67a   :  { %v8461_v35 = vld [vmem:[#allocation15 + $0x680] sm:$0xff]  ;;  %v14157_v12 = vcombine.high %v8621_v20, %v8625_v13  ;;  %v14156_v2 = vcombine.low %v8621_v20, %v8625_v13 }
 0x67b   :  { %v8465_v22 = vld [vmem:[#allocation15 + $0x6a0] sm:$0xff] }
 0x67c   :  { %11423 = vmatpush1.bf16.msra.mxu1 %v13916_v25  ;;  %11458 = vmatpush1.bf16.msra.mxu0 %v14068_v11  ;;  %v8613_v0 = vld [vmem:[#allocation15 + $0xb40] sm:$0xff]  ;;  %v13997_v25 = vcombine.high %v8461_v35, %v8465_v22  ;;  %v13996_v61 = vcombine.low %v8461_v35, %v8465_v22 }
 0x67d   :  { %11424 = vmatprep.subr.bf16.mxu1 %v14037_v5  ;;  %11459 = vmatprep.subr.bf16.mxu0 %v14061_v31  ;;  %v8617_v44 = vld [vmem:[#allocation15 + $0xb60] sm:$0xff] }
 0x67e   :  { %v8453_v11 = vld [vmem:[#allocation15 + $0x640] sm:$0xff]  ;;  %v14149_v5 = vcombine.high %v8613_v0, %v8617_v44  ;;  %v14148_v30 = vcombine.low %v8613_v0, %v8617_v44 }
 0x67f   :  { %v8457_v46 = vld [vmem:[#allocation15 + $0x660] sm:$0xff] }
 0x680   :  { %11425 = vmatpush2.bf16.msra.mxu1 %v14036_v47  ;;  %11460 = vmatpush1.bf16.msra.mxu0 %v14060_v23  ;;  %v8605_v31 = vld [vmem:[#allocation15 + $0xb00] sm:$0xff]  ;;  %v13989_v47 = vcombine.high %v8453_v11, %v8457_v46  ;;  %v13988_v60 = vcombine.low %v8453_v11, %v8457_v46 }
 0x681   :  { %11426 = vmatprep.subr.bf16.mxu1 %v14029_v48  ;;  %11461 = vmatprep.subr.bf16.mxu0 %v14053_v50  ;;  %v8609_v51 = vld [vmem:[#allocation15 + $0xb20] sm:$0xff] }
 0x682   :  { %v8445_v23 = vld [vmem:[#allocation15 + $0x600] sm:$0xff]  ;;  %v14141_v48 = vcombine.high %v8605_v31, %v8609_v51  ;;  %v14140_v49 = vcombine.low %v8605_v31, %v8609_v51  ;;  %v13847_v31 = vcombine.high %v15713_v15, %v15717_v32  ;;  %v8274_v15 = vld [vmem:[#allocation15 + $0xa8] sm:$0xff] }
 0x683   :  { %v8449_v54 = vld [vmem:[#allocation15 + $0x620] sm:$0xff] }
 0x684   :  { %11427 = vmatpush2.bf16.msra.mxu1 %v14028_v24  ;;  %11462 = vmatpush1.bf16.msra.mxu0 %v14052_v18  ;;  %v8597_v50 = vld [vmem:[#allocation15 + $0xac0] sm:$0xff]  ;;  %v13981_v24 = vcombine.high %v8445_v23, %v8449_v54  ;;  %v13980_v52 = vcombine.low %v8445_v23, %v8449_v54  ;;  %v15735_v23 = vld [vmem:[#allocation15 + $0x5c8] sm:$0xff] }
 0x685   :  { %11428 = vmatprep.subr.bf16.mxu1 %v14021_v53  ;;  %11463 = vmatprep.subr.bf16.mxu0 %v14045_v43  ;;  %v8601_v21 = vld [vmem:[#allocation15 + $0xae0] sm:$0xff] }
 0x686   :  { %v14133_v18 = vcombine.high %v8597_v50, %v8601_v21  ;;  %v8589_v53 = vld [vmem:[#allocation15 + $0xa80] sm:$0xff]  ;;  %v14132_v36 = vcombine.low %v8597_v50, %v8601_v21 }
 0x687   :  { %v8593_v37 = vld [vmem:[#allocation15 + $0xaa0] sm:$0xff] }
 0x688   :  { %11429 = vmatpush2.bf16.msra.mxu1 %v14020_v57  ;;  %11464 = vmatpush1.bf16.msra.mxu0 %v14044_v29  ;;  %v8693_v43 = vld [vmem:[#allocation15 + $0xdc0] sm:$0xff]  ;;  %v14125_v57 = vcombine.high %v8589_v53, %v8593_v37 }
 0x689   :  { %11430 = vmatprep.subr.bf16.mxu1 %v14013_v3  ;;  %11465 = vmatprep.subr.bf16.mxu0 %v14165_v6  ;;  %v8697_v55 = vld [vmem:[#allocation15 + $0xde0] sm:$0xff]  ;;  %v14124_v6 = vcombine.low %v8589_v53, %v8593_v37 }
 0x68a   :  { %v14229_v29 = vcombine.high %v8693_v43, %v8697_v55  ;;  %v8581_v3 = vld [vmem:[#allocation15 + $0xa40] sm:$0xff] }
 0x68b   :  { %v8585_v62 = vld [vmem:[#allocation15 + $0xa60] sm:$0xff] }
 0x68c   :  { %11431 = vmatpush2.bf16.msra.mxu1 %v14012_v27  ;;  %11466 = vmatpush2.bf16.msra.mxu0 %v14164_v10  ;;  %v14117_v8 = vcombine.high %v8581_v3, %v8585_v62  ;;  %v8573_v20 = vld [vmem:[#allocation15 + $0xa00] sm:$0xff]  ;;  %v14116_v35 = vcombine.low %v8581_v3, %v8585_v62 }
 0x68d   :  { %11432 = vmatprep.subr.bf16.mxu1 %v14005_v34  ;;  %11467 = vmatprep.subr.bf16.mxu0 %v14157_v12  ;;  %v8577_v13 = vld [vmem:[#allocation15 + $0xa20] sm:$0xff] }
 0x68e   :  { %v14109_v22 = vcombine.high %v8573_v20, %v8577_v13  ;;  %v8677_v50 = vld [vmem:[#allocation15 + $0xd40] sm:$0xff] }
 0x68f   :  { %v8681_v21 = vld [vmem:[#allocation15 + $0xd60] sm:$0xff] }
 0x690   :  { %11433 = vmatpush2.bf16.msra.mxu1 %v14004_v17  ;;  %11468 = vmatpush2.bf16.msra.mxu0 %v14156_v2  ;;  %v8673_v53 = vld [vmem:[#allocation15 + $0xd20] sm:$0xff]  ;;  %v14212_v37 = vcombine.low %v8677_v50, %v8681_v21 }
 0x691   :  { %11434 = vmatprep.subr.bf16.mxu1 %v13997_v25  ;;  %11469 = vmatprep.subr.bf16.mxu0 %v14149_v5  ;;  %v14108_v5 = vcombine.low %v8573_v20, %v8577_v13  ;;  %v8657_v3 = vld [vmem:[#allocation15 + $0xca0] sm:$0xff] }
 0x692   :  { %v8649_v20 = vld [vmem:[#allocation15 + $0xc60] sm:$0xff] }
 0x694   :  { %11435 = vmatpush2.bf16.msra.mxu1 %v13996_v61  ;;  %11470 = vmatpush2.bf16.msra.mxu0 %v14148_v30  ;;  %v8685_v30 = vld [vmem:[#allocation15 + $0xd80] sm:$0xff] }
 0x695   :  { %11436 = vmatprep.subr.bf16.mxu1 %v13989_v47  ;;  %11471 = vmatprep.subr.bf16.mxu0 %v14141_v48 }
 0x698   :  { %11437 = vmatpush2.bf16.msra.mxu1 %v13988_v60  ;;  %11472 = vmatpush2.bf16.msra.mxu0 %v14140_v49 }
 0x699   :  { %11438 = vmatprep.subr.bf16.mxu1 %v13981_v24  ;;  %11473 = vmatprep.subr.bf16.mxu0 %v14133_v18  ;;  %v14213_v24 = vcombine.high %v8677_v50, %v8681_v21  ;;  %v8669_v18 = vld [vmem:[#allocation15 + $0xd00] sm:$0xff] }
 0x69a   :  { %v8725_v21 = vld [vmem:[#allocation15 + $0xec0] sm:$0xff] }
 0x69c   :  { %11439 = vmatpush2.bf16.msra.mxu1 %v13980_v52  ;;  %11474 = vmatpush2.bf16.msra.mxu0 %v14132_v36  ;;  %v8665_v52 = vld [vmem:[#allocation15 + $0xce0] sm:$0xff]  ;;  %v14204_v36 = vcombine.low %v8669_v18, %v8673_v53 }
 0x69d   :  { %11475 = vmatprep.subr.bf16.mxu0 %v14125_v57  ;;  %11490 = vmatprep.subr.bf16.mxu1 %v14229_v29  ;;  %v8653_v29 = vld [vmem:[#allocation15 + $0xc80] sm:$0xff] }
 0x69e   :  { %v14188_v13 = vcombine.low %v8653_v29, %v8657_v3 }
 0x69f   :  { %v8058_v27 = vpop.f32.mrf.mxu1 }
 0x6a0   :  { %v8059_v10 = vadd.f32 %v8058_v27, %v15702_v14  ;;  %v15724_v34 = vpop.f32.mrf.mxu0  ;;  %11476 = vmatpush2.bf16.msra.mxu0 %v14124_v6  ;;  %v14189_v6 = vcombine.high %v8653_v29, %v8657_v3  ;;  %v8701_v3 = vld [vmem:[#allocation15 + $0xe00] sm:$0xff] }
 0x6a1   :  { %v8060_v12 = vpop.f32.mrf.mxu1  ;;  %11477 = vmatprep.subr.bf16.mxu0 %v14117_v8  ;;  %v8645_v8 = vld [vmem:[#allocation15 + $0xc40] sm:$0xff] }
 0x6a2   :  { %v8231_v0 = vadd.f32 %v8059_v10, %v15654_v19  ;;  %v8061_v44 = vadd.f32 %v8060_v12, %v15706_v63  ;;  %v15728_v17 = vpop.f32.mrf.mxu0  ;;  %v8689_v19 = vld [vmem:[#allocation15 + $0xda0] sm:$0xff]  ;;  %v14228_v63 = vcombine.low %v8693_v43, %v8697_v55  ;;  %v14205_v43 = vcombine.high %v8669_v18, %v8673_v53 }
 0x6a3   :  { %v8062_v2 = vpop.f32.mrf.mxu1  ;;  %v14221_v54 = vcombine.high %v8685_v30, %v8689_v19  ;;  %v14220_v49 = vcombine.low %v8685_v30, %v8689_v19  ;;  %v8661_v55 = vld [vmem:[#allocation15 + $0xcc0] sm:$0xff]  ;;  %v14181_v27 = vcombine.high %v8645_v8, %v8649_v20  ;;  %v14180_v12 = vcombine.low %v8645_v8, %v8649_v20 }
 0x6a4   :  { %v8232_v25 = vadd.f32 %v8061_v44, %v15661_v58  ;;  %v8103_v11 = vpop.f32.mrf.mxu0  ;;  %11478 = vmatpush2.bf16.msra.mxu0 %v14116_v35  ;;  %v8239_v14 = vmax.f32 %v8231_v0, 0.0  ;;  %v15737_v58 = vld [vmem:[#allocation15 + $0x5e8] sm:$0xff]  ;;  %v14197_v57 = vcombine.high %v8661_v55, %v8665_v52  ;;  %v14196_v62 = vcombine.low %v8661_v55, %v8665_v52  ;;  %v8637_v10 = vld [vmem:[#allocation15 + $0xc00] sm:$0xff] }
 0x6a5   :  { %v8063_v46 = vpop.f32.mrf.mxu1  ;;  %11479 = vmatprep.subr.bf16.mxu0 %v14109_v22  ;;  %v13974_v60 = vcombine.low %v15735_v23, %v15737_v58  ;;  %v8641_v35 = vld [vmem:[#allocation15 + $0xc20] sm:$0xff] }
 0x6a6   :  { %v8240_v51 = vmax.f32 %v8232_v25, 0.0  ;;  %v8104_v61 = vpop.f32.mrf.mxu0  ;;  %v15739_v48 = vpack.c.bf16 %v8239_v14, %v8239_v14  ;;  %v14173_v22 = vcombine.high %v8637_v10, %v8641_v35  ;;  %v8757_v0 = vld [vmem:[#allocation15 + $0xfc0] sm:$0xff]  ;;  %v14172_v2 = vcombine.low %v8637_v10, %v8641_v35 }
 0x6a7   :  { %v8761_v44 = vld [vmem:[#allocation15 + $0xfe0] sm:$0xff] }
 0x6a8   :  { %v15733_v47 = vpack.c.bf16 %v8240_v51, %v8240_v51  ;;  %11480 = vmatpush2.bf16.msra.mxu0 %v14108_v5  ;;  %v14293_v25 = vcombine.high %v8757_v0, %v8761_v44  ;;  %v8749_v11 = vld [vmem:[#allocation15 + $0xf80] sm:$0xff]  ;;  %v14292_v14 = vcombine.low %v8757_v0, %v8761_v44 }
 0x6a9   :  { %11531 = vmatprep.subr.bf16.mxu0 %v13847_v31  ;;  %v8753_v5 = vld [vmem:[#allocation15 + $0xfa0] sm:$0xff] }
 0x6aa   :  { %11440 = vmatprep.mubr.bf16.mxu1 %v15733_v47  ;;  %v14285_v46 = vcombine.high %v8749_v11, %v8753_v5  ;;  %v8741_v31 = vld [vmem:[#allocation15 + $0xf40] sm:$0xff]  ;;  %v14284_v61 = vcombine.low %v8749_v11, %v8753_v5  ;;  %v13975_v5 = vcombine.high %v15735_v23, %v15737_v58 }
 0x6ab   :  { %11441 = vmatmul.mubr.bf16.vlgmr.msra.gmra.mxu1 %v15739_v48  ;;  %v8745_v51 = vld [vmem:[#allocation15 + $0xf60] sm:$0xff] }
 0x6ac   :  { %11491 = vmatpush1.bf16.msra.mxu1 %v14228_v63  ;;  %v14277_v30 = vcombine.high %v8741_v31, %v8745_v51  ;;  %v8733_v19 = vld [vmem:[#allocation15 + $0xf00] sm:$0xff] }
 0x6ad   :  { %11492 = vmatprep.subr.bf16.mxu1 %v14221_v54  ;;  %v8737_v63 = vld [vmem:[#allocation15 + $0xf20] sm:$0xff]  ;;  %v14276_v54 = vcombine.low %v8741_v31, %v8745_v51  ;;  %v8302_v31 = vld [vmem:[#allocation15 + $0x188] sm:$0xff] }
 0x6ae   :  { %v14269_v50 = vcombine.high %v8733_v19, %v8737_v63  ;;  %v8717_v53 = vld [vmem:[#allocation15 + $0xe80] sm:$0xff] }
 0x6af   :  { %v8709_v52 = vld [vmem:[#allocation15 + $0xe40] sm:$0xff] }
 0x6b0   :  { %11493 = vmatpush1.bf16.msra.mxu1 %v14220_v49  ;;  %v8729_v49 = vld [vmem:[#allocation15 + $0xee0] sm:$0xff] }
 0x6b1   :  { %11494 = vmatprep.subr.bf16.mxu1 %v14213_v24  ;;  %v14268_v24 = vcombine.low %v8733_v19, %v8737_v63  ;;  %v14261_v18 = vcombine.high %v8725_v21, %v8729_v49 }
 0x6b4   :  { %11495 = vmatpush1.bf16.msra.mxu1 %v14212_v37  ;;  %v8721_v37 = vld [vmem:[#allocation15 + $0xea0] sm:$0xff] }
 0x6b5   :  { %11496 = vmatprep.subr.bf16.mxu1 %v14205_v43  ;;  %v14260_v43 = vcombine.low %v8725_v21, %v8729_v49  ;;  %v14253_v55 = vcombine.high %v8717_v53, %v8721_v37 }
 0x6b8   :  { %11497 = vmatpush1.bf16.msra.mxu1 %v14204_v36  ;;  %v8713_v36 = vld [vmem:[#allocation15 + $0xe60] sm:$0xff] }
 0x6b9   :  { %11498 = vmatprep.subr.bf16.mxu1 %v14197_v57  ;;  %v14252_v57 = vcombine.low %v8717_v53, %v8721_v37  ;;  %v14245_v29 = vcombine.high %v8709_v52, %v8713_v36 }
 0x6bc   :  { %11499 = vmatpush1.bf16.msra.mxu1 %v14196_v62  ;;  %v8705_v62 = vld [vmem:[#allocation15 + $0xe20] sm:$0xff] }
 0x6bd   :  { %11500 = vmatprep.subr.bf16.mxu1 %v14189_v6  ;;  %v14237_v10 = vcombine.high %v8701_v3, %v8705_v62 }
 0x6c0   :  { %11501 = vmatpush1.bf16.msra.mxu1 %v14188_v13  ;;  %v14244_v13 = vcombine.low %v8709_v52, %v8713_v36  ;;  %v8266_v52 = vld [vmem:[#allocation15 + $0x68] sm:$0xff] }
 0x6c1   :  { %11502 = vmatprep.subr.bf16.mxu1 %v14181_v27 }
 0x6c4   :  { %11503 = vmatpush1.bf16.msra.mxu1 %v14180_v12 }
 0x6c5   :  { %11504 = vmatprep.subr.bf16.mxu1 %v14173_v22 }
 0x6c8   :  { %11505 = vmatpush1.bf16.msra.mxu1 %v14172_v2 }
 0x6c9   :  { %11506 = vmatprep.subr.bf16.mxu1 %v14293_v25  ;;  %v14236_v25 = vcombine.low %v8701_v3, %v8705_v62  ;;  %v8258_v3 = vld [vmem:[#allocation15 + $0x28] sm:$0xff] }
 0x6cc   :  { %11507 = vmatpush2.bf16.msra.mxu1 %v14292_v14 }
 0x6cd   :  { %11508 = vmatprep.subr.bf16.mxu1 %v14285_v46 }
 0x6d0   :  { %11509 = vmatpush2.bf16.msra.mxu1 %v14284_v61 }
 0x6d1   :  { %11510 = vmatprep.subr.bf16.mxu1 %v14277_v30  ;;  %v8298_v30 = vld [vmem:[#allocation15 + $0x168] sm:$0xff] }
 0x6d4   :  { %11511 = vmatpush2.bf16.msra.mxu1 %v14276_v54  ;;  %v8286_v54 = vld [vmem:[#allocation15 + $0x108] sm:$0xff] }
 0x6d5   :  { %11512 = vmatprep.subr.bf16.mxu1 %v14269_v50  ;;  %v8290_v50 = vld [vmem:[#allocation15 + $0x128] sm:$0xff] }
 0x6d6   :  { %v13823_v49 = vcombine.high %v8286_v54, %v8290_v50  ;;  %v13822_v53 = vcombine.low %v8286_v54, %v8290_v50 }
 0x6d8   :  { %11513 = vmatpush2.bf16.msra.mxu1 %v14268_v24  ;;  %v8278_v24 = vld [vmem:[#allocation15 + $0xc8] sm:$0xff] }
 0x6d9   :  { %11514 = vmatprep.subr.bf16.mxu1 %v14261_v18  ;;  %v8282_v18 = vld [vmem:[#allocation15 + $0xe8] sm:$0xff] }
 0x6da   :  { %v13815_v37 = vcombine.high %v8278_v24, %v8282_v18  ;;  %v13814_v32 = vcombine.low %v8278_v24, %v8282_v18 }
 0x6dc   :  { %11515 = vmatpush2.bf16.msra.mxu1 %v14260_v43  ;;  %v8270_v43 = vld [vmem:[#allocation15 + $0x88] sm:$0xff] }
 0x6dd   :  { %11516 = vmatprep.subr.bf16.mxu1 %v14253_v55  ;;  %v8262_v55 = vld [vmem:[#allocation15 + $0x48] sm:$0xff]  ;;  %v13806_v36 = vcombine.low %v8270_v43, %v8274_v15 }
 0x6de   :  { %v13798_v62 = vcombine.low %v8262_v55, %v8266_v52 }
 0x6df   :  { %v8140_v6 = vpop.f32.mrf.mxu1 }
 0x6e0   :  { %v8141_v8 = vadd.f32 %v8140_v6, %v15724_v34  ;;  %v15746_v20 = vpop.f32.mrf.mxu0  ;;  %11517 = vmatpush2.bf16.msra.mxu1 %v14252_v57  ;;  %v13799_v57 = vcombine.high %v8262_v55, %v8266_v52 }
 0x6e1   :  { %v8142_v27 = vpop.f32.mrf.mxu1  ;;  %11518 = vmatprep.subr.bf16.mxu1 %v14245_v29  ;;  %v8254_v29 = vld [vmem:[#allocation15 + $0x8] sm:$0xff] }
 0x6e2   :  { %v8233_v35 = vadd.f32 %v8141_v8, %v15670_v4  ;;  %v8143_v12 = vadd.f32 %v8142_v27, %v15728_v17  ;;  %v15750_v22 = vpop.f32.mrf.mxu0  ;;  %v8306_v4 = vld [vmem:[#allocation15 + $0x1a8] sm:$0xff]  ;;  %v13791_v6 = vcombine.high %v8254_v29, %v8258_v3  ;;  %v13790_v27 = vcombine.low %v8254_v29, %v8258_v3 }
 0x6e3   :  { %v8144_v0 = vpop.f32.mrf.mxu1  ;;  %v13839_v61 = vcombine.high %v8302_v31, %v8306_v4  ;;  %v13838_v19 = vcombine.low %v8302_v31, %v8306_v4  ;;  %v8374_v8 = vld [vmem:[#allocation15 + $0x3c8] sm:$0xff] }
 0x6e4   :  { %v8234_v44 = vadd.f32 %v8143_v12, %v15677_v9  ;;  %v8185_v2 = vpop.f32.mrf.mxu0  ;;  %11519 = vmatpush2.bf16.msra.mxu1 %v14244_v13  ;;  %v8241_v34 = vmax.f32 %v8233_v35, 0.0  ;;  %v8294_v9 = vld [vmem:[#allocation15 + $0x148] sm:$0xff] }
 0x6e5   :  { %v8145_v11 = vpop.f32.mrf.mxu1  ;;  %11520 = vmatprep.subr.bf16.mxu1 %v14237_v10  ;;  %v13831_v63 = vcombine.high %v8294_v9, %v8298_v30  ;;  %v13830_v21 = vcombine.low %v8294_v9, %v8298_v30  ;;  %v8378_v13 = vld [vmem:[#allocation15 + $0x3e8] sm:$0xff] }
 0x6e6   :  { %v8242_v14 = vmax.f32 %v8234_v44, 0.0  ;;  %v8186_v46 = vpop.f32.mrf.mxu0  ;;  %v15757_v17 = vpack.c.bf16 %v8241_v34, %v8241_v34  ;;  %v13911_v10 = vcombine.high %v8374_v8, %v8378_v13  ;;  %v8366_v35 = vld [vmem:[#allocation15 + $0x388] sm:$0xff]  ;;  %v13910_v0 = vcombine.low %v8374_v8, %v8378_v13 }
 0x6e7   :  { %v8370_v12 = vld [vmem:[#allocation15 + $0x3a8] sm:$0xff] }
 0x6e8   :  { %v15755_v51 = vpack.c.bf16 %v8242_v14, %v8242_v14  ;;  %11521 = vmatpush2.bf16.msra.mxu1 %v14236_v25  ;;  %v13903_v44 = vcombine.high %v8366_v35, %v8370_v12  ;;  %v8358_v2 = vld [vmem:[#allocation15 + $0x348] sm:$0xff]  ;;  %v13902_v34 = vcombine.low %v8366_v35, %v8370_v12 }
 0x6e9   :  { %11572 = vmatprep.subr.bf16.mxu1 %v13975_v5  ;;  %v8362_v25 = vld [vmem:[#allocation15 + $0x368] sm:$0xff] }
 0x6ea   :  { %11481 = vmatprep.mubr.bf16.mxu0 %v15755_v51  ;;  %v13895_v11 = vcombine.high %v8358_v2, %v8362_v25  ;;  %v8350_v5 = vld [vmem:[#allocation15 + $0x308] sm:$0xff]  ;;  %v13894_v46 = vcombine.low %v8358_v2, %v8362_v25 }
 0x6eb   :  { %11482 = vmatmul.mubr.bf16.vlgmr.msra.gmra.mxu0 %v15757_v17  ;;  %v8354_v14 = vld [vmem:[#allocation15 + $0x328] sm:$0xff] }
 0x6ec   :  { %11532 = vmatpush1.bf16.msra.mxu0 %v13846_v56  ;;  %11563 = vmatprep.mubr.bf16.mxu0 %v15709_v28  ;;  %v13807_v56 = vcombine.high %v8270_v43, %v8274_v15  ;;  %v13887_v31 = vcombine.high %v8350_v5, %v8354_v14  ;;  %v8342_v4 = vld [vmem:[#allocation15 + $0x2c8] sm:$0xff]  ;;  %v13886_v9 = vcombine.low %v8350_v5, %v8354_v14 }
 0x6ed   :  { %11533 = vmatprep.subr.bf16.mxu0 %v13839_v61  ;;  %v8346_v61 = vld [vmem:[#allocation15 + $0x2e8] sm:$0xff] }
 0x6ee   :  { %v13879_v30 = vcombine.high %v8342_v4, %v8346_v61  ;;  %v13878_v54 = vcombine.low %v8342_v4, %v8346_v61  ;;  %v8570_v29 = vld [vmem:[#allocation15 + $0x9e8] sm:$0xff] }
 0x6ef   :  { %v8434_v35 = vld [vmem:[#allocation15 + $0x5a8] sm:$0xff] }
 0x6f0   :  { %11534 = vmatpush1.bf16.msra.mxu0 %v13838_v19  ;;  %v8334_v19 = vld [vmem:[#allocation15 + $0x288] sm:$0xff] }
 0x6f1   :  { %11535 = vmatprep.subr.bf16.mxu0 %v13831_v63  ;;  %v8338_v63 = vld [vmem:[#allocation15 + $0x2a8] sm:$0xff] }
 0x6f2   :  { %v13871_v50 = vcombine.high %v8334_v19, %v8338_v63  ;;  %v13870_v24 = vcombine.low %v8334_v19, %v8338_v63  ;;  %v8558_v12 = vld [vmem:[#allocation15 + $0x988] sm:$0xff] }
 0x6f3   :  { %v8422_v2 = vld [vmem:[#allocation15 + $0x548] sm:$0xff] }
 0x6f4   :  { %11536 = vmatpush1.bf16.msra.mxu0 %v13830_v21  ;;  %v8326_v21 = vld [vmem:[#allocation15 + $0x248] sm:$0xff] }
 0x6f5   :  { %11537 = vmatprep.subr.bf16.mxu0 %v13823_v49  ;;  %v8330_v49 = vld [vmem:[#allocation15 + $0x268] sm:$0xff] }
 0x6f6   :  { %v13863_v18 = vcombine.high %v8326_v21, %v8330_v49  ;;  %v8554_v5 = vld [vmem:[#allocation15 + $0x968] sm:$0xff] }
 0x6f7   :  { %v8418_v19 = vld [vmem:[#allocation15 + $0x528] sm:$0xff] }
 0x6f8   :  { %11538 = vmatpush1.bf16.msra.mxu0 %v13822_v53  ;;  %v8318_v53 = vld [vmem:[#allocation15 + $0x208] sm:$0xff] }
 0x6f9   :  { %11539 = vmatprep.subr.bf16.mxu0 %v13815_v37  ;;  %v8322_v37 = vld [vmem:[#allocation15 + $0x228] sm:$0xff] }
 0x6fa   :  { %v13855_v55 = vcombine.high %v8318_v53, %v8322_v37  ;;  %v8542_v63 = vld [vmem:[#allocation15 + $0x908] sm:$0xff] }
 0x6fc   :  { %11540 = vmatpush1.bf16.msra.mxu0 %v13814_v32  ;;  %v13862_v32 = vcombine.low %v8326_v21, %v8330_v49 }
 0x6fd   :  { %11541 = vmatprep.subr.bf16.mxu0 %v13807_v56 }
 0x700   :  { %11542 = vmatpush1.bf16.msra.mxu0 %v13806_v36 }
 0x701   :  { %11543 = vmatprep.subr.bf16.mxu0 %v13799_v57  ;;  %v8566_v57 = vld [vmem:[#allocation15 + $0x9c8] sm:$0xff] }
 0x704   :  { %11544 = vmatpush1.bf16.msra.mxu0 %v13798_v62 }
 0x705   :  { %11545 = vmatprep.subr.bf16.mxu0 %v13791_v6  ;;  %v13854_v6 = vcombine.low %v8318_v53, %v8322_v37  ;;  %v8534_v53 = vld [vmem:[#allocation15 + $0x8c8] sm:$0xff] }
 0x706   :  { %v8538_v37 = vld [vmem:[#allocation15 + $0x8e8] sm:$0xff] }
 0x708   :  { %11546 = vmatpush1.bf16.msra.mxu0 %v13790_v27 }
 0x709   :  { %11547 = vmatprep.subr.bf16.mxu0 %v13911_v10  ;;  %v8430_v10 = vld [vmem:[#allocation15 + $0x588] sm:$0xff] }
 0x70c   :  { %11548 = vmatpush2.bf16.msra.mxu0 %v13910_v0  ;;  %v8562_v0 = vld [vmem:[#allocation15 + $0x9a8] sm:$0xff] }
 0x70d   :  { %11549 = vmatprep.subr.bf16.mxu0 %v13903_v44  ;;  %v14095_v25 = vcombine.high %v8558_v12, %v8562_v0 }
 0x710   :  { %11550 = vmatpush2.bf16.msra.mxu0 %v13902_v34  ;;  %v8426_v34 = vld [vmem:[#allocation15 + $0x568] sm:$0xff] }
 0x711   :  { %11551 = vmatprep.subr.bf16.mxu0 %v13895_v11  ;;  %v8550_v11 = vld [vmem:[#allocation15 + $0x948] sm:$0xff]  ;;  %v13959_v61 = vcombine.high %v8422_v2, %v8426_v34  ;;  %v13958_v23 = vcombine.low %v8422_v2, %v8426_v34 }
 0x712   :  { %v14086_v58 = vcombine.low %v8550_v11, %v8554_v5  ;;  %v8386_v2 = vld [vmem:[#allocation15 + $0x428] sm:$0xff] }
 0x714   :  { %11552 = vmatpush2.bf16.msra.mxu0 %v13894_v46  ;;  %v13966_v46 = vcombine.low %v8430_v10, %v8434_v35 }
 0x715   :  { %11553 = vmatprep.subr.bf16.mxu0 %v13887_v31  ;;  %v14094_v31 = vcombine.low %v8558_v12, %v8562_v0 }
 0x718   :  { %11554 = vmatpush2.bf16.msra.mxu0 %v13886_v9  ;;  %v14087_v9 = vcombine.high %v8550_v11, %v8554_v5 }
 0x719   :  { %11555 = vmatprep.subr.bf16.mxu0 %v13879_v30  ;;  %v8414_v30 = vld [vmem:[#allocation15 + $0x508] sm:$0xff] }
 0x71a   :  { %v13951_v21 = vcombine.high %v8414_v30, %v8418_v19 }
 0x71c   :  { %11556 = vmatpush2.bf16.msra.mxu0 %v13878_v54  ;;  %v8546_v54 = vld [vmem:[#allocation15 + $0x928] sm:$0xff] }
 0x71d   :  { %11557 = vmatprep.subr.bf16.mxu0 %v13871_v50  ;;  %v14079_v49 = vcombine.high %v8542_v63, %v8546_v54 }
 0x71f   :  { %v8222_v43 = vpop.f32.mrf.mxu1 }
 0x720   :  { %v8223_v15 = vadd.f32 %v8222_v43, %v15746_v20  ;;  %11558 = vmatpush2.bf16.msra.mxu0 %v13870_v24  ;;  %v14103_v20 = vcombine.high %v8566_v57, %v8570_v29  ;;  %v8406_v24 = vld [vmem:[#allocation15 + $0x4c8] sm:$0xff]  ;;  %v13950_v43 = vcombine.low %v8414_v30, %v8418_v19 }
 0x721   :  { %v8224_v56 = vpop.f32.mrf.mxu1  ;;  %11559 = vmatprep.subr.bf16.mxu0 %v13863_v18  ;;  %v8410_v18 = vld [vmem:[#allocation15 + $0x4e8] sm:$0xff] }
 0x722   :  { %v8235_v52 = vadd.f32 %v8223_v15, %v15686_v33  ;;  %v8225_v36 = vadd.f32 %v8224_v56, %v15750_v22  ;;  %v14102_v33 = vcombine.low %v8566_v57, %v8570_v29  ;;  %v14078_v15 = vcombine.low %v8542_v63, %v8546_v54  ;;  %v8530_v57 = vld [vmem:[#allocation15 + $0x8a8] sm:$0xff] }
 0x723   :  { %v8226_v3 = vpop.f32.mrf.mxu1  ;;  %v14071_v56 = vcombine.high %v8534_v53, %v8538_v37  ;;  %v13942_v29 = vcombine.low %v8406_v24, %v8410_v18  ;;  %v8634_v30 = vld [vmem:[#allocation15 + $0xbe8] sm:$0xff] }
 0x724   :  { %v8236_v62 = vadd.f32 %v8225_v36, %v15692_v45  ;;  %11560 = vmatpush2.bf16.msra.mxu0 %v13862_v32  ;;  %v8243_v8 = vmax.f32 %v8235_v52, 0.0  ;;  %v13967_v45 = vcombine.high %v8430_v10, %v8434_v35  ;;  %v13943_v32 = vcombine.high %v8406_v24, %v8410_v18  ;;  %v8402_v52 = vld [vmem:[#allocation15 + $0x4a8] sm:$0xff] }
 0x725   :  { %v8227_v13 = vpop.f32.mrf.mxu1  ;;  %11561 = vmatprep.subr.bf16.mxu0 %v13855_v55  ;;  %v8398_v55 = vld [vmem:[#allocation15 + $0x488] sm:$0xff]  ;;  %v14070_v3 = vcombine.low %v8534_v53, %v8538_v37 }
 0x726   :  { %v8244_v27 = vmax.f32 %v8236_v62, 0.0  ;;  %v15771_v22 = vpack.c.bf16 %v8243_v8, %v8243_v8  ;;  %v8526_v36 = vld [vmem:[#allocation15 + $0x888] sm:$0xff]  ;;  %v13935_v62 = vcombine.high %v8398_v55, %v8402_v52  ;;  %v13934_v10 = vcombine.low %v8398_v55, %v8402_v52 }
 0x727   :  { %v8390_v8 = vld [vmem:[#allocation15 + $0x448] sm:$0xff]  ;;  %v14062_v35 = vcombine.low %v8526_v36, %v8530_v57 }
 0x728   :  { %v15769_v44 = vpack.c.bf16 %v8244_v27, %v8244_v27  ;;  %11562 = vmatpush2.bf16.msra.mxu0 %v13854_v6  ;;  %v14063_v6 = vcombine.high %v8526_v36, %v8530_v57  ;;  %v8394_v13 = vld [vmem:[#allocation15 + $0x468] sm:$0xff] }
 0x729   :  { %11613 = vmatprep.subr.bf16.mxu0 %v14103_v20  ;;  %v8518_v20 = vld [vmem:[#allocation15 + $0x848] sm:$0xff]  ;;  %v13927_v12 = vcombine.high %v8390_v8, %v8394_v13  ;;  %v13926_v34 = vcombine.low %v8390_v8, %v8394_v13 }
 0x72a   :  { %11522 = vmatprep.mubr.bf16.mxu1 %v15769_v44  ;;  %v8522_v27 = vld [vmem:[#allocation15 + $0x868] sm:$0xff] }
 0x72b   :  { %11564 = vmatmul.mubr.bf16.vlgmr.msra.gmra.mxu0 %v15715_v16  ;;  %v15775_v14 = vpop.f32.mrf.mxu0  ;;  %11523 = vmatmul.mubr.bf16.vlgmr.msra.gmra.mxu1 %v15771_v22  ;;  %v14055_v0 = vcombine.high %v8518_v20, %v8522_v27  ;;  %v14054_v11 = vcombine.low %v8518_v20, %v8522_v27  ;;  %v8486_v37 = vld [vmem:[#allocation15 + $0x748] sm:$0xff] }
 0x72c   :  { %11573 = vmatpush1.bf16.msra.mxu1 %v13974_v60  ;;  %11614 = vmatpush1.bf16.msra.mxu0 %v14102_v33  ;;  %v8382_v33 = vld [vmem:[#allocation15 + $0x408] sm:$0xff] }
 0x72d   :  { %11645 = vmatprep.mubr.bf16.mxu0 %v15755_v51  ;;  %11604 = vmatprep.mubr.bf16.mxu1 %v15733_v47  ;;  %v15783_v4 = vpop.f32.mrf.mxu0  ;;  %v13919_v5 = vcombine.high %v8382_v33, %v8386_v2  ;;  %v13918_v19 = vcombine.low %v8382_v33, %v8386_v2  ;;  %v8478_v57 = vld [vmem:[#allocation15 + $0x708] sm:$0xff] }
 0x72e   :  { %11574 = vmatprep.subr.bf16.mxu1 %v13967_v45  ;;  %11615 = vmatprep.subr.bf16.mxu0 %v14095_v25  ;;  %v8510_v45 = vld [vmem:[#allocation15 + $0x808] sm:$0xff] }
 0x72f   :  { %v11405_v50 = vpop.f32.mrf.mxu0  ;;  %v8514_v25 = vld [vmem:[#allocation15 + $0x828] sm:$0xff] }
 0x730   :  { %11575 = vmatpush1.bf16.msra.mxu1 %v13966_v46  ;;  %11616 = vmatpush1.bf16.msra.mxu0 %v14094_v31  ;;  %v14047_v46 = vcombine.high %v8510_v45, %v8514_v25  ;;  %v8502_v31 = vld [vmem:[#allocation15 + $0x7c8] sm:$0xff]  ;;  %v14046_v63 = vcombine.low %v8510_v45, %v8514_v25 }
 0x731   :  { %v11406_v60 = vpop.f32.mrf.mxu0  ;;  %11576 = vmatprep.subr.bf16.mxu1 %v13959_v61  ;;  %11617 = vmatprep.subr.bf16.mxu0 %v14087_v9  ;;  %v8506_v61 = vld [vmem:[#allocation15 + $0x7e8] sm:$0xff] }
 0x732   :  { %v8630_v9 = vld [vmem:[#allocation15 + $0xbc8] sm:$0xff]  ;;  %v14039_v54 = vcombine.high %v8502_v31, %v8506_v61 }
 0x733   :  { %v14167_v50 = vcombine.high %v8630_v9, %v8634_v30  ;;  %v8622_v60 = vld [vmem:[#allocation15 + $0xb88] sm:$0xff]  ;;  %v14166_v24 = vcombine.low %v8630_v9, %v8634_v30 }
 0x734   :  { %11577 = vmatpush1.bf16.msra.mxu1 %v13958_v23  ;;  %11618 = vmatpush1.bf16.msra.mxu0 %v14086_v58  ;;  %v8494_v23 = vld [vmem:[#allocation15 + $0x788] sm:$0xff] }
 0x735   :  { %11578 = vmatprep.subr.bf16.mxu1 %v13951_v21  ;;  %11619 = vmatprep.subr.bf16.mxu0 %v14079_v49  ;;  %v8498_v58 = vld [vmem:[#allocation15 + $0x7a8] sm:$0xff]  ;;  %v14038_v49 = vcombine.low %v8502_v31, %v8506_v61 }
 0x736   :  { %v8626_v21 = vld [vmem:[#allocation15 + $0xba8] sm:$0xff]  ;;  %v14031_v18 = vcombine.high %v8494_v23, %v8498_v58 }
 0x737   :  { %v14159_v53 = vcombine.high %v8622_v60, %v8626_v21  ;;  %v14158_v55 = vcombine.low %v8622_v60, %v8626_v21  ;;  %v8470_v27 = vld [vmem:[#allocation15 + $0x6c8] sm:$0xff] }
 0x738   :  { %11579 = vmatpush1.bf16.msra.mxu1 %v13950_v43  ;;  %11620 = vmatpush1.bf16.msra.mxu0 %v14078_v15  ;;  %v8490_v43 = vld [vmem:[#allocation15 + $0x768] sm:$0xff] }
 0x739   :  { %11580 = vmatprep.subr.bf16.mxu1 %v13943_v32  ;;  %11621 = vmatprep.subr.bf16.mxu0 %v14071_v56  ;;  %v8614_v15 = vld [vmem:[#allocation15 + $0xb48] sm:$0xff]  ;;  %v14030_v56 = vcombine.low %v8494_v23, %v8498_v58  ;;  %v14023_v52 = vcombine.high %v8486_v37, %v8490_v43 }
 0x73a   :  { %v8618_v32 = vld [vmem:[#allocation15 + $0xb68] sm:$0xff] }
 0x73b   :  { %v14151_v36 = vcombine.high %v8614_v15, %v8618_v32  ;;  %v14150_v8 = vcombine.low %v8614_v15, %v8618_v32  ;;  %v8462_v25 = vld [vmem:[#allocation15 + $0x688] sm:$0xff] }
 0x73c   :  { %11581 = vmatpush1.bf16.msra.mxu1 %v13942_v29  ;;  %11622 = vmatpush1.bf16.msra.mxu0 %v14070_v3  ;;  %v8482_v29 = vld [vmem:[#allocation15 + $0x728] sm:$0xff] }
 0x73d   :  { %11582 = vmatprep.subr.bf16.mxu1 %v13935_v62  ;;  %11623 = vmatprep.subr.bf16.mxu0 %v14063_v6  ;;  %v8606_v3 = vld [vmem:[#allocation15 + $0xb08] sm:$0xff]  ;;  %v14022_v6 = vcombine.low %v8486_v37, %v8490_v43  ;;  %v14015_v13 = vcombine.high %v8478_v57, %v8482_v29 }
 0x73e   :  { %v8610_v62 = vld [vmem:[#allocation15 + $0xb28] sm:$0xff] }
 0x73f   :  { %v14143_v20 = vcombine.high %v8606_v3, %v8610_v62  ;;  %v14142_v33 = vcombine.low %v8606_v3, %v8610_v62  ;;  %v8454_v30 = vld [vmem:[#allocation15 + $0x648] sm:$0xff] }
 0x740   :  { %11583 = vmatpush1.bf16.msra.mxu1 %v13934_v10  ;;  %11624 = vmatpush1.bf16.msra.mxu0 %v14062_v35  ;;  %v8474_v10 = vld [vmem:[#allocation15 + $0x6e8] sm:$0xff] }
 0x741   :  { %11584 = vmatprep.subr.bf16.mxu1 %v13927_v12  ;;  %11625 = vmatprep.subr.bf16.mxu0 %v14055_v0  ;;  %v8598_v35 = vld [vmem:[#allocation15 + $0xac8] sm:$0xff]  ;;  %v14014_v0 = vcombine.low %v8478_v57, %v8482_v29  ;;  %v14007_v2 = vcombine.high %v8470_v27, %v8474_v10 }
 0x742   :  { %v8602_v12 = vld [vmem:[#allocation15 + $0xae8] sm:$0xff] }
 0x743   :  { %v14135_v45 = vcombine.high %v8598_v35, %v8602_v12  ;;  %v14134_v31 = vcombine.low %v8598_v35, %v8602_v12  ;;  %v8446_v21 = vld [vmem:[#allocation15 + $0x608] sm:$0xff] }
 0x744   :  { %11585 = vmatpush1.bf16.msra.mxu1 %v13926_v34  ;;  %11626 = vmatpush1.bf16.msra.mxu0 %v14054_v11  ;;  %v8466_v34 = vld [vmem:[#allocation15 + $0x6a8] sm:$0xff] }
 0x745   :  { %11586 = vmatprep.subr.bf16.mxu1 %v13919_v5  ;;  %11627 = vmatprep.subr.bf16.mxu0 %v14047_v46  ;;  %v8590_v11 = vld [vmem:[#allocation15 + $0xa88] sm:$0xff]  ;;  %v14006_v46 = vcombine.low %v8470_v27, %v8474_v10  ;;  %v13999_v61 = vcombine.high %v8462_v25, %v8466_v34  ;;  %v8307_v27 = vld [vmem:[#allocation15 + $0x1b0] sm:$0xff] }
 0x746   :  { %v8594_v5 = vld [vmem:[#allocation15 + $0xaa8] sm:$0xff] }
 0x747   :  { %v14127_v9 = vcombine.high %v8590_v11, %v8594_v5  ;;  %v14126_v23 = vcombine.low %v8590_v11, %v8594_v5  ;;  %v8694_v32 = vld [vmem:[#allocation15 + $0xdc8] sm:$0xff]  ;;  %v8299_v11 = vld [vmem:[#allocation15 + $0x170] sm:$0xff] }
 0x748   :  { %11587 = vmatpush1.bf16.msra.mxu1 %v13918_v19  ;;  %11628 = vmatpush1.bf16.msra.mxu0 %v14046_v63  ;;  %v8458_v19 = vld [vmem:[#allocation15 + $0x668] sm:$0xff] }
 0x749   :  { %11588 = vmatprep.subr.bf16.mxu1 %v14039_v54  ;;  %11629 = vmatprep.subr.bf16.mxu0 %v14167_v50  ;;  %v8582_v63 = vld [vmem:[#allocation15 + $0xa48] sm:$0xff]  ;;  %v13998_v50 = vcombine.low %v8462_v25, %v8466_v34  ;;  %v13991_v58 = vcombine.high %v8454_v30, %v8458_v19  ;;  %v8295_v34 = vld [vmem:[#allocation15 + $0x150] sm:$0xff] }
 0x74a   :  { %v8586_v54 = vld [vmem:[#allocation15 + $0xa68] sm:$0xff] }
 0x74b   :  { %v14119_v60 = vcombine.high %v8582_v63, %v8586_v54  ;;  %v14118_v37 = vcombine.low %v8582_v63, %v8586_v54  ;;  %v8682_v25 = vld [vmem:[#allocation15 + $0xd68] sm:$0xff]  ;;  %v8287_v54 = vld [vmem:[#allocation15 + $0x110] sm:$0xff] }
 0x74c   :  { %11589 = vmatpush2.bf16.msra.mxu1 %v14038_v49  ;;  %11630 = vmatpush2.bf16.msra.mxu0 %v14166_v24  ;;  %v8450_v49 = vld [vmem:[#allocation15 + $0x628] sm:$0xff] }
 0x74d   :  { %11590 = vmatprep.subr.bf16.mxu1 %v14031_v18  ;;  %11631 = vmatprep.subr.bf16.mxu0 %v14159_v53  ;;  %v8574_v24 = vld [vmem:[#allocation15 + $0xa08] sm:$0xff]  ;;  %v13990_v53 = vcombine.low %v8454_v30, %v8458_v19  ;;  %v13983_v43 = vcombine.high %v8446_v21, %v8450_v49  ;;  %v13982_v57 = vcombine.low %v8446_v21, %v8450_v49 }
 0x74e   :  { %v8578_v18 = vld [vmem:[#allocation15 + $0xa28] sm:$0xff]  ;;  %v13833_v30 = vcombine.high %v8295_v34, %v8299_v11 }
 0x74f   :  { %v14111_v15 = vcombine.high %v8574_v24, %v8578_v18  ;;  %v14110_v29 = vcombine.low %v8574_v24, %v8578_v18  ;;  %v8670_v19 = vld [vmem:[#allocation15 + $0xd08] sm:$0xff] }
 0x750   :  { %11591 = vmatpush2.bf16.msra.mxu1 %v14030_v56  ;;  %11632 = vmatpush2.bf16.msra.mxu0 %v14158_v55  ;;  %v8698_v56 = vld [vmem:[#allocation15 + $0xde8] sm:$0xff]  ;;  %v8311_v55 = vld [vmem:[#allocation15 + $0x1d0] sm:$0xff] }
 0x751   :  { %11592 = vmatprep.subr.bf16.mxu1 %v14023_v52  ;;  %11633 = vmatprep.subr.bf16.mxu0 %v14151_v36  ;;  %v8315_v52 = vld [vmem:[#allocation15 + $0x1f0] sm:$0xff]  ;;  %v8765_v36 = vld [vmem:[#allocation16] sm:$0xff]  ;;  %v14231_v3 = vcombine.high %v8694_v32, %v8698_v56  ;;  %v14230_v35 = vcombine.low %v8694_v32, %v8698_v56  ;;  %v8674_v63 = vld [vmem:[#allocation15 + $0xd28] sm:$0xff] }
 0x752   :  { %v13849_v62 = vcombine.high %v8311_v55, %v8315_v52  ;;  %v8774_v10 = vrot.slane %v8765_v36, %v15364_v39  ;;  %v13848_v12 = vcombine.low %v8311_v55, %v8315_v52  ;;  %v14207_v21 = vcombine.high %v8670_v19, %v8674_v63  ;;  %v8662_v24 = vld [vmem:[#allocation15 + $0xcc8] sm:$0xff] }
 0x753   :  { %v8666_v18 = vld [vmem:[#allocation15 + $0xce8] sm:$0xff] }
 0x754   :  { %11593 = vmatpush2.bf16.msra.mxu1 %v14022_v6  ;;  %11634 = vmatpush2.bf16.msra.mxu0 %v14150_v8  ;;  %v8770_v6 = vrot.slane %v8765_v36, %v15370_v41  ;;  %v8686_v8 = vld [vmem:[#allocation15 + $0xd88] sm:$0xff]  ;;  %v11404_v39 = vadd.f32 %v15783_v4, %v8774_v10  ;;  %v14199_v32 = vcombine.high %v8662_v24, %v8666_v18  ;;  %v8271_v36 = vld [vmem:[#allocation15 + $0x90] sm:$0xff] }
 0x755   :  { %11594 = vmatprep.subr.bf16.mxu1 %v14015_v13  ;;  %11635 = vmatprep.subr.bf16.mxu0 %v14143_v20  ;;  %v8690_v13 = vld [vmem:[#allocation15 + $0xda8] sm:$0xff]  ;;  %v8303_v20 = vld [vmem:[#allocation15 + $0x190] sm:$0xff] }
 0x756   :  { %v8654_v55 = vld [vmem:[#allocation15 + $0xc88] sm:$0xff] }
 0x757   :  { %v8658_v52 = vld [vmem:[#allocation15 + $0xca8] sm:$0xff] }
 0x758   :  { %11595 = vmatpush2.bf16.msra.mxu1 %v14014_v0  ;;  %11636 = vmatpush2.bf16.msra.mxu0 %v14142_v33  ;;  %v11402_v0 = vadd.f32 %v15775_v14, %v8770_v6  ;;  %v14223_v33 = vcombine.high %v8686_v8, %v8690_v13  ;;  %v14190_v10 = vcombine.low %v8654_v55, %v8658_v52 }
 0x759   :  { %11596 = vmatprep.subr.bf16.mxu1 %v14007_v2  ;;  %11637 = vmatprep.subr.bf16.mxu0 %v14135_v45  ;;  %v13841_v2 = vcombine.high %v8303_v20, %v8307_v27  ;;  %v8678_v45 = vld [vmem:[#allocation15 + $0xd48] sm:$0xff] }
 0x75c   :  { %11597 = vmatpush2.bf16.msra.mxu1 %v14006_v46  ;;  %11638 = vmatpush2.bf16.msra.mxu0 %v14134_v31  ;;  %v14222_v46 = vcombine.low %v8686_v8, %v8690_v13  ;;  %v13840_v31 = vcombine.low %v8303_v20, %v8307_v27  ;;  %v8646_v8 = vld [vmem:[#allocation15 + $0xc48] sm:$0xff]  ;;  %v8263_v20 = vld [vmem:[#allocation15 + $0x50] sm:$0xff] }
 0x75d   :  { %11598 = vmatprep.subr.bf16.mxu1 %v13999_v61  ;;  %11639 = vmatprep.subr.bf16.mxu0 %v14127_v9  ;;  %v14215_v61 = vcombine.high %v8678_v45, %v8682_v25  ;;  %v8650_v13 = vld [vmem:[#allocation15 + $0xc68] sm:$0xff]  ;;  %v8267_v27 = vld [vmem:[#allocation15 + $0x70] sm:$0xff] }
 0x760   :  { %11599 = vmatpush2.bf16.msra.mxu1 %v13998_v50  ;;  %11640 = vmatpush2.bf16.msra.mxu0 %v14126_v23  ;;  %v8291_v50 = vld [vmem:[#allocation15 + $0x130] sm:$0xff]  ;;  %v14214_v23 = vcombine.low %v8678_v45, %v8682_v25 }
 0x761   :  { %11600 = vmatprep.subr.bf16.mxu1 %v13991_v58  ;;  %11641 = vmatprep.subr.bf16.mxu0 %v14119_v60  ;;  %v13832_v60 = vcombine.low %v8295_v34, %v8299_v11  ;;  %v13825_v49 = vcombine.high %v8287_v54, %v8291_v50  ;;  %v8255_v45 = vld [vmem:[#allocation15 + $0x10] sm:$0xff]  ;;  %v13800_v34 = vcombine.low %v8263_v20, %v8267_v27 }
 0x762   :  { %v8259_v25 = vld [vmem:[#allocation15 + $0x30] sm:$0xff] }
 0x764   :  { %11601 = vmatpush2.bf16.msra.mxu1 %v13990_v53  ;;  %11642 = vmatpush2.bf16.msra.mxu0 %v14118_v37  ;;  %v8279_v53 = vld [vmem:[#allocation15 + $0xd0] sm:$0xff] }
 0x765   :  { %11602 = vmatprep.subr.bf16.mxu1 %v13983_v43  ;;  %11643 = vmatprep.subr.bf16.mxu0 %v14111_v15  ;;  %v8283_v37 = vld [vmem:[#allocation15 + $0xf0] sm:$0xff]  ;;  %v14206_v43 = vcombine.low %v8670_v19, %v8674_v63  ;;  %v13824_v15 = vcombine.low %v8287_v54, %v8291_v50  ;;  %v13792_v19 = vcombine.low %v8255_v45, %v8259_v25  ;;  %v8750_v54 = vld [vmem:[#allocation15 + $0xf88] sm:$0xff] }
 0x766   :  { %v13817_v56 = vcombine.high %v8279_v53, %v8283_v37  ;;  %v8754_v50 = vld [vmem:[#allocation15 + $0xfa8] sm:$0xff] }
 0x768   :  { %11603 = vmatpush2.bf16.msra.mxu1 %v13982_v57  ;;  %11644 = vmatpush2.bf16.msra.mxu0 %v14110_v29  ;;  %v8275_v57 = vld [vmem:[#allocation15 + $0xb0] sm:$0xff]  ;;  %v14198_v29 = vcombine.low %v8662_v24, %v8666_v18  ;;  %v8742_v18 = vld [vmem:[#allocation15 + $0xf48] sm:$0xff] }
 0x769   :  { %11654 = vmatprep.subr.bf16.mxu1 %v14231_v3  ;;  %11695 = vmatprep.subr.bf16.mxu0 %v13849_v62  ;;  %v13816_v3 = vcombine.low %v8279_v53, %v8283_v37  ;;  %v14191_v62 = vcombine.high %v8654_v55, %v8658_v52  ;;  %v13809_v6 = vcombine.high %v8271_v36, %v8275_v57  ;;  %v8746_v53 = vld [vmem:[#allocation15 + $0xf68] sm:$0xff]  ;;  %v8359_v37 = vld [vmem:[#allocation15 + $0x350] sm:$0xff] }
 0x76a   :  { %v8734_v52 = vld [vmem:[#allocation15 + $0xf08] sm:$0xff] }
 0x76b   :  { %11605 = vmatmul.mubr.bf16.vlgmr.msra.gmra.mxu1 %v15739_v48  ;;  %11646 = vmatmul.mubr.bf16.vlgmr.msra.gmra.mxu0 %v15757_v17  ;;  %v11442_v41 = vpop.f32.mrf.mxu1 }
 0x76c   :  { %v15791_v5 = vadd.f32 %v11442_v41, %v11402_v0  ;;  %11655 = vmatpush1.bf16.msra.mxu1 %v14230_v35  ;;  %11686 = vmatprep.mubr.bf16.mxu1 %v15769_v44  ;;  %v13808_v35 = vcombine.low %v8271_v36, %v8275_v57  ;;  %v13801_v0 = vcombine.high %v8263_v20, %v8267_v27  ;;  %v8738_v36 = vld [vmem:[#allocation15 + $0xf28] sm:$0xff]  ;;  %v8351_v57 = vld [vmem:[#allocation15 + $0x310] sm:$0xff] }
 0x76d   :  { %11696 = vmatpush1.bf16.msra.mxu0 %v13848_v12  ;;  %11727 = vmatprep.mubr.bf16.mxu0 %v15709_v28  ;;  %v11444_v14 = vpop.f32.mrf.mxu1  ;;  %v14183_v12 = vcombine.high %v8646_v8, %v8650_v13  ;;  %v14182_v41 = vcombine.low %v8646_v8, %v8650_v13  ;;  %v8726_v13 = vld [vmem:[#allocation15 + $0xec8] sm:$0xff]  ;;  %v8343_v27 = vld [vmem:[#allocation15 + $0x2d0] sm:$0xff] }
 0x76e   :  { %v15795_v9 = vadd.f32 %v11444_v14, %v11404_v39  ;;  %11656 = vmatprep.subr.bf16.mxu1 %v14223_v33  ;;  %11697 = vmatprep.subr.bf16.mxu0 %v13841_v2  ;;  %v8638_v33 = vld [vmem:[#allocation15 + $0xc08] sm:$0xff]  ;;  %v13793_v39 = vcombine.high %v8255_v45, %v8259_v25  ;;  %v8335_v25 = vld [vmem:[#allocation15 + $0x290] sm:$0xff] }
 0x76f   :  { %v11446_v4 = vpop.f32.mrf.mxu1  ;;  %v8642_v2 = vld [vmem:[#allocation15 + $0xc28] sm:$0xff] }
 0x770   :  { %11657 = vmatpush1.bf16.msra.mxu1 %v14222_v46  ;;  %v14175_v11 = vcombine.high %v8638_v33, %v8642_v2  ;;  %v8758_v46 = vld [vmem:[#allocation15 + $0xfc8] sm:$0xff] }
 0x771   :  { %11698 = vmatpush1.bf16.msra.mxu0 %v13840_v31  ;;  %v11447_v58 = vpop.f32.mrf.mxu1  ;;  %11658 = vmatprep.subr.bf16.mxu1 %v14215_v61  ;;  %v8762_v14 = vld [vmem:[#allocation15 + $0xfe8] sm:$0xff]  ;;  %v8375_v31 = vld [vmem:[#allocation15 + $0x3d0] sm:$0xff] }
 0x772   :  { %11699 = vmatprep.subr.bf16.mxu0 %v13833_v30  ;;  %v8379_v61 = vld [vmem:[#allocation15 + $0x3f0] sm:$0xff]  ;;  %v14174_v30 = vcombine.low %v8638_v33, %v8642_v2  ;;  %v14295_v63 = vcombine.high %v8758_v46, %v8762_v14  ;;  %v8730_v20 = vld [vmem:[#allocation15 + $0xee8] sm:$0xff] }
 0x773   :  { %v13913_v4 = vcombine.high %v8375_v31, %v8379_v61  ;;  %v8371_v58 = vld [vmem:[#allocation15 + $0x3b0] sm:$0xff]  ;;  %v8718_v2 = vld [vmem:[#allocation15 + $0xe88] sm:$0xff] }
 0x774   :  { %11659 = vmatpush1.bf16.msra.mxu1 %v14214_v23  ;;  %v8367_v23 = vld [vmem:[#allocation15 + $0x390] sm:$0xff]  ;;  %v8722_v45 = vld [vmem:[#allocation15 + $0xea8] sm:$0xff] }
 0x775   :  { %11700 = vmatpush1.bf16.msra.mxu0 %v13832_v60  ;;  %11660 = vmatprep.subr.bf16.mxu1 %v14207_v21  ;;  %v14294_v60 = vcombine.low %v8758_v46, %v8762_v14  ;;  %v13912_v21 = vcombine.low %v8375_v31, %v8379_v61  ;;  %v13905_v24 = vcombine.high %v8367_v23, %v8371_v58  ;;  %v8710_v14 = vld [vmem:[#allocation15 + $0xe48] sm:$0xff]  ;;  %v8327_v61 = vld [vmem:[#allocation15 + $0x250] sm:$0xff] }
 0x776   :  { %11701 = vmatprep.subr.bf16.mxu0 %v13825_v49  ;;  %v14287_v49 = vcombine.high %v8750_v54, %v8754_v50  ;;  %v8714_v31 = vld [vmem:[#allocation15 + $0xe68] sm:$0xff] }
 0x778   :  { %11661 = vmatpush1.bf16.msra.mxu1 %v14206_v43  ;;  %v8363_v43 = vld [vmem:[#allocation15 + $0x370] sm:$0xff] }
 0x779   :  { %11702 = vmatpush1.bf16.msra.mxu0 %v13824_v15  ;;  %11662 = vmatprep.subr.bf16.mxu1 %v14199_v32  ;;  %v14286_v15 = vcombine.low %v8750_v54, %v8754_v50  ;;  %v13904_v32 = vcombine.low %v8367_v23, %v8371_v58  ;;  %v13897_v55 = vcombine.high %v8359_v37, %v8363_v43  ;;  %v8702_v50 = vld [vmem:[#allocation15 + $0xe08] sm:$0xff]  ;;  %v8319_v58 = vld [vmem:[#allocation15 + $0x210] sm:$0xff] }
 0x77a   :  { %11703 = vmatprep.subr.bf16.mxu0 %v13817_v56  ;;  %v14279_v56 = vcombine.high %v8742_v18, %v8746_v53  ;;  %v8706_v23 = vld [vmem:[#allocation15 + $0xe28] sm:$0xff] }
 0x77c   :  { %11663 = vmatpush1.bf16.msra.mxu1 %v14198_v29  ;;  %v8355_v29 = vld [vmem:[#allocation15 + $0x330] sm:$0xff] }
 0x77d   :  { %11704 = vmatpush1.bf16.msra.mxu0 %v13816_v3  ;;  %11664 = vmatprep.subr.bf16.mxu1 %v14191_v62  ;;  %v14278_v3 = vcombine.low %v8742_v18, %v8746_v53  ;;  %v13896_v62 = vcombine.low %v8359_v37, %v8363_v43  ;;  %v13889_v8 = vcombine.high %v8351_v57, %v8355_v29  ;;  %v8439_v53 = vld [vmem:[#allocation15 + $0x5d0] sm:$0xff] }
 0x77e   :  { %11705 = vmatprep.subr.bf16.mxu0 %v13809_v6  ;;  %v14271_v6 = vcombine.high %v8734_v52, %v8738_v36  ;;  %v8443_v37 = vld [vmem:[#allocation15 + $0x5f0] sm:$0xff] }
 0x77f   :  { %v8567_v43 = vld [vmem:[#allocation15 + $0x9d0] sm:$0xff] }
 0x780   :  { %11665 = vmatpush1.bf16.msra.mxu1 %v14190_v10  ;;  %v8347_v10 = vld [vmem:[#allocation15 + $0x2f0] sm:$0xff] }
 0x781   :  { %11706 = vmatpush1.bf16.msra.mxu0 %v13808_v35  ;;  %11666 = vmatprep.subr.bf16.mxu1 %v14183_v12  ;;  %v14270_v35 = vcombine.low %v8734_v52, %v8738_v36  ;;  %v13888_v12 = vcombine.low %v8351_v57, %v8355_v29  ;;  %v13881_v33 = vcombine.high %v8343_v27, %v8347_v10  ;;  %v8431_v36 = vld [vmem:[#allocation15 + $0x590] sm:$0xff] }
 0x782   :  { %11707 = vmatprep.subr.bf16.mxu0 %v13801_v0  ;;  %v14263_v0 = vcombine.high %v8726_v13, %v8730_v20  ;;  %v8435_v57 = vld [vmem:[#allocation15 + $0x5b0] sm:$0xff]  ;;  %v13976_v29 = vcombine.low %v8439_v53, %v8443_v37 }
 0x784   :  { %11667 = vmatpush1.bf16.msra.mxu1 %v14182_v41  ;;  %v8339_v41 = vld [vmem:[#allocation15 + $0x2b0] sm:$0xff] }
 0x785   :  { %11708 = vmatpush1.bf16.msra.mxu0 %v13800_v34  ;;  %11668 = vmatprep.subr.bf16.mxu1 %v14175_v11  ;;  %v14262_v34 = vcombine.low %v8726_v13, %v8730_v20  ;;  %v13880_v11 = vcombine.low %v8343_v27, %v8347_v10  ;;  %v13873_v46 = vcombine.high %v8335_v25, %v8339_v41  ;;  %v8423_v13 = vld [vmem:[#allocation15 + $0x550] sm:$0xff] }
 0x786   :  { %11709 = vmatprep.subr.bf16.mxu0 %v13793_v39  ;;  %v14255_v39 = vcombine.high %v8718_v2, %v8722_v45  ;;  %v8427_v20 = vld [vmem:[#allocation15 + $0x570] sm:$0xff] }
 0x788   :  { %11669 = vmatpush1.bf16.msra.mxu1 %v14174_v30  ;;  %v8331_v30 = vld [vmem:[#allocation15 + $0x270] sm:$0xff] }
 0x789   :  { %11710 = vmatpush1.bf16.msra.mxu0 %v13792_v19  ;;  %11670 = vmatprep.subr.bf16.mxu1 %v14295_v63  ;;  %v14254_v19 = vcombine.low %v8718_v2, %v8722_v45  ;;  %v13872_v63 = vcombine.low %v8335_v25, %v8339_v41  ;;  %v13865_v54 = vcombine.high %v8327_v61, %v8331_v30 }
 0x78a   :  { %11711 = vmatprep.subr.bf16.mxu0 %v13913_v4  ;;  %v14247_v4 = vcombine.high %v8710_v14, %v8714_v31  ;;  %v13961_v25 = vcombine.high %v8423_v13, %v8427_v20 }
 0x78c   :  { %11671 = vmatpush2.bf16.msra.mxu1 %v14294_v60  ;;  %v8323_v60 = vld [vmem:[#allocation15 + $0x230] sm:$0xff] }
 0x78d   :  { %11712 = vmatpush2.bf16.msra.mxu0 %v13912_v21  ;;  %11672 = vmatprep.subr.bf16.mxu1 %v14287_v49  ;;  %v14246_v21 = vcombine.low %v8710_v14, %v8714_v31  ;;  %v13864_v49 = vcombine.low %v8327_v61, %v8331_v30  ;;  %v13857_v18 = vcombine.high %v8319_v58, %v8323_v60  ;;  %v8547_v14 = vld [vmem:[#allocation15 + $0x930] sm:$0xff] }
 0x78e   :  { %11713 = vmatprep.subr.bf16.mxu0 %v13905_v24  ;;  %v14239_v24 = vcombine.high %v8702_v50, %v8706_v23  ;;  %v13960_v31 = vcombine.low %v8423_v13, %v8427_v20  ;;  %v8511_v13 = vld [vmem:[#allocation15 + $0x810] sm:$0xff] }
 0x78f   :  { %v8515_v20 = vld [vmem:[#allocation15 + $0x830] sm:$0xff] }
 0x790   :  { %11673 = vmatpush2.bf16.msra.mxu1 %v14286_v15  ;;  %v8571_v15 = vld [vmem:[#allocation15 + $0x9f0] sm:$0xff] }
 0x791   :  { %11714 = vmatpush2.bf16.msra.mxu0 %v13904_v32  ;;  %11674 = vmatprep.subr.bf16.mxu1 %v14279_v56  ;;  %v14238_v32 = vcombine.low %v8702_v50, %v8706_v23  ;;  %v13856_v56 = vcombine.low %v8319_v58, %v8323_v60  ;;  %v14105_v52 = vcombine.high %v8567_v43, %v8571_v15  ;;  %v8539_v50 = vld [vmem:[#allocation15 + $0x8f0] sm:$0xff] }
 0x792   :  { %11715 = vmatprep.subr.bf16.mxu0 %v13897_v55  ;;  %v13977_v55 = vcombine.high %v8439_v53, %v8443_v37  ;;  %v8531_v53 = vld [vmem:[#allocation15 + $0x8b0] sm:$0xff] }
 0x794   :  { %11675 = vmatpush2.bf16.msra.mxu1 %v14278_v3  ;;  %v8559_v3 = vld [vmem:[#allocation15 + $0x990] sm:$0xff] }
 0x795   :  { %11716 = vmatpush2.bf16.msra.mxu0 %v13896_v62  ;;  %11676 = vmatprep.subr.bf16.mxu1 %v14271_v6  ;;  %v8563_v62 = vld [vmem:[#allocation15 + $0x9b0] sm:$0xff]  ;;  %v14104_v6 = vcombine.low %v8567_v43, %v8571_v15 }
 0x796   :  { %11717 = vmatprep.subr.bf16.mxu0 %v13889_v8  ;;  %v13969_v8 = vcombine.high %v8431_v36, %v8435_v57  ;;  %v14097_v10 = vcombine.high %v8559_v3, %v8563_v62  ;;  %v14096_v45 = vcombine.low %v8559_v3, %v8563_v62 }
 0x798   :  { %11677 = vmatpush2.bf16.msra.mxu1 %v14270_v35  ;;  %v8551_v35 = vld [vmem:[#allocation15 + $0x950] sm:$0xff] }
 0x799   :  { %11718 = vmatpush2.bf16.msra.mxu0 %v13888_v12  ;;  %11678 = vmatprep.subr.bf16.mxu1 %v14263_v0  ;;  %v8555_v12 = vld [vmem:[#allocation15 + $0x970] sm:$0xff] }
 0x79a   :  { %11719 = vmatprep.subr.bf16.mxu0 %v13881_v33  ;;  %v13968_v33 = vcombine.low %v8431_v36, %v8435_v57  ;;  %v14088_v30 = vcombine.low %v8551_v35, %v8555_v12  ;;  %v8523_v36 = vld [vmem:[#allocation15 + $0x870] sm:$0xff] }
 0x79c   :  { %11679 = vmatpush2.bf16.msra.mxu1 %v14262_v34  ;;  %v14089_v34 = vcombine.high %v8551_v35, %v8555_v12  ;;  %v14049_v12 = vcombine.high %v8511_v13, %v8515_v20 }
 0x79d   :  { %11720 = vmatpush2.bf16.msra.mxu0 %v13880_v11  ;;  %11680 = vmatprep.subr.bf16.mxu1 %v14255_v39  ;;  %v8415_v11 = vld [vmem:[#allocation15 + $0x510] sm:$0xff] }
 0x79e   :  { %11721 = vmatprep.subr.bf16.mxu0 %v13873_v46  ;;  %v8419_v39 = vld [vmem:[#allocation15 + $0x530] sm:$0xff] }
 0x79f   :  { %v8543_v46 = vld [vmem:[#allocation15 + $0x910] sm:$0xff]  ;;  %v13952_v23 = vcombine.low %v8415_v11, %v8419_v39 }
 0x7a0   :  { %11681 = vmatpush2.bf16.msra.mxu1 %v14254_v19  ;;  %v13953_v19 = vcombine.high %v8415_v11, %v8419_v39  ;;  %v14080_v58 = vcombine.low %v8543_v46, %v8547_v14  ;;  %v14048_v11 = vcombine.low %v8511_v13, %v8515_v20  ;;  %v8467_v13 = vld [vmem:[#allocation15 + $0x6b0] sm:$0xff] }
 0x7a1   :  { %11722 = vmatpush2.bf16.msra.mxu0 %v13872_v63  ;;  %11682 = vmatprep.subr.bf16.mxu1 %v14247_v4  ;;  %v14081_v63 = vcombine.high %v8543_v46, %v8547_v14  ;;  %v8407_v4 = vld [vmem:[#allocation15 + $0x4d0] sm:$0xff] }
 0x7a2   :  { %11723 = vmatprep.subr.bf16.mxu0 %v13865_v54  ;;  %v8535_v54 = vld [vmem:[#allocation15 + $0x8d0] sm:$0xff] }
 0x7a3   :  { %v14072_v43 = vcombine.low %v8535_v54, %v8539_v50  ;;  %v8495_v46 = vld [vmem:[#allocation15 + $0x790] sm:$0xff] }
 0x7a4   :  { %11683 = vmatpush2.bf16.msra.mxu1 %v14246_v21  ;;  %v14073_v21 = vcombine.high %v8535_v54, %v8539_v50  ;;  %v8499_v14 = vld [vmem:[#allocation15 + $0x7b0] sm:$0xff] }
 0x7a5   :  { %11724 = vmatpush2.bf16.msra.mxu0 %v13864_v49  ;;  %11684 = vmatprep.subr.bf16.mxu1 %v14239_v24  ;;  %v8399_v49 = vld [vmem:[#allocation15 + $0x490] sm:$0xff] }
 0x7a6   :  { %11725 = vmatprep.subr.bf16.mxu0 %v13857_v18  ;;  %v8403_v24 = vld [vmem:[#allocation15 + $0x4b0] sm:$0xff] }
 0x7a7   :  { %v8527_v18 = vld [vmem:[#allocation15 + $0x890] sm:$0xff]  ;;  %v13937_v15 = vcombine.high %v8399_v49, %v8403_v24  ;;  %v13936_v57 = vcombine.low %v8399_v49, %v8403_v24 }
 0x7a8   :  { %11685 = vmatpush2.bf16.msra.mxu1 %v14238_v32  ;;  %v14065_v32 = vcombine.high %v8527_v18, %v8531_v53  ;;  %v8491_v54 = vld [vmem:[#allocation15 + $0x770] sm:$0xff] }
 0x7a9   :  { %11726 = vmatpush2.bf16.msra.mxu0 %v13856_v56  ;;  %11736 = vmatprep.subr.bf16.mxu1 %v13977_v55  ;;  %v8391_v56 = vld [vmem:[#allocation15 + $0x450] sm:$0xff] }
 0x7aa   :  { %11777 = vmatprep.subr.bf16.mxu0 %v14105_v52  ;;  %v8395_v55 = vld [vmem:[#allocation15 + $0x470] sm:$0xff] }
 0x7ab   :  { %11687 = vmatmul.mubr.bf16.vlgmr.msra.gmra.mxu1 %v15771_v22  ;;  %v11483_v27 = vpop.f32.mrf.mxu0  ;;  %v8519_v52 = vld [vmem:[#allocation15 + $0x850] sm:$0xff]  ;;  %v13929_v3 = vcombine.high %v8391_v56, %v8395_v55 }
 0x7ac   :  { %11728 = vmatmul.mubr.bf16.vlgmr.msra.gmra.mxu0 %v15715_v16  ;;  %v15800_v0 = vadd.f32 %v11483_v27, %v15791_v5  ;;  %11737 = vmatpush1.bf16.msra.mxu1 %v13976_v29  ;;  %v14064_v29 = vcombine.low %v8527_v18, %v8531_v53  ;;  %v14057_v62 = vcombine.high %v8519_v52, %v8523_v36  ;;  %v8615_v50 = vld [vmem:[#allocation15 + $0xb50] sm:$0xff] }
 0x7ad   :  { %11768 = vmatprep.mubr.bf16.mxu1 %v15733_v47  ;;  %11778 = vmatpush1.bf16.msra.mxu0 %v14104_v6  ;;  %v11485_v2 = vpop.f32.mrf.mxu0  ;;  %v8383_v6 = vld [vmem:[#allocation15 + $0x410] sm:$0xff]  ;;  %v13928_v27 = vcombine.low %v8391_v56, %v8395_v55 }
 0x7ae   :  { %11809 = vmatprep.mubr.bf16.mxu0 %v15755_v51  ;;  %v15805_v41 = vadd.f32 %v11485_v2, %v15795_v9  ;;  %11738 = vmatprep.subr.bf16.mxu1 %v13969_v8  ;;  %v8411_v9 = vld [vmem:[#allocation15 + $0x4f0] sm:$0xff] }
 0x7af   :  { %11779 = vmatprep.subr.bf16.mxu0 %v14097_v10  ;;  %v11487_v5 = vpop.f32.mrf.mxu0  ;;  %v13945_v60 = vcombine.high %v8407_v4, %v8411_v9  ;;  %v13944_v37 = vcombine.low %v8407_v4, %v8411_v9  ;;  %v8387_v8 = vld [vmem:[#allocation15 + $0x430] sm:$0xff]  ;;  %v14056_v10 = vcombine.low %v8519_v52, %v8523_v36 }
 0x7b0   :  { %11739 = vmatpush1.bf16.msra.mxu1 %v13968_v33  ;;  %v13921_v35 = vcombine.high %v8383_v6, %v8387_v8  ;;  %v8503_v33 = vld [vmem:[#allocation15 + $0x7d0] sm:$0xff] }
 0x7b1   :  { %11780 = vmatpush1.bf16.msra.mxu0 %v14096_v45  ;;  %v11488_v61 = vpop.f32.mrf.mxu0  ;;  %11740 = vmatprep.subr.bf16.mxu1 %v13961_v25  ;;  %v8507_v2 = vld [vmem:[#allocation15 + $0x7f0] sm:$0xff] }
 0x7b2   :  { %11781 = vmatprep.subr.bf16.mxu0 %v14089_v34  ;;  %v8631_v45 = vld [vmem:[#allocation15 + $0xbd0] sm:$0xff]  ;;  %v13920_v34 = vcombine.low %v8383_v6, %v8387_v8  ;;  %v14041_v39 = vcombine.high %v8503_v33, %v8507_v2 }
 0x7b3   :  { %v8635_v25 = vld [vmem:[#allocation15 + $0xbf0] sm:$0xff] }
 0x7b4   :  { %11741 = vmatpush1.bf16.msra.mxu1 %v13960_v31  ;;  %v14169_v5 = vcombine.high %v8631_v45, %v8635_v25  ;;  %v8623_v31 = vld [vmem:[#allocation15 + $0xb90] sm:$0xff] }
 0x7b5   :  { %11782 = vmatpush1.bf16.msra.mxu0 %v14088_v30  ;;  %11742 = vmatprep.subr.bf16.mxu1 %v13953_v19  ;;  %v8627_v61 = vld [vmem:[#allocation15 + $0xbb0] sm:$0xff]  ;;  %v14040_v30 = vcombine.low %v8503_v33, %v8507_v2  ;;  %v14168_v19 = vcombine.low %v8631_v45, %v8635_v25 }
 0x7b6   :  { %11783 = vmatprep.subr.bf16.mxu0 %v14081_v63  ;;  %v14033_v63 = vcombine.high %v8495_v46, %v8499_v14  ;;  %v14161_v4 = vcombine.high %v8623_v31, %v8627_v61  ;;  %v8487_v9 = vld [vmem:[#allocation15 + $0x750] sm:$0xff] }
 0x7b7   :  { %v8479_v24 = vld [vmem:[#allocation15 + $0x710] sm:$0xff] }
 0x7b8   :  { %11743 = vmatpush1.bf16.msra.mxu1 %v13952_v23  ;;  %v8619_v23 = vld [vmem:[#allocation15 + $0xb70] sm:$0xff] }
 0x7b9   :  { %11784 = vmatpush1.bf16.msra.mxu0 %v14080_v58  ;;  %11744 = vmatprep.subr.bf16.mxu1 %v13945_v60  ;;  %v14032_v58 = vcombine.low %v8495_v46, %v8499_v14  ;;  %v14160_v60 = vcombine.low %v8623_v31, %v8627_v61  ;;  %v14153_v49 = vcombine.high %v8615_v50, %v8619_v23  ;;  %v8483_v18 = vld [vmem:[#allocation15 + $0x730] sm:$0xff] }
 0x7ba   :  { %11785 = vmatprep.subr.bf16.mxu0 %v14073_v21  ;;  %v14025_v21 = vcombine.high %v8487_v9, %v8491_v54  ;;  %v8607_v53 = vld [vmem:[#allocation15 + $0xb10] sm:$0xff] }
 0x7bb   :  { %v8471_v55 = vld [vmem:[#allocation15 + $0x6d0] sm:$0xff] }
 0x7bc   :  { %11745 = vmatpush1.bf16.msra.mxu1 %v13944_v37  ;;  %v8611_v37 = vld [vmem:[#allocation15 + $0xb30] sm:$0xff] }
 0x7bd   :  { %11786 = vmatpush1.bf16.msra.mxu0 %v14072_v43  ;;  %11746 = vmatprep.subr.bf16.mxu1 %v13937_v15  ;;  %v14024_v43 = vcombine.low %v8487_v9, %v8491_v54  ;;  %v14152_v15 = vcombine.low %v8615_v50, %v8619_v23  ;;  %v14145_v56 = vcombine.high %v8607_v53, %v8611_v37  ;;  %v8475_v52 = vld [vmem:[#allocation15 + $0x6f0] sm:$0xff]  ;;  %v8312_v23 = vld [vmem:[#allocation15 + $0x1d8] sm:$0xff] }
 0x7be   :  { %11787 = vmatprep.subr.bf16.mxu0 %v14065_v32  ;;  %v14017_v32 = vcombine.high %v8479_v24, %v8483_v18  ;;  %v8599_v36 = vld [vmem:[#allocation15 + $0xad0] sm:$0xff] }
 0x7bf   :  { %v8463_v8 = vld [vmem:[#allocation15 + $0x690] sm:$0xff] }
 0x7c0   :  { %11747 = vmatpush1.bf16.msra.mxu1 %v13936_v57  ;;  %v8603_v57 = vld [vmem:[#allocation15 + $0xaf0] sm:$0xff] }
 0x7c1   :  { %11788 = vmatpush1.bf16.msra.mxu0 %v14064_v29  ;;  %11748 = vmatprep.subr.bf16.mxu1 %v13929_v3  ;;  %v14016_v29 = vcombine.low %v8479_v24, %v8483_v18  ;;  %v14144_v3 = vcombine.low %v8607_v53, %v8611_v37  ;;  %v14137_v6 = vcombine.high %v8599_v36, %v8603_v57  ;;  %v8591_v20 = vld [vmem:[#allocation15 + $0xa90] sm:$0xff] }
 0x7c2   :  { %11789 = vmatprep.subr.bf16.mxu0 %v14057_v62  ;;  %v14009_v62 = vcombine.high %v8471_v55, %v8475_v52  ;;  %v8455_v2 = vld [vmem:[#allocation15 + $0x650] sm:$0xff] }
 0x7c3   :  { %v8459_v45 = vld [vmem:[#allocation15 + $0x670] sm:$0xff] }
 0x7c4   :  { %11749 = vmatpush1.bf16.msra.mxu1 %v13928_v27  ;;  %v8595_v27 = vld [vmem:[#allocation15 + $0xab0] sm:$0xff] }
 0x7c5   :  { %11790 = vmatpush1.bf16.msra.mxu0 %v14056_v10  ;;  %11750 = vmatprep.subr.bf16.mxu1 %v13921_v35  ;;  %v14008_v10 = vcombine.low %v8471_v55, %v8475_v52  ;;  %v14136_v35 = vcombine.low %v8599_v36, %v8603_v57  ;;  %v14129_v33 = vcombine.high %v8591_v20, %v8595_v27  ;;  %v8583_v25 = vld [vmem:[#allocation15 + $0xa50] sm:$0xff] }
 0x7c6   :  { %11791 = vmatprep.subr.bf16.mxu0 %v14049_v12  ;;  %v14001_v12 = vcombine.high %v8463_v8, %v8467_v13  ;;  %v8447_v14 = vld [vmem:[#allocation15 + $0x610] sm:$0xff] }
 0x7c7   :  { %v8451_v31 = vld [vmem:[#allocation15 + $0x630] sm:$0xff] }
 0x7c8   :  { %11751 = vmatpush1.bf16.msra.mxu1 %v13920_v34  ;;  %v8587_v34 = vld [vmem:[#allocation15 + $0xa70] sm:$0xff] }
 0x7c9   :  { %11792 = vmatpush1.bf16.msra.mxu0 %v14048_v11  ;;  %11752 = vmatprep.subr.bf16.mxu1 %v14041_v39  ;;  %v14000_v11 = vcombine.low %v8463_v8, %v8467_v13  ;;  %v14128_v39 = vcombine.low %v8591_v20, %v8595_v27  ;;  %v14121_v46 = vcombine.high %v8583_v25, %v8587_v34  ;;  %v8575_v61 = vld [vmem:[#allocation15 + $0xa10] sm:$0xff] }
 0x7ca   :  { %11793 = vmatprep.subr.bf16.mxu0 %v14169_v5  ;;  %v13993_v5 = vcombine.high %v8455_v2, %v8459_v45  ;;  %v8695_v54 = vld [vmem:[#allocation15 + $0xdd0] sm:$0xff] }
 0x7cb   :  { %v8699_v50 = vld [vmem:[#allocation15 + $0xdf0] sm:$0xff] }
 0x7cc   :  { %11753 = vmatpush2.bf16.msra.mxu1 %v14040_v30  ;;  %v8579_v30 = vld [vmem:[#allocation15 + $0xa30] sm:$0xff]  ;;  %v14232_v37 = vcombine.low %v8695_v54, %v8699_v50 }
 0x7cd   :  { %11794 = vmatpush2.bf16.msra.mxu0 %v14168_v19  ;;  %11754 = vmatprep.subr.bf16.mxu1 %v14033_v63  ;;  %v13992_v19 = vcombine.low %v8455_v2, %v8459_v45  ;;  %v14120_v63 = vcombine.low %v8583_v25, %v8587_v34  ;;  %v14113_v9 = vcombine.high %v8575_v61, %v8579_v30  ;;  %v8687_v18 = vld [vmem:[#allocation15 + $0xd90] sm:$0xff]  ;;  %v8288_v25 = vld [vmem:[#allocation15 + $0x118] sm:$0xff] }
 0x7ce   :  { %11795 = vmatprep.subr.bf16.mxu0 %v14161_v4  ;;  %v13985_v4 = vcombine.high %v8447_v14, %v8451_v31  ;;  %v8691_v53 = vld [vmem:[#allocation15 + $0xdb0] sm:$0xff]  ;;  %v8292_v34 = vld [vmem:[#allocation15 + $0x138] sm:$0xff] }
 0x7cf   :  { %v8679_v55 = vld [vmem:[#allocation15 + $0xd50] sm:$0xff]  ;;  %v14224_v8 = vcombine.low %v8687_v18, %v8691_v53 }
 0x7d0   :  { %11755 = vmatpush2.bf16.msra.mxu1 %v14032_v58  ;;  %v8316_v58 = vld [vmem:[#allocation15 + $0x1f8] sm:$0xff]  ;;  %v8683_v52 = vld [vmem:[#allocation15 + $0xd70] sm:$0xff] }
 0x7d1   :  { %11796 = vmatpush2.bf16.msra.mxu0 %v14160_v60  ;;  %11756 = vmatprep.subr.bf16.mxu1 %v14025_v21  ;;  %v13984_v60 = vcombine.low %v8447_v14, %v8451_v31  ;;  %v14112_v21 = vcombine.low %v8575_v61, %v8579_v30  ;;  %v13851_v24 = vcombine.high %v8312_v23, %v8316_v58  ;;  %v8663_v14 = vld [vmem:[#allocation15 + $0xcd0] sm:$0xff]  ;;  %v8280_v61 = vld [vmem:[#allocation15 + $0xd8] sm:$0xff] }
 0x7d2   :  { %11797 = vmatprep.subr.bf16.mxu0 %v14153_v49  ;;  %v14233_v49 = vcombine.high %v8695_v54, %v8699_v50  ;;  %v8667_v31 = vld [vmem:[#allocation15 + $0xcf0] sm:$0xff]  ;;  %v8284_v30 = vld [vmem:[#allocation15 + $0xf8] sm:$0xff] }
 0x7d3   :  { %v8655_v54 = vld [vmem:[#allocation15 + $0xc90] sm:$0xff] }
 0x7d4   :  { %11757 = vmatpush2.bf16.msra.mxu1 %v14024_v43  ;;  %v8304_v43 = vld [vmem:[#allocation15 + $0x198] sm:$0xff]  ;;  %v8659_v50 = vld [vmem:[#allocation15 + $0xcb0] sm:$0xff] }
 0x7d5   :  { %11798 = vmatpush2.bf16.msra.mxu0 %v14152_v15  ;;  %11758 = vmatprep.subr.bf16.mxu1 %v14017_v32  ;;  %v8308_v15 = vld [vmem:[#allocation15 + $0x1b8] sm:$0xff]  ;;  %v13850_v32 = vcombine.low %v8312_v23, %v8316_v58 }
 0x7d6   :  { %11799 = vmatprep.subr.bf16.mxu0 %v14145_v56  ;;  %v14225_v56 = vcombine.high %v8687_v18, %v8691_v53  ;;  %v13842_v27 = vcombine.low %v8304_v43, %v8308_v15  ;;  %v8272_v23 = vld [vmem:[#allocation15 + $0x98] sm:$0xff]  ;;  %v8647_v18 = vld [vmem:[#allocation15 + $0xc50] sm:$0xff] }
 0x7d7   :  { %v8276_v58 = vld [vmem:[#allocation15 + $0xb8] sm:$0xff]  ;;  %v8651_v53 = vld [vmem:[#allocation15 + $0xc70] sm:$0xff] }
 0x7d8   :  { %11759 = vmatpush2.bf16.msra.mxu1 %v14016_v29  ;;  %v13843_v29 = vcombine.high %v8304_v43, %v8308_v15  ;;  %v8268_v43 = vld [vmem:[#allocation15 + $0x78] sm:$0xff]  ;;  %v14192_v15 = vcombine.low %v8655_v54, %v8659_v50 }
 0x7d9   :  { %11800 = vmatpush2.bf16.msra.mxu0 %v14144_v3  ;;  %11760 = vmatprep.subr.bf16.mxu1 %v14009_v62  ;;  %v8296_v3 = vld [vmem:[#allocation15 + $0x158] sm:$0xff] }
 0x7da   :  { %11801 = vmatprep.subr.bf16.mxu0 %v14137_v6  ;;  %v8300_v62 = vld [vmem:[#allocation15 + $0x178] sm:$0xff] }
 0x7dc   :  { %11761 = vmatpush2.bf16.msra.mxu1 %v14008_v10  ;;  %v14217_v10 = vcombine.high %v8679_v55, %v8683_v52 }
 0x7dd   :  { %11802 = vmatpush2.bf16.msra.mxu0 %v14136_v35  ;;  %11762 = vmatprep.subr.bf16.mxu1 %v14001_v12  ;;  %v13835_v12 = vcombine.high %v8296_v3, %v8300_v62 }
 0x7de   :  { %11803 = vmatprep.subr.bf16.mxu0 %v14129_v33  ;;  %v8671_v33 = vld [vmem:[#allocation15 + $0xd10] sm:$0xff] }
 0x7e0   :  { %11763 = vmatpush2.bf16.msra.mxu1 %v14000_v11  ;;  %v14216_v11 = vcombine.low %v8679_v55, %v8683_v52  ;;  %v8639_v52 = vld [vmem:[#allocation15 + $0xc10] sm:$0xff] }
 0x7e1   :  { %11804 = vmatpush2.bf16.msra.mxu0 %v14128_v39  ;;  %11764 = vmatprep.subr.bf16.mxu1 %v13993_v5 }
 0x7e2   :  { %11805 = vmatprep.subr.bf16.mxu0 %v14121_v46  ;;  %v13834_v46 = vcombine.low %v8296_v3, %v8300_v62  ;;  %v8260_v3 = vld [vmem:[#allocation15 + $0x38] sm:$0xff]  ;;  %v14184_v62 = vcombine.low %v8647_v18, %v8651_v53 }
 0x7e4   :  { %11765 = vmatpush2.bf16.msra.mxu1 %v13992_v19 }
 0x7e5   :  { %11806 = vmatpush2.bf16.msra.mxu0 %v14120_v63  ;;  %11766 = vmatprep.subr.bf16.mxu1 %v13985_v4  ;;  %v13826_v63 = vcombine.low %v8288_v25, %v8292_v34  ;;  %v14201_v4 = vcombine.high %v8663_v14, %v8667_v31 }
 0x7e6   :  { %11807 = vmatprep.subr.bf16.mxu0 %v14113_v9  ;;  %v13819_v9 = vcombine.high %v8280_v61, %v8284_v30 }
 0x7e8   :  { %11767 = vmatpush2.bf16.msra.mxu1 %v13984_v60  ;;  %v14200_v60 = vcombine.low %v8663_v14, %v8667_v31 }
 0x7e9   :  { %11808 = vmatpush2.bf16.msra.mxu0 %v14112_v21  ;;  %11818 = vmatprep.subr.bf16.mxu1 %v14233_v49  ;;  %v13818_v21 = vcombine.low %v8280_v61, %v8284_v30  ;;  %v14193_v49 = vcombine.high %v8655_v54, %v8659_v50  ;;  %v8743_v61 = vld [vmem:[#allocation15 + $0xf50] sm:$0xff] }
 0x7ea   :  { %11859 = vmatprep.subr.bf16.mxu0 %v13851_v24  ;;  %v13811_v24 = vcombine.high %v8272_v23, %v8276_v58  ;;  %v8747_v30 = vld [vmem:[#allocation15 + $0xf70] sm:$0xff] }
 0x7eb   :  { %v15807_v36 = vpop.f32.mrf.mxu0  ;;  %11769 = vmatmul.mubr.bf16.vlgmr.msra.gmra.mxu1 %v15739_v48  ;;  %v11524_v57 = vpop.f32.mrf.mxu1  ;;  %v14281_v54 = vcombine.high %v8743_v61, %v8747_v30 }
 0x7ec   :  { %11810 = vmatmul.mubr.bf16.vlgmr.msra.gmra.mxu0 %v15757_v17  ;;  %v15812_v6 = vadd.f32 %v11524_v57, %v15800_v0  ;;  %11819 = vmatpush1.bf16.msra.mxu1 %v14232_v37  ;;  %v8675_v0 = vld [vmem:[#allocation15 + $0xd30] sm:$0xff]  ;;  %v8264_v37 = vld [vmem:[#allocation15 + $0x58] sm:$0xff] }
 0x7ed   :  { %11850 = vmatprep.mubr.bf16.mxu1 %v15769_v44  ;;  %11860 = vmatpush1.bf16.msra.mxu0 %v13850_v32  ;;  %v15815_v13 = vpop.f32.mrf.mxu0  ;;  %v11526_v20 = vpop.f32.mrf.mxu1  ;;  %v14208_v19 = vcombine.low %v8671_v33, %v8675_v0  ;;  %v13810_v32 = vcombine.low %v8272_v23, %v8276_v58  ;;  %v13803_v55 = vcombine.high %v8264_v37, %v8268_v43  ;;  %v8643_v57 = vld [vmem:[#allocation15 + $0xc30] sm:$0xff] }
 0x7ee   :  { %11891 = vmatprep.mubr.bf16.mxu0 %v15709_v28  ;;  %v15819_v35 = vadd.f32 %v11526_v20, %v15805_v41  ;;  %11820 = vmatprep.subr.bf16.mxu1 %v14225_v56  ;;  %v14209_v28 = vcombine.high %v8671_v33, %v8675_v0  ;;  %v13827_v41 = vcombine.high %v8288_v25, %v8292_v34  ;;  %v8376_v33 = vld [vmem:[#allocation15 + $0x3d8] sm:$0xff]  ;;  %v8735_v23 = vld [vmem:[#allocation15 + $0xf10] sm:$0xff] }
 0x7ef   :  { %v11569_v2 = vpop.f32.mrf.mxu0  ;;  %11861 = vmatprep.subr.bf16.mxu0 %v13843_v29  ;;  %v11528_v45 = vpop.f32.mrf.mxu1  ;;  %v14185_v56 = vcombine.high %v8647_v18, %v8651_v53  ;;  %v8256_v29 = vld [vmem:[#allocation15 + $0x18] sm:$0xff]  ;;  %v14177_v20 = vcombine.high %v8639_v52, %v8643_v57  ;;  %v8739_v58 = vld [vmem:[#allocation15 + $0xf30] sm:$0xff] }
 0x7f0   :  { %11821 = vmatpush1.bf16.msra.mxu1 %v14224_v8  ;;  %v13802_v8 = vcombine.low %v8264_v37, %v8268_v43  ;;  %v8380_v0 = vld [vmem:[#allocation15 + $0x3f8] sm:$0xff]  ;;  %v14176_v2 = vcombine.low %v8639_v52, %v8643_v57  ;;  %v13794_v45 = vcombine.low %v8256_v29, %v8260_v3  ;;  %v14273_v18 = vcombine.high %v8735_v23, %v8739_v58  ;;  %v8727_v37 = vld [vmem:[#allocation15 + $0xed0] sm:$0xff] }
 0x7f1   :  { %11862 = vmatpush1.bf16.msra.mxu0 %v13842_v27  ;;  %v11570_v39 = vpop.f32.mrf.mxu0  ;;  %v11529_v5 = vpop.f32.mrf.mxu1  ;;  %11822 = vmatprep.subr.bf16.mxu1 %v14217_v10  ;;  %v13795_v27 = vcombine.high %v8256_v29, %v8260_v3  ;;  %v8759_v10 = vld [vmem:[#allocation15 + $0xfd0] sm:$0xff]  ;;  %v13915_v34 = vcombine.high %v8376_v33, %v8380_v0 }
 0x7f2   :  { %11863 = vmatprep.subr.bf16.mxu0 %v13835_v12  ;;  %v8763_v12 = vld [vmem:[#allocation15 + $0xff0] sm:$0xff]  ;;  %v8368_v5 = vld [vmem:[#allocation15 + $0x398] sm:$0xff] }
 0x7f3   :  { %v14297_v25 = vcombine.high %v8759_v10, %v8763_v12  ;;  %v8755_v39 = vld [vmem:[#allocation15 + $0xfb0] sm:$0xff] }
 0x7f4   :  { %11823 = vmatpush1.bf16.msra.mxu1 %v14216_v11  ;;  %v8751_v11 = vld [vmem:[#allocation15 + $0xf90] sm:$0xff] }
 0x7f5   :  { %11864 = vmatpush1.bf16.msra.mxu0 %v13834_v46  ;;  %11824 = vmatprep.subr.bf16.mxu1 %v14209_v28  ;;  %v8372_v46 = vld [vmem:[#allocation15 + $0x3b8] sm:$0xff]  ;;  %v14296_v28 = vcombine.low %v8759_v10, %v8763_v12  ;;  %v14289_v14 = vcombine.high %v8751_v11, %v8755_v39  ;;  %v8731_v43 = vld [vmem:[#allocation15 + $0xef0] sm:$0xff] }
 0x7f6   :  { %11865 = vmatprep.subr.bf16.mxu0 %v13827_v41  ;;  %v13914_v41 = vcombine.low %v8376_v33, %v8380_v0  ;;  %v13907_v31 = vcombine.high %v8368_v5, %v8372_v46  ;;  %v14265_v52 = vcombine.high %v8727_v37, %v8731_v43  ;;  %v8719_v29 = vld [vmem:[#allocation15 + $0xe90] sm:$0xff] }
 0x7f7   :  { %v8723_v3 = vld [vmem:[#allocation15 + $0xeb0] sm:$0xff] }
 0x7f8   :  { %11825 = vmatpush1.bf16.msra.mxu1 %v14208_v19  ;;  %v8360_v19 = vld [vmem:[#allocation15 + $0x358] sm:$0xff]  ;;  %v14257_v10 = vcombine.high %v8719_v29, %v8723_v3  ;;  %v8711_v33 = vld [vmem:[#allocation15 + $0xe50] sm:$0xff] }
 0x7f9   :  { %11866 = vmatpush1.bf16.msra.mxu0 %v13826_v63  ;;  %11826 = vmatprep.subr.bf16.mxu1 %v14201_v4  ;;  %v8364_v63 = vld [vmem:[#allocation15 + $0x378] sm:$0xff]  ;;  %v14288_v4 = vcombine.low %v8751_v11, %v8755_v39  ;;  %v8715_v0 = vld [vmem:[#allocation15 + $0xe70] sm:$0xff] }
 0x7fa   :  { %11867 = vmatprep.subr.bf16.mxu0 %v13819_v9  ;;  %v13906_v9 = vcombine.low %v8368_v5, %v8372_v46  ;;  %v13899_v50 = vcombine.high %v8360_v19, %v8364_v63  ;;  %v14249_v11 = vcombine.high %v8711_v33, %v8715_v0  ;;  %v8703_v5 = vld [vmem:[#allocation15 + $0xe10] sm:$0xff] }
 0x7fb   :  { %v8707_v46 = vld [vmem:[#allocation15 + $0xe30] sm:$0xff] }
 0x7fc   :  { %11827 = vmatpush1.bf16.msra.mxu1 %v14200_v60  ;;  %v8352_v60 = vld [vmem:[#allocation15 + $0x318] sm:$0xff] }
 0x7fd   :  { %11868 = vmatpush1.bf16.msra.mxu0 %v13818_v21  ;;  %11828 = vmatprep.subr.bf16.mxu1 %v14193_v49  ;;  %v8356_v21 = vld [vmem:[#allocation15 + $0x338] sm:$0xff]  ;;  %v14280_v49 = vcombine.low %v8743_v61, %v8747_v30  ;;  %v14241_v61 = vcombine.high %v8703_v5, %v8707_v46 }
 0x7fe   :  { %11869 = vmatprep.subr.bf16.mxu0 %v13811_v24  ;;  %v13898_v24 = vcombine.low %v8360_v19, %v8364_v63  ;;  %v13891_v53 = vcombine.high %v8352_v60, %v8356_v21  ;;  %v8440_v19 = vld [vmem:[#allocation15 + $0x5d8] sm:$0xff] }
 0x7ff   :  { %v8444_v63 = vld [vmem:[#allocation15 + $0x5f8] sm:$0xff] }
 0x800   :  { %11829 = vmatpush1.bf16.msra.mxu1 %v14192_v15  ;;  %v8344_v15 = vld [vmem:[#allocation15 + $0x2d8] sm:$0xff] }
 0x801   :  { %11870 = vmatpush1.bf16.msra.mxu0 %v13810_v32  ;;  %11830 = vmatprep.subr.bf16.mxu1 %v14185_v56  ;;  %v8348_v32 = vld [vmem:[#allocation15 + $0x2f8] sm:$0xff]  ;;  %v14272_v56 = vcombine.low %v8735_v23, %v8739_v58  ;;  %v13979_v23 = vcombine.high %v8440_v19, %v8444_v63  ;;  %v15821_v58 = vld [vmem:[#allocation16] sm:$0xff] }
 0x802   :  { %11871 = vmatprep.subr.bf16.mxu0 %v13803_v55  ;;  %v13890_v55 = vcombine.low %v8352_v60, %v8356_v21  ;;  %v13883_v57 = vcombine.high %v8344_v15, %v8348_v32  ;;  %v8778_v60 = vrot.slane %v15821_v58, %v15373_v42  ;;  %v8428_v42 = vld [vmem:[#allocation15 + $0x578] sm:$0xff] }
 0x804   :  { %11831 = vmatpush1.bf16.msra.mxu1 %v14184_v62  ;;  %v8336_v62 = vld [vmem:[#allocation15 + $0x298] sm:$0xff] }
 0x805   :  { %11872 = vmatpush1.bf16.msra.mxu0 %v13802_v8  ;;  %11832 = vmatprep.subr.bf16.mxu1 %v14177_v20  ;;  %v8340_v8 = vld [vmem:[#allocation15 + $0x2b8] sm:$0xff]  ;;  %v14264_v20 = vcombine.low %v8727_v37, %v8731_v43 }
 0x806   :  { %11873 = vmatprep.subr.bf16.mxu0 %v13795_v27  ;;  %v13882_v27 = vcombine.low %v8344_v15, %v8348_v32  ;;  %v13875_v12 = vcombine.high %v8336_v62, %v8340_v8  ;;  %v8560_v37 = vld [vmem:[#allocation15 + $0x998] sm:$0xff]  ;;  %v11566_v32 = vadd.f32 %v15807_v36, %v8778_v60 }
 0x807   :  { %v8564_v43 = vld [vmem:[#allocation15 + $0x9b8] sm:$0xff] }
 0x808   :  { %11833 = vmatpush1.bf16.msra.mxu1 %v14176_v2  ;;  %v8328_v2 = vld [vmem:[#allocation15 + $0x258] sm:$0xff] }
 0x809   :  { %11874 = vmatpush1.bf16.msra.mxu0 %v13794_v45  ;;  %11834 = vmatprep.subr.bf16.mxu1 %v14297_v25  ;;  %v8332_v45 = vld [vmem:[#allocation15 + $0x278] sm:$0xff]  ;;  %v14256_v25 = vcombine.low %v8719_v29, %v8723_v3  ;;  %v14099_v29 = vcombine.high %v8560_v37, %v8564_v43 }
 0x80a   :  { %11875 = vmatprep.subr.bf16.mxu0 %v13915_v34  ;;  %v13874_v34 = vcombine.low %v8336_v62, %v8340_v8  ;;  %v13867_v39 = vcombine.high %v8328_v2, %v8332_v45  ;;  %v8552_v3 = vld [vmem:[#allocation15 + $0x958] sm:$0xff] }
 0x80b   :  { %v8532_v60 = vld [vmem:[#allocation15 + $0x8b8] sm:$0xff] }
 0x80c   :  { %11835 = vmatpush2.bf16.msra.mxu1 %v14296_v28  ;;  %v8320_v28 = vld [vmem:[#allocation15 + $0x218] sm:$0xff] }
 0x80d   :  { %11876 = vmatpush2.bf16.msra.mxu0 %v13914_v41  ;;  %11836 = vmatprep.subr.bf16.mxu1 %v14289_v14  ;;  %v8324_v41 = vld [vmem:[#allocation15 + $0x238] sm:$0xff]  ;;  %v14248_v14 = vcombine.low %v8711_v33, %v8715_v0 }
 0x80e   :  { %11877 = vmatprep.subr.bf16.mxu0 %v13907_v31  ;;  %v13866_v31 = vcombine.low %v8328_v2, %v8332_v45  ;;  %v13859_v30 = vcombine.high %v8320_v28, %v8324_v41  ;;  %v8420_v45 = vld [vmem:[#allocation15 + $0x538] sm:$0xff] }
 0x810   :  { %11837 = vmatpush2.bf16.msra.mxu1 %v14288_v4  ;;  %v8568_v4 = vld [vmem:[#allocation15 + $0x9d8] sm:$0xff] }
 0x811   :  { %11878 = vmatpush2.bf16.msra.mxu0 %v13906_v9  ;;  %11838 = vmatprep.subr.bf16.mxu1 %v14281_v54  ;;  %v8572_v9 = vld [vmem:[#allocation15 + $0x9f8] sm:$0xff]  ;;  %v14240_v54 = vcombine.low %v8703_v5, %v8707_v46 }
 0x812   :  { %11879 = vmatprep.subr.bf16.mxu0 %v13899_v50  ;;  %v13858_v50 = vcombine.low %v8320_v28, %v8324_v41  ;;  %v14107_v21 = vcombine.high %v8568_v4, %v8572_v9  ;;  %v14106_v15 = vcombine.low %v8568_v4, %v8572_v9 }
 0x814   :  { %11839 = vmatpush2.bf16.msra.mxu1 %v14280_v49  ;;  %v8432_v49 = vld [vmem:[#allocation15 + $0x598] sm:$0xff] }
 0x815   :  { %11880 = vmatpush2.bf16.msra.mxu0 %v13898_v24  ;;  %11840 = vmatprep.subr.bf16.mxu1 %v14273_v18  ;;  %v8436_v24 = vld [vmem:[#allocation15 + $0x5b8] sm:$0xff]  ;;  %v8782_v18 = vrot.slane %v15821_v58, %v15367_v40 }
 0x816   :  { %11881 = vmatprep.subr.bf16.mxu0 %v13891_v53  ;;  %v13978_v53 = vcombine.low %v8440_v19, %v8444_v63  ;;  %v8556_v40 = vld [vmem:[#allocation15 + $0x978] sm:$0xff] }
 0x817   :  { %v11568_v62 = vadd.f32 %v15815_v13, %v8782_v18  ;;  %v14091_v2 = vcombine.high %v8552_v3, %v8556_v40  ;;  %v8416_v13 = vld [vmem:[#allocation15 + $0x518] sm:$0xff]  ;;  %v14090_v28 = vcombine.low %v8552_v3, %v8556_v40 }
 0x818   :  { %11841 = vmatpush2.bf16.msra.mxu1 %v14272_v56  ;;  %v13971_v56 = vcombine.high %v8432_v49, %v8436_v24  ;;  %v13954_v19 = vcombine.low %v8416_v13, %v8420_v45  ;;  %v8516_v3 = vld [vmem:[#allocation15 + $0x838] sm:$0xff] }
 0x819   :  { %11882 = vmatpush2.bf16.msra.mxu0 %v13890_v55  ;;  %11842 = vmatprep.subr.bf16.mxu1 %v14265_v52  ;;  %v8424_v55 = vld [vmem:[#allocation15 + $0x558] sm:$0xff] }
 0x81a   :  { %11883 = vmatprep.subr.bf16.mxu0 %v13883_v57 }
 0x81c   :  { %11843 = vmatpush2.bf16.msra.mxu1 %v14264_v20  ;;  %v13970_v20 = vcombine.low %v8432_v49, %v8436_v24 }
 0x81d   :  { %11884 = vmatpush2.bf16.msra.mxu0 %v13882_v27  ;;  %11844 = vmatprep.subr.bf16.mxu1 %v14257_v10  ;;  %v14098_v10 = vcombine.low %v8560_v37, %v8564_v43  ;;  %v8396_v37 = vld [vmem:[#allocation15 + $0x478] sm:$0xff] }
 0x81e   :  { %11885 = vmatprep.subr.bf16.mxu0 %v13875_v12  ;;  %v13963_v12 = vcombine.high %v8424_v55, %v8428_v42  ;;  %v8520_v43 = vld [vmem:[#allocation15 + $0x858] sm:$0xff] }
 0x820   :  { %11845 = vmatpush2.bf16.msra.mxu1 %v14256_v25 }
 0x821   :  { %11886 = vmatpush2.bf16.msra.mxu0 %v13874_v34  ;;  %11846 = vmatprep.subr.bf16.mxu1 %v14249_v11  ;;  %v8544_v34 = vld [vmem:[#allocation15 + $0x918] sm:$0xff] }
 0x822   :  { %11887 = vmatprep.subr.bf16.mxu0 %v13867_v39  ;;  %v8548_v11 = vld [vmem:[#allocation15 + $0x938] sm:$0xff]  ;;  %v13962_v39 = vcombine.low %v8424_v55, %v8428_v42 }
 0x823   :  { %v14083_v41 = vcombine.high %v8544_v34, %v8548_v11  ;;  %v14082_v63 = vcombine.low %v8544_v34, %v8548_v11  ;;  %v8624_v34 = vld [vmem:[#allocation15 + $0xb98] sm:$0xff] }
 0x824   :  { %11847 = vmatpush2.bf16.msra.mxu1 %v14248_v14  ;;  %v8408_v14 = vld [vmem:[#allocation15 + $0x4d8] sm:$0xff] }
 0x825   :  { %11888 = vmatpush2.bf16.msra.mxu0 %v13866_v31  ;;  %11848 = vmatprep.subr.bf16.mxu1 %v14241_v61  ;;  %v8412_v31 = vld [vmem:[#allocation15 + $0x4f8] sm:$0xff] }
 0x826   :  { %11889 = vmatprep.subr.bf16.mxu0 %v13859_v30  ;;  %v8536_v61 = vld [vmem:[#allocation15 + $0x8d8] sm:$0xff]  ;;  %v13947_v4 = vcombine.high %v8408_v14, %v8412_v31 }
 0x827   :  { %v8540_v30 = vld [vmem:[#allocation15 + $0x8f8] sm:$0xff] }
 0x828   :  { %11849 = vmatpush2.bf16.msra.mxu1 %v14240_v54  ;;  %v14075_v9 = vcombine.high %v8536_v61, %v8540_v30  ;;  %v8400_v54 = vld [vmem:[#allocation15 + $0x498] sm:$0xff]  ;;  %v14074_v49 = vcombine.low %v8536_v61, %v8540_v30 }
 0x829   :  { %11890 = vmatpush2.bf16.msra.mxu0 %v13858_v50  ;;  %11900 = vmatprep.subr.bf16.mxu1 %v13979_v23  ;;  %v8404_v50 = vld [vmem:[#allocation15 + $0x4b8] sm:$0xff] }
 0x82a   :  { %11941 = vmatprep.subr.bf16.mxu0 %v14107_v21  ;;  %v8528_v23 = vld [vmem:[#allocation15 + $0x898] sm:$0xff]  ;;  %v13946_v21 = vcombine.low %v8408_v14, %v8412_v31  ;;  %v13939_v24 = vcombine.high %v8400_v54, %v8404_v50 }
 0x82b   :  { %v11606_v52 = vpop.f32.mrf.mxu1  ;;  %v11647_v57 = vpop.f32.mrf.mxu0  ;;  %11851 = vmatmul.mubr.bf16.vlgmr.msra.gmra.mxu1 %v15771_v22  ;;  %v14067_v18 = vcombine.high %v8528_v23, %v8532_v60  ;;  %v8628_v11 = vld [vmem:[#allocation15 + $0xbb8] sm:$0xff] }
 0x82c   :  { %v11607_v8 = vadd.f32 %v11606_v52, %v11566_v32  ;;  %11892 = vmatmul.mubr.bf16.vlgmr.msra.gmra.mxu0 %v15715_v16  ;;  %11901 = vmatpush1.bf16.msra.mxu1 %v13978_v53  ;;  %v8392_v53 = vld [vmem:[#allocation15 + $0x458] sm:$0xff]  ;;  %v13938_v32 = vcombine.low %v8400_v54, %v8404_v50  ;;  %v14162_v30 = vcombine.low %v8624_v34, %v8628_v11 }
 0x82d   :  { %11932 = vmatprep.mubr.bf16.mxu1 %v15733_v47  ;;  %11942 = vmatpush1.bf16.msra.mxu0 %v14106_v15  ;;  %v11608_v36 = vpop.f32.mrf.mxu1  ;;  %v11649_v27 = vpop.f32.mrf.mxu0  ;;  %v8524_v15 = vld [vmem:[#allocation15 + $0x878] sm:$0xff]  ;;  %v13931_v55 = vcombine.high %v8392_v53, %v8396_v37  ;;  %v13930_v40 = vcombine.low %v8392_v53, %v8396_v37 }
 0x82e   :  { %v15832_v33 = vadd.f32 %v11647_v57, %v11607_v8  ;;  %11973 = vmatprep.mubr.bf16.mxu0 %v15755_v51  ;;  %v11609_v0 = vadd.f32 %v11608_v36, %v11568_v62  ;;  %11902 = vmatprep.subr.bf16.mxu1 %v13971_v56  ;;  %v13955_v51 = vcombine.high %v8416_v13, %v8420_v45  ;;  %v8384_v52 = vld [vmem:[#allocation15 + $0x418] sm:$0xff] }
 0x82f   :  { %v11610_v25 = vpop.f32.mrf.mxu1  ;;  %v11651_v16 = vpop.f32.mrf.mxu0  ;;  %11943 = vmatprep.subr.bf16.mxu0 %v14099_v29  ;;  %v14066_v56 = vcombine.low %v8528_v23, %v8532_v60  ;;  %v14059_v42 = vcombine.high %v8520_v43, %v8524_v15  ;;  %v8388_v57 = vld [vmem:[#allocation15 + $0x438] sm:$0xff]  ;;  %v14058_v62 = vcombine.low %v8520_v43, %v8524_v15 }
 0x830   :  { %v15835_v47 = vadd.f32 %v11649_v27, %v11609_v0  ;;  %11903 = vmatpush1.bf16.msra.mxu1 %v13970_v20  ;;  %v8512_v29 = vld [vmem:[#allocation15 + $0x818] sm:$0xff]  ;;  %v13923_v8 = vcombine.high %v8384_v52, %v8388_v57  ;;  %v13922_v0 = vcombine.low %v8384_v52, %v8388_v57 }
 0x831   :  { %11944 = vmatpush1.bf16.msra.mxu0 %v14098_v10  ;;  %v11611_v5 = vpop.f32.mrf.mxu1  ;;  %v11652_v46 = vpop.f32.mrf.mxu0  ;;  %11904 = vmatprep.subr.bf16.mxu1 %v13963_v12  ;;  %v14051_v20 = vcombine.high %v8512_v29, %v8516_v3  ;;  %v8504_v36 = vld [vmem:[#allocation15 + $0x7d8] sm:$0xff] }
 0x832   :  { %11945 = vmatprep.subr.bf16.mxu0 %v14091_v2  ;;  %v8508_v27 = vld [vmem:[#allocation15 + $0x7f8] sm:$0xff]  ;;  %v14050_v2 = vcombine.low %v8512_v29, %v8516_v3 }
 0x833   :  { %v8632_v10 = vld [vmem:[#allocation15 + $0xbd8] sm:$0xff]  ;;  %v14043_v13 = vcombine.high %v8504_v36, %v8508_v27 }
 0x834   :  { %11905 = vmatpush1.bf16.msra.mxu1 %v13962_v39  ;;  %v8636_v12 = vld [vmem:[#allocation15 + $0xbf8] sm:$0xff]  ;;  %v14042_v39 = vcombine.low %v8504_v36, %v8508_v27 }
 0x835   :  { %11946 = vmatpush1.bf16.msra.mxu0 %v14090_v28  ;;  %11906 = vmatprep.subr.bf16.mxu1 %v13955_v51  ;;  %v14171_v45 = vcombine.high %v8632_v10, %v8636_v12  ;;  %v8496_v25 = vld [vmem:[#allocation15 + $0x798] sm:$0xff]  ;;  %v14170_v5 = vcombine.low %v8632_v10, %v8636_v12  ;;  %v14163_v28 = vcombine.high %v8624_v34, %v8628_v11 }
 0x836   :  { %11947 = vmatprep.subr.bf16.mxu0 %v14083_v41  ;;  %v8500_v16 = vld [vmem:[#allocation15 + $0x7b8] sm:$0xff] }
 0x837   :  { %v14035_v46 = vcombine.high %v8496_v25, %v8500_v16  ;;  %v8488_v51 = vld [vmem:[#allocation15 + $0x758] sm:$0xff]  ;;  %v14034_v61 = vcombine.low %v8496_v25, %v8500_v16 }
 0x838   :  { %11907 = vmatpush1.bf16.msra.mxu1 %v13954_v19  ;;  %v8492_v41 = vld [vmem:[#allocation15 + $0x778] sm:$0xff] }
 0x839   :  { %11948 = vmatpush1.bf16.msra.mxu0 %v14082_v63  ;;  %11908 = vmatprep.subr.bf16.mxu1 %v13947_v4  ;;  %v8616_v14 = vld [vmem:[#allocation15 + $0xb58] sm:$0xff]  ;;  %v14027_v19 = vcombine.high %v8488_v51, %v8492_v41  ;;  %v14026_v23 = vcombine.low %v8488_v51, %v8492_v41 }
 0x83a   :  { %11949 = vmatprep.subr.bf16.mxu0 %v14075_v9  ;;  %v8620_v31 = vld [vmem:[#allocation15 + $0xb78] sm:$0xff] }
 0x83b   :  { %v14155_v63 = vcombine.high %v8616_v14, %v8620_v31  ;;  %v8480_v4 = vld [vmem:[#allocation15 + $0x718] sm:$0xff]  ;;  %v14154_v60 = vcombine.low %v8616_v14, %v8620_v31  ;;  %v14906_v31 = vld [vmem:[#allocation18 + $0x78] sm:$0xff]  }
 0x83c   :  { %11909 = vmatpush1.bf16.msra.mxu1 %v13946_v21  ;;  %v8484_v9 = vld [vmem:[#allocation15 + $0x738] sm:$0xff] }
 0x83d   :  { %11950 = vmatpush1.bf16.msra.mxu0 %v14074_v49  ;;  %11910 = vmatprep.subr.bf16.mxu1 %v13939_v24  ;;  %v8608_v54 = vld [vmem:[#allocation15 + $0xb18] sm:$0xff]  ;;  %v14019_v21 = vcombine.high %v8480_v4, %v8484_v9  ;;  %v14018_v43 = vcombine.low %v8480_v4, %v8484_v9  ;;  %v14907_v4 = vld [vmem:[#allocation18 + $0x38] sm:$0xff]  }
 0x83e   :  { %11951 = vmatprep.subr.bf16.mxu0 %v14067_v18  ;;  %v8612_v50 = vld [vmem:[#allocation15 + $0xb38] sm:$0xff] }
 0x83f   :  { %v14147_v49 = vcombine.high %v8608_v54, %v8612_v50  ;;  %v8472_v24 = vld [vmem:[#allocation15 + $0x6d8] sm:$0xff]  ;;  %v14146_v15 = vcombine.low %v8608_v54, %v8612_v50 }
 0x840   :  { %11911 = vmatpush1.bf16.msra.mxu1 %v13938_v32  ;;  %v8476_v18 = vld [vmem:[#allocation15 + $0x6f8] sm:$0xff] }
 0x841   :  { %11952 = vmatpush1.bf16.msra.mxu0 %v14066_v56  ;;  %11912 = vmatprep.subr.bf16.mxu1 %v13931_v55  ;;  %v8600_v53 = vld [vmem:[#allocation15 + $0xad8] sm:$0xff]  ;;  %v14011_v32 = vcombine.high %v8472_v24, %v8476_v18  ;;  %v14010_v29 = vcombine.low %v8472_v24, %v8476_v18 }
 0x842   :  { %11953 = vmatprep.subr.bf16.mxu0 %v14059_v42  ;;  %v8604_v37 = vld [vmem:[#allocation15 + $0xaf8] sm:$0xff] }
 0x843   :  { %v14139_v56 = vcombine.high %v8600_v53, %v8604_v37  ;;  %v8464_v55 = vld [vmem:[#allocation15 + $0x698] sm:$0xff]  ;;  %v14138_v3 = vcombine.low %v8600_v53, %v8604_v37 }
 0x844   :  { %11913 = vmatpush1.bf16.msra.mxu1 %v13930_v40  ;;  %v8468_v42 = vld [vmem:[#allocation15 + $0x6b8] sm:$0xff] }
 0x845   :  { %11954 = vmatpush1.bf16.msra.mxu0 %v14058_v62  ;;  %11914 = vmatprep.subr.bf16.mxu1 %v13923_v8  ;;  %v8592_v52 = vld [vmem:[#allocation15 + $0xa98] sm:$0xff]  ;;  %v14003_v40 = vcombine.high %v8464_v55, %v8468_v42  ;;  %v14002_v10 = vcombine.low %v8464_v55, %v8468_v42 }
 0x846   :  { %11955 = vmatprep.subr.bf16.mxu0 %v14051_v20  ;;  %v8596_v57 = vld [vmem:[#allocation15 + $0xab8] sm:$0xff] }
 0x847   :  { %v14131_v62 = vcombine.high %v8592_v52, %v8596_v57  ;;  %v8456_v8 = vld [vmem:[#allocation15 + $0x658] sm:$0xff]  ;;  %v14130_v12 = vcombine.low %v8592_v52, %v8596_v57  ;;  %v14912_v57 = vld [vmem:[#allocation18 + $0x60] sm:$0xff]  }
 0x848   :  { %11915 = vmatpush1.bf16.msra.mxu1 %v13922_v0  ;;  %v8460_v20 = vld [vmem:[#allocation15 + $0x678] sm:$0xff] }
 0x849   :  { %11956 = vmatpush1.bf16.msra.mxu0 %v14050_v2  ;;  %11916 = vmatprep.subr.bf16.mxu1 %v14043_v13  ;;  %v8584_v36 = vld [vmem:[#allocation15 + $0xa58] sm:$0xff]  ;;  %v13995_v0 = vcombine.high %v8456_v8, %v8460_v20  ;;  %v13994_v34 = vcombine.low %v8456_v8, %v8460_v20  ;;  %v14914_v20 = vld [vmem:[#allocation18 + $0x58] sm:$0xff]  }
 0x84a   :  { %11957 = vmatprep.subr.bf16.mxu0 %v14171_v45  ;;  %v8588_v27 = vld [vmem:[#allocation15 + $0xa78] sm:$0xff] }
 0x84b   :  { %v14123_v2 = vcombine.high %v8584_v36, %v8588_v27  ;;  %v8448_v13 = vld [vmem:[#allocation15 + $0x618] sm:$0xff]  ;;  %v14122_v11 = vcombine.low %v8584_v36, %v8588_v27 }
 0x84c   :  { %11917 = vmatpush2.bf16.msra.mxu1 %v14042_v39  ;;  %v8452_v45 = vld [vmem:[#allocation15 + $0x638] sm:$0xff] }
 0x84d   :  { %11958 = vmatpush2.bf16.msra.mxu0 %v14170_v5  ;;  %11918 = vmatprep.subr.bf16.mxu1 %v14035_v46  ;;  %v8576_v25 = vld [vmem:[#allocation15 + $0xa18] sm:$0xff]  ;;  %v13987_v39 = vcombine.high %v8448_v13, %v8452_v45  ;;  %v13986_v51 = vcombine.low %v8448_v13, %v8452_v45 }
 0x84e   :  { %11959 = vmatprep.subr.bf16.mxu0 %v14163_v28  ;;  %v8580_v16 = vld [vmem:[#allocation15 + $0xa38] sm:$0xff] }
 0x84f   :  { %v14115_v5 = vcombine.high %v8576_v25, %v8580_v16  ;;  %v8696_v46 = vld [vmem:[#allocation15 + $0xdd8] sm:$0xff]  ;;  %v14114_v41 = vcombine.low %v8576_v25, %v8580_v16 }
 0x850   :  { %11919 = vmatpush2.bf16.msra.mxu1 %v14034_v61  ;;  %v8700_v28 = vld [vmem:[#allocation15 + $0xdf8] sm:$0xff] }
 0x851   :  { %11960 = vmatpush2.bf16.msra.mxu0 %v14162_v30  ;;  %11920 = vmatprep.subr.bf16.mxu1 %v14027_v19  ;;  %v14235_v14 = vcombine.high %v8696_v46, %v8700_v28  ;;  %v8688_v61 = vld [vmem:[#allocation15 + $0xd98] sm:$0xff]  ;;  %v12024_v19 = vmax.f32 %v15819_v35, 0.0 }
 0x852   :  { %11961 = vmatprep.subr.bf16.mxu0 %v14155_v63  ;;  %v8692_v30 = vld [vmem:[#allocation15 + $0xdb8] sm:$0xff]  ;;  %v14234_v63 = vcombine.low %v8696_v46, %v8700_v28  ;;  %v14919_v28 = vld [vmem:[#allocation18 + $0x8] sm:$0xff]  }
 0x853   :  { %v14227_v9 = vcombine.high %v8688_v61, %v8692_v30  ;;  %v8680_v54 = vld [vmem:[#allocation15 + $0xd58] sm:$0xff]  ;;  %v14226_v35 = vcombine.low %v8688_v61, %v8692_v30  ;;  %v14921_v30 = vld [vmem:[#allocation18] sm:$0xff]  }
 0x854   :  { %11921 = vmatpush2.bf16.msra.mxu1 %v14026_v23  ;;  %v8684_v50 = vld [vmem:[#allocation15 + $0xd78] sm:$0xff] }
 0x855   :  { %11962 = vmatpush2.bf16.msra.mxu0 %v14154_v60  ;;  %11922 = vmatprep.subr.bf16.mxu1 %v14019_v21  ;;  %v14908_v60 = vld [vmem:[#allocation18 + $0x70] sm:$0xff]   ;;  %v12032_v21 = vpack.c.bf16 %v12024_v19, %v12024_v19  ;;  %v14219_v37 = vcombine.high %v8680_v54, %v8684_v50 }
 0x856   :  { %11963 = vmatprep.subr.bf16.mxu0 %v14147_v49  ;;  %v14909_v53 = vld [vmem:[#allocation18 + $0x30] sm:$0xff]  }
 0x857   :  { %v8656_v36 = vld [vmem:[#allocation15 + $0xc98] sm:$0xff] }
 0x858   :  { %11923 = vmatpush2.bf16.msra.mxu1 %v14018_v43  ;;  %v14910_v43 = vld [vmem:[#allocation18 + $0x68] sm:$0xff]   ;;  %v8660_v27 = vld [vmem:[#allocation15 + $0xcb8] sm:$0xff] }
 0x859   :  { %11964 = vmatpush2.bf16.msra.mxu0 %v14146_v15  ;;  %11924 = vmatprep.subr.bf16.mxu1 %v14011_v32  ;;  %v8676_v15 = vld [vmem:[#allocation15 + $0xd38] sm:$0xff]  ;;  %v14194_v25 = vcombine.low %v8656_v36, %v8660_v27 }
 0x85a   :  { %11965 = vmatprep.subr.bf16.mxu0 %v14139_v56  ;;  %v8648_v13 = vld [vmem:[#allocation15 + $0xc58] sm:$0xff] }
 0x85b   :  { %v8652_v45 = vld [vmem:[#allocation15 + $0xc78] sm:$0xff] }
 0x85c   :  { %11925 = vmatpush2.bf16.msra.mxu1 %v14010_v29  ;;  %v8664_v29 = vld [vmem:[#allocation15 + $0xcd8] sm:$0xff]  ;;  %v14186_v46 = vcombine.low %v8648_v13, %v8652_v45 }
 0x85d   :  { %11966 = vmatpush2.bf16.msra.mxu0 %v14138_v3  ;;  %11926 = vmatprep.subr.bf16.mxu1 %v14003_v40  ;;  %v8668_v3 = vld [vmem:[#allocation15 + $0xcf8] sm:$0xff] }
 0x85e   :  { %11967 = vmatprep.subr.bf16.mxu0 %v14131_v62  ;;  %v14913_v62 = vld [vmem:[#allocation18 + $0x20] sm:$0xff]   ;;  %v14203_v8 = vcombine.high %v8664_v29, %v8668_v3  ;;  %v14917_v16 = vld [vmem:[#allocation18 + $0x10] sm:$0xff]  }
 0x860   :  { %11927 = vmatpush2.bf16.msra.mxu1 %v14002_v10  ;;  %v14202_v10 = vcombine.low %v8664_v29, %v8668_v3 }
 0x861   :  { %11968 = vmatpush2.bf16.msra.mxu0 %v14130_v12  ;;  %11928 = vmatprep.subr.bf16.mxu1 %v13995_v0  ;;  %v14915_v12 = vld [vmem:[#allocation18 + $0x18] sm:$0xff]   ;;  %v14195_v0 = vcombine.high %v8656_v36, %v8660_v27 }
 0x862   :  { %11969 = vmatprep.subr.bf16.mxu0 %v14123_v2  ;;  %v14916_v2 = vld [vmem:[#allocation18 + $0x50] sm:$0xff]  }
 0x864   :  { %11929 = vmatpush2.bf16.msra.mxu1 %v13994_v34  ;;  %v14187_v34 = vcombine.high %v8648_v13, %v8652_v45 }
 0x865   :  { %11970 = vmatpush2.bf16.msra.mxu0 %v14122_v11  ;;  %11930 = vmatprep.subr.bf16.mxu1 %v13987_v39  ;;  %v14918_v11 = vld [vmem:[#allocation18 + $0x48] sm:$0xff]   ;;  %v8640_v39 = vld [vmem:[#allocation15 + $0xc18] sm:$0xff] }
 0x866   :  { %11971 = vmatprep.subr.bf16.mxu0 %v14115_v5  ;;  %v8644_v5 = vld [vmem:[#allocation15 + $0xc38] sm:$0xff] }
 0x867   :  { %v14178_v61 = vcombine.low %v8640_v39, %v8644_v5 }
 0x868   :  { %11931 = vmatpush2.bf16.msra.mxu1 %v13986_v51  ;;  %v14179_v51 = vcombine.high %v8640_v39, %v8644_v5 }
 0x869   :  { %11972 = vmatpush2.bf16.msra.mxu0 %v14114_v41  ;;  %11982 = vmatprep.subr.bf16.mxu1 %v14235_v14  ;;  %v14920_v41 = vld [vmem:[#allocation18 + $0x40] sm:$0xff]   ;;  %v8760_v14 = vld [vmem:[#allocation15 + $0xfd8] sm:$0xff] }
 0x86a   :  { %14365 = vmatprep.subr.bf16.mxu0 %v14906_v31  ;;  %v8764_v31 = vld [vmem:[#allocation15 + $0xff8] sm:$0xff] }
 0x86b   :  { %v11688_v23 = vpop.f32.mrf.mxu1  ;;  %11933 = vmatmul.mubr.bf16.vlgmr.msra.gmra.mxu1 %v15739_v48  ;;  %v14299_v19 = vcombine.high %v8760_v14, %v8764_v31 }
 0x86c   :  { %v15840_v49 = vadd.f32 %v11688_v23, %v15832_v33  ;;  %v15842_v24 = vpop.f32.mrf.mxu0  ;;  %11974 = vmatmul.mubr.bf16.vlgmr.msra.gmra.mxu0 %v15757_v17  ;;  %11983 = vmatpush1.bf16.msra.mxu1 %v14234_v63  ;;  %v8672_v33 = vld [vmem:[#allocation15 + $0xd18] sm:$0xff]  ;;  %v14218_v17 = vcombine.low %v8680_v54, %v8684_v50  ;;  %v12023_v63 = vmax.f32 %v15812_v6, 0.0  ;;  %v14938_v54 = vld [vmem:[#allocation18 + $0x178] sm:$0xff]   ;;  %v14298_v50 = vcombine.low %v8760_v14, %v8764_v31  ;;  %v14953_v31 = vld [vmem:[#allocation18 + $0x100] sm:$0xff]  }
 0x86d   :  { %12014 = vmatprep.mubr.bf16.mxu1 %v15769_v44  ;;  %14366 = vmatpush3.bf16.msra.mxu0 %v14907_v4  ;;  %v15846_v18 = vpop.f32.mrf.mxu1  ;;  %v14911_v44 = vld [vmem:[#allocation18 + $0x28] sm:$0xff]   ;;  %v14211_v42 = vcombine.high %v8672_v33, %v8676_v15  ;;  %v14210_v40 = vcombine.low %v8672_v33, %v8676_v15  ;;  %v8752_v4 = vld [vmem:[#allocation15 + $0xf98] sm:$0xff]  ;;  %v14922_v14 = vld [vmem:[#allocation18 + $0xf8] sm:$0xff]  }
 0x86e   :  { %12590 = vmatprep.mubr.bf16.mxu0 %v12032_v21  ;;  %v15848_v48 = vpop.f32.mrf.mxu0  ;;  %11984 = vmatprep.subr.bf16.mxu1 %v14227_v9  ;;  %v8756_v9 = vld [vmem:[#allocation15 + $0xfb8] sm:$0xff]  ;;  %v12031_v21 = vpack.c.bf16 %v12023_v63, %v12023_v63 }
 0x86f   :  { %v11692_v32 = vpop.f32.mrf.mxu1  ;;  %14367 = vmatprep.subr.bf16.mxu0 %v14908_v60  ;;  %v14291_v23 = vcombine.high %v8752_v4, %v8756_v9  ;;  %v14939_v60 = vld [vmem:[#allocation18 + $0x138] sm:$0xff]   ;;  %v14941_v33 = vld [vmem:[#allocation18 + $0x130] sm:$0xff]  }
 0x870   :  { %v11733_v56 = vpop.f32.mrf.mxu0  ;;  %11985 = vmatpush1.bf16.msra.mxu1 %v14226_v35  ;;  %v8744_v35 = vld [vmem:[#allocation15 + $0xf58] sm:$0xff] }
 0x871   :  { %14368 = vmatpush3.bf16.msra.mxu0 %v14909_v53  ;;  %v11693_v55 = vpop.f32.mrf.mxu1  ;;  %11986 = vmatprep.subr.bf16.mxu1 %v14219_v37  ;;  %v8748_v53 = vld [vmem:[#allocation15 + $0xf78] sm:$0xff]  ;;  %v14942_v56 = vld [vmem:[#allocation18 + $0x168] sm:$0xff]  }
 0x872   :  { %v11734_v52 = vpop.f32.mrf.mxu0  ;;  %14369 = vmatprep.subr.bf16.mxu0 %v14910_v43  ;;  %v14940_v37 = vld [vmem:[#allocation18 + $0x170] sm:$0xff]   ;;  %v14290_v43 = vcombine.low %v8752_v4, %v8756_v9  ;;  %v14283_v6 = vcombine.high %v8744_v35, %v8748_v53 }
 0x873   :  { %v8736_v15 = vld [vmem:[#allocation15 + $0xf18] sm:$0xff] }
 0x874   :  { %11987 = vmatpush1.bf16.msra.mxu1 %v14218_v17  ;;  %v8740_v32 = vld [vmem:[#allocation15 + $0xf38] sm:$0xff]  ;;  %v14282_v17 = vcombine.low %v8744_v35, %v8748_v53 }
 0x875   :  { %14370 = vmatpush3.bf16.msra.mxu0 %v14911_v44  ;;  %11988 = vmatprep.subr.bf16.mxu1 %v14211_v42  ;;  %v14275_v55 = vcombine.high %v8736_v15, %v8740_v32  ;;  %v14943_v44 = vld [vmem:[#allocation18 + $0x128] sm:$0xff]   ;;  %v8728_v42 = vld [vmem:[#allocation15 + $0xed8] sm:$0xff]  ;;  %v14274_v29 = vcombine.low %v8736_v15, %v8740_v32  ;;  %v14931_v15 = vld [vmem:[#allocation18 + $0x98] sm:$0xff]  }
 0x876   :  { %14371 = vmatprep.subr.bf16.mxu0 %v14912_v57  ;;  %v8732_v52 = vld [vmem:[#allocation15 + $0xef8] sm:$0xff]  ;;  %v14944_v57 = vld [vmem:[#allocation18 + $0x160] sm:$0xff]  }
 0x877   :  { %v14267_v3 = vcombine.high %v8728_v42, %v8732_v52  ;;  %v14266_v36 = vcombine.low %v8728_v42, %v8732_v52  ;;  %v14924_v63 = vld [vmem:[#allocation18 + $0xf0] sm:$0xff]   ;;  %v14937_v42 = vld [vmem:[#allocation18 + $0x80] sm:$0xff]   ;;  %v12025_v52 = vmax.f32 %v15840_v49, 0.0  ;;  %v14962_v49 = vld [vmem:[#allocation18 + $0x1d8] sm:$0xff]  }
 0x878   :  { %11989 = vmatpush1.bf16.msra.mxu1 %v14210_v40  ;;  %v14945_v40 = vld [vmem:[#allocation18 + $0x120] sm:$0xff]   ;;  %v14932_v32 = vld [vmem:[#allocation18 + $0xd0] sm:$0xff]  }
 0x879   :  { %14372 = vmatpush3.bf16.msra.mxu0 %v14913_v62  ;;  %11990 = vmatprep.subr.bf16.mxu1 %v14203_v8  ;;  %v8720_v62 = vld [vmem:[#allocation15 + $0xe98] sm:$0xff] }
 0x87a   :  { %14373 = vmatprep.subr.bf16.mxu0 %v14914_v20  ;;  %v8724_v8 = vld [vmem:[#allocation15 + $0xeb8] sm:$0xff]  ;;  %v14946_v20 = vld [vmem:[#allocation18 + $0x158] sm:$0xff]  }
 0x87b   :  { %v14259_v27 = vcombine.high %v8720_v62, %v8724_v8  ;;  %v14258_v13 = vcombine.low %v8720_v62, %v8724_v8  ;;  %v14957_v62 = vld [vmem:[#allocation18 + $0x1b0] sm:$0xff]   ;;  %v14958_v8 = vld [vmem:[#allocation18 + $0x1e8] sm:$0xff]  }
 0x87c   :  { %11991 = vmatpush1.bf16.msra.mxu1 %v14202_v10  ;;  %v14947_v10 = vld [vmem:[#allocation18 + $0x118] sm:$0xff]  }
 0x87d   :  { %14374 = vmatpush3.bf16.msra.mxu0 %v14915_v12  ;;  %11992 = vmatprep.subr.bf16.mxu1 %v14195_v0  ;;  %v8712_v12 = vld [vmem:[#allocation15 + $0xe58] sm:$0xff] }
 0x87e   :  { %14375 = vmatprep.subr.bf16.mxu0 %v14916_v2  ;;  %v8716_v0 = vld [vmem:[#allocation15 + $0xe78] sm:$0xff] }
 0x87f   :  { %v14948_v2 = vld [vmem:[#allocation18 + $0x150] sm:$0xff]   ;;  %v14251_v45 = vcombine.high %v8712_v12, %v8716_v0  ;;  %v14250_v39 = vcombine.low %v8712_v12, %v8716_v0  ;;  %v8790_v12 = vrot.slane %v15821_v58, %v2853_v59 }
 0x880   :  { %11993 = vmatpush1.bf16.msra.mxu1 %v14194_v25  ;;  %v14949_v25 = vld [vmem:[#allocation18 + $0x110] sm:$0xff]  }
 0x881   :  { %14376 = vmatpush3.bf16.msra.mxu0 %v14917_v16  ;;  %11994 = vmatprep.subr.bf16.mxu1 %v14187_v34  ;;  %v8704_v16 = vld [vmem:[#allocation15 + $0xe18] sm:$0xff] }
 0x882   :  { %14377 = vmatprep.subr.bf16.mxu0 %v14918_v11  ;;  %v8708_v34 = vld [vmem:[#allocation15 + $0xe38] sm:$0xff]  ;;  %v14950_v11 = vld [vmem:[#allocation18 + $0x148] sm:$0xff]  }
 0x883   :  { %v14243_v5 = vcombine.high %v8704_v16, %v8708_v34  ;;  %v14964_v0 = vld [vmem:[#allocation18 + $0x1d0] sm:$0xff]  }
 0x884   :  { %11995 = vmatpush1.bf16.msra.mxu1 %v14186_v46  ;;  %v14951_v46 = vld [vmem:[#allocation18 + $0x108] sm:$0xff]  }
 0x885   :  { %14378 = vmatpush3.bf16.msra.mxu0 %v14919_v28  ;;  %11996 = vmatprep.subr.bf16.mxu1 %v14179_v51  ;;  %v11691_v28 = vadd.f32 %v15846_v18, %v15835_v47  ;;  %v14952_v51 = vld [vmem:[#allocation18 + $0x140] sm:$0xff]  }
 0x886   :  { %14379 = vmatprep.subr.bf16.mxu0 %v14920_v41  ;;  %v14242_v41 = vcombine.low %v8704_v16, %v8708_v34 }
 0x888   :  { %11997 = vmatpush1.bf16.msra.mxu1 %v14178_v61  ;;  %v8786_v61 = vrot.slane %v15821_v58, %v2849_v26  ;;  %v14926_v26 = vld [vmem:[#allocation18 + $0xe8] sm:$0xff]  }
 0x889   :  { %14380 = vmatpush3.bf16.msra.mxu0 %v14921_v30  ;;  %11998 = vmatprep.subr.bf16.mxu1 %v14299_v19  ;;  %v12026_v30 = vmax.f32 %v11691_v28, 0.0  ;;  %v14923_v19 = vld [vmem:[#allocation18 + $0xb8] sm:$0xff]  }
 0x88a   :  { %14409 = vmatprep.subr.bf16.mxu0 %v14938_v54  ;;  %v11730_v47 = vadd.f32 %v15842_v24, %v8786_v61  ;;  %v14928_v24 = vld [vmem:[#allocation18 + $0xe0] sm:$0xff]  }
 0x88b   :  { %v12034_v18 = vpack.c.bf16 %v12026_v30, %v12026_v30 }
 0x88c   :  { %12591 = vmatmul.mubr.bf16.vlgmr.msra.gmra.mxu0 %v12031_v21  ;;  %11999 = vmatpush2.bf16.msra.mxu1 %v14298_v50  ;;  %v14925_v50 = vld [vmem:[#allocation18 + $0xb0] sm:$0xff]  }
 0x88d   :  { %12000 = vmatprep.subr.bf16.mxu1 %v14291_v23  ;;  %14410 = vmatpush3.bf16.msra.mxu0 %v14939_v60 }
 0x88e   :  { %14411 = vmatprep.subr.bf16.mxu0 %v14940_v37  ;;  %v14927_v37 = vld [vmem:[#allocation18 + $0xa8] sm:$0xff]  }
 0x890   :  { %12001 = vmatpush2.bf16.msra.mxu1 %v14290_v43 }
 0x891   :  { %12002 = vmatprep.subr.bf16.mxu1 %v14283_v6  ;;  %14412 = vmatpush3.bf16.msra.mxu0 %v14941_v33  ;;  %v14930_v33 = vld [vmem:[#allocation18 + $0xd8] sm:$0xff]  }
 0x892   :  { %14413 = vmatprep.subr.bf16.mxu0 %v14942_v56  ;;  %v14933_v56 = vld [vmem:[#allocation18 + $0x90] sm:$0xff]  }
 0x894   :  { %12003 = vmatpush2.bf16.msra.mxu1 %v14282_v17  ;;  %v14934_v17 = vld [vmem:[#allocation18 + $0xc8] sm:$0xff]  }
 0x895   :  { %12004 = vmatprep.subr.bf16.mxu1 %v14275_v55  ;;  %14414 = vmatpush3.bf16.msra.mxu0 %v14943_v44  ;;  %v14935_v55 = vld [vmem:[#allocation18 + $0x88] sm:$0xff]   ;;  %v14936_v44 = vld [vmem:[#allocation18 + $0xc0] sm:$0xff]  }
 0x896   :  { %14415 = vmatprep.subr.bf16.mxu0 %v14944_v57  ;;  %v12033_v57 = vpack.c.bf16 %v12025_v52, %v12025_v52 }
 0x898   :  { %12005 = vmatpush2.bf16.msra.mxu1 %v14274_v29  ;;  %v14954_v29 = vld [vmem:[#allocation18 + $0x1f8] sm:$0xff]  }
 0x899   :  { %12006 = vmatprep.subr.bf16.mxu1 %v14267_v3  ;;  %14416 = vmatpush3.bf16.msra.mxu0 %v14945_v40  ;;  %v14955_v3 = vld [vmem:[#allocation18 + $0x1b8] sm:$0xff]   ;;  %v14956_v40 = vld [vmem:[#allocation18 + $0x1f0] sm:$0xff]  }
 0x89a   :  { %14417 = vmatprep.subr.bf16.mxu0 %v14946_v20  ;;  %v14959_v20 = vld [vmem:[#allocation18 + $0x1a8] sm:$0xff]  }
 0x89c   :  { %12007 = vmatpush2.bf16.msra.mxu1 %v14266_v36  ;;  %v14960_v36 = vld [vmem:[#allocation18 + $0x1e0] sm:$0xff]  }
 0x89d   :  { %12008 = vmatprep.subr.bf16.mxu1 %v14259_v27  ;;  %14418 = vmatpush3.bf16.msra.mxu0 %v14947_v10  ;;  %v14961_v27 = vld [vmem:[#allocation18 + $0x1a0] sm:$0xff]   ;;  %v14963_v10 = vld [vmem:[#allocation18 + $0x198] sm:$0xff]  }
 0x89e   :  { %14419 = vmatprep.subr.bf16.mxu0 %v14948_v2  ;;  %v14965_v2 = vld [vmem:[#allocation18 + $0x190] sm:$0xff]  }
 0x8a0   :  { %12009 = vmatpush2.bf16.msra.mxu1 %v14258_v13  ;;  %v11732_v13 = vadd.f32 %v15848_v48, %v8790_v12  ;;  %v14968_v48 = vld [vmem:[#allocation18 + $0x1c0] sm:$0xff]  }
 0x8a1   :  { %12010 = vmatprep.subr.bf16.mxu1 %v14251_v45  ;;  %14420 = vmatpush3.bf16.msra.mxu0 %v14949_v25 }
 0x8a2   :  { %14421 = vmatprep.subr.bf16.mxu0 %v14950_v11 }
 0x8a4   :  { %12011 = vmatpush2.bf16.msra.mxu1 %v14250_v39 }
 0x8a5   :  { %12012 = vmatprep.subr.bf16.mxu1 %v14243_v5  ;;  %14422 = vmatpush3.bf16.msra.mxu0 %v14951_v46  ;;  %v14966_v5 = vld [vmem:[#allocation18 + $0x1c8] sm:$0xff]  }
 0x8a6   :  { %14423 = vmatprep.subr.bf16.mxu0 %v14952_v51  ;;  %v14967_v51 = vld [vmem:[#allocation18 + $0x188] sm:$0xff]  }
 0x8a8   :  { %12013 = vmatpush2.bf16.msra.mxu1 %v14242_v41 }
 0x8a9   :  { %14387 = vmatprep.subr.bf16.mxu1 %v14922_v14  ;;  %14424 = vmatpush3.bf16.msra.mxu0 %v14953_v31 }
 0x8ab   :  { %v11770_v4 = vpop.f32.mrf.mxu1  ;;  %12015 = vmatmul.mubr.bf16.vlgmr.msra.gmra.mxu1 %v15771_v22  ;;  %v14929_v22 = vld [vmem:[#allocation18 + $0xa0] sm:$0xff]  }
 0x8ac   :  { %v11771_v9 = vadd.f32 %v11770_v4, %v11730_v47  ;;  %v11811_v54 = vpop.f32.mrf.mxu0  ;;  %14388 = vmatpush3.bf16.msra.mxu1 %v14923_v19  ;;  %12630 = vmatprep.mubr.bf16.mxu1 %v12034_v18  ;;  %v8794_v18 = vrot.slane %v15821_v58, %v2857_v1  ;;  %v8798_v1 = vrot.slane %v15821_v58, %v2861_v7 }
 0x8ad   :  { %v11772_v23 = vpop.f32.mrf.mxu1  ;;  %14389 = vmatprep.subr.bf16.mxu1 %v14924_v63  ;;  %v14969_v63 = vld [vmem:[#allocation18 + $0x180] sm:$0xff]  }
 0x8ae   :  { %v11812_v60 = vadd.f32 %v11811_v54, %v11771_v9  ;;  %v11813_v21 = vpop.f32.mrf.mxu0  ;;  %v11773_v45 = vadd.f32 %v11772_v23, %v11732_v13 }
 0x8af   :  { %v11774_v35 = vpop.f32.mrf.mxu1 }
 0x8b0   :  { %v11815_v53 = vpop.f32.mrf.mxu0  ;;  %14390 = vmatpush3.bf16.msra.mxu1 %v14925_v50  ;;  %v11814_v16 = vadd.f32 %v11813_v21, %v11773_v45 }
 0x8b1   :  { %v11775_v43 = vpop.f32.mrf.mxu1  ;;  %14391 = vmatprep.subr.bf16.mxu1 %v14926_v26 }
 0x8b2   :  { %v11816_v6 = vpop.f32.mrf.mxu0 }
 0x8b4   :  { %14392 = vmatpush3.bf16.msra.mxu1 %v14927_v37 }
 0x8b5   :  { %14393 = vmatprep.subr.bf16.mxu1 %v14928_v24 }
 0x8b8   :  { %14394 = vmatpush3.bf16.msra.mxu1 %v14929_v22 }
 0x8b9   :  { %14395 = vmatprep.subr.bf16.mxu1 %v14930_v33 }
 0x8bc   :  { %14396 = vmatpush3.bf16.msra.mxu1 %v14931_v15 }
 0x8bd   :  { %14397 = vmatprep.subr.bf16.mxu1 %v14932_v32 }
 0x8c0   :  { %14398 = vmatpush3.bf16.msra.mxu1 %v14933_v56 }
 0x8c1   :  { %14399 = vmatprep.subr.bf16.mxu1 %v14934_v17 }
 0x8c4   :  { %14400 = vmatpush3.bf16.msra.mxu1 %v14935_v55 }
 0x8c5   :  { %14401 = vmatprep.subr.bf16.mxu1 %v14936_v44 }
 0x8c8   :  { %14402 = vmatpush3.bf16.msra.mxu1 %v14937_v42 }
 0x8c9   :  { %14431 = vmatprep.subr.bf16.mxu1 %v14954_v29 }
 0x8cb   :  { %12631 = vmatmul.mubr.bf16.vlgmr.msra.gmra.mxu1 %v12033_v57 }
 0x8cc   :  { %14432 = vmatpush3.bf16.msra.mxu1 %v14955_v3 }
 0x8cd   :  { %14433 = vmatprep.subr.bf16.mxu1 %v14956_v40 }
 0x8d0   :  { %14434 = vmatpush3.bf16.msra.mxu1 %v14957_v62 }
 0x8d1   :  { %14435 = vmatprep.subr.bf16.mxu1 %v14958_v8  ;;  %v14300_v8 = vld [vmem:[#allocation19] ss:$0 sm:$0xff] }
 0x8d4   :  { %14436 = vmatpush3.bf16.msra.mxu1 %v14959_v20 }
 0x8d5   :  { %14437 = vmatprep.subr.bf16.mxu1 %v14960_v36 }
 0x8d8   :  { %14438 = vmatpush3.bf16.msra.mxu1 %v14961_v27 }
 0x8d9   :  { %14439 = vmatprep.subr.bf16.mxu1 %v14962_v49 }
 0x8dc   :  { %14440 = vmatpush3.bf16.msra.mxu1 %v14963_v10 }
 0x8dd   :  { %14441 = vmatprep.subr.bf16.mxu1 %v14964_v0 }
 0x8e0   :  { %14442 = vmatpush3.bf16.msra.mxu1 %v14965_v2 }
 0x8e1   :  { %14443 = vmatprep.subr.bf16.mxu1 %v14966_v5 }
 0x8e4   :  { %14444 = vmatpush3.bf16.msra.mxu1 %v14967_v51 }
 0x8e5   :  { %14445 = vmatprep.subr.bf16.mxu1 %v14968_v48 }
 0x8e8   :  { %14446 = vmatpush3.bf16.msra.mxu1 %v14969_v63 }
 0x8eb   :  { %v11852_v25 = vpop.f32.mrf.mxu1 }
 0x8ec   :  { %v11853_v34 = vadd.f32 %v11852_v25, %v11812_v60  ;;  %v11893_v11 = vpop.f32.mrf.mxu0 }
 0x8ed   :  { %v11854_v39 = vpop.f32.mrf.mxu1  ;;  %v11894_v4 = vadd.f32 %v11893_v11, %v8794_v18 }
 0x8ee   :  { %v11855_v46 = vadd.f32 %v11854_v39, %v11814_v16  ;;  %v11895_v28 = vpop.f32.mrf.mxu0  ;;  %v12027_v41 = vmax.f32 %v11853_v34, 0.0 }
 0x8ef   :  { %v11856_v59 = vpop.f32.mrf.mxu1  ;;  %v11896_v15 = vadd.f32 %v11895_v28, %v8798_v1 }
 0x8f0   :  { %v12028_v14 = vmax.f32 %v11855_v46, 0.0  ;;  %v11897_v31 = vpop.f32.mrf.mxu0  ;;  %v12035_v47 = vpack.c.bf16 %v12027_v41, %v12027_v41 }
 0x8f1   :  { %v11857_v61 = vpop.f32.mrf.mxu1 }
 0x8f2   :  { %v12036_v30 = vpack.c.bf16 %v12028_v14, %v12028_v14  ;;  %v11898_v19 = vpop.f32.mrf.mxu0 }
 0x8f4   :  { %12670 = vmatprep.mubr.bf16.mxu0 %v12036_v30 }
 0x8f5   :  { %12671 = vmatmul.mubr.bf16.vlgmr.msra.gmra.mxu0 %v12035_v47 }
 0x92b   :  { %v11934_v9 = vpop.f32.mrf.mxu1 }
 0x92c   :  { %v11935_v54 = vadd.f32 %v11934_v9, %v11894_v4  ;;  %v11975_v50 = vpop.f32.mrf.mxu0 }
 0x92d   :  { %v11936_v23 = vpop.f32.mrf.mxu1 }
 0x92e   :  { %v11976_v26 = vadd.f32 %v11975_v50, %v11935_v54  ;;  %v11977_v60 = vpop.f32.mrf.mxu0  ;;  %v11937_v32 = vadd.f32 %v11936_v23, %v11896_v15 }
 0x92f   :  { %v11938_v21 = vpop.f32.mrf.mxu1 }
 0x930   :  { %v11979_v35 = vpop.f32.mrf.mxu0  ;;  %v11978_v17 = vadd.f32 %v11977_v60, %v11937_v32 }
 0x931   :  { %v11939_v53 = vpop.f32.mrf.mxu1 }
 0x932   :  { %v11980_v37 = vpop.f32.mrf.mxu0 }
 0x94c   :  { %v14381_v43 = vpop.f32.mrf.mxu0 }
 0x94e   :  { %v14382_v24 = vpop.f32.mrf.mxu0 }
 0x94f   :  { %v14383_v6 = vadd.f32 %v14382_v24, %v14381_v43 }
 0x950   :  { %v14384_v22 = vpop.f32.mrf.mxu0 }
 0x951   :  { %v12593_v36 = vadd.f32 %v14383_v6, %v14300_v8 }
 0x952   :  { %v14385_v33 = vpop.f32.mrf.mxu0 }
 0x96b   :  { %v12016_v56 = vpop.f32.mrf.mxu1 }
 0x96c   :  { %v12017_v55 = vadd.f32 %v12016_v56, %v11976_v26 }
 0x96d   :  { %v12018_v44 = vpop.f32.mrf.mxu1 }
 0x96e   :  { %v12019_v42 = vadd.f32 %v12018_v44, %v11978_v17  ;;  %v12029_v52 = vmax.f32 %v12017_v55, 0.0 }
 0x96f   :  { %v12020_v57 = vpop.f32.mrf.mxu1 }
 0x970   :  { %v12030_v29 = vmax.f32 %v12019_v42, 0.0  ;;  %v12037_v62 = vpack.c.bf16 %v12029_v52, %v12029_v52 }
 0x971   :  { %v12021_v3 = vpop.f32.mrf.mxu1 }
 0x972   :  { %v12038_v40 = vpack.c.bf16 %v12030_v29, %v12030_v29 }
 0x974   :  { %12710 = vmatprep.mubr.bf16.mxu1 %v12038_v40 }
 0x975   :  { %12711 = vmatmul.mubr.bf16.vlgmr.msra.gmra.mxu1 %v12037_v62 }
 0x98b   :  { %v14403_v20 = vpop.f32.mrf.mxu1 }
 0x98d   :  { %v14404_v38 = vpop.f32.mrf.mxu1 }
 0x98e   :  { %v14405_v7 = vadd.f32 %v14404_v38, %v14403_v20 }
 0x98f   :  { %v14406_v58 = vpop.f32.mrf.mxu1 }
 0x990   :  { %v12633_v27 = vadd.f32 %v14405_v7, %v12593_v36 }
 0x991   :  { %v14407_v49 = vpop.f32.mrf.mxu1 }
 0x9b5   :  { %v14425_v10 = vpop.f32.mrf.mxu0 }
 0x9b7   :  { %v14426_v12 = vpop.f32.mrf.mxu0 }
 0x9b8   :  { %v14427_v0 = vadd.f32 %v14426_v12, %v14425_v10 }
 0x9b9   :  { %v14428_v2 = vpop.f32.mrf.mxu0 }
 0x9ba   :  { %v12673_v13 = vadd.f32 %v14427_v0, %v12633_v27 }
 0x9bb   :  { %v14429_v45 = vpop.f32.mrf.mxu0 }
 0xa35   :  { %v14447_v25 = vpop.f32.mrf.mxu1 }
 0xa37   :  { %v14448_v16 = vpop.f32.mrf.mxu1 }
 0xa38   :  { %v14449_v34 = vadd.f32 %v14448_v16, %v14447_v25 }
 0xa39   :  { %v14450_v11 = vpop.f32.mrf.mxu1 }
 0xa3a   :  { %v12713_v39 = vadd.f32 %v14449_v34, %v12673_v13 }
 0xa3b   :  { %v14451_v5 = vpop.f32.mrf.mxu1 }
 0xa3c   :  { %12718 = vst [vmem:[%s15885_s13] sm:$0xff] %v12713_v39 }
 0xa3d   :  { %12723 = vsyncpa [#allocation3], 1 }
 0xa3e   :  { %12724 = vsyncpa [#allocation5], 1 }
 0xa3f   :  { %12725 = vsyncpa [#allocation8], 1 }
 0xa40   :  { %12726 = vsyncpa [#allocation11], 1 }
 0xa41   :  { %12727 = vsyncpa [#allocation14], 1 }
 0xa42   :  { %12728 = vsyncpa [#allocation17], 1 }
 0xa43   :  { %12729 = vsyncpa [#allocation20], 1 }

</bundles_post_ra>
